<compile_context>
chip_gen: v7x
topology: tpu7x:2x2x1
jax: 0.10.0
libtpu: 0.0.40
codegen_flags: <defaults>
</compile_context>

<pallas_src>
import functools

import jax
import jax.numpy as jnp
import numpy as np
from jax import lax
from jax.experimental import pallas as pl
from jax.experimental.pallas import tpu as pltpu

INPUT_WINDOW = 16          # small stand-in for input_window_length=599
FC1_OUT = 512

# (kernel_size, cin, cout, left_pad, right_pad) -- torch padding='same'
# (left = (k-1)//2, right = k-1-left, matching torch's padding='same' split)
CONV_CFG = [
    (8, 1, 20, 3, 4),
    (6, 20, 20, 2, 3),
    (5, 20, 30, 2, 2),
    (4, 30, 40, 1, 2),
    (4, 40, 40, 1, 2),
]

_MAX_ABS_SHIFT = max(max(left, right) for (_, _, _, left, right) in CONV_CFG)


# --------------------------- spec / hardware helpers ---------------------------

_HAS_PIPELINE_MODE = hasattr(pl, "Buffered") and (
    "pipeline_mode" in getattr(pl.BlockSpec, "__dataclass_fields__", {}))


def _const_spec(shape, grid_rank):
    """Whole-array, grid-invariant operand; single pipeline buffer if supported."""
    nd = len(shape)
    if grid_rank == 1:
        index_map = lambda i: (0,) * nd
    else:
        index_map = lambda i, k: (0,) * nd
    if _HAS_PIPELINE_MODE:
        try:
            return pl.BlockSpec(shape, index_map, pipeline_mode=pl.Buffered(1))
        except TypeError:
            pass
    return pl.BlockSpec(shape, index_map)


def _vmem_limit_bytes(frac=0.75, fallback=32 * 1024 * 1024):
    """Generation-aware VMEM limit (~48 MiB on v7x, ~96 MiB on v5e/v6e)."""
    try:
        return int(pltpu.get_tpu_info().vmem_capacity_bytes * frac)
    except Exception:
        return fallback


def _num_tensorcores():
    """TensorCores per chip: 2 on v4/v5p/v7x (dual-TC / megacore), else 1."""
    try:
        kind = jax.devices()[0].device_kind.lower()
    except Exception:
        return 1
    if "v5e" in kind or "v5 lite" in kind or "v5lite" in kind or "v6" in kind:
        return 1
    if "v4" in kind or "v5" in kind or "7" in kind:
        return 2
    return 1


def _pick_block_b(B):
    """block_b = B on single-TC chips (one big step), B/2 on dual-TC chips."""
    n_tc = _num_tensorcores()
    block_b = B if n_tc <= 1 else max(1, B // n_tc)
    if block_b % 8 != 0 or B % block_b != 0:
        block_b = B
    return block_b


def _build_layer_masks(block_b, W):
    """Per-layer combined im2col validity masks; rows = b*W + t within a block."""
    t = np.arange(block_b * W) % W
    masks = []
    for (k, cin, _, left, _) in CONV_CFG:
        cols = []
        for j in range(k):
            s = j - left
            valid = ((t + s >= 0) & (t + s < W)).astype(np.float32)
            cols.append(np.repeat(valid[:, None], cin, axis=1))
        masks.append(jnp.asarray(np.concatenate(cols, axis=1)))   # (N, k*cin)
    return masks


# ------------------------------- Pallas kernels -------------------------------

def _conv_kernel(x_ref, m1, m2, m3, m4, m5,
                 w1, b1, w2, b2, w3, b3, w4, b4, w5, b5, out_ref):
    # Activation layout: rows = b*W + t (sublanes), lanes = channels.
    act = x_ref[...]                                           # (N, 1) f32
    n_rows = act.shape[0]
    masks = (m1, m2, m3, m4, m5)
    params = ((w1, b1), (w2, b2), (w3, b3), (w4, b4), (w5, b5))
    for (k, cin, cout, left, _), m_ref, (w_ref, b_ref) in zip(CONV_CFG, masks, params):
        # im2col: k shifted copies stacked on the lane axis.  pltpu.roll wraps
        # across sample boundaries; the combined mask zeros exactly those rows.
        cols = []
        for j in range(k):
            s = j - left                                       # out[t] reads x[t + s]
            cols.append(act if s == 0
                        else pltpu.roll(act, shift=(-s) % n_rows, axis=0))
        xs = jnp.concatenate(cols, axis=1) * m_ref[...]        # (N, k*cin) f32
        z = jnp.dot(xs.astype(jnp.bfloat16), w_ref[...],       # bf16 MXU, f32 acc
                    preferred_element_type=jnp.float32) + b_ref[...]
        act = jnp.maximum(z, 0.0)                              # ReLU; dropout = identity
    out_ref[...] = act.astype(out_ref.dtype)                   # (N, 40)


def _fc_kernel(flat_ref, wfc1_ref, bfc1_ref, wfc2_ref, bfc2_ref, out_ref, hid_acc):
    k = pl.program_id(1)

    @pl.when(k == 0)
    def _init():
        hid_acc[...] = jnp.zeros_like(hid_acc)

    # fc1 streamed over 128-lane chunks of the (W*40) contraction dimension.
    hid_acc[...] += jnp.dot(flat_ref[...].astype(jnp.bfloat16), wfc1_ref[...],
                            preferred_element_type=jnp.float32)

    @pl.when(k == pl.num_programs(1) - 1)
    def _finalize():
        hid = jnp.maximum(hid_acc[...] + bfc1_ref[...], 0.0)   # (Bblk, 512) f32
        # fc2, lane-dense output: (rows, 512) . (Bblk, 512)^T -> batch on lanes.
        w2 = jnp.broadcast_to(wfc2_ref[...], (8, wfc2_ref.shape[1]))
        scores = lax.dot_general(w2, hid.astype(jnp.bfloat16),
                                 dimension_numbers=(((1,), (1,)), ((), ())),
                                 preferred_element_type=jnp.float32)  # (8, Bblk)
        out_ref[...] = (scores[0:1, :] + bfc2_ref[...]).astype(out_ref.dtype)


# --------------------------------- wrapper -----------------------------------

def seq2point_forward(x, kparams, *, block_b=None):
    """x: (B, W) float32 -> (B, 1) float32."""
    B, W = x.shape
    assert W > _MAX_ABS_SHIFT, (
        "input window must exceed the largest conv half-width so pltpu.roll "
        "wrap-around rows are exactly the mask-zeroed rows")
    if block_b is None:
        block_b = _pick_block_b(B)
    nblk = pl.cdiv(B, block_b)
    b_pad = nblk * block_b
    if b_pad != B:
        x = jnp.pad(x, ((0, b_pad - B), (0, 0)))
    n_rows = block_b * W
    assert n_rows % 8 == 0, "block_b * W must be a multiple of 8"

    masks = _build_layer_masks(block_b, W)                     # 5 x (n_rows, k*cin)

    # (b_pad, W) -> (b_pad*W, 1): free row-major reshape; rows = b*W + t.
    # TODO(synk): at real W=599 feed x as (block_b, W) tiles (and fold conv1's
    # 8 taps into layer 2's im2col) to avoid this 1-lane-wide input block.
    x_rows = x.reshape(b_pad * W, 1).astype(jnp.float32)

    conv_ins = [kparams[n] for n in
                ("w1", "b1", "w2", "b2", "w3", "b3", "w4", "b4", "w5", "b5")]

    conv_macs = sum(k * cin * cout for (k, cin, cout, _, _) in CONV_CFG)
    mask_elems = sum(int(m.size) for m in masks)
    conv_cost = pl.CostEstimate(
        flops=2 * b_pad * W * conv_macs,
        transcendentals=0,
        bytes_accessed=4 * b_pad * W * (1 + 40) + 2 * conv_macs + 4 * mask_elems)

    vmem_limit = _vmem_limit_bytes()

    conv_out = pl.pallas_call(
        _conv_kernel,
        out_shape=jax.ShapeDtypeStruct((b_pad * W, 40), jnp.float32),
        grid=(nblk,),
        in_specs=[pl.BlockSpec((n_rows, 1), lambda i: (i, 0))]
                 + [_const_spec(m.shape, 1) for m in masks]
                 + [_const_spec(a.shape, 1) for a in conv_ins],
        out_specs=pl.BlockSpec((n_rows, 40), lambda i: (i, 0)),
        compiler_params=pltpu.CompilerParams(
            dimension_semantics=("parallel",),
            vmem_limit_bytes=vmem_limit),
        cost_estimate=conv_cost,
    )(x_rows, *masks, *conv_ins)

    # conv -> fc handoff: free row-major reshape, (b*W + t, c) -> (b, t*40 + c).
    # TODO(synk): at real W=599 fuse the conv stack and FC1 into one pallas_call
    # (keep the (Bblk*W, 40) activations in VMEM) to remove this HBM round trip.
    K = W * 40
    flat = conv_out.reshape(b_pad, K)

    # K-blocked / streamed fc1: 128-lane chunks of the contraction dimension.
    # TODO(synk): at real W=599 (K=23960) pad K to a 128-multiple and use a
    # larger chunk (e.g. 2560) instead of falling back to the full array.
    kchunk = 128 if K % 128 == 0 else K
    nk = K // kchunk

    fc_cost = pl.CostEstimate(
        flops=2 * b_pad * (K * FC1_OUT + FC1_OUT),
        transcendentals=0,
        bytes_accessed=4 * b_pad * K + 2 * K * FC1_OUT + 4 * b_pad)

    out_rows = pl.pallas_call(
        _fc_kernel,
        out_shape=jax.ShapeDtypeStruct((nblk, block_b), jnp.float32),
        grid=(nblk, nk),
        in_specs=[pl.BlockSpec((block_b, kchunk), lambda i, k: (i, k)),
                  pl.BlockSpec((kchunk, FC1_OUT), lambda i, k: (k, 0)),
                  _const_spec(kparams["bfc1"].shape, 2),
                  _const_spec(kparams["wfc2"].shape, 2),
                  _const_spec(kparams["bfc2"].shape, 2)],
        out_specs=pl.BlockSpec((1, block_b), lambda i, k: (i, 0)),
        scratch_shapes=[pltpu.VMEM((block_b, FC1_OUT), jnp.float32)],
        compiler_params=pltpu.CompilerParams(
            dimension_semantics=("parallel", "arbitrary"),
            vmem_limit_bytes=vmem_limit),
        cost_estimate=fc_cost,
    )(flat, kparams["wfc1"], kparams["bfc1"], kparams["wfc2"], kparams["bfc2"])

    # (nblk, block_b) lane-dense rows -> (B, 1)
    return out_rows.reshape(b_pad, 1)[:B]


# ------------------------- parameters (deterministic) -------------------------

def init_torch_params(key, W):
    """PyTorch-layout parameters, deterministic uniform init (kaiming-style bounds)."""
    params = {}
    keys = jax.random.split(key, 14)
    idx = 0
    for li, (k, cin, cout, _, _) in enumerate(CONV_CFG, start=1):
        bound = 1.0 / float(cin * k) ** 0.5
        params[f"w{li}"] = jax.random.uniform(keys[idx], (cout, cin, k, 1),
                                              jnp.float32, -bound, bound); idx += 1
        params[f"b{li}"] = jax.random.uniform(keys[idx], (cout,),
                                              jnp.float32, -bound, bound); idx += 1
    fc1_in = 40 * W
    bound = 1.0 / float(fc1_in) ** 0.5
    params["fc1_w"] = jax.random.uniform(keys[idx], (FC1_OUT, fc1_in),
                                         jnp.float32, -bound, bound); idx += 1
    params["fc1_b"] = jax.random.uniform(keys[idx], (FC1_OUT,),
                                         jnp.float32, -bound, bound); idx += 1
    bound = 1.0 / float(FC1_OUT) ** 0.5
    params["fc2_w"] = jax.random.uniform(keys[idx], (1, FC1_OUT),
                                         jnp.float32, -bound, bound); idx += 1
    params["fc2_b"] = jax.random.uniform(keys[idx], (1,),
                                         jnp.float32, -bound, bound); idx += 1
    return params


def pack_kernel_params(tp, W, dtype=jnp.bfloat16):
    """Torch-layout params -> matmul-ready kernel layouts (weights in `dtype`,
    biases kept f32 so all adds happen in f32)."""
    kp = {}
    for li, (k, cin, cout, _, _) in enumerate(CONV_CFG, start=1):
        w = tp[f"w{li}"][..., 0]                                    # (Cout, Cin, k)
        kp[f"w{li}"] = jnp.transpose(w, (2, 1, 0)).reshape(k * cin, cout).astype(dtype)
        kp[f"b{li}"] = tp[f"b{li}"][None, :].astype(jnp.float32)    # (1, Cout)
    # torch Flatten of NCHW gives feature index c*W + t; kernel flat index is t*40 + c.
    wfc1 = tp["fc1_w"].T.reshape(40, W, FC1_OUT).transpose(1, 0, 2).reshape(W * 40, FC1_OUT)
    kp["wfc1"] = wfc1.astype(dtype)                                 # (W*40, 512)
    kp["bfc1"] = tp["fc1_b"][None, :].astype(jnp.float32)           # (1, 512)
    kp["wfc2"] = tp["fc2_w"].astype(dtype)                          # (1, 512) row form
    kp["bfc2"] = tp["fc2_b"][None, :].astype(jnp.float32)           # (1, 1)
    return kp


# ------------------------------ pure-JAX reference ------------------------------

def ref_forward(x, tp):
    a = x[:, None, :, None].astype(jnp.float32)                     # NCHW (B, 1, W, 1)
    for li, (k, cin, cout, left, right) in enumerate(CONV_CFG, start=1):
        a = lax.conv_general_dilated(a, tp[f"w{li}"], window_strides=(1, 1),
                                     padding=[(left, right), (0, 0)],
                                     dimension_numbers=("NCHW", "OIHW", "NCHW"))
        a = jnp.maximum(a + tp[f"b{li}"].reshape(1, -1, 1, 1), 0.0)
    flat = a.reshape(a.shape[0], -1)                                 # (B, 40*W), c*W + t
    hid = jnp.maximum(flat @ tp["fc1_w"].T + tp["fc1_b"], 0.0)
    return hid @ tp["fc2_w"].T + tp["fc2_b"]


# ------------------------------------ main ------------------------------------

if __name__ == "__main__":
    B, W = 16, INPUT_WINDOW
    key = jax.random.PRNGKey(0)
    kx, kp = jax.random.split(key)
    x = jax.random.normal(kx, (B, W), jnp.float32)

    torch_params = init_torch_params(kp, W)
    kernel_params = pack_kernel_params(torch_params, W, dtype=jnp.bfloat16)

    block_b = _pick_block_b(B)
    fwd = jax.jit(functools.partial(seq2point_forward, block_b=block_b))
    out = jax.block_until_ready(fwd(x, kernel_params))

    ref = ref_forward(x, torch_params)
    assert out.shape == (B, 1), out.shape
    if not jnp.allclose(out, ref, rtol=2e-2, atol=2e-2):
        raise AssertionError(f"kernel/ref mismatch:\nkernel={out}\nref={ref}")
    print("KERNEL_OK")
</pallas_src>

<mosaic_0001>
module attributes {stable_mosaic.version = 11 : i64} {
  func.func @_fc_kernel(%arg0: i32, %arg1: i32, %arg2: memref<16x128xf32, #tpu.memory_space<vmem>>, %arg3: memref<128x512xbf16, #tpu.memory_space<vmem>>, %arg4: memref<1x512xf32, #tpu.memory_space<vmem>>, %arg5: memref<1x512xbf16, #tpu.memory_space<vmem>>, %arg6: memref<1x1xf32, #tpu.memory_space<vmem>>, %arg7: memref<1x16xf32, #tpu.memory_space<vmem>>, %arg8: memref<16x512xf32, #tpu.memory_space<vmem>>) attributes {dimension_semantics = [#tpu.dimension_semantics<parallel>, #tpu.dimension_semantics<arbitrary>], iteration_bounds = array<i64: 1, 5>, scalar_prefetch = 0 : i64, scratch_operands = 1 : i64, tpu.core_type = #tpu.core_type<tc>, window_params = [{transform_indices = @transform_0, window_bounds = array<i64: 16, 128>}, {transform_indices = @transform_1, window_bounds = array<i64: 128, 512>}, {pipeline_mode = #tpu.pipeline_mode<synchronous>, transform_indices = @transform_2, window_bounds = array<i64: 1, 512>}, {pipeline_mode = #tpu.pipeline_mode<synchronous>, transform_indices = @transform_3, window_bounds = array<i64: 1, 512>}, {pipeline_mode = #tpu.pipeline_mode<synchronous>, transform_indices = @transform_4, window_bounds = array<i64: 1, 1>}, {transform_indices = @transform_5, window_bounds = array<i64: 1, 16>}]} {
    %c0_i32 = arith.constant 0 : i32
    %0 = arith.cmpi eq, %arg1, %c0_i32 : i32
    %1 = arith.extui %0 : i1 to i32
    %c0_i32_0 = arith.constant 0 : i32
    %2 = arith.cmpi ne, %1, %c0_i32_0 : i32
    scf.if %2 {
      %cst_9 = arith.constant 0.000000e+00 : f32
      %13 = vector.broadcast %cst_9 : f32 to vector<16x512xf32>
      %c0_10 = arith.constant 0 : index
      %c0_11 = arith.constant 0 : index
      %14 = vector.load %arg8[%c0_10, %c0_11] : memref<16x512xf32, #tpu.memory_space<vmem>>, vector<16x512xf32>
      tpu.vector_store %arg8[%c0_10, %c0_11], %13 {strides = array<i32>} : memref<16x512xf32, #tpu.memory_space<vmem>>, vector<16x512xf32>,
    } else {
    }
    %c0 = arith.constant 0 : index
    %c0_1 = arith.constant 0 : index
    %3 = vector.load %arg8[%c0, %c0_1] : memref<16x512xf32, #tpu.memory_space<vmem>>, vector<16x512xf32>
    %c0_2 = arith.constant 0 : index
    %c0_3 = arith.constant 0 : index
    %4 = vector.load %arg2[%c0_2, %c0_3] : memref<16x128xf32, #tpu.memory_space<vmem>>, vector<16x128xf32>
    %5 = arith.truncf %4 : vector<16x128xf32> to vector<16x128xbf16>
    %c0_4 = arith.constant 0 : index
    %c0_5 = arith.constant 0 : index
    %6 = vector.load %arg3[%c0_4, %c0_5] : memref<128x512xbf16, #tpu.memory_space<vmem>>, vector<128x512xbf16>
    %cst = arith.constant dense<0.000000e+00> : vector<16x512xf32>
    %7 = tpu.matmul %5, %6, %cst {dimension_numbers = #tpu.dot_dimension_numbers<[1], [0], [0], [1], [0, 0, 1, 1], [], []>} : vector<16x128xbf16>, vector<128x512xbf16>, vector<16x512xf32> -> vector<16x512xf32>
    %8 = arith.addf %3, %7 : vector<16x512xf32>
    %c0_6 = arith.constant 0 : index
    %c0_7 = arith.constant 0 : index
    %9 = vector.load %arg8[%c0_6, %c0_7] : memref<16x512xf32, #tpu.memory_space<vmem>>, vector<16x512xf32>
    tpu.vector_store %arg8[%c0_6, %c0_7], %8 {strides = array<i32>} : memref<16x512xf32, #tpu.memory_space<vmem>>, vector<16x512xf32>,
    %c4_i32 = arith.constant 4 : i32
    %10 = arith.cmpi eq, %arg1, %c4_i32 : i32
    %11 = arith.extui %10 : i1 to i32
    %c0_i32_8 = arith.constant 0 : i32
    %12 = arith.cmpi ne, %11, %c0_i32_8 : i32
    scf.if %12 {
      %c0_9 = arith.constant 0 : index
      %c0_10 = arith.constant 0 : index
      %13 = vector.load %arg8[%c0_9, %c0_10] : memref<16x512xf32, #tpu.memory_space<vmem>>, vector<16x512xf32>
      %c0_11 = arith.constant 0 : index
      %c0_12 = arith.constant 0 : index
      %14 = vector.load %arg4[%c0_11, %c0_12] : memref<1x512xf32, #tpu.memory_space<vmem>>, vector<1x512xf32>
      %15 = vector.broadcast %14 : vector<1x512xf32> to vector<16x512xf32>
      %16 = arith.addf %13, %15 : vector<16x512xf32>
      %cst_13 = arith.constant 0.000000e+00 : f32
      %17 = vector.broadcast %cst_13 : f32 to vector<16x512xf32>
      %18 = arith.maximumf %16, %17 : vector<16x512xf32>
      %c0_14 = arith.constant 0 : index
      %c0_15 = arith.constant 0 : index
      %19 = vector.load %arg5[%c0_14, %c0_15] : memref<1x512xbf16, #tpu.memory_space<vmem>>, vector<1x512xbf16>
      %20 = vector.shape_cast %19 : vector<1x512xbf16> to vector<1x512xbf16>
      %21 = vector.broadcast %20 : vector<1x512xbf16> to vector<8x512xbf16>
      %22 = arith.truncf %18 : vector<16x512xf32> to vector<16x512xbf16>
      %cst_16 = arith.constant dense<0.000000e+00> : vector<8x16xf32>
      %23 = tpu.matmul %21, %22, %cst_16 {dimension_numbers = #tpu.dot_dimension_numbers<[1], [1], [0], [0], [0, 0, 1, 0], [], []>} : vector<8x512xbf16>, vector<16x512xbf16>, vector<8x16xf32> -> vector<8x16xf32>
      %24 = vector.extract_strided_slice %23 {offsets = [0, 0], sizes = [1, 16], strides = [1, 1]} : vector<8x16xf32> to vector<1x16xf32>
      %c0_17 = arith.constant 0 : index
      %c0_18 = arith.constant 0 : index
      %25 = vector.load %arg6[%c0_17, %c0_18] : memref<1x1xf32, #tpu.memory_space<vmem>>, vector<1x1xf32>
      %26 = vector.broadcast %25 : vector<1x1xf32> to vector<1x16xf32>
      %27 = arith.addf %24, %26 : vector<1x16xf32>
      %c0_19 = arith.constant 0 : index
      %c0_20 = arith.constant 0 : index
      %28 = vector.load %arg7[%c0_19, %c0_20] : memref<1x16xf32, #tpu.memory_space<vmem>>, vector<1x16xf32>
      tpu.vector_store %arg7[%c0_19, %c0_20], %27 {strides = array<i32>} : memref<1x16xf32, #tpu.memory_space<vmem>>, vector<1x16xf32>,
    } else {
    }
    return
  }
  func.func @transform_0(%arg0: i32, %arg1: i32) -> (i32, i32) {
    %c0_i32 = arith.constant 0 : i32
    return %arg0, %arg1 : i32, i32
  }
  func.func @transform_1(%arg0: i32, %arg1: i32) -> (i32, i32) {
    %c0_i32 = arith.constant 0 : i32
    %c0_i32_0 = arith.constant 0 : i32
    return %arg1, %c0_i32 : i32, i32
  }
  func.func @transform_2(%arg0: i32, %arg1: i32) -> (i32, i32) {
    %c0_i32 = arith.constant 0 : i32
    %c0_i32_0 = arith.constant 0 : i32
    %c0_i32_1 = arith.constant 0 : i32
    return %c0_i32, %c0_i32_0 : i32, i32
  }
  func.func @transform_3(%arg0: i32, %arg1: i32) -> (i32, i32) {
    %c0_i32 = arith.constant 0 : i32
    %c0_i32_0 = arith.constant 0 : i32
    %c0_i32_1 = arith.constant 0 : i32
    return %c0_i32, %c0_i32_0 : i32, i32
  }
  func.func @transform_4(%arg0: i32, %arg1: i32) -> (i32, i32) {
    %c0_i32 = arith.constant 0 : i32
    %c0_i32_0 = arith.constant 0 : i32
    %c0_i32_1 = arith.constant 0 : i32
    return %c0_i32, %c0_i32_0 : i32, i32
  }
  func.func @transform_5(%arg0: i32, %arg1: i32) -> (i32, i32) {
    %c0_i32 = arith.constant 0 : i32
    %c0_i32_0 = arith.constant 0 : i32
    return %arg0, %c0_i32 : i32, i32
  }
}

module attributes {stable_mosaic.version = 11 : i64} {
  func.func @_conv_kernel(%arg0: i32, %arg1: memref<256x1xf32, #tpu.memory_space<vmem>>, %arg2: memref<256x8xf32, #tpu.memory_space<vmem>>, %arg3: memref<256x120xf32, #tpu.memory_space<vmem>>, %arg4: memref<256x100xf32, #tpu.memory_space<vmem>>, %arg5: memref<256x120xf32, #tpu.memory_space<vmem>>, %arg6: memref<256x160xf32, #tpu.memory_space<vmem>>, %arg7: memref<8x20xbf16, #tpu.memory_space<vmem>>, %arg8: memref<1x20xf32, #tpu.memory_space<vmem>>, %arg9: memref<120x20xbf16, #tpu.memory_space<vmem>>, %arg10: memref<1x20xf32, #tpu.memory_space<vmem>>, %arg11: memref<100x30xbf16, #tpu.memory_space<vmem>>, %arg12: memref<1x30xf32, #tpu.memory_space<vmem>>, %arg13: memref<120x40xbf16, #tpu.memory_space<vmem>>, %arg14: memref<1x40xf32, #tpu.memory_space<vmem>>, %arg15: memref<160x40xbf16, #tpu.memory_space<vmem>>, %arg16: memref<1x40xf32, #tpu.memory_space<vmem>>, %arg17: memref<256x40xf32, #tpu.memory_space<vmem>>) attributes {dimension_semantics = [#tpu.dimension_semantics<parallel>], iteration_bounds = array<i64: 1>, scalar_prefetch = 0 : i64, scratch_operands = 0 : i64, tpu.core_type = #tpu.core_type<tc>, window_params = [{transform_indices = @transform_0, window_bounds = array<i64: 256, 1>}, {pipeline_mode = #tpu.pipeline_mode<synchronous>, transform_indices = @transform_1, window_bounds = array<i64: 256, 8>}, {pipeline_mode = #tpu.pipeline_mode<synchronous>, transform_indices = @transform_2, window_bounds = array<i64: 256, 120>}, {pipeline_mode = #tpu.pipeline_mode<synchronous>, transform_indices = @transform_3, window_bounds = array<i64: 256, 100>}, {pipeline_mode = #tpu.pipeline_mode<synchronous>, transform_indices = @transform_4, window_bounds = array<i64: 256, 120>}, {pipeline_mode = #tpu.pipeline_mode<synchronous>, transform_indices = @transform_5, window_bounds = array<i64: 256, 160>}, {pipeline_mode = #tpu.pipeline_mode<synchronous>, transform_indices = @transform_6, window_bounds = array<i64: 8, 20>}, {pipeline_mode = #tpu.pipeline_mode<synchronous>, transform_indices = @transform_7, window_bounds = array<i64: 1, 20>}, {pipeline_mode = #tpu.pipeline_mode<synchronous>, transform_indices = @transform_8, window_bounds = array<i64: 120, 20>}, {pipeline_mode = #tpu.pipeline_mode<synchronous>, transform_indices = @transform_9, window_bounds = array<i64: 1, 20>}, {pipeline_mode = #tpu.pipeline_mode<synchronous>, transform_indices = @transform_10, window_bounds = array<i64: 100, 30>}, {pipeline_mode = #tpu.pipeline_mode<synchronous>, transform_indices = @transform_11, window_bounds = array<i64: 1, 30>}, {pipeline_mode = #tpu.pipeline_mode<synchronous>, transform_indices = @transform_12, window_bounds = array<i64: 120, 40>}, {pipeline_mode = #tpu.pipeline_mode<synchronous>, transform_indices = @transform_13, window_bounds = array<i64: 1, 40>}, {pipeline_mode = #tpu.pipeline_mode<synchronous>, transform_indices = @transform_14, window_bounds = array<i64: 160, 40>}, {pipeline_mode = #tpu.pipeline_mode<synchronous>, transform_indices = @transform_15, window_bounds = array<i64: 1, 40>}, {transform_indices = @transform_16, window_bounds = array<i64: 256, 40>}]} {
    %c0 = arith.constant 0 : index
    %c0_0 = arith.constant 0 : index
    %0 = vector.load %arg1[%c0, %c0_0] : memref<256x1xf32, #tpu.memory_space<vmem>>, vector<256x1xf32>
    %c3_i32 = arith.constant 3 : i32
    %1 = tpu.dynamic_rotate %0 by %c3_i32 dim 0 : vector<256x1xf32>, i32 -> vector<256x1xf32>
    %c2_i32 = arith.constant 2 : i32
    %2 = tpu.dynamic_rotate %0 by %c2_i32 dim 0 : vector<256x1xf32>, i32 -> vector<256x1xf32>
    %c1_i32 = arith.constant 1 : i32
    %3 = tpu.dynamic_rotate %0 by %c1_i32 dim 0 : vector<256x1xf32>, i32 -> vector<256x1xf32>
    %c255_i32 = arith.constant 255 : i32
    %4 = tpu.dynamic_rotate %0 by %c255_i32 dim 0 : vector<256x1xf32>, i32 -> vector<256x1xf32>
    %c254_i32 = arith.constant 254 : i32
    %5 = tpu.dynamic_rotate %0 by %c254_i32 dim 0 : vector<256x1xf32>, i32 -> vector<256x1xf32>
    %c253_i32 = arith.constant 253 : i32
    %6 = tpu.dynamic_rotate %0 by %c253_i32 dim 0 : vector<256x1xf32>, i32 -> vector<256x1xf32>
    %c252_i32 = arith.constant 252 : i32
    %7 = tpu.dynamic_rotate %0 by %c252_i32 dim 0 : vector<256x1xf32>, i32 -> vector<256x1xf32>
    %8 = tpu.concatenate %1, %2, %3, %0, %4, %5, %6, %7 in 1 : vector<256x1xf32>, vector<256x1xf32>, vector<256x1xf32>, vector<256x1xf32>, vector<256x1xf32>, vector<256x1xf32>, vector<256x1xf32>, vector<256x1xf32> -> vector<256x8xf32>
    %c0_1 = arith.constant 0 : index
    %c0_2 = arith.constant 0 : index
    %9 = vector.load %arg2[%c0_1, %c0_2] : memref<256x8xf32, #tpu.memory_space<vmem>>, vector<256x8xf32>
    %10 = arith.mulf %8, %9 : vector<256x8xf32>
    %11 = arith.truncf %10 : vector<256x8xf32> to vector<256x8xbf16>
    %c0_3 = arith.constant 0 : index
    %c0_4 = arith.constant 0 : index
    %12 = vector.load %arg7[%c0_3, %c0_4] : memref<8x20xbf16, #tpu.memory_space<vmem>>, vector<8x20xbf16>
    %cst = arith.constant dense<0.000000e+00> : vector<256x20xf32>
    %13 = tpu.matmul %11, %12, %cst {dimension_numbers = #tpu.dot_dimension_numbers<[1], [0], [0], [1], [0, 0, 1, 1], [], []>} : vector<256x8xbf16>, vector<8x20xbf16>, vector<256x20xf32> -> vector<256x20xf32>
    %c0_5 = arith.constant 0 : index
    %c0_6 = arith.constant 0 : index
    %14 = vector.load %arg8[%c0_5, %c0_6] : memref<1x20xf32, #tpu.memory_space<vmem>>, vector<1x20xf32>
    %15 = vector.broadcast %14 : vector<1x20xf32> to vector<256x20xf32>
    %16 = arith.addf %13, %15 : vector<256x20xf32>
    %cst_7 = arith.constant 0.000000e+00 : f32
    %17 = vector.broadcast %cst_7 : f32 to vector<256x20xf32>
    %18 = arith.maximumf %16, %17 : vector<256x20xf32>
    %c2_i32_8 = arith.constant 2 : i32
    %19 = tpu.dynamic_rotate %18 by %c2_i32_8 dim 0 : vector<256x20xf32>, i32 -> vector<256x20xf32>
    %c1_i32_9 = arith.constant 1 : i32
    %20 = tpu.dynamic_rotate %18 by %c1_i32_9 dim 0 : vector<256x20xf32>, i32 -> vector<256x20xf32>
    %c255_i32_10 = arith.constant 255 : i32
    %21 = tpu.dynamic_rotate %18 by %c255_i32_10 dim 0 : vector<256x20xf32>, i32 -> vector<256x20xf32>
    %c254_i32_11 = arith.constant 254 : i32
    %22 = tpu.dynamic_rotate %18 by %c254_i32_11 dim 0 : vector<256x20xf32>, i32 -> vector<256x20xf32>
    %c253_i32_12 = arith.constant 253 : i32
    %23 = tpu.dynamic_rotate %18 by %c253_i32_12 dim 0 : vector<256x20xf32>, i32 -> vector<256x20xf32>
    %24 = tpu.concatenate %19, %20, %18, %21, %22, %23 in 1 : vector<256x20xf32>, vector<256x20xf32>, vector<256x20xf32>, vector<256x20xf32>, vector<256x20xf32>, vector<256x20xf32> -> vector<256x120xf32>
    %c0_13 = arith.constant 0 : index
    %c0_14 = arith.constant 0 : index
    %25 = vector.load %arg3[%c0_13, %c0_14] : memref<256x120xf32, #tpu.memory_space<vmem>>, vector<256x120xf32>
    %26 = arith.mulf %24, %25 : vector<256x120xf32>
    %27 = arith.truncf %26 : vector<256x120xf32> to vector<256x120xbf16>
    %c0_15 = arith.constant 0 : index
    %c0_16 = arith.constant 0 : index
    %28 = vector.load %arg9[%c0_15, %c0_16] : memref<120x20xbf16, #tpu.memory_space<vmem>>, vector<120x20xbf16>
    %cst_17 = arith.constant dense<0.000000e+00> : vector<256x20xf32>
    %29 = tpu.matmul %27, %28, %cst_17 {dimension_numbers = #tpu.dot_dimension_numbers<[1], [0], [0], [1], [0, 0, 1, 1], [], []>} : vector<256x120xbf16>, vector<120x20xbf16>, vector<256x20xf32> -> vector<256x20xf32>
    %c0_18 = arith.constant 0 : index
    %c0_19 = arith.constant 0 : index
    %30 = vector.load %arg10[%c0_18, %c0_19] : memref<1x20xf32, #tpu.memory_space<vmem>>, vector<1x20xf32>
    %31 = vector.broadcast %30 : vector<1x20xf32> to vector<256x20xf32>
    %32 = arith.addf %29, %31 : vector<256x20xf32>
    %cst_20 = arith.constant 0.000000e+00 : f32
    %33 = vector.broadcast %cst_20 : f32 to vector<256x20xf32>
    %34 = arith.maximumf %32, %33 : vector<256x20xf32>
    %c2_i32_21 = arith.constant 2 : i32
    %35 = tpu.dynamic_rotate %34 by %c2_i32_21 dim 0 : vector<256x20xf32>, i32 -> vector<256x20xf32>
    %c1_i32_22 = arith.constant 1 : i32
    %36 = tpu.dynamic_rotate %34 by %c1_i32_22 dim 0 : vector<256x20xf32>, i32 -> vector<256x20xf32>
    %c255_i32_23 = arith.constant 255 : i32
    %37 = tpu.dynamic_rotate %34 by %c255_i32_23 dim 0 : vector<256x20xf32>, i32 -> vector<256x20xf32>
    %c254_i32_24 = arith.constant 254 : i32
    %38 = tpu.dynamic_rotate %34 by %c254_i32_24 dim 0 : vector<256x20xf32>, i32 -> vector<256x20xf32>
    %39 = tpu.concatenate %35, %36, %34, %37, %38 in 1 : vector<256x20xf32>, vector<256x20xf32>, vector<256x20xf32>, vector<256x20xf32>, vector<256x20xf32> -> vector<256x100xf32>
    %c0_25 = arith.constant 0 : index
    %c0_26 = arith.constant 0 : index
    %40 = vector.load %arg4[%c0_25, %c0_26] : memref<256x100xf32, #tpu.memory_space<vmem>>, vector<256x100xf32>
    %41 = arith.mulf %39, %40 : vector<256x100xf32>
    %42 = arith.truncf %41 : vector<256x100xf32> to vector<256x100xbf16>
    %c0_27 = arith.constant 0 : index
    %c0_28 = arith.constant 0 : index
    %43 = vector.load %arg11[%c0_27, %c0_28] : memref<100x30xbf16, #tpu.memory_space<vmem>>, vector<100x30xbf16>
    %cst_29 = arith.constant dense<0.000000e+00> : vector<256x30xf32>
    %44 = tpu.matmul %42, %43, %cst_29 {dimension_numbers = #tpu.dot_dimension_numbers<[1], [0], [0], [1], [0, 0, 1, 1], [], []>} : vector<256x100xbf16>, vector<100x30xbf16>, vector<256x30xf32> -> vector<256x30xf32>
    %c0_30 = arith.constant 0 : index
    %c0_31 = arith.constant 0 : index
    %45 = vector.load %arg12[%c0_30, %c0_31] : memref<1x30xf32, #tpu.memory_space<vmem>>, vector<1x30xf32>
    %46 = vector.broadcast %45 : vector<1x30xf32> to vector<256x30xf32>
    %47 = arith.addf %44, %46 : vector<256x30xf32>
    %cst_32 = arith.constant 0.000000e+00 : f32
    %48 = vector.broadcast %cst_32 : f32 to vector<256x30xf32>
    %49 = arith.maximumf %47, %48 : vector<256x30xf32>
    %c1_i32_33 = arith.constant 1 : i32
    %50 = tpu.dynamic_rotate %49 by %c1_i32_33 dim 0 : vector<256x30xf32>, i32 -> vector<256x30xf32>
    %c255_i32_34 = arith.constant 255 : i32
    %51 = tpu.dynamic_rotate %49 by %c255_i32_34 dim 0 : vector<256x30xf32>, i32 -> vector<256x30xf32>
    %c254_i32_35 = arith.constant 254 : i32
    %52 = tpu.dynamic_rotate %49 by %c254_i32_35 dim 0 : vector<256x30xf32>, i32 -> vector<256x30xf32>
    %53 = tpu.concatenate %50, %49, %51, %52 in 1 : vector<256x30xf32>, vector<256x30xf32>, vector<256x30xf32>, vector<256x30xf32> -> vector<256x120xf32>
    %c0_36 = arith.constant 0 : index
    %c0_37 = arith.constant 0 : index
    %54 = vector.load %arg5[%c0_36, %c0_37] : memref<256x120xf32, #tpu.memory_space<vmem>>, vector<256x120xf32>
    %55 = arith.mulf %53, %54 : vector<256x120xf32>
    %56 = arith.truncf %55 : vector<256x120xf32> to vector<256x120xbf16>
    %c0_38 = arith.constant 0 : index
    %c0_39 = arith.constant 0 : index
    %57 = vector.load %arg13[%c0_38, %c0_39] : memref<120x40xbf16, #tpu.memory_space<vmem>>, vector<120x40xbf16>
    %cst_40 = arith.constant dense<0.000000e+00> : vector<256x40xf32>
    %58 = tpu.matmul %56, %57, %cst_40 {dimension_numbers = #tpu.dot_dimension_numbers<[1], [0], [0], [1], [0, 0, 1, 1], [], []>} : vector<256x120xbf16>, vector<120x40xbf16>, vector<256x40xf32> -> vector<256x40xf32>
    %c0_41 = arith.constant 0 : index
    %c0_42 = arith.constant 0 : index
    %59 = vector.load %arg14[%c0_41, %c0_42] : memref<1x40xf32, #tpu.memory_space<vmem>>, vector<1x40xf32>
    %60 = vector.broadcast %59 : vector<1x40xf32> to vector<256x40xf32>
    %61 = arith.addf %58, %60 : vector<256x40xf32>
    %cst_43 = arith.constant 0.000000e+00 : f32
    %62 = vector.broadcast %cst_43 : f32 to vector<256x40xf32>
    %63 = arith.maximumf %61, %62 : vector<256x40xf32>
    %c1_i32_44 = arith.constant 1 : i32
    %64 = tpu.dynamic_rotate %63 by %c1_i32_44 dim 0 : vector<256x40xf32>, i32 -> vector<256x40xf32>
    %c255_i32_45 = arith.constant 255 : i32
    %65 = tpu.dynamic_rotate %63 by %c255_i32_45 dim 0 : vector<256x40xf32>, i32 -> vector<256x40xf32>
    %c254_i32_46 = arith.constant 254 : i32
    %66 = tpu.dynamic_rotate %63 by %c254_i32_46 dim 0 : vector<256x40xf32>, i32 -> vector<256x40xf32>
    %67 = tpu.concatenate %64, %63, %65, %66 in 1 : vector<256x40xf32>, vector<256x40xf32>, vector<256x40xf32>, vector<256x40xf32> -> vector<256x160xf32>
    %c0_47 = arith.constant 0 : index
    %c0_48 = arith.constant 0 : index
    %68 = vector.load %arg6[%c0_47, %c0_48] : memref<256x160xf32, #tpu.memory_space<vmem>>, vector<256x160xf32>
    %69 = arith.mulf %67, %68 : vector<256x160xf32>
    %70 = arith.truncf %69 : vector<256x160xf32> to vector<256x160xbf16>
    %c0_49 = arith.constant 0 : index
    %c0_50 = arith.constant 0 : index
    %71 = vector.load %arg15[%c0_49, %c0_50] : memref<160x40xbf16, #tpu.memory_space<vmem>>, vector<160x40xbf16>
    %cst_51 = arith.constant dense<0.000000e+00> : vector<256x40xf32>
    %72 = tpu.matmul %70, %71, %cst_51 {dimension_numbers = #tpu.dot_dimension_numbers<[1], [0], [0], [1], [0, 0, 1, 1], [], []>} : vector<256x160xbf16>, vector<160x40xbf16>, vector<256x40xf32> -> vector<256x40xf32>
    %c0_52 = arith.constant 0 : index
    %c0_53 = arith.constant 0 : index
    %73 = vector.load %arg16[%c0_52, %c0_53] : memref<1x40xf32, #tpu.memory_space<vmem>>, vector<1x40xf32>
    %74 = vector.broadcast %73 : vector<1x40xf32> to vector<256x40xf32>
    %75 = arith.addf %72, %74 : vector<256x40xf32>
    %cst_54 = arith.constant 0.000000e+00 : f32
    %76 = vector.broadcast %cst_54 : f32 to vector<256x40xf32>
    %77 = arith.maximumf %75, %76 : vector<256x40xf32>
    %c0_55 = arith.constant 0 : index
    %c0_56 = arith.constant 0 : index
    %78 = vector.load %arg17[%c0_55, %c0_56] : memref<256x40xf32, #tpu.memory_space<vmem>>, vector<256x40xf32>
    tpu.vector_store %arg17[%c0_55, %c0_56], %77 {strides = array<i32>} : memref<256x40xf32, #tpu.memory_space<vmem>>, vector<256x40xf32>,
    return
  }
  func.func @transform_0(%arg0: i32) -> (i32, i32) {
    %c0_i32 = arith.constant 0 : i32
    %c0_i32_0 = arith.constant 0 : i32
    return %arg0, %c0_i32 : i32, i32
  }
  func.func @transform_1(%arg0: i32) -> (i32, i32) {
    %c0_i32 = arith.constant 0 : i32
    %c0_i32_0 = arith.constant 0 : i32
    %c0_i32_1 = arith.constant 0 : i32
    return %c0_i32, %c0_i32_0 : i32, i32
  }
  func.func @transform_2(%arg0: i32) -> (i32, i32) {
    %c0_i32 = arith.constant 0 : i32
    %c0_i32_0 = arith.constant 0 : i32
    %c0_i32_1 = arith.constant 0 : i32
    return %c0_i32, %c0_i32_0 : i32, i32
  }
  func.func @transform_3(%arg0: i32) -> (i32, i32) {
    %c0_i32 = arith.constant 0 : i32
    %c0_i32_0 = arith.constant 0 : i32
    %c0_i32_1 = arith.constant 0 : i32
    return %c0_i32, %c0_i32_0 : i32, i32
  }
  func.func @transform_4(%arg0: i32) -> (i32, i32) {
    %c0_i32 = arith.constant 0 : i32
    %c0_i32_0 = arith.constant 0 : i32
    %c0_i32_1 = arith.constant 0 : i32
    return %c0_i32, %c0_i32_0 : i32, i32
  }
  func.func @transform_5(%arg0: i32) -> (i32, i32) {
    %c0_i32 = arith.constant 0 : i32
    %c0_i32_0 = arith.constant 0 : i32
    %c0_i32_1 = arith.constant 0 : i32
    return %c0_i32, %c0_i32_0 : i32, i32
  }
  func.func @transform_6(%arg0: i32) -> (i32, i32) {
    %c0_i32 = arith.constant 0 : i32
    %c0_i32_0 = arith.constant 0 : i32
    %c0_i32_1 = arith.constant 0 : i32
    return %c0_i32, %c0_i32_0 : i32, i32
  }
  func.func @transform_7(%arg0: i32) -> (i32, i32) {
    %c0_i32 = arith.constant 0 : i32
    %c0_i32_0 = arith.constant 0 : i32
    %c0_i32_1 = arith.constant 0 : i32
    return %c0_i32, %c0_i32_0 : i32, i32
  }
  func.func @transform_8(%arg0: i32) -> (i32, i32) {
    %c0_i32 = arith.constant 0 : i32
    %c0_i32_0 = arith.constant 0 : i32
    %c0_i32_1 = arith.constant 0 : i32
    return %c0_i32, %c0_i32_0 : i32, i32
  }
  func.func @transform_9(%arg0: i32) -> (i32, i32) {
    %c0_i32 = arith.constant 0 : i32
    %c0_i32_0 = arith.constant 0 : i32
    %c0_i32_1 = arith.constant 0 : i32
    return %c0_i32, %c0_i32_0 : i32, i32
  }
  func.func @transform_10(%arg0: i32) -> (i32, i32) {
    %c0_i32 = arith.constant 0 : i32
    %c0_i32_0 = arith.constant 0 : i32
    %c0_i32_1 = arith.constant 0 : i32
    return %c0_i32, %c0_i32_0 : i32, i32
  }
  func.func @transform_11(%arg0: i32) -> (i32, i32) {
    %c0_i32 = arith.constant 0 : i32
    %c0_i32_0 = arith.constant 0 : i32
    %c0_i32_1 = arith.constant 0 : i32
    return %c0_i32, %c0_i32_0 : i32, i32
  }
  func.func @transform_12(%arg0: i32) -> (i32, i32) {
    %c0_i32 = arith.constant 0 : i32
    %c0_i32_0 = arith.constant 0 : i32
    %c0_i32_1 = arith.constant 0 : i32
    return %c0_i32, %c0_i32_0 : i32, i32
  }
  func.func @transform_13(%arg0: i32) -> (i32, i32) {
    %c0_i32 = arith.constant 0 : i32
    %c0_i32_0 = arith.constant 0 : i32
    %c0_i32_1 = arith.constant 0 : i32
    return %c0_i32, %c0_i32_0 : i32, i32
  }
  func.func @transform_14(%arg0: i32) -> (i32, i32) {
    %c0_i32 = arith.constant 0 : i32
    %c0_i32_0 = arith.constant 0 : i32
    %c0_i32_1 = arith.constant 0 : i32
    return %c0_i32, %c0_i32_0 : i32, i32
  }
  func.func @transform_15(%arg0: i32) -> (i32, i32) {
    %c0_i32 = arith.constant 0 : i32
    %c0_i32_0 = arith.constant 0 : i32
    %c0_i32_1 = arith.constant 0 : i32
    return %c0_i32, %c0_i32_0 : i32, i32
  }
  func.func @transform_16(%arg0: i32) -> (i32, i32) {
    %c0_i32 = arith.constant 0 : i32
    %c0_i32_0 = arith.constant 0 : i32
    return %arg0, %c0_i32 : i32, i32
  }
}

</mosaic_0001>

<bundles_post_ra>
// kernel: seq2point_forward.3
= control target key start
LH: loop header
LB: loop body
LE: loop exit
PB: predicated region body
PF: predicated region fallthrough
CT: control target
= control target key end

     0   :  { %s1306_s0 = inlined_call_operand.vmem [shape: f32[16,640], index: 0, kind: input, shape index: {}]   ;;  %s1307_s1 = inlined_call_operand.vmem [shape: bf16[640,512], index: 1, kind: input, shape index: {}]   ;;  %s1308_s2 = inlined_call_operand.vmem [shape: f32[1,512], index: 2, kind: input, shape index: {}]   ;;  %s1309_s3 = inlined_call_operand.vmem [shape: bf16[1,512], index: 3, kind: input, shape index: {}]   ;;  %s1310_s4 = inlined_call_operand.<no memory space> [shape: f32[1,1], index: 4, kind: input, shape index: {}]   ;;  %s1311_s5 = inlined_call_operand.hbm [shape: f32[1,16], index: 5, kind: output, shape index: {}]  }
   0x1   :  { %v10_v0 = vstv %s1310_s4 }
   0x2   :  { %11 = vst [vmem:[#allocation3] sm:$0x1] %v10_v0 }
   0x3   :  { %12 = vsyncpa [#allocation6], 0  ;;  %s1155_s20 = smov 0   ;;  %s1157_s21 = smov 0  }
   0x4   :  { %s1159_s22 = smov 0   ;;  %s1161_s23 = smov 0  }
   0x5   :  { %s1163_s24 = smov 0  }
   0x6 LB: > { %s897_s4 = sadd.s32 4294967295, %s1115_s24   ;;  %s27_s25 = sadd.s32 1, %s1111_s23  ;;  %s1115_s24 = sphi %s1163_s24, %s18_s24   ;;  %s1111_s23 = sphi %s1161_s23, %s1316_s23   ;;  %s1107_s22 = sphi %s1159_s22, %s1315_s22   ;;  %s1103_s21 = sphi %s1157_s21, %s1314_s21   ;;  %s1099_s20 = sphi %s1155_s20, %s1313_s20  }
   0x7   : > { %p28_p0 = scmp.ge.s32.totalorder %s27_s25, 5  ;;  %p46_p1 = scmp.ne.s32.totalorder %s1103_s21, %s1099_s20 }
   0x8   : > { %p47_p2 = scmp.eq.s32.totalorder %s1115_s24, 0  ;;  %s39_s27 = sadd.s32 1, %s1103_s21 }
   0x9   : > { %s1318_s25 = smov (%p28_p0, %s27_s25), 0  ;;  %p899_p5 = scmp.ge.s32.totalorder %s1115_s24, 5 }
   0xa   : > { %p48_p3 = por %p47_p2, %p46_p1  ;;  %s35_s26 = ssub.s32 %s1111_s23, %s1318_s25 }
   0xb   : > { %p37_p4 = scmp.eq.s32.totalorder %s35_s26, 0  ;;  %196 = sbr.rel (%p899_p5) target bundleno = 25 (0x19), region = 28 }
   0xd   : > { %s1191_s28 = scalar_select %p37_p4, %s1103_s21, %s39_s27  }
  0x12   : > { %199 = sbr.rel (!%p48_p3) target bundleno = 25 (0x19), region = 32  ;;  %s201_s29 = sand.u32 (%p48_p3), 1, %s1103_s21  }
  0x13   : > { %s901_s30 = sshll.u32 (%p48_p3), %s1111_s23, 3  ;;  %s900_s6 = sshll.u32 (%p48_p3), %s201_s29, 4 }
  0x14   : > { %s208_s9 = scalar_lea.vmem (%p48_p3), %s1306_s0, %s901_s30  ;;  %s203_s10 = scalar_lea.vmem (%p48_p3), [#allocation4], %s900_s6 }
  0x15   : > { %v238_v1 = vld [vmem:[%s208_s9] sm:$0xff] (%p48_p3)  ;;  %v240_v2 = vld [vmem:[%s208_s9 + $0x28] sm:$0xff] (%p48_p3) }
  0x16   : > { %239 = vst [vmem:[%s203_s10] sm:$0xff] (%p48_p3), %v238_v1  ;;  %241 = vst [vmem:[%s203_s10 + $0x8] sm:$0xff] (%p48_p3), %v240_v2 }
  0x19 PF: > { %p902_p6 = scmp.ge.s32.totalorder %s1115_s24, 1  ;;  %p256_p7 = scmp.lt.s32.totalorder %s1115_s24, 6 }
  0x1b   : > { %p257_p8 = pnand %p902_p6, %p256_p7 }
  0x1c   : > { %s263_s11 = sand.u32 (!%p257_p8), 1, %s1099_s20   ;;  %s904_s12 = sshll.u32 (!%p257_p8), %s1107_s22, 4 }
  0x1d   : > { %260 = sbr.rel (%p257_p8) target bundleno = 558 (0x22e), region = 74  ;;  %s1203_s13 = sshll.u32 (!%p257_p8), %s263_s11, 4 }
  0x1e   : > { %p293_p9 = scmp.lt.s32.totalorder (!%p257_p8), %s904_s12, 79  ;;  %s265_s18 = scalar_lea.vmem (!%p257_p8), [#allocation4], %s1203_s13 }
  0x1f   : > { %p907_p10 = scmp.ne.s32.totalorder (!%p257_p8), %s1107_s22, 0 }
  0x24   : > { %s1320_s12 = smov (!%p293_p9, %s904_s12), 79  ;;  %303 = sbr.rel (%p907_p10) target bundleno = 43 (0x2b), region = 82 }
  0x25   : > { %s946_s14 = sshll.u32 %s1320_s12, 4  ;;  %v1117_v3 = vmov (!%p907_p10), 0.0  }
  0x26   : > { %s1208_s17 = scalar_lea.vmem %s1307_s1, %s946_s14  ;;  %304 = vst [vmem:[#allocation2] sm:$0xff] (!%p907_p10), %v1117_v3  ;;  %305 = vst [vmem:[#allocation2 + $0x8] sm:$0xff] (!%p907_p10), %v1117_v3 }
  0x27   : > { %306 = vst [vmem:[#allocation2 + $0x10] sm:$0xff] (!%p907_p10), %v1117_v3  ;;  %307 = vst [vmem:[#allocation2 + $0x18] sm:$0xff] (!%p907_p10), %v1117_v3 }
  0x28   : > { %308 = vst [vmem:[#allocation2 + $0x20] sm:$0xff] (!%p907_p10), %v1117_v3  ;;  %309 = vst [vmem:[#allocation2 + $0x28] sm:$0xff] (!%p907_p10), %v1117_v3 }
  0x29   : > { %310 = vst [vmem:[#allocation2 + $0x30] sm:$0xff] (!%p907_p10), %v1117_v3  ;;  %311 = vst [vmem:[#allocation2 + $0x38] sm:$0xff] (!%p907_p10), %v1117_v3 }
  0x2b PF: > { %v998_v4 = vld [vmem:[%s1208_s17 + $0x4] ss:$16 sps:$4 sm:$0xff]   ;;  %v1000_v5 = vld [vmem:[%s1208_s17 + $0xc] ss:$16 sps:$4 sm:$0xff]   ;;  %v1118_v6 = vmov 0   ;;  %p940_p11 = scmp.ne.s32.totalorder %s1107_s22, 4 }
  0x2c   : > { %547 = vmatprep.mubr.bf16.mxu0 %v1118_v6  ;;  %590 = vmatprep.mubr.bf16.mxu1 %v1118_v6  ;;  %v1002_v7 = vld [vmem:[%s1208_s17] ss:$16 sps:$4 sm:$0xff]   ;;  %v1003_v8 = vld [vmem:[%s1208_s17 + $0x8] ss:$16 sps:$4 sm:$0xff]   ;;  %v1004_v9 = vld [vmem:[%s1208_s17 + $0x24] ss:$16 sps:$4 sm:$0xff]   ;;  %v631_v0 = vlaneseq (!%p940_p11) }
  0x2d   : > { %515 = vmatprep.subr.bf16.mxu0 %v998_v4  ;;  %558 = vmatprep.subr.bf16.mxu1 %v1000_v5  ;;  %v1006_v10 = vld [vmem:[%s1208_s17 + $0x2c] ss:$16 sps:$4 sm:$0xff]   ;;  %v1008_v11 = vld [vmem:[%s1208_s17 + $0x20] ss:$16 sps:$4 sm:$0xff]   ;;  %v1009_v12 = vld [vmem:[%s1208_s17 + $0x28] ss:$16 sps:$4 sm:$0xff]  }
  0x2e   : > { %516 = vmatpush1.bf16.msra.mxu0 %v1002_v7  ;;  %559 = vmatpush1.bf16.msra.mxu1 %v1003_v8  ;;  %v1010_v13 = vld [vmem:[%s1208_s17 + $0x44] ss:$16 sps:$4 sm:$0xff]   ;;  %v1012_v14 = vld [vmem:[%s1208_s17 + $0x4c] ss:$16 sps:$4 sm:$0xff]   ;;  %v1014_v15 = vld [vmem:[%s1208_s17 + $0x40] ss:$16 sps:$4 sm:$0xff]  }
  0x2f   : > { %517 = vmatprep.subr.bf16.mxu0 %v1004_v9  ;;  %560 = vmatprep.subr.bf16.mxu1 %v1006_v10  ;;  %v1015_v16 = vld [vmem:[%s1208_s17 + $0x48] ss:$16 sps:$4 sm:$0xff]   ;;  %v1016_v17 = vld [vmem:[%s1208_s17 + $0x64] ss:$16 sps:$4 sm:$0xff]   ;;  %v1018_v18 = vld [vmem:[%s1208_s17 + $0x6c] ss:$16 sps:$4 sm:$0xff]  }
  0x30   : > { %v1020_v19 = vld [vmem:[%s1208_s17 + $0x60] ss:$16 sps:$4 sm:$0xff]   ;;  %v1021_v20 = vld [vmem:[%s1208_s17 + $0x68] ss:$16 sps:$4 sm:$0xff]   ;;  %v1022_v21 = vld [vmem:[%s1208_s17 + $0x84] ss:$16 sps:$4 sm:$0xff]  }
  0x31   : > { %v1024_v22 = vld [vmem:[%s1208_s17 + $0x8c] ss:$16 sps:$4 sm:$0xff]   ;;  %v1026_v23 = vld [vmem:[%s1208_s17 + $0x80] ss:$16 sps:$4 sm:$0xff]   ;;  %v1027_v24 = vld [vmem:[%s1208_s17 + $0x88] ss:$16 sps:$4 sm:$0xff]  }
  0x32   : > { %518 = vmatpush1.bf16.msra.mxu0 %v1008_v11  ;;  %561 = vmatpush1.bf16.msra.mxu1 %v1009_v12  ;;  %v1028_v25 = vld [vmem:[%s1208_s17 + $0xa4] ss:$16 sps:$4 sm:$0xff]   ;;  %v1030_v26 = vld [vmem:[%s1208_s17 + $0xac] ss:$16 sps:$4 sm:$0xff]   ;;  %v1032_v27 = vld [vmem:[%s1208_s17 + $0xa0] ss:$16 sps:$4 sm:$0xff]  }
  0x33   : > { %519 = vmatprep.subr.bf16.mxu0 %v1010_v13  ;;  %562 = vmatprep.subr.bf16.mxu1 %v1012_v14  ;;  %v1033_v28 = vld [vmem:[%s1208_s17 + $0xa8] ss:$16 sps:$4 sm:$0xff]   ;;  %v1034_v29 = vld [vmem:[%s1208_s17 + $0xc4] ss:$16 sps:$4 sm:$0xff]   ;;  %v1036_v30 = vld [vmem:[%s1208_s17 + $0xcc] ss:$16 sps:$4 sm:$0xff]  }
  0x34   : > { %v1038_v31 = vld [vmem:[%s1208_s17 + $0xc0] ss:$16 sps:$4 sm:$0xff]   ;;  %v1039_v32 = vld [vmem:[%s1208_s17 + $0xc8] ss:$16 sps:$4 sm:$0xff]   ;;  %v1040_v33 = vld [vmem:[%s1208_s17 + $0xe4] ss:$16 sps:$4 sm:$0xff]  }
  0x35   : > { %v1042_v34 = vld [vmem:[%s1208_s17 + $0xec] ss:$16 sps:$4 sm:$0xff]   ;;  %v1044_v35 = vld [vmem:[%s1208_s17 + $0xe0] ss:$16 sps:$4 sm:$0xff]   ;;  %v1045_v36 = vld [vmem:[%s1208_s17 + $0xe8] ss:$16 sps:$4 sm:$0xff]  }
  0x36   : > { %520 = vmatpush1.bf16.msra.mxu0 %v1014_v15  ;;  %563 = vmatpush1.bf16.msra.mxu1 %v1015_v16  ;;  %v320_v37 = vld [vmem:[%s265_s18] sm:$0xff]  ;;  %v321_v38 = vld [vmem:[%s265_s18 + $0x8] sm:$0xff]  ;;  %v1119_v1 = vmov (!%p940_p11), 1966171168   ;;  %v632_v4 = vshrl.u32 (!%p940_p11), %v631_v0, 7  ;;  %v1120_v5 = vmov (!%p940_p11), 0  }
  0x37   : > { %521 = vmatprep.subr.bf16.mxu0 %v1016_v17  ;;  %564 = vmatprep.subr.bf16.mxu1 %v1018_v18  ;;  %v322_v39 = vpack.c.bf16 %v321_v38, %v320_v37  ;;  %v312_v40 = vld [vmem:[#allocation2] sm:$0xff]  ;;  %v314_v41 = vld [vmem:[#allocation2 + $0x10] sm:$0xff]  ;;  %v313_v42 = vld [vmem:[#allocation2 + $0x8] sm:$0xff]  ;;  %v678_v2 = vunpack.c.l.s4 (!%p940_p11), %v1119_v1  ;;  %vm816_vm0 = vcmask (!%p940_p11), 122880  }
  0x38   : > { %v315_v43 = vld [vmem:[#allocation2 + $0x18] sm:$0xff]  ;;  %v316_v46 = vld [vmem:[#allocation2 + $0x20] sm:$0xff]  ;;  %v318_v47 = vld [vmem:[#allocation2 + $0x30] sm:$0xff]  ;;  %1046 = vset.pattern.permute.xlu0 (!%p940_p11), %v1120_v5  ;;  %v637_v11 = vsub.s32 (!%p940_p11), 1, %v632_v4  ;;  %v645_v12 = vsub.s32 (!%p940_p11), 3, %v632_v4  ;;  %v1255_v13 = vsub.s32 (!%p940_p11), 0, %v632_v4 }
  0x39   : > { %v317_v52 = vld [vmem:[#allocation2 + $0x28] sm:$0xff]  ;;  %v319_v53 = vld [vmem:[#allocation2 + $0x38] sm:$0xff]  ;;  %v629_v3 = vld [vmem:[%s1308_s2] sm:$0xf] (!%p940_p11)  ;;  %v679_v7 = vunpack.c.0.s8 (!%p940_p11), %v678_v2  ;;  %v641_v14 = vsub.s32 (!%p940_p11), 2, %v632_v4 }
  0x3a   : > { %522 = vmatpush1.bf16.msra.mxu0 %v1020_v19  ;;  %565 = vmatpush1.bf16.msra.mxu1 %v1021_v20  ;;  %v941_v6 = vld.sshfl [vmem:[%s1309_s3] sm:$0x33 pattern:$0x75316420] (!%p940_p11)  ;;  %v638_v20 = vrot.slane (!%p940_p11), %v629_v3, %v637_v11 }
  0x3b   : > { %523 = vmatprep.subr.bf16.mxu0 %v1022_v21  ;;  %566 = vmatprep.subr.bf16.mxu1 %v1024_v22  ;;  %v805_v8 = vld [vmem:[#allocation3] sm:$0x1] (!%p940_p11)  ;;  %v676_v18 = vcombine.high (!%p940_p11), %v941_v6, %v941_v6  ;;  %v682_v19 = vsub.s32 (!%p940_p11), %v679_v7, %v632_v4  ;;  %v646_v21 = vrot.slane (!%p940_p11), %v629_v3, %v645_v12 }
  0x3c   : > { %808 = vperm.xlu0 (!%p940_p11), %1046, %v805_v8  }
  0x3e   : > { %524 = vmatpush1.bf16.msra.mxu0 %v1026_v23  ;;  %567 = vmatpush1.bf16.msra.mxu1 %v1027_v24  ;;  %v634_v23 = vrot.slane (!%p940_p11), %v629_v3, %v1255_v13 }
  0x3f   : > { %525 = vmatprep.subr.bf16.mxu0 %v1028_v25  ;;  %568 = vmatprep.subr.bf16.mxu1 %v1030_v26  ;;  %v642_v26 = vrot.slane (!%p940_p11), %v629_v3, %v641_v14 }
  0x42   : > { %526 = vmatpush1.bf16.msra.mxu0 %v1032_v27  ;;  %569 = vmatpush1.bf16.msra.mxu1 %v1033_v28  ;;  %v690_v27 = vrot.slane (!%p940_p11), %v676_v18, %v682_v19  ;;  %v683_v28 = vrot.slane (!%p940_p11), %v941_v6, %v682_v19 }
  0x43   : > { %527 = vmatprep.subr.bf16.mxu0 %v1034_v29  ;;  %570 = vmatprep.subr.bf16.mxu1 %v1036_v30 }
  0x46   : > { %528 = vmatpush1.bf16.msra.mxu0 %v1038_v31  ;;  %571 = vmatpush1.bf16.msra.mxu1 %v1039_v32 }
  0x47   : > { %529 = vmatprep.subr.bf16.mxu0 %v1040_v33  ;;  %572 = vmatprep.subr.bf16.mxu1 %v1042_v34 }
  0x4a   : > { %530 = vmatpush1.bf16.msra.mxu0 %v1044_v35  ;;  %573 = vmatpush1.bf16.msra.mxu1 %v1045_v36 }
  0x4d   : > { %548 = vmatmul.mubr.bf16.vlgmr.msra.gmra.mrb[0].mxu0 %v322_v39  ;;  %591 = vmatmul.mubr.bf16.vlgmr.msra.gmra.mrb[0].mxu1 %v322_v39 }
 0x120   : > { %v549_v44 = vpop.f32.mrb[0].mxu0  ;;  %v592_v45 = vpop.f32.mrb[0].mxu1  ;;  %620 = sbr.rel (%p940_p11) target bundleno = 533 (0x215), region = 86 }
 0x121   : > { %v601_v48 = vadd.f32 %v549_v44, %v312_v40  ;;  %v603_v49 = vadd.f32 %v592_v45, %v314_v41  ;;  %v551_v50 = vpop.f32.mrb[1].mxu0  ;;  %v594_v51 = vpop.f32.mrb[1].mxu1 }
 0x122   : > { %v602_v54 = vadd.f32 %v551_v50, %v313_v42  ;;  %v604_v55 = vadd.f32 %v594_v51, %v315_v43  ;;  %v553_v56 = vpop.f32.mrb[2].mxu0  ;;  %v596_v57 = vpop.f32.mrb[2].mxu1  ;;  %v691_v51 = vcombine.high (!%p940_p11), %v683_v28, %v683_v28 }
 0x123   : > { %609 = vst [vmem:[#allocation2] sm:$0xff] %v601_v48  ;;  %611 = vst [vmem:[#allocation2 + $0x10] sm:$0xff] %v603_v49  ;;  %v605_v58 = vadd.f32 %v553_v56, %v316_v46  ;;  %v607_v59 = vadd.f32 %v596_v57, %v318_v47  ;;  %v555_v60 = vpop.f32.mrb[3].mxu0  ;;  %v598_v61 = vpop.f32.mrb[3].mxu1  ;;  %v701_v47 = vpack.i.b16 (!%p940_p11), %v690_v27, %v690_v27 }
 0x124   : > { %610 = vst [vmem:[#allocation2 + $0x8] sm:$0xff] %v602_v54  ;;  %612 = vst [vmem:[#allocation2 + $0x18] sm:$0xff] %v604_v55  ;;  %v606_v62 = vadd.f32 %v555_v60, %v317_v52  ;;  %v608_v63 = vadd.f32 %v598_v61, %v319_v53  ;;  %v692_v48 = vcombine.high (!%p940_p11), %v690_v27, %v690_v27 }
 0x125   : > { %613 = vst [vmem:[#allocation2 + $0x20] sm:$0xff] %v605_v58  ;;  %615 = vst [vmem:[#allocation2 + $0x30] sm:$0xff] %v607_v59  ;;  %v706_v52 = vrot.slane (!%p940_p11), %v701_v47, %v1255_v13  ;;  %v694_v54 = vpack.i.b16 (!%p940_p11), %v683_v28, %v683_v28  ;;  %v708_v55 = vpack.i.b16 (!%p940_p11), %v691_v51, %v691_v51  ;;  %v809_v59 = vpop.permute.xlu0 (!%p940_p11), %808 }
 0x126   : > { %614 = vst [vmem:[#allocation2 + $0x28] sm:$0xff] %v606_v62  ;;  %616 = vst [vmem:[#allocation2 + $0x38] sm:$0xff] %v608_v63  ;;  %v715_v53 = vpack.i.b16 (!%p940_p11), %v692_v48, %v692_v48  ;;  %v814_v60 = vrot.slane (!%p940_p11), %v809_v59, %v1255_v13 }
 0x127   : > { %757 = vmatprep.mubr.bf16.mxu0 %v706_v52  ;;  %v699_v57 = vrot.slane %v694_v54, %v1255_v13  ;;  %v713_v58 = vrot.slane %v708_v55, %v1255_v13 }
 0x128   : > { %v720_v56 = vrot.slane %v715_v53, %v1255_v13 }
 0x12a   : > { %v621_v17 = vld [vmem:[#allocation2] sm:$0xff]  ;;  %v623_v24 = vld [vmem:[#allocation2 + $0x10] sm:$0xff]  ;;  %797 = vmatprep.mubr.bf16.mxu1 %v720_v56 }
 0x12b   : > { %v622_v9 = vld [vmem:[#allocation2 + $0x8] sm:$0xff]  ;;  %v624_v15 = vld [vmem:[#allocation2 + $0x18] sm:$0xff]  ;;  %v651_v33 = vadd.f32 %v634_v23, %v621_v17  ;;  %v653_v35 = vadd.f32 %v642_v26, %v623_v24 }
 0x12c   : > { %v625_v22 = vld [vmem:[#allocation2 + $0x20] sm:$0xff]  ;;  %v627_v25 = vld [vmem:[#allocation2 + $0x30] sm:$0xff]  ;;  %v652_v29 = vadd.f32 %v638_v20, %v622_v9  ;;  %v654_v31 = vadd.f32 %v646_v21, %v624_v15 }
 0x12d   : > { %v626_v10 = vld [vmem:[#allocation2 + $0x28] sm:$0xff]  ;;  %v628_v16 = vld [vmem:[#allocation2 + $0x38] sm:$0xff]  ;;  %v655_v34 = vadd.f32 %v634_v23, %v625_v22  ;;  %v657_v36 = vadd.f32 %v642_v26, %v627_v25  ;;  %v659_v41 = vmax.f32 %v651_v33, 0.0  ;;  %v661_v43 = vmax.f32 %v653_v35, 0.0 }
 0x12e   : > { %v656_v30 = vadd.f32 %v638_v20, %v626_v10  ;;  %v658_v32 = vadd.f32 %v646_v21, %v628_v16  ;;  %v660_v37 = vmax.f32 %v652_v29, 0.0  ;;  %v662_v39 = vmax.f32 %v654_v31, 0.0 }
 0x12f   : > { %v663_v42 = vmax.f32 %v655_v34, 0.0  ;;  %v665_v44 = vmax.f32 %v657_v36, 0.0 }
 0x130   : > { %v664_v38 = vmax.f32 %v656_v30, 0.0  ;;  %v666_v40 = vmax.f32 %v658_v32, 0.0 }
 0x131   : > { %v721_v49 = vpack.c.bf16 %v663_v42, %v659_v41  ;;  %v723_v50 = vpack.c.bf16 %v665_v44, %v661_v43 }
 0x132   : > { %v722_v45 = vpack.c.bf16 %v664_v38, %v660_v37  ;;  %v724_v46 = vpack.c.bf16 %v666_v40, %v662_v39 }
 0x134   : > { %725 = vmatprep.subr.bf16.mxu0 %v722_v45  ;;  %765 = vmatprep.subr.bf16.mxu1 %v724_v46 }
 0x135   : > { %726 = vmatpush1.bf16.xpose.msra.mxu0 %v721_v49  ;;  %766 = vmatpush1.bf16.xpose.msra.mxu1 %v723_v50 }
 0x13c   : > { %758 = vmatmul.mubr.bf16.vlgmr.msra.gmra.mrb[0].mxu0 %v699_v57  ;;  %798 = vmatmul.mubr.bf16.vlgmr.msra.gmra.mrb[0].mxu1 %v713_v58 }
 0x20f   : > { %v759_v61 = vpop.f32.mrb[0].mxu0  ;;  %v799_v62 = vpop.f32.mrb[0].mxu1 }
 0x210   : > { %v800_v63 = vadd.f32 %v799_v62, %v759_v61  ;;  %v761_v0 = vpop.f32.mrb[1].mxu0  ;;  %v801_v1 = vpop.f32.mrb[1].mxu1 }
 0x211   : > { %v762_v2 = vpop.f32.mrb[2].mxu0  ;;  %v802_v3 = vpop.f32.mrb[2].mxu1 }
 0x212   : > { %v815_v4 = vadd.f32 %v814_v60, %v800_v63  ;;  %v763_v5 = vpop.f32.mrb[3].mxu0  ;;  %v803_v6 = vpop.f32.mrb[3].mxu1 }
 0x214   : > { %817 = vst.msk [vmem:[#allocation5] sm:$0x1] %vm816_vm0, %v815_v4 }
 0x215 PF: > { %p1265_p12 = scmp.eq.s32.totalorder %s897_s4, 4  ;;  %s1121_s29 = smov [#allocation5]  }
 0x216   : > { %s827_s30 = sshll.u32 %s1121_s29, 4  ;;  %s828_s30 = int_to_ptr.vmem [resolvable:$true] %s827_s30 }
 0x217   : > { %s1047_s6 = scalar_lea.vmem %s828_s30, 16  ;;  %s1053_s7 = scalar_lea.vmem %s828_s30, 32 }
 0x218   : > { %p1048_p13 = scmp.ne.s32.totalorder %s828_s30, %s1047_s6  ;;  %p1054_p2 = scmp.lt.s32.totalorder %s828_s30, %s828_s30 }
 0x219   : > { %p1055_p3 = scmp.lt.s32.totalorder %s1053_s7, %s1047_s6 }
 0x21a   : > { %p1049_p0 = pnand %p1048_p13, %p1265_p12 }
 0x21b   : > { %p1056_p4 = por %p1055_p3, %p1054_p2 }
 0x21c   : > { %p1050_p1 = pneg %p1049_p0 }
 0x21e   : > { %p1057_p5 = pnand %p1056_p4, %p1050_p1 }
 0x220   : > { %1060 = shalt.err (!%p1057_p5)
}
 0x221   : > { %s1061_s9 = scalar_lea.hbm %s1311_s5, 16 }
 0x222   : > { %p1062_p6 = scmp.ne.s32.totalorder %s1311_s5, %s1061_s9  ;;  %p1067_p9 = scmp.lt.u32.totalorder %s1061_s9, %s1311_s5 }
 0x224   : > { %p1063_p7 = pnand %p1062_p6, %p1265_p12 }
 0x226   : > { %p1064_p8 = pneg %p1063_p7 }
 0x228   : > { %p1069_p10 = pnand %p1067_p9, %p1064_p8 }
 0x22a   : > { %1072 = shalt.err (!%p1069_p10)
}
 0x22b   : > { %948 = dma.vmem_to_hbm [thread:$0]  (%p1265_p12), %s828_s30, 16, %s1311_s5, [#allocation6]  }
 0x22c   : > { %1094 = dma.done.wait (%p1265_p12), [#allocation6], 16  }
 0x22d   : > { %1096 = vsyncadd (%p1265_p12), [#allocation6], 4294967280 }
 0x22e PF: > { %s18_s24 = sadd.s32 1, %s1115_s24   ;;  %s1313_s20 = smov %s1103_s21 }
 0x22f   : > { %p15_p11 = scmp.ge.s32.totalorder %s18_s24, 7   ;;  %s1314_s21 = smov %s1191_s28 }
 0x230   : > { %s1315_s22 = smov %s1111_s23  ;;  %s1316_s23 = smov %s1318_s25 }
 0x231   :  { %17 = sbr.rel (!%p15_p11) target bundleno = 6 (0x6), region = 122 }
 0x238   :  { %840 = vsyncpa [#allocation6], 1 }
 0x239   :  { %842 = vsyncpa [#allocation6 + $0x1], 1 }

// kernel: seq2point_forward.2
= control target key start
LH: loop header
LB: loop body
LE: loop exit
PB: predicated region body
PF: predicated region fallthrough
CT: control target
= control target key end

     0   :  { %s14907_s0 = inlined_call_operand.vmem [shape: f32[256,1], index: 0, kind: input, shape index: {}]   ;;  %s14908_s1 = inlined_call_operand.hbm [shape: f32[256,8], index: 1, kind: input, shape index: {}]   ;;  %s14909_s2 = inlined_call_operand.hbm [shape: f32[256,120], index: 2, kind: input, shape index: {}]   ;;  %s14910_s3 = inlined_call_operand.hbm [shape: f32[256,100], index: 3, kind: input, shape index: {}]   ;;  %s14911_s4 = inlined_call_operand.hbm [shape: f32[256,120], index: 4, kind: input, shape index: {}]   ;;  %s14912_s5 = inlined_call_operand.vmem [shape: f32[256,160], index: 5, kind: input, shape index: {}]   ;;  %s14913_s6 = inlined_call_operand.vmem [shape: bf16[8,20], index: 6, kind: input, shape index: {}]   ;;  %s14914_s7 = inlined_call_operand.vmem [shape: f32[1,20], index: 7, kind: input, shape index: {}]   ;;  %s14915_s8 = inlined_call_operand.vmem [shape: bf16[120,20], index: 8, kind: input, shape index: {}]   ;;  %s14916_s9 = inlined_call_operand.vmem [shape: f32[1,20], index: 9, kind: input, shape index: {}]   ;;  %s14917_s10 = inlined_call_operand.vmem [shape: bf16[100,30], index: 10, kind: input, shape index: {}]   ;;  %s14918_s11 = inlined_call_operand.vmem [shape: f32[1,30], index: 11, kind: input, shape index: {}]   ;;  %s14919_s12 = inlined_call_operand.vmem [shape: bf16[120,40], index: 12, kind: input, shape index: {}]   ;;  %s14920_s13 = inlined_call_operand.vmem [shape: f32[1,40], index: 13, kind: input, shape index: {}]   ;;  %s14921_s14 = inlined_call_operand.vmem [shape: bf16[160,40], index: 14, kind: input, shape index: {}]   ;;  %s14922_s15 = inlined_call_operand.vmem [shape: f32[1,40], index: 15, kind: input, shape index: {}]   ;;  %s14923_s16 = inlined_call_operand.vmem [shape: f32[256,40], index: 16, kind: output, shape index: {}]  }
   0x1   :  { %15036 = sst [smem:[#allocation76_spill]] %s14907_s0 }
   0x2   :  { %21 = vsyncpa [#allocation3], 0 }
   0x3   :  { %22 = vsyncpa [#allocation5], 0 }
   0x4   :  { %23 = vsyncpa [#allocation8], 0  ;;  %s7680_s21 = smov [#allocation4]   ;;  %s7681_s23 = smov [#allocation2]  }
   0x5   :  { %s43_s22 = sshll.u32 %s7680_s21, 4  ;;  %s31_s24 = sshll.u32 %s7681_s23, 4  ;;  %s44_s22 = int_to_ptr.vmem [resolvable:$true] %s43_s22  ;;  %s7787_s24 = int_to_ptr.vmem [resolvable:$true] %s31_s24 }
   0x6   :  { %s7586_s27 = scalar_lea.hbm %s14909_s2, 4096 }
   0x7   :  { %p7587_p0 = scmp.ne.s32.totalorder %s14909_s2, %s7586_s27  ;;  %p7590_p1 = scmp.lt.u32.totalorder %s7586_s27, %s14909_s2 }
   0x9   :  { %p7592_p2 = pnand %p7590_p1, %p7587_p0 }
   0xb   :  { %7595 = shalt.err (!%p7592_p2)
}
   0xc   :  { %s7596_s17 = scalar_lea.vmem %s44_s22, 4096  ;;  %p7601_p4 = scmp.lt.s32.totalorder %s44_s22, %s44_s22 }
   0xd   :  { %p7597_p3 = scmp.ne.s32.totalorder %s44_s22, %s7596_s17  ;;  %p7602_p5 = scmp.lt.s32.totalorder %s7596_s17, %s7596_s17 }
   0xf   :  { %p7603_p6 = por %p7602_p5, %p7601_p4 }
  0x11   :  { %p7604_p7 = pnand %p7603_p6, %p7597_p3 }
  0x13   :  { %7607 = shalt.err (!%p7604_p7)
}
  0x14   :  { %s7682_s18 = smov 128   ;;  %s7683_s19 = smov 8  }
  0x15   :  { %49 = dma.hbm_to_vmem [thread:$0]  %s14909_s2, 4096, %s44_s22, [#allocation5], %s7682_s18, %s7682_s18, %s7683_s19  }
  0x16   :  { %s7608_s26 = scalar_lea.hbm %s14908_s1, 4096 }
  0x17   :  { %p7609_p8 = scmp.ne.s32.totalorder %s14908_s1, %s7608_s26  ;;  %p7612_p9 = scmp.lt.u32.totalorder %s7608_s26, %s14908_s1 }
  0x19   :  { %p7614_p10 = pnand %p7612_p9, %p7609_p8 }
  0x1b   :  { %7617 = shalt.err (!%p7614_p10)
}
  0x1c   :  { %s7618_s0 = scalar_lea.vmem %s7787_s24, 4096  ;;  %p7623_p12 = scmp.lt.s32.totalorder %s7787_s24, %s7787_s24 }
  0x1d   :  { %p7619_p11 = scmp.ne.s32.totalorder %s7787_s24, %s7618_s0  ;;  %p7624_p13 = scmp.lt.s32.totalorder %s7618_s0, %s7618_s0 }
  0x1f   :  { %p7625_p0 = por %p7624_p13, %p7623_p12 }
  0x21   :  { %p7626_p1 = pnand %p7625_p0, %p7619_p11 }
  0x23   :  { %7629 = shalt.err (!%p7626_p1)
}
  0x24   :  { %37 = dma.hbm_to_vmem [thread:$0]  %s14908_s1, 4096, %s7787_s24, [#allocation3], %s7682_s18, %s7682_s18, %s7683_s19  }
  0x25   :  { %s7684_s17 = smov [#allocation6]   ;;  %s7685_s21 = smov [#allocation7]  }
  0x26   :  { %s55_s20 = sshll.u32 %s7684_s17, 4  ;;  %s67_s23 = sshll.u32 %s7685_s21, 4  ;;  %s56_s20 = int_to_ptr.vmem [resolvable:$true] %s55_s20  ;;  %s7824_s23 = int_to_ptr.vmem [resolvable:$true] %s67_s23 }
  0x27   :  { %s7630_s27 = scalar_lea.hbm %s14910_s3, 4096 }
  0x28   :  { %p7631_p2 = scmp.ne.s32.totalorder %s14910_s3, %s7630_s27  ;;  %p7634_p3 = scmp.lt.u32.totalorder %s7630_s27, %s14910_s3 }
  0x2a   :  { %p7636_p4 = pnand %p7634_p3, %p7631_p2 }
  0x2c   :  { %7639 = shalt.err (!%p7636_p4)
}
  0x2d   :  { %s7640_s1 = scalar_lea.vmem %s56_s20, 4096  ;;  %p7645_p6 = scmp.lt.s32.totalorder %s56_s20, %s56_s20 }
  0x2e   :  { %p7641_p5 = scmp.ne.s32.totalorder %s56_s20, %s7640_s1  ;;  %p7646_p7 = scmp.lt.s32.totalorder %s7640_s1, %s7640_s1 }
  0x30   :  { %p7647_p8 = por %p7646_p7, %p7645_p6 }
  0x32   :  { %p7648_p9 = pnand %p7647_p8, %p7641_p5 }
  0x34   :  { %7651 = shalt.err (!%p7648_p9)
}
  0x35   :  { %61 = dma.hbm_to_vmem [thread:$0]  %s14910_s3, 4096, %s56_s20, [#allocation5], %s7682_s18, %s7682_s18, %s7683_s19  }
  0x36   :  { %s7652_s21 = scalar_lea.hbm %s14911_s4, 4096 }
  0x37   :  { %p7653_p10 = scmp.ne.s32.totalorder %s14911_s4, %s7652_s21  ;;  %p7656_p11 = scmp.lt.u32.totalorder %s7652_s21, %s14911_s4 }
  0x39   :  { %p7658_p12 = pnand %p7656_p11, %p7653_p10 }
  0x3b   :  { %7661 = shalt.err (!%p7658_p12)
}
  0x3c   :  { %s7662_s29 = scalar_lea.vmem %s7824_s23, 4096  ;;  %p7667_p0 = scmp.lt.s32.totalorder %s7824_s23, %s7824_s23 }
  0x3d   :  { %p7663_p13 = scmp.ne.s32.totalorder %s7824_s23, %s7662_s29  ;;  %p7668_p1 = scmp.lt.s32.totalorder %s7662_s29, %s7662_s29 }
  0x3f   :  { %p7669_p2 = por %p7668_p1, %p7667_p0 }
  0x41   :  { %p7670_p3 = pnand %p7669_p2, %p7663_p13 }
  0x43   :  { %7673 = shalt.err (!%p7670_p3)
}
  0x44   :  { %73 = dma.hbm_to_vmem [thread:$0]  %s14911_s4, 4096, %s7824_s23, [#allocation8], %s7682_s18, %s7682_s18, %s7683_s19  }
  0x45   :  { %7674 = dma.done.wait [#allocation3], 4096  }
  0x46   :  { %7675 = vsyncadd [#allocation3], 4294963200 }
  0x47   :  { %7676 = dma.done.wait [#allocation5], 8192  }
  0x48   :  { %7677 = vsyncadd [#allocation5], 4294959104 }
  0x49   :  { %7678 = dma.done.wait [#allocation8], 4096  }
  0x4a   :  { %7679 = vsyncadd [#allocation8], 4294963200  ;;  %v173_v0 = vlaneseq  ;;  %s15037_s1 = sld [smem:[#allocation76_spill]]  ;;  %s7686_s21 = smov 1   ;;  %v1805_v58 = vld [vmem:[%s14913_s6] sm:$0xf] }
  0x4b   :  { %s7687_s25 = smov 2   ;;  %s7688_s26 = smov 3   ;;  %vm1862_vm6 = vcmask 1043456   ;;  %vm1494_vm8 = vcmask 7168   ;;  %vm1527_vm9 = vcmask 15360   ;;  %vm1560_vm10 = vcmask 23552  }
  0x4c   :  { %v7861_v1 = vshrl.u32 %v173_v0, 7  ;;  %s7689_s29 = smov 4   ;;  %s7690_s3 = smov 5   ;;  %7523 = vmatprep.subr.msk.bf16.mxu0 %vm1862_vm6, %v1805_v58  ;;  %v1864_v62 = vsel %vm1862_vm6, %v1805_v58, 0  ;;  %vm1593_vm11 = vcmask 31744   ;;  %vm1626_vm12 = vcmask 39936  }
  0x4d   :  { %s7691_s20 = smov 6   ;;  %7328 = vmatpush3.bf16.msra.mxu0 %v1864_v62  ;;  %s7692_s2 = smov 7   ;;  %vm1659_vm13 = vcmask 48128   ;;  %vm1692_vm14 = vcmask 56320   ;;  %vm1813_vm15 = vcmask 64512  }
  0x4e   :  { %vm240_vm0 = vcmp.lt.s32.totalorder %v7861_v1, 2  ;;  %vm305_vm1 = vcmp.lt.s32.totalorder %v7861_v1, 1  ;;  %vm370_vm2 = vcmp.lt.s32.totalorder %v7861_v1, 7  ;;  %vm175_vm3 = vcmp.lt.s32.totalorder %v7861_v1, 3  ;;  %s7696_s22 = smov 80   ;;  %s7697_s17 = smov 100  }
  0x4f   :  { %vm435_vm4 = vcmp.lt.s32.totalorder %v7861_v1, 6  ;;  %vm500_vm5 = vcmp.lt.s32.totalorder %v7861_v1, 5  ;;  %vm565_vm7 = vcmp.lt.s32.totalorder %v7861_v1, 4  ;;  %s7698_s28 = smov 30   ;;  %s7701_s6 = smov 120   ;;  %v6613_v1 = vld [vmem:[%s14912_s5 + $0xa0] sm:$0xff] }
  0x50   :  { %v7866_v2 = vld [vmem:[%s15037_s1 + $0x8] sm:$0xff]  ;;  %v7871_v3 = vld [vmem:[%s15037_s1 + $0x10] sm:$0xff]  ;;  %v7877_v4 = vld [vmem:[%s15037_s1] sm:$0xff] }
  0x51   :  { %v209_v5 = vrot.slane %v7866_v2, 6  ;;  %v210_v6 = vrot.slane %v7871_v3, 6  ;;  %v7884_v7 = vld [vmem:[%s15037_s1 + $0xf8] sm:$0xff]  ;;  %v208_v8 = vrot.slane %v7877_v4, 6  ;;  %v273_v15 = vrot.slane %v7877_v4, 7  ;;  %v7943_v28 = vld [vmem:[%s15037_s1 + $0x20] sm:$0xff] }
  0x52   :  { %v7890_v9 = vld [vmem:[%s15037_s1 + $0x18] sm:$0xff]  ;;  %v239_v10 = vrot.slane %v7884_v7, 6  ;;  %v274_v16 = vrot.slane %v7866_v2, 7  ;;  %v304_v18 = vrot.slane %v7884_v7, 7  ;;  %v275_v20 = vrot.slane %v7871_v3, 7 }
  0x53   :  { %v211_v11 = vrot.slane %v7890_v9, 6  ;;  %v270_v12 = vsel %vm240_vm0, %v209_v5, %v210_v6  ;;  %v271_v17 = vsel %vm240_vm0, %v208_v8, %v209_v5  ;;  %v276_v21 = vrot.slane %v7890_v9, 7 }
  0x54   :  { %634 = vrot.lane.b32.xlu1 %v270_v12, %s7686_s21  ;;  %v272_v13 = vsel %vm240_vm0, %v239_v10, %v208_v8  ;;  %v336_v19 = vsel %vm305_vm1, %v273_v15, %v274_v16  ;;  %v337_v22 = vsel %vm305_vm1, %v304_v18, %v273_v15  ;;  %v335_v24 = vsel %vm305_vm1, %v274_v16, %v275_v20  ;;  %v8052_v8 = vld [vmem:[%s15037_s1 + $0x28] sm:$0xff]  ;;  %v8067_v16 = vld [vmem:[%s15037_s1 + $0x30] sm:$0xff] }
  0x55   :  { %630 = vrot.lane.b32.xlu0 %v272_v13, %s7686_s21  ;;  %v269_v14 = vsel %vm240_vm0, %v210_v6, %v211_v11  ;;  %v334_v23 = vsel %vm305_vm1, %v275_v20, %v276_v21  ;;  %v339_v25 = vrot.slane %v7866_v2, 1  ;;  %v340_v26 = vrot.slane %v7871_v3, 1 }
  0x56   :  { %v338_v27 = vrot.slane %v7877_v4, 1  ;;  %v341_v30 = vrot.slane %v7890_v9, 1  ;;  %v342_v31 = vrot.slane %v7943_v28, 1  ;;  %v143_v33 = vrot.slane %v7871_v3, 5 }
  0x57   :  { %v400_v29 = vsel %vm370_vm2, %v339_v25, %v340_v26  ;;  %v142_v34 = vrot.slane %v7866_v2, 5  ;;  %v141_v35 = vrot.slane %v7877_v4, 5  ;;  %v404_v36 = vrot.slane %v7866_v2, 2 }
  0x58   :  { %636 = vrot.lane.b32.xlu1 %v269_v14, %s7686_s21  ;;  %v401_v32 = vsel %vm370_vm2, %v338_v27, %v339_v25  ;;  %v405_v37 = vrot.slane %v7871_v3, 2  ;;  %v398_v38 = vsel %vm370_vm2, %v341_v30, %v342_v31  ;;  %v144_v40 = vrot.slane %v7890_v9, 5 }
  0x59   :  { %632 = vrot.lane.b32.xlu0 %v271_v17, %s7686_s21  ;;  %v7971_v39 = vsel %vm175_vm3, %v142_v34, %v143_v33  ;;  %v7978_v41 = vsel %vm175_vm3, %v141_v35, %v142_v34  ;;  %v399_v42 = vsel %vm370_vm2, %v340_v26, %v341_v30  ;;  %v14928_v43 = vrot.slane %v7877_v4, 2  ;;  %v8072_v17 = vld [vmem:[%s15037_s1 + $0x38] sm:$0xff] }
  0x5a   :  { %v7988_v44 = vsel %vm175_vm3, %v143_v33, %v144_v40  ;;  %v465_v45 = vsel %vm435_vm4, %v404_v36, %v405_v37  ;;  %v406_v46 = vrot.slane %v7890_v9, 2  ;;  %v407_v47 = vrot.slane %v7943_v28, 2 }
  0x5b   :  { %v466_v48 = vsel %vm435_vm4, %v14928_v43, %v404_v36  ;;  %v469_v50 = vrot.slane %v7866_v2, 3  ;;  %v470_v51 = vrot.slane %v7871_v3, 3  ;;  %v14927_v53 = vrot.slane %v7877_v4, 3 }
  0x5c   :  { %760 = vrot.lane.b32.xlu1 %v336_v19, %s7687_s25  ;;  %v463_v49 = vsel %vm435_vm4, %v406_v46, %v407_v47  ;;  %v464_v52 = vsel %vm435_vm4, %v405_v37, %v406_v46  ;;  %v471_v55 = vrot.slane %v7890_v9, 3  ;;  %v472_v56 = vrot.slane %v7943_v28, 3 }
  0x5d   :  { %758 = vrot.lane.b32.xlu0 %v337_v22, %s7687_s25  ;;  %v530_v54 = vsel %vm500_vm5, %v469_v50, %v470_v51  ;;  %v531_v57 = vsel %vm500_vm5, %v14927_v53, %v469_v50  ;;  %v534_v60 = vrot.slane %v7866_v2, 4  ;;  %v535_v61 = vrot.slane %v7871_v3, 4 }
  0x5e   :  { %v528_v59 = vsel %vm500_vm5, %v471_v55, %v472_v56  ;;  %v529_v63 = vsel %vm500_vm5, %v470_v51, %v471_v55  ;;  %v14926_v0 = vrot.slane %v7877_v4, 4  ;;  %v537_v5 = vrot.slane %v7943_v28, 4 }
  0x5f   :  { %v212_v13 = vrot.slane %v7943_v28, 6  ;;  %v213_v14 = vrot.slane %v8052_v8, 6  ;;  %v214_v20 = vrot.slane %v8067_v16, 6  ;;  %v215_v22 = vrot.slane %v8072_v17, 6 }
  0x60   :  { %764 = vrot.lane.b32.xlu1 %v334_v23, %s7687_s25  ;;  %v596_v6 = vsel %vm565_vm7, %v14926_v0, %v534_v60  ;;  %v277_v25 = vrot.slane %v7943_v28, 7  ;;  %v278_v26 = vrot.slane %v8052_v8, 7  ;;  %v279_v30 = vrot.slane %v8067_v16, 7 }
  0x61   :  { %762 = vrot.lane.b32.xlu0 %v335_v24, %s7687_s25  ;;  %v267_v19 = vsel %vm240_vm0, %v212_v13, %v213_v14  ;;  %v268_v23 = vsel %vm240_vm0, %v211_v11, %v212_v13  ;;  %v265_v24 = vsel %vm240_vm0, %v214_v20, %v215_v22  ;;  %v344_v37 = vrot.slane %v8067_v16, 1 }
  0x62   :  { %v332_v11 = vsel %vm305_vm1, %v277_v25, %v278_v26  ;;  %v333_v33 = vsel %vm305_vm1, %v276_v21, %v277_v25  ;;  %v331_v36 = vsel %vm305_vm1, %v278_v26, %v279_v30  ;;  %v343_v21 = vrot.slane %v8052_v8, 1  ;;  %v8215_v26 = vld [vmem:[%s15037_s1 + $0x50] sm:$0xff] }
  0x63   :  { %v408_v50 = vrot.slane %v8052_v8, 2  ;;  %v409_v51 = vrot.slane %v8067_v16, 2  ;;  %v475_v62 = vrot.slane %v8072_v17, 3 }
  0x64   :  { %888 = vrot.lane.b32.xlu1 %v7866_v2, %s7688_s26  ;;  %v595_v2 = vsel %vm565_vm7, %v534_v60, %v535_v61  ;;  %v474_v60 = vrot.slane %v8067_v16, 3 }
  0x65   :  { %886 = vrot.lane.b32.xlu0 %v7877_v4, %s7688_s26 }
  0x66   :  { %v525_v13 = vsel %vm500_vm5, %v474_v60, %v475_v62 }
  0x68   :  { %892 = vrot.lane.b32.xlu1 %v7890_v9, %s7688_s26 }
  0x69   :  { %890 = vrot.lane.b32.xlu0 %v7871_v3, %s7688_s26  ;;  %v536_v3 = vrot.slane %v7890_v9, 4 }
  0x6b   :  { %v593_v12 = vsel %vm565_vm7, %v536_v3, %v537_v5  ;;  %v594_v15 = vsel %vm565_vm7, %v535_v61, %v536_v3 }
  0x6c   :  { %1016 = vrot.lane.b32.xlu1 %v400_v29, %s7689_s29  ;;  %v266_v29 = vsel %vm240_vm0, %v213_v14, %v214_v20  ;;  %v540_v14 = vrot.slane %v8072_v17, 4  ;;  %v8200_v20 = vld [vmem:[%s15037_s1 + $0x48] sm:$0xff] }
  0x6d   :  { %1014 = vrot.lane.b32.xlu0 %v401_v32, %s7689_s29  ;;  %v280_v32 = vrot.slane %v8072_v17, 7  ;;  %v217_v25 = vrot.slane %v8200_v20, 6 }
  0x6f   :  { %v330_v34 = vsel %vm305_vm1, %v279_v30, %v280_v32  ;;  %v218_v30 = vrot.slane %v8215_v26, 6 }
  0x70   :  { %1020 = vrot.lane.b32.xlu1 %v398_v38, %s7689_s29  ;;  %v8123_v38 = vld [vmem:[%s15037_s1 + $0x40] sm:$0xff] }
  0x71   :  { %1018 = vrot.lane.b32.xlu0 %v399_v42, %s7689_s29  ;;  %v396_v42 = vsel %vm370_vm2, %v343_v21, %v344_v37  ;;  %v346_v46 = vrot.slane %v8123_v38, 1  ;;  %v411_v55 = vrot.slane %v8123_v38, 2 }
  0x74   :  { %1144 = vrot.lane.b32.xlu1 %v465_v45, %s7690_s3  ;;  %v345_v45 = vrot.slane %v8072_v17, 1 }
  0x75   :  { %1142 = vrot.lane.b32.xlu0 %v466_v48, %s7690_s3  ;;  %v397_v48 = vsel %vm370_vm2, %v342_v31, %v343_v21  ;;  %v461_v31 = vsel %vm435_vm4, %v408_v50, %v409_v51  ;;  %v281_v21 = vrot.slane %v8123_v38, 7 }
  0x78   :  { %1148 = vrot.lane.b32.xlu1 %v463_v49, %s7690_s3  ;;  %v394_v49 = vsel %vm370_vm2, %v345_v45, %v346_v46 }
  0x79   :  { %1146 = vrot.lane.b32.xlu0 %v464_v52, %s7690_s3  ;;  %v395_v52 = vsel %vm370_vm2, %v344_v37, %v345_v45  ;;  %v282_v37 = vrot.slane %v8200_v20, 7  ;;  %v262_v45 = vsel %vm240_vm0, %v217_v25, %v218_v30 }
  0x7c   :  { %1272 = vrot.lane.b32.xlu1 %v530_v54, %s7691_s20  ;;  %v410_v54 = vrot.slane %v8072_v17, 2 }
  0x7d   :  { %1270 = vrot.lane.b32.xlu0 %v531_v57, %s7691_s20  ;;  %v462_v57 = vsel %vm435_vm4, %v407_v47, %v408_v50 }
  0x7e   :  { %v459_v58 = vsel %vm435_vm4, %v410_v54, %v411_v55  ;;  %v460_v61 = vsel %vm435_vm4, %v409_v51, %v410_v54 }
  0x80   :  { %1276 = vrot.lane.b32.xlu1 %v528_v59, %s7691_s20  ;;  %v473_v59 = vrot.slane %v8052_v8, 3 }
  0x81   :  { %1274 = vrot.lane.b32.xlu0 %v529_v63, %s7691_s20  ;;  %v476_v63 = vrot.slane %v8123_v38, 3 }
  0x82   :  { %v526_v47 = vsel %vm500_vm5, %v473_v59, %v474_v60 }
  0x83   :  { %v524_v3 = vsel %vm500_vm5, %v475_v62, %v476_v63 }
  0x84   :  { %1400 = vrot.lane.b32.xlu1 %v595_v2, %s7692_s2  ;;  %v527_v2 = vsel %vm500_vm5, %v472_v56, %v473_v59 }
  0x85   :  { %1398 = vrot.lane.b32.xlu0 %v596_v6, %s7692_s2  ;;  %v538_v6 = vrot.slane %v8052_v8, 4 }
  0x88   :  { %1404 = vrot.lane.b32.xlu1 %v593_v12, %s7692_s2  ;;  %v539_v12 = vrot.slane %v8067_v16, 4 }
  0x89   :  { %1402 = vrot.lane.b32.xlu0 %v594_v15, %s7692_s2  ;;  %v541_v15 = vrot.slane %v8123_v38, 4 }
  0x8a   :  { %v591_v56 = vsel %vm565_vm7, %v538_v6, %v539_v12 }
  0x8c   :  { %640 = vrot.lane.b32.xlu1 %v267_v19, %s7686_s21  ;;  %v592_v19 = vsel %vm565_vm7, %v537_v5, %v538_v6  ;;  %v590_v5 = vsel %vm565_vm7, %v539_v12, %v540_v14 }
  0x8d   :  { %638 = vrot.lane.b32.xlu0 %v268_v23, %s7686_s21  ;;  %v589_v23 = vsel %vm565_vm7, %v540_v14, %v541_v15 }
  0x90   :  { %644 = vrot.lane.b32.xlu1 %v265_v24, %s7686_s21  ;;  %v216_v24 = vrot.slane %v8123_v38, 6 }
  0x91   :  { %642 = vrot.lane.b32.xlu0 %v266_v29, %s7686_s21  ;;  %v8220_v29 = vld [vmem:[%s15037_s1 + $0x58] sm:$0xff] }
  0x92   :  { %v284_v50 = vrot.slane %v8220_v29, 7  ;;  %v349_v12 = vrot.slane %v8220_v29, 1 }
  0x94   :  { %768 = vrot.lane.b32.xlu1 %v332_v11, %s7687_s25  ;;  %v263_v11 = vsel %vm240_vm0, %v216_v24, %v217_v25  ;;  %v413_v25 = vrot.slane %v8215_v26, 2 }
  0x95   :  { %766 = vrot.lane.b32.xlu0 %v333_v33, %s7687_s25  ;;  %v219_v33 = vrot.slane %v8220_v29, 6 }
  0x98   :  { %772 = vrot.lane.b32.xlu1 %v330_v34, %s7687_s25  ;;  %v264_v34 = vsel %vm240_vm0, %v215_v22, %v216_v24  ;;  %v328_v22 = vsel %vm305_vm1, %v281_v21, %v282_v37  ;;  %v412_v24 = vrot.slane %v8200_v20, 2 }
  0x99   :  { %770 = vrot.lane.b32.xlu0 %v331_v36, %s7687_s25  ;;  %v261_v36 = vsel %vm240_vm0, %v218_v30, %v219_v33 }
  0x9a   :  { %v457_v30 = vsel %vm435_vm4, %v412_v24, %v413_v25 }
  0x9c   :  { %896 = vrot.lane.b32.xlu1 %v8052_v8, %s7688_s26 }
  0x9d   :  { %894 = vrot.lane.b32.xlu0 %v7943_v28, %s7688_s26 }
  0xa0   :  { %900 = vrot.lane.b32.xlu1 %v8072_v17, %s7688_s26 }
  0xa1   :  { %898 = vrot.lane.b32.xlu0 %v8067_v16, %s7688_s26 }
  0xa4   :  { %1024 = vrot.lane.b32.xlu1 %v396_v42, %s7689_s29 }
  0xa5   :  { %1022 = vrot.lane.b32.xlu0 %v397_v48, %s7689_s29 }
  0xa8   :  { %1028 = vrot.lane.b32.xlu1 %v394_v49, %s7689_s29  ;;  %v283_v49 = vrot.slane %v8215_v26, 7 }
  0xa9   :  { %1026 = vrot.lane.b32.xlu0 %v395_v52, %s7689_s29  ;;  %v329_v52 = vsel %vm305_vm1, %v280_v32, %v281_v21 }
  0xaa   :  { %v326_v54 = vsel %vm305_vm1, %v283_v49, %v284_v50 }
  0xac   :  { %1152 = vrot.lane.b32.xlu1 %v461_v31, %s7690_s3 }
  0xad   :  { %1150 = vrot.lane.b32.xlu0 %v462_v57, %s7690_s3 }
  0xb0   :  { %1156 = vrot.lane.b32.xlu1 %v459_v58, %s7690_s3  ;;  %v327_v58 = vsel %vm305_vm1, %v282_v37, %v283_v49  ;;  %v458_v37 = vsel %vm435_vm4, %v411_v55, %v412_v24  ;;  %v477_v49 = vrot.slane %v8200_v20, 3 }
  0xb1   :  { %1154 = vrot.lane.b32.xlu0 %v460_v61, %s7690_s3  ;;  %v347_v61 = vrot.slane %v8200_v20, 1 }
  0xb3   :  { %v393_v14 = vsel %vm370_vm2, %v346_v46, %v347_v61 }
  0xb4   :  { %1280 = vrot.lane.b32.xlu1 %v526_v47, %s7691_s20  ;;  %v348_v47 = vrot.slane %v8215_v26, 1 }
  0xb5   :  { %1278 = vrot.lane.b32.xlu0 %v527_v2, %s7691_s20  ;;  %v8289_v2 = vld [vmem:[%s15037_s1 + $0x60] sm:$0xff] }
  0xb6   :  { %v392_v6 = vsel %vm370_vm2, %v347_v61, %v348_v47  ;;  %v391_v46 = vsel %vm370_vm2, %v348_v47, %v349_v12  ;;  %v479_v47 = vrot.slane %v8220_v29, 3 }
  0xb8   :  { %1284 = vrot.lane.b32.xlu1 %v524_v3, %s7691_s20 }
  0xb9   :  { %1282 = vrot.lane.b32.xlu0 %v525_v13, %s7691_s20  ;;  %v350_v13 = vrot.slane %v8289_v2, 1 }
  0xbc   :  { %1408 = vrot.lane.b32.xlu1 %v591_v56, %s7692_s2 }
  0xbd   :  { %1406 = vrot.lane.b32.xlu0 %v592_v19, %s7692_s2 }
  0xc0   :  { %1412 = vrot.lane.b32.xlu1 %v589_v23, %s7692_s2  ;;  %v390_v23 = vsel %vm370_vm2, %v349_v12, %v350_v13 }
  0xc1   :  { %1410 = vrot.lane.b32.xlu0 %v590_v5, %s7692_s2 }
  0xc4   :  { %648 = vrot.lane.b32.xlu1 %v263_v11, %s7686_s21 }
  0xc5   :  { %646 = vrot.lane.b32.xlu0 %v264_v34, %s7686_s21  ;;  %v414_v34 = vrot.slane %v8220_v29, 2 }
  0xc6   :  { %v8240_v42 = vpop.permute.xlu1 %634 }
  0xc7   :  { %v8244_v48 = vpop.permute.xlu0 %630 }
  0xc8   :  { %652 = vrot.lane.b32.xlu1 %v261_v36, %s7686_s21  ;;  %v415_v36 = vrot.slane %v8289_v2, 2 }
  0xc9   :  { %650 = vrot.lane.b32.xlu0 %v262_v45, %s7686_s21 }
  0xca   :  { %v8252_v51 = vpop.permute.xlu1 %636 }
  0xcb   :  { %v8258_v31 = vpop.permute.xlu0 %632 }
  0xcc   :  { %776 = vrot.lane.b32.xlu1 %v328_v22, %s7687_s25  ;;  %v455_v22 = vsel %vm435_vm4, %v414_v34, %v415_v36 }
  0xcd   :  { %774 = vrot.lane.b32.xlu0 %v329_v52, %s7687_s25  ;;  %v478_v52 = vrot.slane %v8215_v26, 3 }
  0xce   :  { %v8266_v57 = vpop.permute.xlu1 %760 }
  0xcf   :  { %v8270_v59 = vpop.permute.xlu0 %758  ;;  %v522_v61 = vsel %vm500_vm5, %v477_v49, %v478_v52 }
  0xd0   :  { %780 = vrot.lane.b32.xlu1 %v326_v54, %s7687_s25 }
  0xd1   :  { %778 = vrot.lane.b32.xlu0 %v327_v58, %s7687_s25  ;;  %v456_v58 = vsel %vm435_vm4, %v413_v25, %v414_v34 }
  0xd2   :  { %v8274_v32 = vpop.permute.xlu1 %764 }
  0xd3   :  { %v8276_v60 = vpop.permute.xlu0 %762 }
  0xd4   :  { %904 = vrot.lane.b32.xlu1 %v8200_v20, %s7688_s26 }
  0xd5   :  { %902 = vrot.lane.b32.xlu0 %v8123_v38, %s7688_s26 }
  0xd6   :  { %v8284_v62 = vpop.permute.xlu1 %888 }
  0xd7   :  { %v8291_v3 = vpop.permute.xlu0 %886 }
  0xd8   :  { %908 = vrot.lane.b32.xlu1 %v8220_v29, %s7688_s26 }
  0xd9   :  { %906 = vrot.lane.b32.xlu0 %v8215_v26, %s7688_s26 }
  0xda   :  { %v8301_v56 = vpop.permute.xlu1 %892 }
  0xdb   :  { %v8307_v19 = vpop.permute.xlu0 %890 }
  0xdc   :  { %1032 = vrot.lane.b32.xlu1 %v392_v6, %s7689_s29  ;;  %v480_v6 = vrot.slane %v8289_v2, 3 }
  0xdd   :  { %1030 = vrot.lane.b32.xlu0 %v393_v14, %s7689_s29  ;;  %v523_v14 = vsel %vm500_vm5, %v476_v63, %v477_v49  ;;  %v8373_v63 = vld [vmem:[%s15037_s1 + $0x68] sm:$0xff] }
  0xde   :  { %v8317_v5 = vpop.permute.xlu1 %1016  ;;  %v520_v25 = vsel %vm500_vm5, %v479_v47, %v480_v6 }
  0xdf   :  { %v8321_v11 = vpop.permute.xlu0 %1014 }
  0xe0   :  { %1036 = vrot.lane.b32.xlu1 %v390_v23, %s7689_s29  ;;  %v14925_v23 = vrot.slane %v7884_v7, 5 }
  0xe1   :  { %1034 = vrot.lane.b32.xlu0 %v391_v46, %s7689_s29  ;;  %v542_v46 = vrot.slane %v8200_v20, 4 }
  0xe2   :  { %v8329_v21 = vpop.permute.xlu1 %1020 }
  0xe3   :  { %v8335_v45 = vpop.permute.xlu0 %1018 }
  0xe4   :  { %1160 = vrot.lane.b32.xlu1 %v457_v30, %s7690_s3  ;;  %v543_v30 = vrot.slane %v8215_v26, 4 }
  0xe5   :  { %1158 = vrot.lane.b32.xlu0 %v458_v37, %s7690_s3  ;;  %v521_v37 = vsel %vm500_vm5, %v478_v52, %v479_v47  ;;  %v221_v52 = vrot.slane %v8373_v63, 6  ;;  %v1496_v47 = vsel %vm1494_vm8, %v7978_v41, %v8258_v31  ;;  %v588_v41 = vsel %vm565_vm7, %v541_v15, %v542_v46  ;;  %v8405_v31 = vld [vmem:[%s15037_s1 + $0x70] sm:$0xff] }
  0xe6   :  { %v1145_v54 = vpop.permute.xlu1 %1144 }
  0xe7   :  { %v1143_v55 = vpop.permute.xlu0 %1142 }
  0xe8   :  { %1164 = vrot.lane.b32.xlu1 %v455_v22, %s7690_s3  ;;  %v207_v22 = vsel %vm175_vm3, %v14925_v23, %v141_v35  ;;  %v587_v35 = vsel %vm565_vm7, %v542_v46, %v543_v30 }
  0xe9   :  { %1162 = vrot.lane.b32.xlu0 %v456_v58, %s7690_s3  ;;  %v544_v58 = vrot.slane %v8220_v29, 4  ;;  %v1495_v23 = vsel %vm1494_vm8, %v207_v22, %v8244_v48 }
  0xea   :  { %v8353_v12 = vpop.permute.xlu1 %1148 }
  0xeb   :  { %v8360_v24 = vpop.permute.xlu0 %1146 }
  0xec   :  { %1288 = vrot.lane.b32.xlu1 %v522_v61, %s7691_s20  ;;  %v545_v61 = vrot.slane %v8289_v2, 4 }
  0xed   :  { %1286 = vrot.lane.b32.xlu0 %v523_v14, %s7691_s20  ;;  %v220_v14 = vrot.slane %v8289_v2, 6 }
  0xee   :  { %v1273_v34 = vpop.permute.xlu1 %1272 }
  0xef   :  { %v1271_v49 = vpop.permute.xlu0 %1270 }
  0xf0   :  { %1292 = vrot.lane.b32.xlu1 %v520_v25, %s7691_s20  ;;  %v1529_v25 = vsel %vm1527_vm9, %v1496_v47, %v8266_v57  ;;  %v585_v57 = vsel %vm565_vm7, %v544_v58, %v545_v61 }
  0xf1   :  { %1290 = vrot.lane.b32.xlu0 %v521_v37, %s7691_s20  ;;  %v1528_v37 = vsel %vm1527_vm9, %v1495_v23, %v8270_v59  ;;  %v1562_v48 = vsel %vm1560_vm10, %v1529_v25, %v8284_v62  ;;  %v586_v59 = vsel %vm565_vm7, %v543_v30, %v544_v58  ;;  %v259_v62 = vsel %vm240_vm0, %v220_v14, %v221_v52 }
  0xf2   :  { %v1277_v0 = vpop.permute.xlu1 %1276  ;;  %v1561_v15 = vsel %vm1560_vm10, %v1528_v37, %v8291_v3  ;;  %v1595_v46 = vsel %vm1593_vm11, %v1562_v48, %v8317_v5  ;;  %v1498_v23 = vsel %vm1494_vm8, %v7988_v44, %v8252_v51  ;;  %v1726_v5 = vld [vmem:[#allocation2 + $0x8] sm:$0xff]  ;;  %v1497_v30 = vsel %vm1494_vm8, %v7971_v39, %v8240_v42 }
  0xf3   :  { %v1275_v22 = vpop.permute.xlu0 %1274  ;;  %v1594_v3 = vsel %vm1593_vm11, %v1561_v15, %v8321_v11  ;;  %v1628_v47 = vsel %vm1626_vm12, %v1595_v46, %v1145_v54  ;;  %v1531_v58 = vsel %vm1527_vm9, %v1498_v23, %v8274_v32  ;;  %v1725_v11 = vld [vmem:[#allocation2] sm:$0xff]  ;;  %v8444_v54 = vld [vmem:[%s15037_s1 + $0x78] sm:$0xff] }
  0xf4   :  { %1416 = vrot.lane.b32.xlu1 %v587_v35, %s7692_s2  ;;  %v222_v35 = vrot.slane %v8405_v31, 6  ;;  %v1627_v25 = vsel %vm1626_vm12, %v1594_v3, %v1143_v55  ;;  %v1661_v44 = vsel %vm1659_vm13, %v1628_v47, %v1273_v34  ;;  %v1564_v39 = vsel %vm1560_vm10, %v1531_v58, %v8301_v56  ;;  %v1728_v46 = vld [vmem:[#allocation2 + $0x18] sm:$0xff]  ;;  %v1727_v47 = vld [vmem:[#allocation2 + $0x10] sm:$0xff] }
  0xf5   :  { %1414 = vrot.lane.b32.xlu0 %v588_v41, %s7692_s2  ;;  %v1530_v41 = vsel %vm1527_vm9, %v1497_v30, %v8276_v60  ;;  %v1660_v42 = vsel %vm1659_vm13, %v1627_v25, %v1271_v49  ;;  %v1597_v37 = vsel %vm1593_vm11, %v1564_v39, %v8329_v21 }
  0xf6   :  { %v1401_v51 = vpop.permute.xlu1 %1400  ;;  %v1563_v34 = vsel %vm1560_vm10, %v1530_v41, %v8307_v19  ;;  %v1630_v56 = vsel %vm1626_vm12, %v1597_v37, %v8353_v12  ;;  %v223_v19 = vrot.slane %v8444_v54, 6  ;;  %v288_v41 = vrot.slane %v8444_v54, 7 }
  0xf7   :  { %v1694_v32 = vsel %vm1692_vm14, %v1661_v44, %v1401_v51  ;;  %v1399_v55 = vpop.permute.xlu0 %1398  ;;  %v1596_v60 = vsel %vm1593_vm11, %v1563_v34, %v8335_v45  ;;  %v1663_v23 = vsel %vm1659_vm13, %v1630_v56, %v1277_v0  ;;  %v260_v45 = vsel %vm240_vm0, %v219_v33, %v220_v14  ;;  %v8535_v56 = vld [vmem:[%s15037_s1 + $0x80] sm:$0xff] }
  0xf8   :  { %v1758_v48 = vmul.f32 %v1726_v5, %v1694_v32  ;;  %v1693_v15 = vsel %vm1692_vm14, %v1660_v42, %v1399_v55  ;;  %1420 = vrot.lane.b32.xlu1 %v585_v57, %s7692_s2  ;;  %v1629_v21 = vsel %vm1626_vm12, %v1596_v60, %v8360_v24  ;;  %v257_v33 = vsel %vm240_vm0, %v222_v35, %v223_v19 }
  0xf9   :  { %v1757_v49 = vmul.f32 %v1725_v11, %v1693_v15  ;;  %1418 = vrot.lane.b32.xlu0 %v586_v59, %s7692_s2  ;;  %v1662_v12 = vsel %vm1659_vm13, %v1629_v21, %v1275_v22  ;;  %v285_v24 = vrot.slane %v8289_v2, 7  ;;  %v286_v14 = vrot.slane %v8373_v63, 7 }
  0xfa   :  { %v1405_v3 = vpop.permute.xlu1 %1404  ;;  %v287_v11 = vrot.slane %v8405_v31, 7  ;;  %v352_v15 = vrot.slane %v8405_v31, 1  ;;  %v353_v21 = vrot.slane %v8444_v54, 1 }
  0xfb   :  { %v1696_v57 = vsel %vm1692_vm14, %v1663_v23, %v1405_v3  ;;  %v1403_v59 = vpop.permute.xlu0 %1402  ;;  %v1789_v5 = vpack.c.bf16 %v1758_v48, %v1757_v49  ;;  %v324_v51 = vsel %vm305_vm1, %v285_v24, %v286_v14  ;;  %v351_v48 = vrot.slane %v8373_v63, 1 }
  0xfc   :  { %v1760_v30 = vmul.f32 %v1728_v46, %v1696_v57  ;;  %v1695_v58 = vsel %vm1692_vm14, %v1662_v12, %v1403_v59  ;;  %656 = vrot.lane.b32.xlu1 %v259_v62, %s7686_s21  ;;  %v258_v62 = vsel %vm240_vm0, %v221_v52, %v222_v35  ;;  %v325_v52 = vsel %vm305_vm1, %v284_v50, %v285_v24 }
  0xfd   :  { %v1759_v0 = vmul.f32 %v1727_v47, %v1695_v58  ;;  %654 = vrot.lane.b32.xlu0 %v260_v45, %s7686_s21  ;;  %7329 = vmatprep.mubr.msk.bf16.mxu0 %vm1813_vm15, %v1789_v5  ;;  %v322_v42 = vsel %vm305_vm1, %v287_v11, %v288_v41  ;;  %v323_v55 = vsel %vm305_vm1, %v286_v14, %v287_v11  ;;  %v354_v23 = vrot.slane %v8535_v56, 1 }
  0xfe   :  { %v8483_v22 = vpop.permute.xlu1 %640  ;;  %v388_v46 = vsel %vm370_vm2, %v351_v48, %v352_v15  ;;  %v389_v47 = vsel %vm370_vm2, %v350_v13, %v351_v48  ;;  %v416_v57 = vrot.slane %v8373_v63, 2  ;;  %v417_v59 = vrot.slane %v8405_v31, 2 }
  0xff   :  { %v1790_v25 = vpack.c.bf16 %v1760_v30, %v1759_v0  ;;  %v8489_v44 = vpop.permute.xlu0 %638  ;;  %v386_v12 = vsel %vm370_vm2, %v353_v21, %v354_v23  ;;  %v387_v13 = vsel %vm370_vm2, %v352_v15, %v353_v21  ;;  %v418_v0 = vrot.slane %v8444_v54, 2 }
 0x100   :  { %660 = vrot.lane.b32.xlu1 %v257_v33, %s7686_s21  ;;  %v453_v58 = vsel %vm435_vm4, %v416_v57, %v417_v59  ;;  %v419_v33 = vrot.slane %v8535_v56, 2  ;;  %v454_v14 = vsel %vm435_vm4, %v415_v36, %v416_v57  ;;  %v482_v11 = vrot.slane %v8405_v31, 3 }
 0x101   :  { %658 = vrot.lane.b32.xlu0 %v258_v62, %s7686_s21  ;;  %7330 = vmatmul.mubr.msk.bf16.vlgmr.msra.gmra.mrb[0].mxu0 %vm1813_vm15, %v1790_v25  ;;  %v483_v48 = vrot.slane %v8444_v54, 3  ;;  %v484_v15 = vrot.slane %v8535_v56, 3  ;;  %v146_v21 = vrot.slane %v8052_v8, 5  ;;  %v546_v8 = vrot.slane %v8373_v63, 4 }
 0x102   :  { %v8498_v39 = vpop.permute.xlu1 %644  ;;  %v451_v25 = vsel %vm435_vm4, %v418_v0, %v419_v33 }
 0x103   :  { %v8504_v35 = vpop.permute.xlu0 %642 }
 0x104   :  { %784 = vrot.lane.b32.xlu1 %v324_v51, %s7687_s25  ;;  %v481_v51 = vrot.slane %v8373_v63, 3 }
 0x105   :  { %782 = vrot.lane.b32.xlu0 %v325_v52, %s7687_s25 }
 0x106   :  { %v8512_v32 = vpop.permute.xlu1 %768 }
 0x107   :  { %v8516_v34 = vpop.permute.xlu0 %766 }
 0x108   :  { %788 = vrot.lane.b32.xlu1 %v322_v42, %s7687_s25  ;;  %v452_v42 = vsel %vm435_vm4, %v417_v59, %v418_v0  ;;  %v547_v59 = vrot.slane %v8405_v31, 4  ;;  %v148_v0 = vrot.slane %v8072_v17, 5 }
 0x109   :  { %786 = vrot.lane.b32.xlu0 %v323_v55, %s7687_s25  ;;  %v518_v55 = vsel %vm500_vm5, %v481_v51, %v482_v11 }
 0x10a   :  { %v8520_v50 = vpop.permute.xlu1 %772  ;;  %v583_v9 = vsel %vm565_vm7, %v546_v8, %v547_v59 }
 0x10b   :  { %v8522_v37 = vpop.permute.xlu0 %770 }
 0x10c   :  { %912 = vrot.lane.b32.xlu1 %v8373_v63, %s7688_s26 }
 0x10d   :  { %910 = vrot.lane.b32.xlu0 %v8289_v2, %s7688_s26 }
 0x10e   :  { %v8530_v60 = vpop.permute.xlu1 %896 }
 0x10f   :  { %v8537_v49 = vpop.permute.xlu0 %894 }
 0x110   :  { %916 = vrot.lane.b32.xlu1 %v8444_v54, %s7688_s26 }
 0x111   :  { %914 = vrot.lane.b32.xlu0 %v8405_v31, %s7688_s26 }
 0x112   :  { %v8547_v3 = vpop.permute.xlu1 %900 }
 0x113   :  { %v8553_v45 = vpop.permute.xlu0 %898 }
 0x114   :  { %1040 = vrot.lane.b32.xlu1 %v388_v46, %s7689_s29  ;;  %v145_v46 = vrot.slane %v7943_v28, 5  ;;  %v516_v28 = vsel %vm500_vm5, %v483_v48, %v484_v15 }
 0x115   :  { %1038 = vrot.lane.b32.xlu0 %v389_v47, %s7689_s29 }
 0x116   :  { %v8563_v5 = vpop.permute.xlu1 %1024 }
 0x117   :  { %v8567_v30 = vpop.permute.xlu0 %1022 }
 0x118   :  { %1044 = vrot.lane.b32.xlu1 %v386_v12, %s7689_s29  ;;  %v519_v12 = vsel %vm500_vm5, %v480_v6, %v481_v51  ;;  %v202_v6 = vsel %vm175_vm3, %v145_v46, %v146_v21  ;;  %v203_v51 = vsel %vm175_vm3, %v144_v40, %v145_v46 }
 0x119   :  { %1042 = vrot.lane.b32.xlu0 %v387_v13, %s7689_s29  ;;  %v8620_v13 = vld [vmem:[%s15037_s1 + $0x88] sm:$0xff]  ;;  %v1500_v43 = vsel %vm1494_vm8, %v202_v6, %v8483_v22  ;;  %v1499_v40 = vsel %vm1494_vm8, %v203_v51, %v8489_v44  ;;  %v584_v22 = vsel %vm565_vm7, %v545_v61, %v546_v8 }
 0x11a   :  { %v8575_v24 = vpop.permute.xlu1 %1028  ;;  %v225_v53 = vrot.slane %v8620_v13, 6  ;;  %v1532_v6 = vsel %vm1527_vm9, %v1499_v40, %v8516_v34 }
 0x11b   :  { %v8581_v62 = vpop.permute.xlu0 %1026  ;;  %v1565_v8 = vsel %vm1560_vm10, %v1532_v6, %v8537_v49 }
 0x11c   :  { %1168 = vrot.lane.b32.xlu1 %v453_v58, %s7690_s3  ;;  %v147_v58 = vrot.slane %v8067_v16, 5  ;;  %v224_v16 = vrot.slane %v8535_v56, 6 }
 0x11d   :  { %1166 = vrot.lane.b32.xlu0 %v454_v14, %s7690_s3 }
 0x11e   :  { %v1153_v52 = vpop.permute.xlu1 %1152  ;;  %v201_v44 = vsel %vm175_vm3, %v146_v21, %v147_v58 }
 0x11f   :  { %v1151_v36 = vpop.permute.xlu0 %1150 }
 0x120   :  { %1172 = vrot.lane.b32.xlu1 %v451_v25, %s7690_s3  ;;  %v517_v25 = vsel %vm500_vm5, %v482_v11, %v483_v48  ;;  %v200_v11 = vsel %vm175_vm3, %v147_v58, %v148_v0  ;;  %v1533_v48 = vsel %vm1527_vm9, %v1500_v43, %v8512_v32  ;;  %v1598_v58 = vsel %vm1593_vm11, %v1565_v8, %v8567_v30  ;;  %v8696_v30 = vld [vmem:[%s15037_s1 + $0x98] sm:$0xff] }
 0x121   :  { %1170 = vrot.lane.b32.xlu0 %v452_v42, %s7690_s3  ;;  %v1566_v43 = vsel %vm1560_vm10, %v1533_v48, %v8530_v60  ;;  %v255_v60 = vsel %vm240_vm0, %v224_v16, %v225_v53  ;;  %v1502_v21 = vsel %vm1494_vm8, %v200_v11, %v8498_v39  ;;  %v1729_v11 = vld [vmem:[#allocation2 + $0x20] sm:$0xff] }
 0x122   :  { %v8601_v47 = vpop.permute.xlu1 %1156 }
 0x123   :  { %v8607_v57 = vpop.permute.xlu0 %1154 }
 0x124   :  { %1296 = vrot.lane.b32.xlu1 %v518_v55, %s7691_s20  ;;  %v548_v55 = vrot.slane %v8444_v54, 4 }
 0x125   :  { %1294 = vrot.lane.b32.xlu0 %v519_v12, %s7691_s20  ;;  %v549_v12 = vrot.slane %v8535_v56, 4 }
 0x126   :  { %v1281_v14 = vpop.permute.xlu1 %1280  ;;  %v582_v34 = vsel %vm565_vm7, %v547_v59, %v548_v55  ;;  %v1501_v59 = vsel %vm1494_vm8, %v201_v44, %v8504_v35 }
 0x127   :  { %v1279_v42 = vpop.permute.xlu0 %1278  ;;  %v581_v61 = vsel %vm565_vm7, %v548_v55, %v549_v12  ;;  %v1535_v55 = vsel %vm1527_vm9, %v1502_v21, %v8520_v50  ;;  %v1731_v21 = vld [vmem:[#allocation2 + $0x30] sm:$0xff] }
 0x128   :  { %1300 = vrot.lane.b32.xlu1 %v516_v28, %s7691_s20  ;;  %v8657_v28 = vld [vmem:[%s15037_s1 + $0x90] sm:$0xff]  ;;  %v1568_v35 = vsel %vm1560_vm10, %v1535_v55, %v8547_v3 }
 0x129   :  { %1298 = vrot.lane.b32.xlu0 %v517_v25, %s7691_s20  ;;  %v1599_v25 = vsel %vm1593_vm11, %v1566_v43, %v8563_v5  ;;  %v1730_v5 = vld [vmem:[#allocation2 + $0x28] sm:$0xff]  ;;  %v226_v51 = vrot.slane %v8657_v28, 6  ;;  %v1732_v43 = vld [vmem:[#allocation2 + $0x38] sm:$0xff] }
 0x12a   :  { %v1285_v46 = vpop.permute.xlu1 %1284  ;;  %v1632_v49 = vsel %vm1626_vm12, %v1599_v25, %v1153_v52  ;;  %v1534_v52 = vsel %vm1527_vm9, %v1501_v59, %v8522_v37 }
 0x12b   :  { %v1283_v32 = vpop.permute.xlu0 %1282  ;;  %v1665_v39 = vsel %vm1659_vm13, %v1632_v49, %v1281_v14  ;;  %v1567_v14 = vsel %vm1560_vm10, %v1534_v52, %v8553_v45  ;;  %v227_v45 = vrot.slane %v8696_v30, 6 }
 0x12c   :  { %1424 = vrot.lane.b32.xlu1 %v583_v9, %s7692_s2  ;;  %v1631_v9 = vsel %vm1626_vm12, %v1598_v58, %v1151_v36  ;;  %v1600_v37 = vsel %vm1593_vm11, %v1567_v14, %v8581_v62  ;;  %v256_v62 = vsel %vm240_vm0, %v223_v19, %v224_v16  ;;  %v289_v16 = vrot.slane %v8535_v56, 7 }
 0x12d   :  { %1422 = vrot.lane.b32.xlu0 %v584_v22, %s7692_s2  ;;  %v1664_v48 = vsel %vm1659_vm13, %v1631_v9, %v1279_v42  ;;  %v1601_v22 = vsel %vm1593_vm11, %v1568_v35, %v8575_v24  ;;  %v1633_v24 = vsel %vm1626_vm12, %v1600_v37, %v8607_v57  ;;  %v253_v19 = vsel %vm240_vm0, %v226_v51, %v227_v45 }
 0x12e   :  { %v1409_v40 = vpop.permute.xlu1 %1408  ;;  %v1634_v3 = vsel %vm1626_vm12, %v1601_v22, %v8601_v47  ;;  %v1666_v47 = vsel %vm1659_vm13, %v1633_v24, %v1283_v32  ;;  %v355_v14 = vrot.slane %v8620_v13, 1  ;;  %v356_v22 = vrot.slane %v8657_v28, 1 }
 0x12f   :  { %v1698_v50 = vsel %vm1692_vm14, %v1665_v39, %v1409_v40  ;;  %v1407_v36 = vpop.permute.xlu0 %1406  ;;  %v1667_v8 = vsel %vm1659_vm13, %v1634_v3, %v1285_v46  ;;  %v290_v46 = vrot.slane %v8620_v13, 7  ;;  %v291_v39 = vrot.slane %v8657_v28, 7 }
 0x130   :  { %v1762_v44 = vmul.f32 %v1730_v5, %v1698_v50  ;;  %v1697_v6 = vsel %vm1692_vm14, %v1664_v48, %v1407_v36  ;;  %1428 = vrot.lane.b32.xlu1 %v581_v61, %s7692_s2  ;;  %v292_v40 = vrot.slane %v8696_v30, 7  ;;  %v384_v3 = vsel %vm370_vm2, %v355_v14, %v356_v22 }
 0x131   :  { %v1761_v42 = vmul.f32 %v1729_v11, %v1697_v6  ;;  %1426 = vrot.lane.b32.xlu0 %v582_v34, %s7692_s2  ;;  %v320_v9 = vsel %vm305_vm1, %v289_v16, %v290_v46  ;;  %v319_v48 = vsel %vm305_vm1, %v290_v46, %v291_v39  ;;  %v8787_v6 = vld [vmem:[%s15037_s1 + $0xa0] sm:$0xff] }
 0x132   :  { %v1413_v25 = vpop.permute.xlu1 %1412  ;;  %v318_v52 = vsel %vm305_vm1, %v291_v39, %v292_v40 }
 0x133   :  { %v1791_v61 = vpack.c.bf16 %v1762_v44, %v1761_v42  ;;  %v1700_v34 = vsel %vm1692_vm14, %v1667_v8, %v1413_v25  ;;  %v1411_v58 = vpop.permute.xlu0 %1410  ;;  %v357_v42 = vrot.slane %v8696_v30, 1  ;;  %v385_v8 = vsel %vm370_vm2, %v354_v23, %v355_v14 }
 0x134   :  { %v1764_v49 = vmul.f32 %v1732_v43, %v1700_v34  ;;  %v1699_v5 = vsel %vm1692_vm14, %v1666_v47, %v1411_v58  ;;  %664 = vrot.lane.b32.xlu1 %v255_v60, %s7686_s21  ;;  %v254_v60 = vsel %vm240_vm0, %v225_v53, %v226_v51  ;;  %v321_v53 = vsel %vm305_vm1, %v288_v41, %v289_v16 }
 0x135   :  { %v1763_v57 = vmul.f32 %v1731_v21, %v1699_v5  ;;  %662 = vrot.lane.b32.xlu0 %v256_v62, %s7686_s21  ;;  %7333 = vmatprep.mubr.msk.bf16.mxu0 %vm1813_vm15, %v1791_v61  ;;  %v358_v43 = vrot.slane %v8787_v6, 1  ;;  %v420_v62 = vrot.slane %v8620_v13, 2  ;;  %v421_v47 = vrot.slane %v8657_v28, 2 }
 0x136   :  { %v8735_v32 = vpop.permute.xlu1 %648  ;;  %v383_v23 = vsel %vm370_vm2, %v356_v22, %v357_v42  ;;  %v423_v5 = vrot.slane %v8787_v6, 2  ;;  %v149_v14 = vrot.slane %v8123_v38, 5  ;;  %v150_v22 = vrot.slane %v8200_v20, 5 }
 0x137   :  { %v1792_v59 = vpack.c.bf16 %v1764_v49, %v1763_v57  ;;  %v8741_v55 = vpop.permute.xlu0 %646  ;;  %v382_v21 = vsel %vm370_vm2, %v357_v42, %v358_v43  ;;  %v449_v58 = vsel %vm435_vm4, %v420_v62, %v421_v47  ;;  %v422_v49 = vrot.slane %v8696_v30, 2 }
 0x138   :  { %668 = vrot.lane.b32.xlu1 %v253_v19, %s7686_s21  ;;  %v450_v19 = vsel %vm435_vm4, %v419_v33, %v420_v62  ;;  %v550_v20 = vrot.slane %v8620_v13, 4  ;;  %v8872_v62 = vld [vmem:[%s15037_s1 + $0xa8] sm:$0xff] }
 0x139   :  { %666 = vrot.lane.b32.xlu0 %v254_v60, %s7686_s21  ;;  %7334 = vmatmul.mubr.msk.bf16.gmra.mrb[4].mxu0 %vm1813_vm15, %v1792_v59  ;;  %v447_v46 = vsel %vm435_vm4, %v422_v49, %v423_v5  ;;  %v485_v60 = vrot.slane %v8620_v13, 3  ;;  %v486_v59 = vrot.slane %v8657_v28, 3  ;;  %v448_v39 = vsel %vm435_vm4, %v421_v47, %v422_v49 }
 0x13a   :  { %v8750_v11 = vpop.permute.xlu1 %652  ;;  %v151_v47 = vrot.slane %v8215_v26, 5  ;;  %v228_v26 = vrot.slane %v8787_v6, 6 }
 0x13b   :  { %v8756_v51 = vpop.permute.xlu0 %650  ;;  %v515_v42 = vsel %vm500_vm5, %v484_v15, %v485_v60  ;;  %v198_v15 = vsel %vm175_vm3, %v149_v14, %v150_v22 }
 0x13c   :  { %792 = vrot.lane.b32.xlu1 %v320_v9, %s7687_s25 }
 0x13d   :  { %790 = vrot.lane.b32.xlu0 %v321_v53, %s7687_s25  ;;  %v514_v53 = vsel %vm500_vm5, %v485_v60, %v486_v59  ;;  %v552_v60 = vrot.slane %v8696_v30, 4 }
 0x13e   :  { %v8764_v35 = vpop.permute.xlu1 %776 }
 0x13f   :  { %v8768_v50 = vpop.permute.xlu0 %774 }
 0x140   :  { %796 = vrot.lane.b32.xlu1 %v318_v52, %s7687_s25  ;;  %v487_v52 = vrot.slane %v8696_v30, 3 }
 0x141   :  { %794 = vrot.lane.b32.xlu0 %v319_v48, %s7687_s25  ;;  %v488_v48 = vrot.slane %v8787_v6, 3 }
 0x142   :  { %v8772_v41 = vpop.permute.xlu1 %780  ;;  %v513_v49 = vsel %vm500_vm5, %v486_v59, %v487_v52 }
 0x143   :  { %v8774_v36 = vpop.permute.xlu0 %778  ;;  %v512_v38 = vsel %vm500_vm5, %v487_v52, %v488_v48 }
 0x144   :  { %920 = vrot.lane.b32.xlu1 %v8620_v13, %s7688_s26 }
 0x145   :  { %918 = vrot.lane.b32.xlu0 %v8535_v56, %s7688_s26 }
 0x146   :  { %v8782_v44 = vpop.permute.xlu1 %904 }
 0x147   :  { %v8789_v37 = vpop.permute.xlu0 %902 }
 0x148   :  { %924 = vrot.lane.b32.xlu1 %v8696_v30, %s7688_s26 }
 0x149   :  { %922 = vrot.lane.b32.xlu0 %v8657_v28, %s7688_s26 }
 0x14a   :  { %v8799_v24 = vpop.permute.xlu1 %908 }
 0x14b   :  { %v8805_v25 = vpop.permute.xlu0 %906 }
 0x14c   :  { %1048 = vrot.lane.b32.xlu1 %v384_v3, %s7689_s29 }
 0x14d   :  { %1046 = vrot.lane.b32.xlu0 %v385_v8, %s7689_s29 }
 0x14e   :  { %v8815_v61 = vpop.permute.xlu1 %1032 }
 0x14f   :  { %v8819_v34 = vpop.permute.xlu0 %1030 }
 0x150   :  { %1052 = vrot.lane.b32.xlu1 %v382_v21, %s7689_s29  ;;  %v551_v21 = vrot.slane %v8657_v28, 4 }
 0x151   :  { %1050 = vrot.lane.b32.xlu0 %v383_v23, %s7689_s29  ;;  %v152_v23 = vrot.slane %v8220_v29, 5 }
 0x152   :  { %v8827_v57 = vpop.permute.xlu1 %1036  ;;  %v579_v17 = vsel %vm565_vm7, %v550_v20, %v551_v21 }
 0x153   :  { %v8833_v16 = vpop.permute.xlu0 %1034  ;;  %v196_v59 = vsel %vm175_vm3, %v151_v47, %v152_v23 }
 0x154   :  { %1176 = vrot.lane.b32.xlu1 %v449_v58, %s7690_s3 }
 0x155   :  { %1174 = vrot.lane.b32.xlu0 %v450_v19, %s7690_s3  ;;  %v199_v19 = vsel %vm175_vm3, %v148_v0, %v149_v14 }
 0x156   :  { %v1161_v9 = vpop.permute.xlu1 %1160  ;;  %v1503_v0 = vsel %vm1494_vm8, %v199_v19, %v8741_v55  ;;  %v197_v55 = vsel %vm175_vm3, %v150_v22, %v151_v47  ;;  %v1506_v22 = vsel %vm1494_vm8, %v196_v59, %v8750_v11  ;;  %v1733_v59 = vld [vmem:[#allocation2 + $0x40] sm:$0xff] }
 0x157   :  { %v1159_v33 = vpop.permute.xlu0 %1158 }
 0x158   :  { %1180 = vrot.lane.b32.xlu1 %v447_v46, %s7690_s3 }
 0x159   :  { %1178 = vrot.lane.b32.xlu0 %v448_v39, %s7690_s3  ;;  %v553_v39 = vrot.slane %v8787_v6, 4 }
 0x15a   :  { %v8853_v3 = vpop.permute.xlu1 %1164 }
 0x15b   :  { %v8859_v8 = vpop.permute.xlu0 %1162 }
 0x15c   :  { %1304 = vrot.lane.b32.xlu1 %v514_v53, %s7691_s20  ;;  %v229_v53 = vrot.slane %v8872_v62, 6 }
 0x15d   :  { %1302 = vrot.lane.b32.xlu0 %v515_v42, %s7691_s20  ;;  %v1504_v42 = vsel %vm1494_vm8, %v198_v15, %v8735_v32  ;;  %v580_v32 = vsel %vm565_vm7, %v549_v12, %v550_v20  ;;  %v1536_v15 = vsel %vm1527_vm9, %v1503_v0, %v8768_v50  ;;  %v577_v12 = vsel %vm565_vm7, %v552_v60, %v553_v39 }
 0x15e   :  { %v1289_v58 = vpop.permute.xlu1 %1288  ;;  %v1537_v52 = vsel %vm1527_vm9, %v1504_v42, %v8764_v35  ;;  %v1569_v20 = vsel %vm1560_vm10, %v1536_v15, %v8789_v37  ;;  %v578_v50 = vsel %vm565_vm7, %v551_v21, %v552_v60  ;;  %v1505_v21 = vsel %vm1494_vm8, %v197_v55, %v8756_v51 }
 0x15f   :  { %v1287_v46 = vpop.permute.xlu0 %1286  ;;  %v1570_v35 = vsel %vm1560_vm10, %v1537_v52, %v8782_v44  ;;  %v251_v44 = vsel %vm240_vm0, %v228_v26, %v229_v53  ;;  %v1602_v47 = vsel %vm1593_vm11, %v1569_v20, %v8819_v34  ;;  %v1539_v60 = vsel %vm1527_vm9, %v1506_v22, %v8772_v41  ;;  %v8948_v34 = vld [vmem:[%s15037_s1 + $0xb8] sm:$0xff]  ;;  %v1735_v22 = vld [vmem:[#allocation2 + $0x50] sm:$0xff] }
 0x160   :  { %1308 = vrot.lane.b32.xlu1 %v512_v38, %s7691_s20  ;;  %v8909_v38 = vld [vmem:[%s15037_s1 + $0xb0] sm:$0xff]  ;;  %v1603_v19 = vsel %vm1593_vm11, %v1570_v35, %v8815_v61  ;;  %v1734_v61 = vld [vmem:[#allocation2 + $0x48] sm:$0xff]  ;;  %v1572_v51 = vsel %vm1560_vm10, %v1539_v60, %v8799_v24  ;;  %v1736_v35 = vld [vmem:[#allocation2 + $0x58] sm:$0xff] }
 0x161   :  { %1306 = vrot.lane.b32.xlu0 %v513_v49, %s7691_s20  ;;  %v1636_v37 = vsel %vm1626_vm12, %v1603_v19, %v1161_v9  ;;  %v230_v42 = vrot.slane %v8909_v38, 6  ;;  %v1538_v9 = vsel %vm1527_vm9, %v1505_v21, %v8774_v36 }
 0x162   :  { %v1293_v14 = vpop.permute.xlu1 %1292  ;;  %v1669_v11 = vsel %vm1659_vm13, %v1636_v37, %v1289_v58  ;;  %v1571_v58 = vsel %vm1560_vm10, %v1538_v9, %v8805_v25  ;;  %v231_v25 = vrot.slane %v8948_v34, 6 }
 0x163   :  { %v1291_v49 = vpop.permute.xlu0 %1290  ;;  %v1604_v36 = vsel %vm1593_vm11, %v1571_v58, %v8833_v16  ;;  %v252_v16 = vsel %vm240_vm0, %v227_v45, %v228_v26  ;;  %v293_v26 = vrot.slane %v8787_v6, 7  ;;  %v359_v58 = vrot.slane %v8872_v62, 1 }
 0x164   :  { %1432 = vrot.lane.b32.xlu1 %v579_v17, %s7692_s2  ;;  %v1635_v17 = vsel %vm1626_vm12, %v1602_v47, %v1159_v33  ;;  %v249_v45 = vsel %vm240_vm0, %v230_v42, %v231_v25 }
 0x165   :  { %1430 = vrot.lane.b32.xlu0 %v580_v32, %s7692_s2  ;;  %v1668_v52 = vsel %vm1659_vm13, %v1635_v17, %v1287_v46  ;;  %v1605_v32 = vsel %vm1593_vm11, %v1572_v51, %v8827_v57  ;;  %v1637_v57 = vsel %vm1626_vm12, %v1604_v36, %v8859_v8 }
 0x166   :  { %v1417_v0 = vpop.permute.xlu1 %1416  ;;  %v1638_v24 = vsel %vm1626_vm12, %v1605_v32, %v8853_v3  ;;  %v1670_v3 = vsel %vm1659_vm13, %v1637_v57, %v1291_v49  ;;  %v360_v32 = vrot.slane %v8909_v38, 1 }
 0x167   :  { %v1702_v41 = vsel %vm1692_vm14, %v1669_v11, %v1417_v0  ;;  %v1415_v33 = vpop.permute.xlu0 %1414  ;;  %v1671_v20 = vsel %vm1659_vm13, %v1638_v24, %v1293_v14  ;;  %v294_v14 = vrot.slane %v8872_v62, 7  ;;  %v295_v11 = vrot.slane %v8909_v38, 7 }
 0x168   :  { %v1766_v55 = vmul.f32 %v1734_v61, %v1702_v41  ;;  %v1701_v15 = vsel %vm1692_vm14, %v1668_v52, %v1415_v33  ;;  %1436 = vrot.lane.b32.xlu1 %v577_v12, %s7692_s2  ;;  %v296_v0 = vrot.slane %v8948_v34, 7  ;;  %v380_v24 = vsel %vm370_vm2, %v359_v58, %v360_v32 }
 0x169   :  { %v1765_v46 = vmul.f32 %v1733_v59, %v1701_v15  ;;  %1434 = vrot.lane.b32.xlu0 %v578_v50, %s7692_s2  ;;  %v316_v17 = vsel %vm305_vm1, %v293_v26, %v294_v14  ;;  %v315_v52 = vsel %vm305_vm1, %v294_v14, %v295_v11  ;;  %v9039_v15 = vld [vmem:[%s15037_s1 + $0xc0] sm:$0xff] }
 0x16a   :  { %v1421_v19 = vpop.permute.xlu1 %1420  ;;  %v314_v9 = vsel %vm305_vm1, %v295_v11, %v296_v0 }
 0x16b   :  { %v1793_v12 = vpack.c.bf16 %v1766_v55, %v1765_v46  ;;  %v1704_v50 = vsel %vm1692_vm14, %v1671_v20, %v1421_v19  ;;  %v1419_v47 = vpop.permute.xlu0 %1418  ;;  %v361_v46 = vrot.slane %v8948_v34, 1  ;;  %v381_v20 = vsel %vm370_vm2, %v358_v43, %v359_v58 }
 0x16c   :  { %v1768_v37 = vmul.f32 %v1736_v35, %v1704_v50  ;;  %v1703_v61 = vsel %vm1692_vm14, %v1670_v3, %v1419_v47  ;;  %672 = vrot.lane.b32.xlu1 %v251_v44, %s7686_s21  ;;  %v250_v44 = vsel %vm240_vm0, %v229_v53, %v230_v42  ;;  %v317_v53 = vsel %vm305_vm1, %v292_v40, %v293_v26 }
 0x16d   :  { %v1767_v8 = vmul.f32 %v1735_v22, %v1703_v61  ;;  %670 = vrot.lane.b32.xlu0 %v252_v16, %s7686_s21  ;;  %7337 = vmatprep.mubr.msk.bf16.mxu0 %vm1813_vm15, %v1793_v12  ;;  %v362_v35 = vrot.slane %v9039_v15, 1  ;;  %v424_v16 = vrot.slane %v8872_v62, 2  ;;  %v425_v3 = vrot.slane %v8909_v38, 2 }
 0x16e   :  { %v8987_v49 = vpop.permute.xlu1 %656  ;;  %v379_v43 = vsel %vm370_vm2, %v360_v32, %v361_v46  ;;  %v427_v61 = vrot.slane %v9039_v15, 2  ;;  %v153_v58 = vrot.slane %v8289_v2, 5  ;;  %v154_v32 = vrot.slane %v8373_v63, 5 }
 0x16f   :  { %v1794_v21 = vpack.c.bf16 %v1768_v37, %v1767_v8  ;;  %v8993_v60 = vpop.permute.xlu0 %654  ;;  %v378_v22 = vsel %vm370_vm2, %v361_v46, %v362_v35  ;;  %v445_v47 = vsel %vm435_vm4, %v424_v16, %v425_v3  ;;  %v426_v37 = vrot.slane %v8948_v34, 2 }
 0x170   :  { %676 = vrot.lane.b32.xlu1 %v249_v45, %s7686_s21  ;;  %v446_v45 = vsel %vm435_vm4, %v423_v5, %v424_v16  ;;  %v554_v63 = vrot.slane %v8872_v62, 4  ;;  %v9124_v16 = vld [vmem:[%s15037_s1 + $0xc8] sm:$0xff] }
 0x171   :  { %674 = vrot.lane.b32.xlu0 %v250_v44, %s7686_s21  ;;  %7338 = vmatmul.mubr.msk.bf16.gmra.mrb[8].mxu0 %vm1813_vm15, %v1794_v21  ;;  %v443_v14 = vsel %vm435_vm4, %v426_v37, %v427_v61  ;;  %v489_v44 = vrot.slane %v8872_v62, 3  ;;  %v490_v21 = vrot.slane %v8909_v38, 3  ;;  %v444_v11 = vsel %vm435_vm4, %v425_v3, %v426_v37 }
 0x172   :  { %v9002_v59 = vpop.permute.xlu1 %660  ;;  %v155_v3 = vrot.slane %v8405_v31, 5  ;;  %v232_v31 = vrot.slane %v9039_v15, 6 }
 0x173   :  { %v9008_v42 = vpop.permute.xlu0 %658  ;;  %v511_v46 = vsel %vm500_vm5, %v488_v48, %v489_v44  ;;  %v194_v48 = vsel %vm175_vm3, %v153_v58, %v154_v32 }
 0x174   :  { %800 = vrot.lane.b32.xlu1 %v316_v17, %s7687_s25 }
 0x175   :  { %798 = vrot.lane.b32.xlu0 %v317_v53, %s7687_s25  ;;  %v510_v53 = vsel %vm500_vm5, %v489_v44, %v490_v21  ;;  %v556_v44 = vrot.slane %v8948_v34, 4 }
 0x176   :  { %v9016_v51 = vpop.permute.xlu1 %784 }
 0x177   :  { %v9020_v41 = vpop.permute.xlu0 %782 }
 0x178   :  { %804 = vrot.lane.b32.xlu1 %v314_v9, %s7687_s25  ;;  %v491_v9 = vrot.slane %v8948_v34, 3 }
 0x179   :  { %802 = vrot.lane.b32.xlu0 %v315_v52, %s7687_s25  ;;  %v492_v52 = vrot.slane %v9039_v15, 3 }
 0x17a   :  { %v9024_v40 = vpop.permute.xlu1 %788  ;;  %v509_v37 = vsel %vm500_vm5, %v490_v21, %v491_v9 }
 0x17b   :  { %v9026_v33 = vpop.permute.xlu0 %786  ;;  %v508_v2 = vsel %vm500_vm5, %v491_v9, %v492_v52 }
 0x17c   :  { %928 = vrot.lane.b32.xlu1 %v8872_v62, %s7688_s26 }
 0x17d   :  { %926 = vrot.lane.b32.xlu0 %v8787_v6, %s7688_s26 }
 0x17e   :  { %v9034_v55 = vpop.permute.xlu1 %912 }
 0x17f   :  { %v9041_v36 = vpop.permute.xlu0 %910 }
 0x180   :  { %932 = vrot.lane.b32.xlu1 %v8948_v34, %s7688_s26 }
 0x181   :  { %930 = vrot.lane.b32.xlu0 %v8909_v38, %s7688_s26 }
 0x182   :  { %v9051_v57 = vpop.permute.xlu1 %916 }
 0x183   :  { %v9057_v19 = vpop.permute.xlu0 %914 }
 0x184   :  { %1056 = vrot.lane.b32.xlu1 %v380_v24, %s7689_s29 }
 0x185   :  { %1054 = vrot.lane.b32.xlu0 %v381_v20, %s7689_s29 }
 0x186   :  { %v9067_v12 = vpop.permute.xlu1 %1040 }
 0x187   :  { %v9071_v50 = vpop.permute.xlu0 %1038 }
 0x188   :  { %1060 = vrot.lane.b32.xlu1 %v378_v22, %s7689_s29  ;;  %v555_v22 = vrot.slane %v8909_v38, 4 }
 0x189   :  { %1058 = vrot.lane.b32.xlu0 %v379_v43, %s7689_s29  ;;  %v156_v43 = vrot.slane %v8444_v54, 5 }
 0x18a   :  { %v9079_v8 = vpop.permute.xlu1 %1044  ;;  %v575_v29 = vsel %vm565_vm7, %v554_v63, %v555_v22 }
 0x18b   :  { %v9085_v26 = vpop.permute.xlu0 %1042  ;;  %v192_v21 = vsel %vm175_vm3, %v155_v3, %v156_v43 }
 0x18c   :  { %1184 = vrot.lane.b32.xlu1 %v445_v47, %s7690_s3 }
 0x18d   :  { %1182 = vrot.lane.b32.xlu0 %v446_v45, %s7690_s3  ;;  %v195_v45 = vsel %vm175_vm3, %v152_v23, %v153_v58 }
 0x18e   :  { %v1169_v17 = vpop.permute.xlu1 %1168  ;;  %v1507_v23 = vsel %vm1494_vm8, %v195_v45, %v8993_v60  ;;  %v193_v60 = vsel %vm175_vm3, %v154_v32, %v155_v3  ;;  %v1510_v32 = vsel %vm1494_vm8, %v192_v21, %v9002_v59 }
 0x18f   :  { %v1167_v5 = vpop.permute.xlu0 %1166 }
 0x190   :  { %1188 = vrot.lane.b32.xlu1 %v443_v14, %s7690_s3 }
 0x191   :  { %1186 = vrot.lane.b32.xlu0 %v444_v11, %s7690_s3  ;;  %v557_v11 = vrot.slane %v9039_v15, 4 }
 0x192   :  { %v9105_v24 = vpop.permute.xlu1 %1172 }
 0x193   :  { %v9111_v20 = vpop.permute.xlu0 %1170  ;;  %v573_v6 = vsel %vm565_vm7, %v556_v44, %v557_v11 }
 0x194   :  { %1312 = vrot.lane.b32.xlu1 %v510_v53, %s7691_s20  ;;  %v233_v53 = vrot.slane %v9124_v16, 6 }
 0x195   :  { %1310 = vrot.lane.b32.xlu0 %v511_v46, %s7691_s20  ;;  %v1508_v46 = vsel %vm1494_vm8, %v194_v48, %v8987_v49  ;;  %v576_v49 = vsel %vm565_vm7, %v553_v39, %v554_v63  ;;  %v1540_v48 = vsel %vm1527_vm9, %v1507_v23, %v9020_v41  ;;  %v574_v41 = vsel %vm565_vm7, %v555_v22, %v556_v44  ;;  %v1737_v23 = vld [vmem:[#allocation2 + $0x60] sm:$0xff] }
 0x196   :  { %v1297_v47 = vpop.permute.xlu1 %1296  ;;  %v1541_v9 = vsel %vm1527_vm9, %v1508_v46, %v9016_v51  ;;  %v1573_v39 = vsel %vm1560_vm10, %v1540_v48, %v9041_v36  ;;  %v1509_v22 = vsel %vm1494_vm8, %v193_v60, %v9008_v42  ;;  %v1543_v44 = vsel %vm1527_vm9, %v1510_v32, %v9024_v40  ;;  %v1740_v48 = vld [vmem:[#allocation2 + $0x78] sm:$0xff] }
 0x197   :  { %v1295_v14 = vpop.permute.xlu0 %1294  ;;  %v1574_v51 = vsel %vm1560_vm10, %v1541_v9, %v9034_v55  ;;  %v247_v55 = vsel %vm240_vm0, %v232_v31, %v233_v53  ;;  %v1606_v3 = vsel %vm1593_vm11, %v1573_v39, %v9071_v50  ;;  %v9200_v50 = vld [vmem:[%s15037_s1 + $0xd8] sm:$0xff]  ;;  %v1576_v42 = vsel %vm1560_vm10, %v1543_v44, %v9051_v57 }
 0x198   :  { %1316 = vrot.lane.b32.xlu1 %v508_v2, %s7691_s20  ;;  %v9161_v2 = vld [vmem:[%s15037_s1 + $0xd0] sm:$0xff]  ;;  %v1607_v63 = vsel %vm1593_vm11, %v1574_v51, %v9067_v12  ;;  %v1738_v12 = vld [vmem:[#allocation2 + $0x68] sm:$0xff]  ;;  %v1639_v46 = vsel %vm1626_vm12, %v1606_v3, %v1167_v5  ;;  %v1609_v9 = vsel %vm1593_vm11, %v1576_v42, %v9079_v8 }
 0x199   :  { %1314 = vrot.lane.b32.xlu0 %v509_v37, %s7691_s20  ;;  %v1640_v36 = vsel %vm1626_vm12, %v1607_v63, %v1169_v17  ;;  %v234_v45 = vrot.slane %v9161_v2, 6  ;;  %v1542_v17 = vsel %vm1527_vm9, %v1509_v22, %v9026_v33  ;;  %v1672_v21 = vsel %vm1659_vm13, %v1639_v46, %v1295_v14  ;;  %v1739_v63 = vld [vmem:[#allocation2 + $0x70] sm:$0xff] }
 0x19a   :  { %v1301_v58 = vpop.permute.xlu1 %1300  ;;  %v1673_v59 = vsel %vm1659_vm13, %v1640_v36, %v1297_v47  ;;  %v1575_v47 = vsel %vm1560_vm10, %v1542_v17, %v9057_v19  ;;  %v1642_v57 = vsel %vm1626_vm12, %v1609_v9, %v9105_v24  ;;  %v235_v19 = vrot.slane %v9200_v50, 6 }
 0x19b   :  { %v1299_v37 = vpop.permute.xlu0 %1298  ;;  %v1608_v33 = vsel %vm1593_vm11, %v1575_v47, %v9085_v26  ;;  %v1675_v51 = vsel %vm1659_vm13, %v1642_v57, %v1301_v58  ;;  %v248_v26 = vsel %vm240_vm0, %v231_v25, %v232_v31  ;;  %v297_v31 = vrot.slane %v9039_v15, 7 }
 0x19c   :  { %1440 = vrot.lane.b32.xlu1 %v575_v29, %s7692_s2  ;;  %v1641_v8 = vsel %vm1626_vm12, %v1608_v33, %v9111_v20  ;;  %v245_v25 = vsel %vm240_vm0, %v234_v45, %v235_v19  ;;  %v298_v58 = vrot.slane %v9124_v16, 7  ;;  %v299_v46 = vrot.slane %v9161_v2, 7 }
 0x19d   :  { %1438 = vrot.lane.b32.xlu0 %v576_v49, %s7692_s2  ;;  %v1674_v24 = vsel %vm1659_vm13, %v1641_v8, %v1299_v37  ;;  %v364_v47 = vrot.slane %v9161_v2, 1  ;;  %v365_v57 = vrot.slane %v9200_v50, 1 }
 0x19e   :  { %v1425_v29 = vpop.permute.xlu1 %1424  ;;  %v312_v44 = vsel %vm305_vm1, %v297_v31, %v298_v58  ;;  %v311_v42 = vsel %vm305_vm1, %v298_v58, %v299_v46  ;;  %v493_v58 = vrot.slane %v9124_v16, 3 }
 0x19f   :  { %v1706_v40 = vsel %vm1692_vm14, %v1673_v59, %v1425_v29  ;;  %v1423_v5 = vpop.permute.xlu0 %1422  ;;  %v300_v59 = vrot.slane %v9200_v50, 7 }
 0x1a0   :  { %v1770_v49 = vmul.f32 %v1738_v12, %v1706_v40  ;;  %v1705_v60 = vsel %vm1692_vm14, %v1672_v21, %v1423_v5  ;;  %1444 = vrot.lane.b32.xlu1 %v573_v6, %s7692_s2  ;;  %v363_v5 = vrot.slane %v9124_v16, 1 }
 0x1a1   :  { %v1769_v14 = vmul.f32 %v1737_v23, %v1705_v60  ;;  %1442 = vrot.lane.b32.xlu0 %v574_v41, %s7692_s2  ;;  %v310_v23 = vsel %vm305_vm1, %v299_v46, %v300_v59 }
 0x1a2   :  { %v1429_v39 = vpop.permute.xlu1 %1428  ;;  %v376_v33 = vsel %vm370_vm2, %v363_v5, %v364_v47  ;;  %v377_v8 = vsel %vm370_vm2, %v362_v35, %v363_v5  ;;  %v375_v35 = vsel %vm370_vm2, %v364_v47, %v365_v57  ;;  %v158_v5 = vrot.slane %v8620_v13, 5 }
 0x1a3   :  { %v1795_v6 = vpack.c.bf16 %v1770_v49, %v1769_v14  ;;  %v1708_v41 = vsel %vm1692_vm14, %v1675_v51, %v1429_v39  ;;  %v1427_v32 = vpop.permute.xlu0 %1426  ;;  %v9291_v49 = vld [vmem:[%s15037_s1 + $0xe0] sm:$0xff] }
 0x1a4   :  { %v1772_v3 = vmul.f32 %v1740_v48, %v1708_v41  ;;  %v1707_v36 = vsel %vm1692_vm14, %v1674_v24, %v1427_v32  ;;  %680 = vrot.lane.b32.xlu1 %v247_v55, %s7686_s21  ;;  %v246_v55 = vsel %vm240_vm0, %v233_v53, %v234_v45  ;;  %v313_v53 = vsel %vm305_vm1, %v296_v0, %v297_v31 }
 0x1a5   :  { %v1771_v20 = vmul.f32 %v1739_v63, %v1707_v36  ;;  %678 = vrot.lane.b32.xlu0 %v248_v26, %s7686_s21  ;;  %7341 = vmatprep.mubr.msk.bf16.mxu0 %vm1813_vm15, %v1795_v6  ;;  %v366_v14 = vrot.slane %v9291_v49, 1  ;;  %v428_v63 = vrot.slane %v9124_v16, 2  ;;  %v429_v26 = vrot.slane %v9161_v2, 2 }
 0x1a6   :  { %v9239_v37 = vpop.permute.xlu1 %664  ;;  %v430_v32 = vrot.slane %v9200_v50, 2 }
 0x1a7   :  { %v1796_v12 = vpack.c.bf16 %v1772_v3, %v1771_v20  ;;  %v9245_v22 = vpop.permute.xlu0 %662  ;;  %v374_v39 = vsel %vm370_vm2, %v365_v57, %v366_v14  ;;  %v441_v41 = vsel %vm435_vm4, %v428_v63, %v429_v26  ;;  %v431_v3 = vrot.slane %v9291_v49, 2 }
 0x1a8   :  { %684 = vrot.lane.b32.xlu1 %v245_v25, %s7686_s21  ;;  %v442_v20 = vsel %vm435_vm4, %v427_v61, %v428_v63 }
 0x1a9   :  { %682 = vrot.lane.b32.xlu0 %v246_v55, %s7686_s21  ;;  %7342 = vmatmul.mubr.msk.bf16.gmra.mrb[12].mxu0 %vm1813_vm15, %v1796_v12  ;;  %v439_v31 = vsel %vm435_vm4, %v430_v32, %v431_v3  ;;  %v494_v55 = vrot.slane %v9161_v2, 3 }
 0x1aa   :  { %v9254_v29 = vpop.permute.xlu1 %668 }
 0x1ab   :  { %v9260_v45 = vpop.permute.xlu0 %666  ;;  %v506_v46 = vsel %vm500_vm5, %v493_v58, %v494_v55 }
 0x1ac   :  { %808 = vrot.lane.b32.xlu1 %v312_v44, %s7687_s25  ;;  %v440_v44 = vsel %vm435_vm4, %v429_v26, %v430_v32  ;;  %v561_v32 = vrot.slane %v9291_v49, 4 }
 0x1ad   :  { %806 = vrot.lane.b32.xlu0 %v313_v53, %s7687_s25  ;;  %v495_v53 = vrot.slane %v9200_v50, 3 }
 0x1ae   :  { %v9268_v17 = vpop.permute.xlu1 %792 }
 0x1af   :  { %v9272_v21 = vpop.permute.xlu0 %790 }
 0x1b0   :  { %812 = vrot.lane.b32.xlu1 %v310_v23, %s7687_s25  ;;  %v496_v23 = vrot.slane %v9291_v49, 3 }
 0x1b1   :  { %810 = vrot.lane.b32.xlu0 %v311_v42, %s7687_s25  ;;  %v157_v42 = vrot.slane %v8535_v56, 5  ;;  %v9373_v56 = vld [vmem:[%s15037_s1 + $0xe8] sm:$0xff] }
 0x1b2   :  { %v9276_v0 = vpop.permute.xlu1 %796  ;;  %v504_v13 = vsel %vm500_vm5, %v495_v53, %v496_v23 }
 0x1b3   :  { %v9278_v40 = vpop.permute.xlu0 %794  ;;  %v190_v63 = vsel %vm175_vm3, %v157_v42, %v158_v5 }
 0x1b4   :  { %936 = vrot.lane.b32.xlu1 %v9124_v16, %s7688_s26  ;;  %v1512_v54 = vsel %vm1494_vm8, %v190_v63, %v9239_v37 }
 0x1b5   :  { %934 = vrot.lane.b32.xlu0 %v9039_v15, %s7688_s26 }
 0x1b6   :  { %v9286_v9 = vpop.permute.xlu1 %920 }
 0x1b7   :  { %v9293_v60 = vpop.permute.xlu0 %918 }
 0x1b8   :  { %940 = vrot.lane.b32.xlu1 %v9200_v50, %s7688_s26 }
 0x1b9   :  { %938 = vrot.lane.b32.xlu0 %v9161_v2, %s7688_s26 }
 0x1ba   :  { %v9303_v48 = vpop.permute.xlu1 %924 }
 0x1bb   :  { %v9309_v51 = vpop.permute.xlu0 %922 }
 0x1bc   :  { %1064 = vrot.lane.b32.xlu1 %v376_v33, %s7689_s29  ;;  %v507_v33 = vsel %vm500_vm5, %v492_v52, %v493_v58  ;;  %v558_v52 = vrot.slane %v9124_v16, 4  ;;  %v236_v58 = vrot.slane %v9291_v49, 6 }
 0x1bd   :  { %1062 = vrot.lane.b32.xlu0 %v377_v8, %s7689_s29  ;;  %v159_v8 = vrot.slane %v8657_v28, 5  ;;  %v559_v28 = vrot.slane %v9161_v2, 4 }
 0x1be   :  { %v9319_v24 = vpop.permute.xlu1 %1048 }
 0x1bf   :  { %v9323_v6 = vpop.permute.xlu0 %1046 }
 0x1c0   :  { %1068 = vrot.lane.b32.xlu1 %v374_v39, %s7689_s29  ;;  %v160_v39 = vrot.slane %v8696_v30, 5 }
 0x1c1   :  { %1066 = vrot.lane.b32.xlu0 %v375_v35, %s7689_s29  ;;  %v505_v35 = vsel %vm500_vm5, %v494_v55, %v495_v53  ;;  %v9402_v55 = vld [vmem:[%s15037_s1 + $0xf0] sm:$0xff]  ;;  %v571_v53 = vsel %vm565_vm7, %v558_v52, %v559_v28 }
 0x1c2   :  { %v9331_v36 = vpop.permute.xlu1 %1052 }
 0x1c3   :  { %v9337_v25 = vpop.permute.xlu0 %1050 }
 0x1c4   :  { %1192 = vrot.lane.b32.xlu1 %v441_v41, %s7690_s3  ;;  %v560_v41 = vrot.slane %v9200_v50, 4 }
 0x1c5   :  { %1190 = vrot.lane.b32.xlu0 %v442_v20, %s7690_s3  ;;  %v191_v20 = vsel %vm175_vm3, %v156_v43, %v157_v42  ;;  %v189_v43 = vsel %vm175_vm3, %v158_v5, %v159_v8  ;;  %v572_v42 = vsel %vm565_vm7, %v557_v11, %v558_v52 }
 0x1c6   :  { %v1177_v12 = vpop.permute.xlu1 %1176  ;;  %v569_v5 = vsel %vm565_vm7, %v560_v41, %v561_v32 }
 0x1c7   :  { %v9349_v61 = vpop.permute.xlu0 %1174 }
 0x1c8   :  { %1196 = vrot.lane.b32.xlu1 %v439_v31, %s7690_s3 }
 0x1c9   :  { %1194 = vrot.lane.b32.xlu0 %v440_v44, %s7690_s3  ;;  %v237_v44 = vrot.slane %v9373_v56, 6 }
 0x1ca   :  { %v9359_v47 = vpop.permute.xlu1 %1180 }
 0x1cb   :  { %v9365_v57 = vpop.permute.xlu0 %1178 }
 0x1cc   :  { %1320 = vrot.lane.b32.xlu1 %v506_v46, %s7691_s20  ;;  %v188_v46 = vsel %vm175_vm3, %v159_v8, %v160_v39  ;;  %v570_v8 = vsel %vm565_vm7, %v559_v28, %v560_v41  ;;  %v1513_v28 = vsel %vm1494_vm8, %v189_v43, %v9260_v45  ;;  %v9447_v41 = vld [vmem:[%s14914_s7] ss:$0 sm:$0xff] }
 0x1cd   :  { %1318 = vrot.lane.b32.xlu0 %v507_v33, %s7691_s20  ;;  %v1511_v33 = vsel %vm1494_vm8, %v191_v20, %v9245_v22  ;;  %v243_v22 = vsel %vm240_vm0, %v236_v58, %v237_v44  ;;  %v1514_v63 = vsel %vm1494_vm8, %v188_v46, %v9254_v29  ;;  %v1546_v45 = vsel %vm1527_vm9, %v1513_v28, %v9278_v40  ;;  %v1742_v46 = vld [vmem:[#allocation2 + $0x88] sm:$0xff] }
 0x1ce   :  { %v1305_v26 = vpop.permute.xlu1 %1304  ;;  %v1544_v15 = vsel %vm1527_vm9, %v1511_v33, %v9272_v21  ;;  %v1547_v29 = vsel %vm1527_vm9, %v1514_v63, %v9276_v0  ;;  %v1579_v43 = vsel %vm1560_vm10, %v1546_v45, %v9309_v51  ;;  %v1741_v33 = vld [vmem:[#allocation2 + $0x80] sm:$0xff] }
 0x1cf   :  { %v1303_v31 = vpop.permute.xlu0 %1302  ;;  %v1577_v21 = vsel %vm1560_vm10, %v1544_v15, %v9293_v60 }
 0x1d0   :  { %1324 = vrot.lane.b32.xlu1 %v504_v13, %s7691_s20  ;;  %v1545_v13 = vsel %vm1527_vm9, %v1512_v54, %v9268_v17  ;;  %v238_v17 = vrot.slane %v9402_v55, 6  ;;  %v1610_v60 = vsel %vm1593_vm11, %v1577_v21, %v9323_v6  ;;  %v1580_v54 = vsel %vm1560_vm10, %v1547_v29, %v9303_v48 }
 0x1d1   :  { %1322 = vrot.lane.b32.xlu0 %v505_v35, %s7691_s20  ;;  %v1578_v11 = vsel %vm1560_vm10, %v1545_v13, %v9286_v9  ;;  %v1643_v0 = vsel %vm1626_vm12, %v1610_v60, %v9349_v61  ;;  %v1613_v51 = vsel %vm1593_vm11, %v1580_v54, %v9331_v36  ;;  %v1743_v60 = vld [vmem:[#allocation2 + $0x90] sm:$0xff] }
 0x1d2   :  { %v1309_v37 = vpop.permute.xlu1 %1308  ;;  %v1611_v9 = vsel %vm1593_vm11, %v1578_v11, %v9319_v24  ;;  %v1646_v28 = vsel %vm1626_vm12, %v1613_v51, %v9359_v47 }
 0x1d3   :  { %v1307_v52 = vpop.permute.xlu0 %1306  ;;  %v1644_v20 = vsel %vm1626_vm12, %v1611_v9, %v1177_v12  ;;  %v1676_v12 = vsel %vm1659_vm13, %v1643_v0, %v1303_v31  ;;  %v1612_v31 = vsel %vm1593_vm11, %v1579_v43, %v9337_v25  ;;  %v1679_v29 = vsel %vm1659_vm13, %v1646_v28, %v1309_v37 }
 0x1d4   :  { %v7331_v35 = vpop.f32.mrb[0].mxu0  ;;  %1448 = vrot.lane.b32.xlu1 %v571_v53, %s7692_s2  ;;  %v1677_v40 = vsel %vm1659_vm13, %v1644_v20, %v1305_v26  ;;  %v1645_v36 = vsel %vm1626_vm12, %v1612_v31, %v9365_v57  ;;  %v244_v25 = vsel %vm240_vm0, %v235_v19, %v236_v58  ;;  %v301_v43 = vrot.slane %v9291_v49, 7 }
 0x1d5   :  { %1446 = vrot.lane.b32.xlu0 %v572_v42, %s7692_s2  ;;  %v9458_v24 = vpop.f32.mrb[1].mxu0  ;;  %v1909_v42 = vadd.f32 %v7331_v35, %v9447_v41  ;;  %v1744_v35 = vld [vmem:[#allocation2 + $0x98] sm:$0xff]  ;;  %v1678_v47 = vsel %vm1659_vm13, %v1645_v36, %v1307_v52  ;;  %v302_v0 = vrot.slane %v9373_v56, 7  ;;  %v241_v19 = vsel %vm240_vm0, %v238_v17, %v239_v10 }
 0x1d6   :  { %v7332_v53 = vpop.f32.mrb[2].mxu0  ;;  %v1433_v6 = vpop.permute.xlu1 %1432 }
 0x1d7   :  { %v1912_v13 = vadd.f32 %v7332_v53, %v9447_v41  ;;  %v1710_v15 = vsel %vm1692_vm14, %v1677_v40, %v1433_v6  ;;  %v1431_v48 = vpop.permute.xlu0 %1430  ;;  %v1903_v11 = vpop.f32.mrb[3].mxu0  ;;  %v242_v53 = vsel %vm240_vm0, %v237_v44, %v238_v17  ;;  %v303_v44 = vrot.slane %v9402_v55, 7 }
 0x1d8   :  { %v1774_v63 = vmul.f32 %v1742_v46, %v1710_v15  ;;  %v1709_v61 = vsel %vm1692_vm14, %v1676_v12, %v1431_v48  ;;  %v1904_v26 = vadd.f32 %v9447_v41, %v1903_v11  ;;  %1452 = vrot.lane.b32.xlu1 %v569_v5, %s7692_s2  ;;  %v308_v15 = vsel %vm305_vm1, %v301_v43, %v302_v0 }
 0x1d9   :  { %v9480_v21 = vmax.f32 %v1912_v13, 0.0  ;;  %v1773_v9 = vmul.f32 %v1741_v33, %v1709_v61  ;;  %1450 = vrot.lane.b32.xlu0 %v570_v8, %s7692_s2  ;;  %v9495_v8 = vmax.f32 %v1909_v42, 0.0  ;;  %v309_v61 = vsel %vm305_vm1, %v300_v59, %v301_v43 }
 0x1da   :  { %v9486_v45 = vmax.f32 %v1904_v26, 0.0  ;;  %v1437_v5 = vpop.permute.xlu1 %1436  ;;  %v306_v59 = vsel %vm305_vm1, %v303_v44, %v304_v18  ;;  %v367_v18 = vrot.slane %v9373_v56, 1 }
 0x1db   :  { %15038 = vst [vmem:[#allocation12_spill] sm:$0xff] %v9480_v21  ;;  %v1797_v20 = vpack.c.bf16 %v1774_v63, %v1773_v9  ;;  %v1712_v57 = vsel %vm1692_vm14, %v1679_v29, %v1437_v5  ;;  %v1435_v46 = vpop.permute.xlu0 %1434  ;;  %v2190_v52 = vrot.slane %v9480_v21, 1  ;;  %v14931_v6 = vrot.slane %v9480_v21, 2 }
 0x1dc   :  { %v1776_v37 = vmul.f32 %v1744_v35, %v1712_v57  ;;  %v1711_v54 = vsel %vm1692_vm14, %v1678_v47, %v1435_v46  ;;  %688 = vrot.lane.b32.xlu1 %v243_v22, %s7686_s21  ;;  %v2124_v58 = vrot.slane %v9486_v45, 7  ;;  %v2125_v10 = vrot.slane %v9495_v8, 7 }
 0x1dd   :  { %v1775_v40 = vmul.f32 %v1743_v60, %v1711_v54  ;;  %686 = vrot.lane.b32.xlu0 %v244_v25, %s7686_s21  ;;  %7345 = vmatprep.mubr.msk.bf16.mxu0 %vm1813_vm15, %v1797_v20  ;;  %v2189_v42 = vrot.slane %v9495_v8, 1  ;;  %v14929_v13 = vrot.slane %v9480_v21, 3  ;;  %v14932_v48 = vrot.slane %v9495_v8, 2  ;;  %v9605_v20 = vld [vmem:[%s15037_s1 + $0xf8] sm:$0xff] }
 0x1de   :  { %v9512_v22 = vpop.permute.xlu1 %672  ;;  %v14930_v17 = vrot.slane %v9495_v8, 3  ;;  %v9540_v11 = vsel %vm305_vm1, %v2124_v58, %v2125_v10  ;;  %v307_v35 = vsel %vm305_vm1, %v302_v0, %v303_v44  ;;  %v368_v60 = vrot.slane %v9402_v55, 1 }
 0x1df   :  { %v1798_v33 = vpack.c.bf16 %v1776_v37, %v1775_v40  ;;  %v9521_v12 = vpop.permute.xlu0 %670  ;;  %v9548_v51 = vsel %vm370_vm2, %v2189_v42, %v2190_v52  ;;  %v9562_v26 = vsel %vm435_vm4, %v14932_v48, %v14931_v6  ;;  %v369_v46 = vrot.slane %v9605_v20, 1 }
 0x1e0   :  { %692 = vrot.lane.b32.xlu1 %v241_v19, %s7686_s21  ;;  %v9572_v28 = vsel %vm500_vm5, %v14930_v17, %v14929_v13  ;;  %v372_v57 = vsel %vm370_vm2, %v367_v18, %v368_v60  ;;  %v373_v54 = vsel %vm370_vm2, %v366_v14, %v367_v18  ;;  %v432_v40 = vrot.slane %v9373_v56, 2 }
 0x1e1   :  { %690 = vrot.lane.b32.xlu0 %v242_v53, %s7686_s21  ;;  %7346 = vmatmul.mubr.msk.bf16.gmra.mrb[16].mxu0 %vm1813_vm15, %v1798_v33  ;;  %v402_v0 = vsel %vm370_vm2, %v369_v46, %v338_v27  ;;  %v433_v19 = vrot.slane %v9402_v55, 2  ;;  %v371_v14 = vsel %vm370_vm2, %v368_v60, %v369_v46  ;;  %v434_v27 = vrot.slane %v9605_v20, 2 }
 0x1e2   :  { %v9550_v63 = vpop.permute.xlu1 %676  ;;  %v497_v60 = vrot.slane %v9373_v56, 3  ;;  %v164_v13 = vrot.slane %v8948_v34, 5 }
 0x1e3   :  { %v9564_v31 = vpop.permute.xlu0 %674 }
 0x1e4   :  { %816 = vrot.lane.b32.xlu1 %v308_v15, %s7687_s25  ;;  %v437_v15 = vsel %vm435_vm4, %v432_v40, %v433_v19 }
 0x1e5   :  { %814 = vrot.lane.b32.xlu0 %v309_v61, %s7687_s25  ;;  %v438_v61 = vsel %vm435_vm4, %v431_v3, %v432_v40  ;;  %v499_v40 = vrot.slane %v9605_v20, 3 }
 0x1e6   :  { %v9580_v9 = vpop.permute.xlu1 %800 }
 0x1e7   :  { %v9584_v36 = vpop.permute.xlu0 %798 }
 0x1e8   :  { %820 = vrot.lane.b32.xlu1 %v306_v59, %s7687_s25 }
 0x1e9   :  { %818 = vrot.lane.b32.xlu0 %v307_v35, %s7687_s25  ;;  %v15039_v35 = vrot.slane %v7877_v4, 2 }
 0x1ea   :  { %v9588_v29 = vpop.permute.xlu1 %804 }
 0x1eb   :  { %v9590_v5 = vpop.permute.xlu0 %802  ;;  %v467_v18 = vsel %vm435_vm4, %v434_v27, %v15039_v35 }
 0x1ec   :  { %944 = vrot.lane.b32.xlu1 %v9373_v56, %s7688_s26 }
 0x1ed   :  { %942 = vrot.lane.b32.xlu0 %v9291_v49, %s7688_s26 }
 0x1ee   :  { %v9598_v25 = vpop.permute.xlu1 %928 }
 0x1ef   :  { %v9600_v47 = vpop.permute.xlu0 %926 }
 0x1f0   :  { %948 = vrot.lane.b32.xlu1 %v9605_v20, %s7688_s26 }
 0x1f1   :  { %946 = vrot.lane.b32.xlu0 %v9402_v55, %s7688_s26 }
 0x1f2   :  { %v9614_v37 = vpop.permute.xlu1 %932 }
 0x1f3   :  { %v9620_v43 = vpop.permute.xlu0 %930 }
 0x1f4   :  { %1072 = vrot.lane.b32.xlu1 %v372_v57, %s7689_s29  ;;  %v498_v57 = vrot.slane %v9402_v55, 3 }
 0x1f5   :  { %1070 = vrot.lane.b32.xlu0 %v373_v54, %s7689_s29  ;;  %v436_v54 = vsel %vm435_vm4, %v433_v19, %v434_v27  ;;  %v503_v19 = vsel %vm500_vm5, %v496_v23, %v497_v60  ;;  %v1901_v27 = vadd.f32 %v9447_v41, %v9458_v24  ;;  %v562_v23 = vrot.slane %v9373_v56, 4 }
 0x1f6   :  { %v9630_v53 = vpop.permute.xlu1 %1056 }
 0x1f7   :  { %v9634_v33 = vpop.permute.xlu0 %1054  ;;  %v9693_v6 = vmax.f32 %v1901_v27, 0.0  ;;  %v15041_v27 = vrot.slane %v7877_v4, 4 }
 0x1f8   :  { %1076 = vrot.lane.b32.xlu1 %v402_v0, %s7689_s29  ;;  %v502_v0 = vsel %vm500_vm5, %v497_v60, %v498_v57  ;;  %v563_v60 = vrot.slane %v9402_v55, 4 }
 0x1f9   :  { %1074 = vrot.lane.b32.xlu0 %v371_v14, %s7689_s29  ;;  %v7583_v14 = vld [vmem:[%s15037_s1 + $0xa0] sm:$0xff] }
 0x1fa   :  { %v9641_v44 = vpop.permute.xlu1 %1060  ;;  %v567_v30 = vsel %vm565_vm7, %v562_v23, %v563_v60 }
 0x1fb   :  { %v9647_v59 = vpop.permute.xlu0 %1058 }
 0x1fc   :  { %1200 = vrot.lane.b32.xlu1 %v437_v15, %s7690_s3  ;;  %v161_v15 = vrot.slane %v7583_v14, 5 }
 0x1fd   :  { %1198 = vrot.lane.b32.xlu0 %v438_v61, %s7690_s3  ;;  %v162_v61 = vrot.slane %v8872_v62, 5  ;;  %v15040_v62 = vrot.slane %v7877_v4, 3 }
 0x1fe   :  { %v1185_v46 = vpop.permute.xlu1 %1184 }
 0x1ff   :  { %v1183_v3 = vpop.permute.xlu0 %1182  ;;  %v532_v14 = vsel %vm500_vm5, %v499_v40, %v15040_v62  ;;  %v186_v24 = vsel %vm175_vm3, %v161_v15, %v162_v61 }
 0x200   :  { %1204 = vrot.lane.b32.xlu1 %v467_v18, %s7690_s3 }
 0x201   :  { %1202 = vrot.lane.b32.xlu0 %v436_v54, %s7690_s3  ;;  %v163_v54 = vrot.slane %v8909_v38, 5  ;;  %v501_v38 = vsel %vm500_vm5, %v498_v57, %v499_v40  ;;  %v1516_v57 = vsel %vm1494_vm8, %v186_v24, %v9512_v22  ;;  %s7693_s3 = smov 20  }
 0x202   :  { %v9668_v35 = vpop.permute.xlu1 %1188 }
 0x203   :  { %v9676_v18 = vpop.permute.xlu0 %1186  ;;  %v184_v48 = vsel %vm175_vm3, %v163_v54, %v164_v13 }
 0x204   :  { %1328 = vrot.lane.b32.xlu1 %v502_v0, %s7691_s20  ;;  %v564_v0 = vrot.slane %v9605_v20, 4  ;;  %v185_v20 = vsel %vm175_vm3, %v162_v61, %v163_v54 }
 0x205   :  { %1326 = vrot.lane.b32.xlu0 %v503_v19, %s7691_s20  ;;  %v187_v19 = vsel %vm175_vm3, %v160_v39, %v161_v15  ;;  %v568_v39 = vsel %vm565_vm7, %v561_v32, %v562_v23  ;;  %v1549_v15 = vsel %vm1527_vm9, %v1516_v57, %v9580_v9  ;;  %v14933_v9 = vrot.slane %v9693_v6, 7 }
 0x206   :  { %v1313_v17 = vpop.permute.xlu1 %1312  ;;  %v1515_v40 = vsel %vm1494_vm8, %v187_v19, %v9521_v12  ;;  %v597_v61 = vsel %vm565_vm7, %v564_v0, %v15041_v27  ;;  %v566_v54 = vsel %vm565_vm7, %v563_v60, %v564_v0  ;;  %v1582_v12 = vsel %vm1560_vm10, %v1549_v15, %v9598_v25 }
 0x207   :  { %v1311_v62 = vpop.permute.xlu0 %1310  ;;  %v1548_v32 = vsel %vm1527_vm9, %v1515_v40, %v9584_v36  ;;  %v1517_v4 = vsel %vm1494_vm8, %v185_v20, %v9564_v31  ;;  %v1745_v20 = vld [vmem:[#allocation2 + $0xa0] sm:$0xff]  ;;  %vm3085_vm7 = vcmask 490496  }
 0x208   :  { %1332 = vrot.lane.b32.xlu1 %v532_v14, %s7691_s20  ;;  %v1518_v14 = vsel %vm1494_vm8, %v184_v48, %v9550_v63  ;;  %v1581_v60 = vsel %vm1560_vm10, %v1548_v32, %v9600_v47  ;;  %v1615_v48 = vsel %vm1593_vm11, %v1582_v12, %v9630_v53  ;;  %v1550_v36 = vsel %vm1527_vm9, %v1517_v4, %v9590_v5  ;;  %v1748_v32 = vld [vmem:[#allocation2 + $0xb8] sm:$0xff] }
 0x209   :  { %1330 = vrot.lane.b32.xlu0 %v501_v38, %s7691_s20  ;;  %v1551_v24 = vsel %vm1527_vm9, %v1518_v14, %v9588_v29  ;;  %v1614_v31 = vsel %vm1593_vm11, %v1581_v60, %v9634_v33  ;;  %v1648_v29 = vsel %vm1626_vm12, %v1615_v48, %v1185_v46  ;;  %v1746_v38 = vld [vmem:[#allocation2 + $0xa8] sm:$0xff]  ;;  %v1583_v53 = vsel %vm1560_vm10, %v1550_v36, %v9620_v43  ;;  %v1747_v48 = vld [vmem:[#allocation2 + $0xb0] sm:$0xff]  ;;  %s7694_s20 = smov 40  }
 0x20a   :  { %v1317_v22 = vpop.permute.xlu1 %1316  ;;  %v1584_v25 = vsel %vm1560_vm10, %v1551_v24, %v9614_v37  ;;  %v1647_v0 = vsel %vm1626_vm12, %v1614_v31, %v1183_v3  ;;  %v1681_v19 = vsel %vm1659_vm13, %v1648_v29, %v1313_v17  ;;  %v2126_v12 = vrot.slane %v9480_v21, 7 }
 0x20b   :  { %v1315_v23 = vpop.permute.xlu0 %1314  ;;  %v1617_v33 = vsel %vm1593_vm11, %v1584_v25, %v9641_v44  ;;  %v1680_v46 = vsel %vm1659_vm13, %v1647_v0, %v1311_v62  ;;  %v1616_v44 = vsel %vm1593_vm11, %v1583_v53, %v9647_v59  ;;  %v2185_v59 = vsel %vm305_vm1, %v14933_v9, %v2124_v58 }
 0x20c   :  { %v7335_v63 = vpop.f32.mrb[4].mxu0  ;;  %1456 = vrot.lane.b32.xlu1 %v567_v30, %s7692_s2  ;;  %v1650_v62 = vsel %vm1626_vm12, %v1617_v33, %v9668_v35  ;;  %v1649_v4 = vsel %vm1626_vm12, %v1616_v44, %v9676_v18  ;;  %v2183_v0 = vsel %vm305_vm1, %v2125_v10, %v2126_v12 }
 0x20d   :  { %1454 = vrot.lane.b32.xlu0 %v568_v39, %s7692_s2  ;;  %v1916_v47 = vpop.f32.mrb[5].mxu0  ;;  %v1925_v30 = vadd.f32 %v7335_v63, %v9447_v41  ;;  %v1683_v24 = vsel %vm1659_vm13, %v1650_v62, %v1317_v22  ;;  %v1682_v35 = vsel %vm1659_vm13, %v1649_v4, %v1315_v23 }
 0x20e   :  { %v1917_v5 = vadd.f32 %v9447_v41, %v1916_v47  ;;  %v7336_v57 = vpop.f32.mrb[6].mxu0  ;;  %v1441_v37 = vpop.permute.xlu1 %1440 }
 0x20f   :  { %v1714_v39 = vsel %vm1692_vm14, %v1681_v19, %v1441_v37  ;;  %v1439_v40 = vpop.permute.xlu0 %1438  ;;  %v1919_v43 = vpop.f32.mrb[7].mxu0  ;;  %v1928_v3 = vadd.f32 %v7336_v57, %v9447_v41  ;;  %v9784_v22 = vmax.f32 %v1925_v30, 0.0 }
 0x210   :  { %v1778_v15 = vmul.f32 %v1746_v38, %v1714_v39  ;;  %v1713_v17 = vsel %vm1692_vm14, %v1680_v46, %v1439_v40  ;;  %v1920_v27 = vadd.f32 %v9447_v41, %v1919_v43  ;;  %1460 = vrot.lane.b32.xlu1 %v597_v61, %s7692_s2  ;;  %v9772_v60 = vmax.f32 %v1917_v5, 0.0 }
 0x211   :  { %v1777_v14 = vmul.f32 %v1745_v20, %v1713_v17  ;;  %1458 = vrot.lane.b32.xlu0 %v566_v54, %s7692_s2  ;;  %v9786_v25 = vmax.f32 %v1928_v3, 0.0  ;;  %v2129_v57 = vrot.slane %v9784_v22, 7  ;;  %v2193_v40 = vrot.slane %v9784_v22, 1  ;;  %s7695_s2 = smov 60  }
 0x212   :  { %v1445_v61 = vpop.permute.xlu1 %1444  ;;  %v9781_v63 = vmax.f32 %v1920_v27, 0.0  ;;  %v2127_v23 = vrot.slane %v9772_v60, 7  ;;  %v2191_v20 = vrot.slane %v9772_v60, 1  ;;  %v2255_v39 = vrot.slane %v9772_v60, 2 }
 0x213   :  { %v1799_v54 = vpack.c.bf16 %v1778_v15, %v1777_v14  ;;  %v1716_v18 = vsel %vm1692_vm14, %v1683_v24, %v1445_v61  ;;  %v1443_v36 = vpop.permute.xlu0 %1442  ;;  %15043 = vst [vmem:[#allocation14_spill] sm:$0xff] %v9786_v25  ;;  %v14943_v37 = vrot.slane %v9786_v25, 1  ;;  %v14938_v46 = vrot.slane %v9786_v25, 2 }
 0x214   :  { %15042 = vst [vmem:[#allocation13_spill] sm:$0xff] %v9781_v63  ;;  %v1780_v31 = vmul.f32 %v1748_v32, %v1716_v18  ;;  %v1715_v29 = vsel %vm1692_vm14, %v1682_v35, %v1443_v36  ;;  %2413 = vrot.lane.b32.xlu1 %v2185_v59, %s7693_s3  ;;  %v2128_v19 = vrot.slane %v9781_v63, 7  ;;  %v14944_v5 = vrot.slane %v9781_v63, 1 }
 0x215   :  { %v1779_v47 = vmul.f32 %v1747_v48, %v1715_v29  ;;  %7349 = vmatprep.mubr.msk.bf16.mxu0 %vm1813_vm15, %v1799_v54  ;;  %v14940_v33 = vrot.slane %v9781_v63, 2  ;;  %v14936_v10 = vrot.slane %v9781_v63, 3  ;;  %v14934_v43 = vrot.slane %v9786_v25, 3 }
 0x216   :  { %v9791_v58 = vpop.permute.xlu1 %680  ;;  %v9819_v3 = vsel %vm305_vm1, %v2126_v12, %v2127_v23  ;;  %v2319_v17 = vrot.slane %v9772_v60, 3  ;;  %v14941_v27 = vrot.slane %v9784_v22, 2  ;;  %v9831_v44 = vsel %vm305_vm1, %v2128_v19, %v2129_v57 }
 0x217   :  { %v1800_v38 = vpack.c.bf16 %v1780_v31, %v1779_v47  ;;  %v9794_v53 = vpop.permute.xlu0 %678  ;;  %v9837_v62 = vsel %vm370_vm2, %v2191_v20, %v14944_v5  ;;  %v14937_v14 = vrot.slane %v9784_v22, 3  ;;  %v9848_v32 = vsel %vm370_vm2, %v2193_v40, %v14943_v37 }
 0x218   :  { %2417 = vrot.lane.b32.xlu1 %v2183_v0, %s7693_s3  ;;  %v9854_v12 = vsel %vm435_vm4, %v2255_v39, %v14940_v33  ;;  %v9862_v4 = vsel %vm435_vm4, %v14941_v27, %v14938_v46  ;;  %v9868_v24 = vsel %vm500_vm5, %v2319_v17, %v14936_v10  ;;  %v14935_v35 = vrot.slane %v9486_v45, 1 }
 0x219   :  { %7350 = vmatmul.mubr.msk.bf16.gmra.mrb[20].mxu0 %vm1813_vm15, %v1800_v38  ;;  %v9876_v48 = vsel %vm500_vm5, %v14937_v14, %v14934_v43  ;;  %v2246_v47 = vsel %vm370_vm2, %v2190_v52, %v2191_v20  ;;  %v14939_v38 = vrot.slane %v9486_v45, 2  ;;  %v15044_v43 = vrot.slane %v9495_v8, 2 }
 0x21a   :  { %v9810_v30 = vpop.permute.xlu1 %684  ;;  %v2248_v36 = vsel %vm370_vm2, %v14935_v35, %v2189_v42  ;;  %v15045_v52 = vrot.slane %v9480_v21, 2  ;;  %v15046_v46 = vrot.slane %v9495_v8, 3  ;;  %v166_v27 = vrot.slane %v9124_v16, 5 }
 0x21b   :  { %v9821_v15 = vpop.permute.xlu0 %682  ;;  %v2312_v42 = vsel %vm435_vm4, %v14939_v38, %v15044_v43 }
 0x21c   :  { %2541 = vrot.lane.b32.xlu1 %v9486_v45, %s7694_s20  ;;  %v2310_v20 = vsel %vm435_vm4, %v15045_v52, %v2255_v39  ;;  %v15047_v39 = vrot.slane %v9480_v21, 3 }
 0x21e   :  { %v809_v61 = vpop.permute.xlu1 %808  ;;  %v2374_v52 = vsel %vm500_vm5, %v15047_v39, %v2319_v17  ;;  %v14946_v17 = vrot.slane %v9786_v25, 7  ;;  %v167_v39 = vrot.slane %v9161_v2, 5 }
 0x21f   :  { %v807_v59 = vpop.permute.xlu0 %806 }
 0x220   :  { %2545 = vrot.lane.b32.xlu1 %v9480_v21, %s7694_s20  ;;  %v2179_v2 = vsel %vm305_vm1, %v2129_v57, %v14946_v17 }
 0x222   :  { %v813_v54 = vpop.permute.xlu1 %812 }
 0x223   :  { %v811_v18 = vpop.permute.xlu0 %810 }
 0x224   :  { %2669 = vrot.lane.b32.xlu1 %v2248_v36, %s7695_s2 }
 0x226   :  { %v937_v31 = vpop.permute.xlu1 %936 }
 0x227   :  { %v935_v29 = vpop.permute.xlu0 %934 }
 0x228   :  { %2673 = vrot.lane.b32.xlu1 %v2246_v47, %s7695_s2  ;;  %v14942_v47 = vrot.slane %v9486_v45, 3 }
 0x22a   :  { %v941_v0 = vpop.permute.xlu1 %940  ;;  %v2376_v43 = vsel %vm500_vm5, %v14942_v47, %v15046_v46 }
 0x22b   :  { %v939_v9 = vpop.permute.xlu0 %938 }
 0x22c   :  { %2797 = vrot.lane.b32.xlu1 %v2312_v42, %s7696_s22 }
 0x22e   :  { %v1065_v36 = vpop.permute.xlu1 %1064 }
 0x22f   :  { %v1063_v35 = vpop.permute.xlu0 %1062 }
 0x230   :  { %2801 = vrot.lane.b32.xlu1 %v2310_v20, %s7696_s22  ;;  %v7584_v20 = vld [vmem:[%s15037_s1 + $0xc0] sm:$0xff] }
 0x231   :  { %v165_v33 = vrot.slane %v7584_v20, 5 }
 0x232   :  { %v1069_v10 = vpop.permute.xlu1 %1068 }
 0x233   :  { %v9907_v14 = vpop.permute.xlu0 %1066  ;;  %v182_v16 = vsel %vm175_vm3, %v165_v33, %v166_v27  ;;  %v183_v37 = vsel %vm175_vm3, %v164_v13, %v165_v33 }
 0x234   :  { %2925 = vrot.lane.b32.xlu1 %v2376_v43, %s7697_s17  ;;  %v2181_v43 = vsel %vm305_vm1, %v2127_v23, %v2128_v19  ;;  %v181_v19 = vsel %vm175_vm3, %v166_v27, %v167_v39  ;;  %v1520_v34 = vsel %vm1494_vm8, %v182_v16, %v9791_v58  ;;  %v1519_v13 = vsel %vm1494_vm8, %v183_v37, %v9794_v53 }
 0x235   :  { %v1553_v33 = vsel %vm1527_vm9, %v1520_v34, %v809_v61  ;;  %v1552_v17 = vsel %vm1527_vm9, %v1519_v13, %v807_v59 }
 0x236   :  { %v1193_v42 = vpop.permute.xlu1 %1192  ;;  %v1586_v27 = vsel %vm1560_vm10, %v1553_v33, %v937_v31  ;;  %v1585_v53 = vsel %vm1560_vm10, %v1552_v17, %v935_v29 }
 0x237   :  { %v1191_v38 = vpop.permute.xlu0 %1190  ;;  %v1619_v37 = vsel %vm1593_vm11, %v1586_v27, %v1065_v36  ;;  %v1618_v59 = vsel %vm1593_vm11, %v1585_v53, %v1063_v35 }
 0x238   :  { %2929 = vrot.lane.b32.xlu1 %v2374_v52, %s7697_s17  ;;  %v14945_v52 = vrot.slane %v9200_v50, 5  ;;  %v1652_v31 = vsel %vm1626_vm12, %v1619_v37, %v1193_v42  ;;  %v1651_v29 = vsel %vm1626_vm12, %v1618_v59, %v1191_v38  ;;  %v15049_v59 = vrot.slane %v9781_v63, 1 }
 0x23a   :  { %v1197_v46 = vpop.permute.xlu1 %1196  ;;  %v180_v23 = vsel %vm175_vm3, %v167_v39, %v14945_v52  ;;  %v1521_v52 = vsel %vm1494_vm8, %v181_v19, %v9821_v15  ;;  %v1749_v19 = vld [vmem:[#allocation2 + $0xc0] sm:$0xff] }
 0x23b   :  { %v1195_v47 = vpop.permute.xlu0 %1194  ;;  %v1522_v57 = vsel %vm1494_vm8, %v180_v23, %v9810_v30  ;;  %v1554_v58 = vsel %vm1527_vm9, %v1521_v52, %v811_v18 }
 0x23c   :  { %2421 = vrot.lane.b32.xlu1 %v2181_v43, %s7693_s3  ;;  %v1587_v15 = vsel %vm1560_vm10, %v1554_v58, %v939_v9 }
 0x23e   :  { %v1321_v20 = vpop.permute.xlu1 %1320 }
 0x23f   :  { %v1319_v5 = vpop.permute.xlu0 %1318  ;;  %v1685_v36 = vsel %vm1659_vm13, %v1652_v31, %v1321_v20  ;;  %v2244_v31 = vsel %vm370_vm2, %v15049_v59, %v2193_v40 }
 0x240   :  { %2425 = vrot.lane.b32.xlu1 %v2179_v2, %s7693_s3  ;;  %v1555_v2 = vsel %vm1527_vm9, %v1522_v57, %v813_v54  ;;  %v1750_v54 = vld [vmem:[#allocation2 + $0xc8] sm:$0xff] }
 0x241   :  { %v1588_v30 = vsel %vm1560_vm10, %v1555_v2, %v941_v0  ;;  %v1684_v0 = vsel %vm1659_vm13, %v1651_v29, %v1319_v5  ;;  %v1620_v5 = vsel %vm1593_vm11, %v1587_v15, %v9907_v14  ;;  %v1752_v2 = vld [vmem:[#allocation2 + $0xd8] sm:$0xff] }
 0x242   :  { %v1325_v43 = vpop.permute.xlu1 %1324  ;;  %v1621_v18 = vsel %vm1593_vm11, %v1588_v30, %v1069_v10  ;;  %v1653_v58 = vsel %vm1626_vm12, %v1620_v5, %v1195_v47  ;;  %v1751_v30 = vld [vmem:[#allocation2 + $0xd0] sm:$0xff] }
 0x243   :  { %v1323_v39 = vpop.permute.xlu0 %1322  ;;  %v1654_v57 = vsel %vm1626_vm12, %v1621_v18, %v1197_v46 }
 0x244   :  { %v7339_v61 = vpop.f32.mrb[8].mxu0  ;;  %2549 = vrot.lane.b32.xlu1 %v9781_v63, %s7694_s20  ;;  %v1687_v53 = vsel %vm1659_vm13, %v1654_v57, %v1325_v43  ;;  %v1686_v14 = vsel %vm1659_vm13, %v1653_v58, %v1323_v39 }
 0x245   :  { %v1932_v16 = vpop.f32.mrb[9].mxu0  ;;  %v1941_v9 = vadd.f32 %v7339_v61, %v9447_v41 }
 0x246   :  { %v1933_v17 = vadd.f32 %v9447_v41, %v1932_v16  ;;  %v7340_v52 = vpop.f32.mrb[10].mxu0  ;;  %v1449_v23 = vpop.permute.xlu1 %1448 }
 0x247   :  { %v1944_v35 = vadd.f32 %v7340_v52, %v9447_v41  ;;  %v1718_v42 = vsel %vm1692_vm14, %v1685_v36, %v1449_v23  ;;  %v1447_v34 = vpop.permute.xlu0 %1446  ;;  %v1935_v13 = vpop.f32.mrb[11].mxu0  ;;  %v10005_v43 = vmax.f32 %v1941_v9, 0.0 }
 0x248   :  { %v9983_v10 = vmax.f32 %v1933_v17, 0.0  ;;  %v1782_v38 = vmul.f32 %v1750_v54, %v1718_v42  ;;  %v1717_v20 = vsel %vm1692_vm14, %v1684_v0, %v1447_v34  ;;  %v1936_v33 = vadd.f32 %v9447_v41, %v1935_v13  ;;  %2553 = vrot.lane.b32.xlu1 %v9786_v25, %s7694_s20 }
 0x249   :  { %v1781_v27 = vmul.f32 %v1749_v19, %v1717_v20  ;;  %v10007_v54 = vmax.f32 %v1944_v35, 0.0  ;;  %v15051_v19 = vrot.slane %v9786_v25, 1  ;;  %v2133_v35 = vrot.slane %v10005_v43, 7 }
 0x24a   :  { %v9994_v37 = vmax.f32 %v1936_v33, 0.0  ;;  %v1453_v61 = vpop.permute.xlu1 %1452  ;;  %v2195_v47 = vrot.slane %v9983_v10, 1  ;;  %v2131_v39 = vrot.slane %v9983_v10, 7  ;;  %v15052_v13 = vrot.slane %v9784_v22, 2 }
 0x24b   :  { %v1801_v46 = vpack.c.bf16 %v1782_v38, %v1781_v27  ;;  %v1720_v15 = vsel %vm1692_vm14, %v1687_v53, %v1453_v61  ;;  %v1451_v16 = vpop.permute.xlu0 %1450  ;;  %15050 = vst [vmem:[#allocation16_spill] sm:$0xff] %v10007_v54  ;;  %v14953_v42 = vrot.slane %v10007_v54, 1  ;;  %v15053_v38 = vrot.slane %v9781_v63, 2 }
 0x24c   :  { %15048 = vst [vmem:[#allocation15_spill] sm:$0xff] %v9994_v37  ;;  %v1784_v18 = vmul.f32 %v1752_v2, %v1720_v15  ;;  %v1719_v29 = vsel %vm1692_vm14, %v1686_v14, %v1451_v16  ;;  %2677 = vrot.lane.b32.xlu1 %v2244_v31, %s7695_s2  ;;  %v2132_v17 = vrot.slane %v9994_v37, 7  ;;  %v2242_v0 = vsel %vm370_vm2, %v15051_v19, %v2195_v47 }
 0x24d   :  { %v1783_v36 = vmul.f32 %v1751_v30, %v1719_v29  ;;  %7353 = vmatprep.mubr.msk.bf16.mxu0 %vm1813_vm15, %v1801_v46  ;;  %v2196_v9 = vrot.slane %v9994_v37, 1  ;;  %v14951_v34 = vrot.slane %v9994_v37, 2  ;;  %v2308_v20 = vsel %vm435_vm4, %v15053_v38, %v15052_v13 }
 0x24e   :  { %v10012_v40 = vpop.permute.xlu1 %688  ;;  %v14948_v33 = vrot.slane %v10007_v54, 2  ;;  %v14947_v5 = vrot.slane %v9994_v37, 3  ;;  %v14949_v57 = vrot.slane %v10007_v54, 3  ;;  %v2259_v2 = vrot.slane %v9983_v10, 2 }
 0x24f   :  { %v1802_v52 = vpack.c.bf16 %v1784_v18, %v1783_v36  ;;  %v10016_v23 = vpop.permute.xlu0 %686  ;;  %v2197_v58 = vrot.slane %v10005_v43, 1  ;;  %v15054_v53 = vrot.slane %v9786_v25, 7  ;;  %v10047_v30 = vsel %vm305_vm1, %v2132_v17, %v2133_v35 }
 0x250   :  { %2681 = vrot.lane.b32.xlu1 %v2242_v0, %s7695_s2  ;;  %v2323_v31 = vrot.slane %v9983_v10, 3  ;;  %v14952_v14 = vrot.slane %v10005_v43, 2  ;;  %v14950_v46 = vrot.slane %v10005_v43, 3  ;;  %v10054_v15 = vsel %vm370_vm2, %v2195_v47, %v2196_v9 }
 0x251   :  { %7354 = vmatmul.mubr.msk.bf16.gmra.mrb[24].mxu0 %vm1813_vm15, %v1802_v52  ;;  %v10043_v61 = vsel %vm305_vm1, %v15054_v53, %v2131_v39  ;;  %v10061_v16 = vsel %vm370_vm2, %v2197_v58, %v14953_v42  ;;  %v10067_v18 = vsel %vm435_vm4, %v2259_v2, %v14951_v34  ;;  %v15059_v0 = vrot.slane %v9786_v25, 2 }
 0x252   :  { %v693_v27 = vpop.permute.xlu1 %692  ;;  %15055 = vst [vmem:[#allocation17_spill] sm:$0xff] %v10067_v18  ;;  %v10075_v47 = vsel %vm435_vm4, %v14952_v14, %v14948_v33  ;;  %v10081_v29 = vsel %vm500_vm5, %v2323_v31, %v14947_v5  ;;  %v10089_v36 = vsel %vm500_vm5, %v14950_v46, %v14949_v57  ;;  %v15060_v53 = vrot.slane %v9784_v22, 3 }
 0x253   :  { %v691_v59 = vpop.permute.xlu0 %690  ;;  %15056 = vst [vmem:[#allocation18_spill] sm:$0xff] %v10075_v47  ;;  %15057 = vst [vmem:[#allocation19_spill] sm:$0xff] %v10081_v29  ;;  %v2306_v13 = vsel %vm435_vm4, %v15059_v0, %v2259_v2  ;;  %v15061_v5 = vrot.slane %v9781_v63, 3  ;;  %v15062_v34 = vrot.slane %v9786_v25, 3  ;;  %v2177_v14 = vsel %vm305_vm1, %v2131_v39, %v2132_v17 }
 0x254   :  { %2805 = vrot.lane.b32.xlu1 %v2308_v20, %s7696_s22  ;;  %15058 = vst [vmem:[#allocation20_spill] sm:$0xff] %v10089_v36  ;;  %v14957_v42 = vrot.slane %v10007_v54, 7  ;;  %v169_v17 = vrot.slane %v9291_v49, 5  ;;  %v171_v63 = vrot.slane %v9402_v55, 5  ;;  %v15063_v36 = vrot.slane %v9200_v50, 5 }
 0x255   :  { %v2372_v33 = vsel %vm500_vm5, %v15061_v5, %v15060_v53  ;;  %v2370_v2 = vsel %vm500_vm5, %v15062_v34, %v2323_v31 }
 0x256   :  { %v817_v52 = vpop.permute.xlu1 %816  ;;  %v2175_v53 = vsel %vm305_vm1, %v2133_v35, %v14957_v42  ;;  %v179_v49 = vsel %vm175_vm3, %v15063_v36, %v169_v17 }
 0x257   :  { %v815_v19 = vpop.permute.xlu0 %814 }
 0x258   :  { %2809 = vrot.lane.b32.xlu1 %v2306_v13, %s7696_s22 }
 0x25a   :  { %v821_v38 = vpop.permute.xlu1 %820 }
 0x25b   :  { %v819_v20 = vpop.permute.xlu0 %818 }
 0x25c   :  { %2933 = vrot.lane.b32.xlu1 %v2372_v33, %s7697_s17 }
 0x25e   :  { %v945_v57 = vpop.permute.xlu1 %944 }
 0x25f   :  { %v943_v46 = vpop.permute.xlu0 %942 }
 0x260   :  { %2937 = vrot.lane.b32.xlu1 %v2370_v2, %s7697_s17 }
 0x262   :  { %v949_v0 = vpop.permute.xlu1 %948 }
 0x263   :  { %v947_v13 = vpop.permute.xlu0 %946 }
 0x264   :  { %2429 = vrot.lane.b32.xlu1 %v2177_v14, %s7693_s3  ;;  %v170_v14 = vrot.slane %v9373_v56, 5  ;;  %v15064_v56 = vrot.slane %v7884_v7, 5 }
 0x266   :  { %v1073_v5 = vpop.permute.xlu1 %1072  ;;  %v178_v42 = vsel %vm175_vm3, %v169_v17, %v170_v14  ;;  %v176_v55 = vsel %vm175_vm3, %v171_v63, %v15064_v56 }
 0x267   :  { %v1071_v33 = vpop.permute.xlu0 %1070  ;;  %v1526_v50 = vsel %vm1494_vm8, %v176_v55, %v693_v27  ;;  %v1753_v55 = vld [vmem:[#allocation2 + $0xe0] sm:$0xff] }
 0x268   :  { %2433 = vrot.lane.b32.xlu1 %v2175_v53, %s7693_s3  ;;  %v2240_v53 = vsel %vm370_vm2, %v2196_v9, %v2197_v58  ;;  %v177_v9 = vsel %vm175_vm3, %v170_v14, %v171_v63  ;;  %v1524_v58 = vsel %vm1494_vm8, %v178_v42, %v10012_v40  ;;  %v1559_v56 = vsel %vm1527_vm9, %v1526_v50, %v821_v38 }
 0x269   :  { %v1557_v47 = vsel %vm1527_vm9, %v1524_v58, %v817_v52  ;;  %v1525_v7 = vsel %vm1494_vm8, %v177_v9, %v691_v59  ;;  %vm3019_vm3 = vcmask 162816  }
 0x26a   :  { %v1077_v34 = vpop.permute.xlu1 %1076  ;;  %v1590_v18 = vsel %vm1560_vm10, %v1557_v47, %v945_v57  ;;  %v1558_v14 = vsel %vm1527_vm9, %v1525_v7, %v819_v20  ;;  %v1754_v57 = vld [vmem:[#allocation2 + $0xe8] sm:$0xff] }
 0x26b   :  { %v1075_v31 = vpop.permute.xlu0 %1074  ;;  %v1623_v42 = vsel %vm1593_vm11, %v1590_v18, %v1073_v5  ;;  %v1591_v52 = vsel %vm1560_vm10, %v1558_v14, %v947_v13 }
 0x26c   :  { %2557 = vrot.lane.b32.xlu1 %v9994_v37, %s7694_s20  ;;  %v1624_v47 = vsel %vm1593_vm11, %v1591_v52, %v1075_v31 }
 0x26e   :  { %v1201_v2 = vpop.permute.xlu1 %1200 }
 0x26f   :  { %v1199_v39 = vpop.permute.xlu0 %1198  ;;  %v1656_v38 = vsel %vm1626_vm12, %v1623_v42, %v1201_v2  ;;  %v1755_v42 = vld [vmem:[#allocation2 + $0xf0] sm:$0xff] }
 0x270   :  { %2561 = vrot.lane.b32.xlu1 %v10007_v54, %s7694_s20 }
 0x272   :  { %v1205_v25 = vpop.permute.xlu1 %1204 }
 0x273   :  { %v1203_v35 = vpop.permute.xlu0 %1202 }
 0x274   :  { %2685 = vrot.lane.b32.xlu1 %v2240_v53, %s7695_s2  ;;  %v1523_v53 = vsel %vm1494_vm8, %v179_v49, %v10016_v23  ;;  %v1592_v23 = vsel %vm1560_vm10, %v1559_v56, %v949_v0  ;;  %v1657_v7 = vsel %vm1626_vm12, %v1624_v47, %v1203_v35  ;;  %v15069_v47 = vrot.slane %v9994_v37, 2 }
 0x275   :  { %v1556_v17 = vsel %vm1527_vm9, %v1523_v53, %v815_v19  ;;  %v1625_v19 = vsel %vm1593_vm11, %v1592_v23, %v1077_v34  ;;  %vm3118_vm8 = vcmask 654336   ;;  %vm3151_vm9 = vcmask 818176  }
 0x276   :  { %v1329_v21 = vpop.permute.xlu1 %1328  ;;  %v1589_v40 = vsel %vm1560_vm10, %v1556_v17, %v943_v46  ;;  %v1658_v50 = vsel %vm1626_vm12, %v1625_v19, %v1205_v25  ;;  %v1756_v17 = vld [vmem:[#allocation2 + $0xf8] sm:$0xff]  ;;  %vm3331_vm10 = vcmask 982016  }
 0x277   :  { %v1327_v29 = vpop.permute.xlu0 %1326  ;;  %v1622_v59 = vsel %vm1593_vm11, %v1589_v40, %v1071_v33  ;;  %v1689_v46 = vsel %vm1659_vm13, %v1656_v38, %v1329_v21  ;;  %vm4659_vm11 = vcmask 1041408  }
 0x278   :  { %v1655_v20 = vsel %vm1626_vm12, %v1622_v59, %v1199_v39  ;;  %vm6840_vm12 = vcmask 261120  }
 0x279   :  { %v1688_v13 = vsel %vm1659_vm13, %v1655_v20, %v1327_v29 }
 0x27a   :  { %v1333_v36 = vpop.permute.xlu1 %1332 }
 0x27b   :  { %v1331_v63 = vpop.permute.xlu0 %1330  ;;  %v1691_v56 = vsel %vm1659_vm13, %v1658_v50, %v1333_v36  ;;  %v15067_v36 = vrot.slane %v10007_v54, 1  ;;  %v15070_v50 = vrot.slane %v10007_v54, 7 }
 0x27c   :  { %v7343_v27 = vpop.f32.mrb[12].mxu0  ;;  %v1690_v14 = vsel %vm1659_vm13, %v1657_v7, %v1331_v63 }
 0x27d   :  { %v1948_v49 = vpop.f32.mrb[13].mxu0  ;;  %v1957_v33 = vadd.f32 %v7343_v27, %v9447_v41 }
 0x27e   :  { %v1949_v0 = vadd.f32 %v9447_v41, %v1948_v49  ;;  %v7344_v18 = vpop.f32.mrb[14].mxu0  ;;  %v1457_v5 = vpop.permute.xlu1 %1456 }
 0x27f   :  { %v1960_v34 = vadd.f32 %v7344_v18, %v9447_v41  ;;  %v1722_v2 = vsel %vm1692_vm14, %v1689_v46, %v1457_v5  ;;  %v1455_v9 = vpop.permute.xlu0 %1454  ;;  %v1951_v58 = vpop.f32.mrb[15].mxu0  ;;  %v10176_v52 = vmax.f32 %v1957_v33, 0.0 }
 0x280   :  { %v10165_v31 = vmax.f32 %v1949_v0, 0.0  ;;  %v1786_v39 = vmul.f32 %v1754_v57, %v1722_v2  ;;  %v1721_v21 = vsel %vm1692_vm14, %v1688_v13, %v1455_v9  ;;  %v1952_v53 = vadd.f32 %v9447_v41, %v1951_v58 }
 0x281   :  { %v1785_v29 = vmul.f32 %v1753_v55, %v1721_v21  ;;  %v10178_v59 = vmax.f32 %v1960_v34, 0.0  ;;  %v15068_v57 = vrot.slane %v10005_v43, 2  ;;  %v2137_v5 = vrot.slane %v10176_v52, 7 }
 0x282   :  { %v10173_v40 = vmax.f32 %v1952_v53, 0.0  ;;  %v1461_v23 = vpop.permute.xlu1 %1460  ;;  %v2199_v27 = vrot.slane %v10165_v31, 1  ;;  %v2135_v46 = vrot.slane %v10165_v31, 7  ;;  %v2263_v33 = vrot.slane %v10165_v31, 2 }
 0x283   :  { %15066 = vst [vmem:[#allocation22_spill] sm:$0xff] %v10178_v59  ;;  %v1803_v41 = vpack.c.bf16 %v1786_v39, %v1785_v29  ;;  %v1724_v25 = vsel %vm1692_vm14, %v1691_v56, %v1461_v23  ;;  %v1459_v35 = vpop.permute.xlu0 %1458  ;;  %v2304_v20 = vsel %vm435_vm4, %v15069_v47, %v15068_v57  ;;  %v2202_v13 = vrot.slane %v10178_v59, 1 }
 0x284   :  { %15065 = vst [vmem:[#allocation21_spill] sm:$0xff] %v10173_v40  ;;  %v1788_v19 = vmul.f32 %v1756_v17, %v1724_v25  ;;  %v1723_v38 = vsel %vm1692_vm14, %v1690_v14, %v1459_v35  ;;  %v2238_v63 = vsel %vm370_vm2, %v15067_v36, %v2199_v27  ;;  %v2136_v0 = vrot.slane %v10173_v40, 7 }
 0x285   :  { %v1787_v49 = vmul.f32 %v1755_v42, %v1723_v38  ;;  %7357 = vmatprep.mubr.msk.bf16.mxu0 %vm1813_vm15, %v1803_v41  ;;  %2689 = vrot.lane.b32.xlu1 %v2238_v63, %s7695_s2  ;;  %v2200_v55 = vrot.slane %v10173_v40, 1  ;;  %v2264_v34 = vrot.slane %v10173_v40, 2  ;;  %v14963_v2 = vrot.slane %v10178_v59, 2 }
 0x286   :  { %v14961_v9 = vrot.slane %v10173_v40, 3  ;;  %v2201_v58 = vrot.slane %v10176_v52, 1  ;;  %v14960_v39 = vrot.slane %v10178_v59, 3  ;;  %v2327_v21 = vrot.slane %v10165_v31, 3 }
 0x287   :  { %v1804_v18 = vpack.c.bf16 %v1788_v19, %v1787_v49  ;;  %v2265_v53 = vrot.slane %v10176_v52, 2  ;;  %v10213_v7 = vsel %vm305_vm1, %v15070_v50, %v2135_v46  ;;  %v10217_v29 = vsel %vm305_vm1, %v2136_v0, %v2137_v5 }
 0x288   :  { %v14962_v17 = vrot.slane %v10176_v52, 3  ;;  %v10222_v56 = vsel %vm370_vm2, %v2199_v27, %v2200_v55  ;;  %v10226_v14 = vsel %vm370_vm2, %v2201_v58, %v2202_v13  ;;  %v15071_v23 = vrot.slane %v10007_v54, 2 }
 0x289   :  { %7358 = vmatmul.mubr.msk.bf16.gmra.mrb[28].mxu0 %vm1813_vm15, %v1804_v18  ;;  %2813 = vrot.lane.b32.xlu1 %v2304_v20, %s7696_s22  ;;  %v10234_v41 = vsel %vm435_vm4, %v2263_v33, %v2264_v34  ;;  %v10240_v25 = vsel %vm435_vm4, %v2265_v53, %v14963_v2  ;;  %v10246_v27 = vsel %vm500_vm5, %v2327_v21, %v14961_v9  ;;  %v15075_v19 = vrot.slane %v10005_v43, 3 }
 0x28a   :  { %v2302_v42 = vsel %vm435_vm4, %v15071_v23, %v2263_v33  ;;  %15072 = vst [vmem:[#allocation23_spill] sm:$0xff] %v10240_v25  ;;  %15073 = vst [vmem:[#allocation24_spill] sm:$0xff] %v10246_v27  ;;  %v10255_v35 = vsel %vm500_vm5, %v14962_v17, %v14960_v39  ;;  %v15076_v38 = vrot.slane %v9994_v37, 3  ;;  %v15077_v63 = vrot.slane %v10007_v54, 3  ;;  %v10286_v33 = vld [vmem:[%s14914_s7] ss:$0 sm:$0xff] }
 0x28b   :  { %15074 = vst [vmem:[#allocation25_spill] sm:$0xff] %v10255_v35  ;;  %v2173_v57 = vsel %vm305_vm1, %v2135_v46, %v2136_v0  ;;  %v2138_v47 = vrot.slane %v10178_v59, 7  ;;  %v2236_v18 = vsel %vm370_vm2, %v2200_v55, %v2201_v58  ;;  %v15091_v37 = vrot.slane %v10178_v59, 2 }
 0x28c   :  { %v2368_v36 = vsel %vm500_vm5, %v15076_v38, %v15075_v19  ;;  %v2366_v49 = vsel %vm500_vm5, %v15077_v63, %v2327_v21 }
 0x28d   :  { %2817 = vrot.lane.b32.xlu1 %v2302_v42, %s7696_s22  ;;  %v2171_v20 = vsel %vm305_vm1, %v2137_v5, %v2138_v47 }
 0x291   :  { %2941 = vrot.lane.b32.xlu1 %v2368_v36, %s7697_s17 }
 0x295   :  { %2945 = vrot.lane.b32.xlu1 %v2366_v49, %s7697_s17 }
 0x299   :  { %2437 = vrot.lane.b32.xlu1 %v2173_v57, %s7693_s3 }
 0x29d   :  { %2441 = vrot.lane.b32.xlu1 %v2171_v20, %s7693_s3 }
 0x2a1   :  { %2565 = vrot.lane.b32.xlu1 %v10173_v40, %s7694_s20 }
 0x2a5   :  { %2569 = vrot.lane.b32.xlu1 %v10178_v59, %s7694_s20 }
 0x2a9   :  { %2693 = vrot.lane.b32.xlu1 %v2236_v18, %s7695_s2 }
 0x2b4   :  { %v7347_v46 = vpop.f32.mrb[16].mxu0 }
 0x2b5   :  { %v1964_v0 = vpop.f32.mrb[17].mxu0  ;;  %v1973_v50 = vadd.f32 %v10286_v33, %v7347_v46 }
 0x2b6   :  { %v1965_v5 = vadd.f32 %v10286_v33, %v1964_v0  ;;  %v7348_v21 = vpop.f32.mrb[18].mxu0  ;;  %v2300_v0 = vsel %vm435_vm4, %v2264_v34, %v2265_v53 }
 0x2b7   :  { %v1976_v23 = vadd.f32 %v10286_v33, %v7348_v21  ;;  %v1967_v42 = vpop.f32.mrb[19].mxu0  ;;  %v10299_v63 = vmax.f32 %v1973_v50, 0.0 }
 0x2b8   :  { %v10291_v19 = vmax.f32 %v1965_v5, 0.0  ;;  %v1968_v55 = vadd.f32 %v10286_v33, %v1967_v42 }
 0x2b9   :  { %v10294_v58 = vmax.f32 %v1976_v23, 0.0  ;;  %15081 = vst [vmem:[#allocation29_spill] sm:$0xff] %v10299_v63  ;;  %v2141_v50 = vrot.slane %v10299_v63, 7  ;;  %v2269_v39 = vrot.slane %v10299_v63, 2 }
 0x2ba   :  { %15078 = vst [vmem:[#allocation26_spill] sm:$0xff] %v10291_v19  ;;  %v10296_v38 = vmax.f32 %v1968_v55, 0.0  ;;  %v2203_v36 = vrot.slane %v10291_v19, 1  ;;  %v2139_v57 = vrot.slane %v10291_v19, 7  ;;  %v2267_v55 = vrot.slane %v10291_v19, 2 }
 0x2bb   :  { %15079 = vst [vmem:[#allocation27_spill] sm:$0xff] %v10294_v58  ;;  %v2206_v46 = vrot.slane %v10294_v58, 1  ;;  %v14967_v21 = vrot.slane %v10294_v58, 2  ;;  %v14969_v42 = vrot.slane %v10294_v58, 3 }
 0x2bc   :  { %15080 = vst [vmem:[#allocation28_spill] sm:$0xff] %v10296_v38  ;;  %v2234_v49 = vsel %vm370_vm2, %v2202_v13, %v2203_v36  ;;  %v2140_v20 = vrot.slane %v10296_v38, 7  ;;  %v2204_v18 = vrot.slane %v10296_v38, 1  ;;  %v2268_v5 = vrot.slane %v10296_v38, 2 }
 0x2bd   :  { %2697 = vrot.lane.b32.xlu1 %v2234_v49, %s7695_s2  ;;  %v2205_v13 = vrot.slane %v10299_v63, 1  ;;  %v14968_v23 = vrot.slane %v10296_v38, 3  ;;  %v2331_v49 = vrot.slane %v10291_v19, 3  ;;  %v10323_v53 = vsel %vm305_vm1, %v2138_v47, %v2139_v57 }
 0x2be   :  { %15082 = vst [vmem:[#allocation30_spill] sm:$0xff] %v10323_v53  ;;  %v10327_v9 = vsel %vm305_vm1, %v2140_v20, %v2141_v50  ;;  %v10331_v17 = vsel %vm370_vm2, %v2203_v36, %v2204_v18  ;;  %v10339_v34 = vsel %vm435_vm4, %v2267_v55, %v2268_v5  ;;  %v10345_v47 = vsel %vm435_vm4, %v2269_v39, %v14967_v21 }
 0x2bf   :  { %15083 = vst [vmem:[#allocation31_spill] sm:$0xff] %v10327_v9  ;;  %15084 = vst [vmem:[#allocation32_spill] sm:$0xff] %v10331_v17  ;;  %v10335_v2 = vsel %vm370_vm2, %v2205_v13, %v2206_v46  ;;  %v10351_v36 = vsel %vm500_vm5, %v2331_v49, %v14968_v23  ;;  %v2298_v21 = vsel %vm435_vm4, %v15091_v37, %v2267_v55  ;;  %v15093_v23 = vrot.slane %v10173_v40, 3 }
 0x2c0   :  { %15085 = vst [vmem:[#allocation33_spill] sm:$0xff] %v10335_v2  ;;  %15086 = vst [vmem:[#allocation34_spill] sm:$0xff] %v10339_v34  ;;  %v15094_v34 = vrot.slane %v10178_v59, 3  ;;  %v2169_v37 = vsel %vm305_vm1, %v2139_v57, %v2140_v20  ;;  %v10392_v57 = vpop.permute.xlu1 %2413 }
 0x2c1   :  { %2821 = vrot.lane.b32.xlu1 %v2300_v0, %s7696_s22  ;;  %15087 = vst [vmem:[#allocation35_spill] sm:$0xff] %v10345_v47  ;;  %15088 = vst [vmem:[#allocation36_spill] sm:$0xff] %v10351_v36  ;;  %v15089_v0 = vrot.slane %v10299_v63, 3  ;;  %v15092_v47 = vrot.slane %v10176_v52, 3 }
 0x2c3   :  { %v10359_v54 = vsel %vm500_vm5, %v15089_v0, %v14969_v42  ;;  %v2364_v36 = vsel %vm500_vm5, %v15093_v23, %v15092_v47  ;;  %v2362_v0 = vsel %vm500_vm5, %v15094_v34, %v2331_v49  ;;  %v2232_v23 = vsel %vm370_vm2, %v2204_v18, %v2205_v13 }
 0x2c4   :  { %15090 = vst [vmem:[#allocation37_spill] sm:$0xff] %v10359_v54  ;;  %v10400_v42 = vpop.permute.xlu1 %2417 }
 0x2c5   :  { %2825 = vrot.lane.b32.xlu1 %v2298_v21, %s7696_s22  ;;  %v2142_v21 = vrot.slane %v10294_v58, 7 }
 0x2c7   :  { %v2167_v55 = vsel %vm305_vm1, %v2141_v50, %v2142_v21 }
 0x2c8   :  { %v10419_v40 = vpop.permute.xlu1 %2541 }
 0x2c9   :  { %2949 = vrot.lane.b32.xlu1 %v2364_v36, %s7697_s17 }
 0x2cd   :  { %2953 = vrot.lane.b32.xlu1 %v2362_v0, %s7697_s17 }
 0x2d1   :  { %2445 = vrot.lane.b32.xlu1 %v2169_v37, %s7693_s3 }
 0x2d5   :  { %2449 = vrot.lane.b32.xlu1 %v2167_v55, %s7693_s3 }
 0x2d9   :  { %2573 = vrot.lane.b32.xlu1 %v10296_v38, %s7694_s20 }
 0x2dd   :  { %2577 = vrot.lane.b32.xlu1 %v10294_v58, %s7694_s20 }
 0x2e1   :  { %2701 = vrot.lane.b32.xlu1 %v2232_v23, %s7695_s2 }
 0x2ec   :  { %v7351_v20 = vpop.f32.mrb[20].mxu0 }
 0x2ed   :  { %v1980_v49 = vpop.f32.mrb[21].mxu0  ;;  %v1989_v47 = vadd.f32 %v10286_v33, %v7351_v20 }
 0x2ee   :  { %v1981_v34 = vadd.f32 %v10286_v33, %v1980_v49  ;;  %v7352_v50 = vpop.f32.mrb[22].mxu0 }
 0x2ef   :  { %v1992_v36 = vadd.f32 %v10286_v33, %v7352_v50  ;;  %v1983_v0 = vpop.f32.mrb[23].mxu0  ;;  %v10407_v59 = vmax.f32 %v1989_v47, 0.0 }
 0x2f0   :  { %v10397_v37 = vmax.f32 %v1981_v34, 0.0  ;;  %v1984_v55 = vadd.f32 %v10286_v33, %v1983_v0 }
 0x2f1   :  { %v10402_v18 = vmax.f32 %v1992_v36, 0.0  ;;  %15098 = vst [vmem:[#allocation41_spill] sm:$0xff] %v10407_v59  ;;  %v2145_v54 = vrot.slane %v10407_v59, 7  ;;  %v2273_v0 = vrot.slane %v10407_v59, 2 }
 0x2f2   :  { %15095 = vst [vmem:[#allocation38_spill] sm:$0xff] %v10397_v37  ;;  %v10404_v13 = vmax.f32 %v1984_v55, 0.0  ;;  %v2207_v23 = vrot.slane %v10397_v37, 1  ;;  %v2143_v49 = vrot.slane %v10397_v37, 7  ;;  %v2271_v17 = vrot.slane %v10397_v37, 2 }
 0x2f3   :  { %15096 = vst [vmem:[#allocation39_spill] sm:$0xff] %v10402_v18  ;;  %v2210_v36 = vrot.slane %v10402_v18, 1  ;;  %v2335_v19 = vrot.slane %v10397_v37, 3 }
 0x2f4   :  { %15097 = vst [vmem:[#allocation40_spill] sm:$0xff] %v10404_v13  ;;  %v2230_v20 = vsel %vm370_vm2, %v2206_v46, %v2207_v23  ;;  %v2144_v34 = vrot.slane %v10404_v13, 7  ;;  %v2208_v50 = vrot.slane %v10404_v13, 1  ;;  %v2296_v46 = vsel %vm435_vm4, %v2268_v5, %v2269_v39 }
 0x2f5   :  { %2705 = vrot.lane.b32.xlu1 %v2230_v20, %s7695_s2  ;;  %v2209_v20 = vrot.slane %v10407_v59, 1  ;;  %v10431_v47 = vsel %vm305_vm1, %v2142_v21, %v2143_v49  ;;  %v15103_v37 = vrot.slane %v10404_v13, 2 }
 0x2f6   :  { %15099 = vst [vmem:[#allocation42_spill] sm:$0xff] %v10431_v47  ;;  %v10437_v5 = vsel %vm305_vm1, %v2144_v34, %v2145_v54  ;;  %v10441_v2 = vsel %vm370_vm2, %v2207_v23, %v2208_v50 }
 0x2f7   :  { %15100 = vst [vmem:[#allocation43_spill] sm:$0xff] %v10437_v5  ;;  %15101 = vst [vmem:[#allocation44_spill] sm:$0xff] %v10441_v2  ;;  %v10445_v55 = vsel %vm370_vm2, %v2209_v20, %v2210_v36  ;;  %v10451_v21 = vsel %vm435_vm4, %v2271_v17, %v15103_v37  ;;  %v15107_v5 = vrot.slane %v10404_v13, 3  ;;  %v15110_v2 = vrot.slane %v10407_v59, 3 }
 0x2f8   :  { %15102 = vst [vmem:[#allocation45_spill] sm:$0xff] %v10445_v55  ;;  %15104 = vst [vmem:[#allocation46_spill] sm:$0xff] %v10451_v21  ;;  %v15109_v55 = vrot.slane %v10402_v18, 3  ;;  %v15112_v21 = vrot.slane %v10294_v58, 2 }
 0x2f9   :  { %2829 = vrot.lane.b32.xlu1 %v2296_v46, %s7696_s22  ;;  %v15105_v46 = vrot.slane %v10402_v18, 2  ;;  %v10463_v23 = vsel %vm500_vm5, %v2335_v19, %v15107_v5  ;;  %v15113_v5 = vrot.slane %v10299_v63, 3 }
 0x2fa   :  { %15108 = vst [vmem:[#allocation48_spill] sm:$0xff] %v10463_v23  ;;  %v10471_v37 = vsel %vm500_vm5, %v15110_v2, %v15109_v55  ;;  %v15114_v23 = vrot.slane %v10296_v38, 3  ;;  %v15115_v55 = vrot.slane %v10294_v58, 3 }
 0x2fb   :  { %v10457_v39 = vsel %vm435_vm4, %v2273_v0, %v15105_v46  ;;  %15111 = vst [vmem:[#allocation49_spill] sm:$0xff] %v10471_v37  ;;  %v2294_v46 = vsel %vm435_vm4, %v15112_v21, %v2271_v17  ;;  %v2165_v21 = vsel %vm305_vm1, %v2143_v49, %v2144_v34  ;;  %v2228_v49 = vsel %vm370_vm2, %v2208_v50, %v2209_v20 }
 0x2fc   :  { %15106 = vst [vmem:[#allocation47_spill] sm:$0xff] %v10457_v39  ;;  %v10477_v39 = vpop.permute.xlu1 %2545  ;;  %v2360_v47 = vsel %vm500_vm5, %v15114_v23, %v15113_v5  ;;  %v2358_v17 = vsel %vm500_vm5, %v15115_v55, %v2335_v19 }
 0x2fd   :  { %2833 = vrot.lane.b32.xlu1 %v2294_v46, %s7696_s22  ;;  %v2146_v46 = vrot.slane %v10402_v18, 7 }
 0x300   :  { %v10487_v2 = vpop.permute.xlu1 %2669 }
 0x301   :  { %2957 = vrot.lane.b32.xlu1 %v2360_v47, %s7697_s17  ;;  %v2163_v47 = vsel %vm305_vm1, %v2145_v54, %v2146_v46 }
 0x304   :  { %v10497_v38 = vpop.permute.xlu1 %2673 }
 0x305   :  { %2961 = vrot.lane.b32.xlu1 %v2358_v17, %s7697_s17 }
 0x308   :  { %v10503_v23 = vpop.permute.xlu1 %2797 }
 0x309   :  { %2453 = vrot.lane.b32.xlu1 %v2165_v21, %s7693_s3 }
 0x30c   :  { %v10507_v19 = vpop.permute.xlu1 %2801 }
 0x30d   :  { %2457 = vrot.lane.b32.xlu1 %v2163_v47, %s7693_s3  ;;  %15116 = vst [vmem:[#allocation50_spill] sm:$0xff] %v10507_v19 }
 0x310   :  { %v10514_v34 = vpop.permute.xlu1 %2925 }
 0x311   :  { %2581 = vrot.lane.b32.xlu1 %v10404_v13, %s7694_s20 }
 0x314   :  { %v10516_v54 = vpop.permute.xlu1 %2929 }
 0x315   :  { %2585 = vrot.lane.b32.xlu1 %v10402_v18, %s7694_s20  ;;  %15117 = vst [vmem:[#allocation51_spill] sm:$0xff] %v10516_v54 }
 0x318   :  { %v10519_v47 = vpop.permute.xlu1 %2421 }
 0x319   :  { %2709 = vrot.lane.b32.xlu1 %v2228_v49, %s7695_s2  ;;  %15118 = vst [vmem:[#allocation52_spill] sm:$0xff] %v10519_v47 }
 0x31c   :  { %v10536_v47 = vpop.permute.xlu1 %2425 }
 0x31d   :  { %15121 = vst [vmem:[#allocation55_spill] sm:$0xff] %v10536_v47 }
 0x324   :  { %v7355_v5 = vpop.f32.mrb[24].mxu0 }
 0x325   :  { %v1996_v55 = vpop.f32.mrb[25].mxu0  ;;  %v2005_v58 = vadd.f32 %v10286_v33, %v7355_v5 }
 0x326   :  { %v1997_v17 = vadd.f32 %v10286_v33, %v1996_v55  ;;  %v7356_v21 = vpop.f32.mrb[26].mxu0 }
 0x327   :  { %v2008_v37 = vadd.f32 %v10286_v33, %v7356_v21  ;;  %v1999_v63 = vpop.f32.mrb[27].mxu0  ;;  %v10531_v35 = vmax.f32 %v2005_v58, 0.0 }
 0x328   :  { %v10523_v9 = vmax.f32 %v1997_v17, 0.0  ;;  %v2000_v50 = vadd.f32 %v10286_v33, %v1999_v63 }
 0x329   :  { %v10526_v20 = vmax.f32 %v2008_v37, 0.0  ;;  %v2149_v47 = vrot.slane %v10531_v35, 7  ;;  %v2277_v21 = vrot.slane %v10531_v35, 2 }
 0x32a   :  { %15119 = vst [vmem:[#allocation53_spill] sm:$0xff] %v10523_v9  ;;  %v10528_v49 = vmax.f32 %v2000_v50, 0.0  ;;  %v2211_v53 = vrot.slane %v10523_v9, 1  ;;  %v2147_v5 = vrot.slane %v10523_v9, 7  ;;  %v2275_v25 = vrot.slane %v10523_v9, 2 }
 0x32b   :  { %v2214_v37 = vrot.slane %v10526_v20, 1  ;;  %v2339_v19 = vrot.slane %v10523_v9, 3 }
 0x32c   :  { %15120 = vst [vmem:[#allocation54_spill] sm:$0xff] %v10528_v49  ;;  %v2226_v55 = vsel %vm370_vm2, %v2210_v36, %v2211_v53  ;;  %v2148_v17 = vrot.slane %v10528_v49, 7  ;;  %v2212_v63 = vrot.slane %v10528_v49, 1  ;;  %v15122_v36 = vrot.slane %v10404_v13, 2 }
 0x32d   :  { %2713 = vrot.lane.b32.xlu1 %v2226_v55, %s7695_s2  ;;  %v2213_v55 = vrot.slane %v10531_v35, 1  ;;  %v10557_v50 = vsel %vm305_vm1, %v2146_v46, %v2147_v5  ;;  %v15127_v9 = vrot.slane %v10528_v49, 2 }
 0x32e   :  { %v2292_v27 = vsel %vm435_vm4, %v15122_v36, %v2273_v0  ;;  %15123 = vst [vmem:[#allocation56_spill] sm:$0xff] %v10557_v50  ;;  %v10563_v36 = vsel %vm305_vm1, %v2148_v17, %v2149_v47  ;;  %v10567_v54 = vsel %vm370_vm2, %v2211_v53, %v2212_v63  ;;  %v15135_v50 = vrot.slane %v10531_v35, 3 }
 0x32f   :  { %15124 = vst [vmem:[#allocation57_spill] sm:$0xff] %v10563_v36  ;;  %15125 = vst [vmem:[#allocation58_spill] sm:$0xff] %v10567_v54  ;;  %v10571_v58 = vsel %vm370_vm2, %v2213_v55, %v2214_v37  ;;  %v10577_v46 = vsel %vm435_vm4, %v2275_v25, %v15127_v9  ;;  %v15131_v36 = vrot.slane %v10528_v49, 3  ;;  %v10591_v54 = vpop.permute.xlu1 %2549 }
 0x330   :  { %15126 = vst [vmem:[#allocation59_spill] sm:$0xff] %v10571_v58  ;;  %15128 = vst [vmem:[#allocation60_spill] sm:$0xff] %v10577_v46  ;;  %v15134_v58 = vrot.slane %v10526_v20, 3  ;;  %v15137_v46 = vrot.slane %v10402_v18, 2 }
 0x331   :  { %2837 = vrot.lane.b32.xlu1 %v2292_v27, %s7696_s22  ;;  %v15129_v27 = vrot.slane %v10526_v20, 2  ;;  %v10589_v53 = vsel %vm500_vm5, %v2339_v19, %v15131_v36  ;;  %15133 = vst [vmem:[#allocation63_spill] sm:$0xff] %v10591_v54  ;;  %v15138_v36 = vrot.slane %v10407_v59, 3 }
 0x332   :  { %15132 = vst [vmem:[#allocation62_spill] sm:$0xff] %v10589_v53  ;;  %v10599_v9 = vsel %vm500_vm5, %v15135_v50, %v15134_v58  ;;  %v15139_v53 = vrot.slane %v10404_v13, 3  ;;  %v15141_v58 = vrot.slane %v10402_v18, 3 }
 0x333   :  { %v10583_v0 = vsel %vm435_vm4, %v2277_v21, %v15129_v27  ;;  %15136 = vst [vmem:[#allocation64_spill] sm:$0xff] %v10599_v9  ;;  %v2290_v27 = vsel %vm435_vm4, %v15137_v46, %v2275_v25  ;;  %v10612_v54 = vpop.permute.xlu1 %2553  ;;  %v2161_v46 = vsel %vm305_vm1, %v2147_v5, %v2148_v17  ;;  %v2224_v5 = vsel %vm370_vm2, %v2212_v63, %v2213_v55 }
 0x334   :  { %15130 = vst [vmem:[#allocation61_spill] sm:$0xff] %v10583_v0  ;;  %v2356_v0 = vsel %vm500_vm5, %v15139_v53, %v15138_v36  ;;  %15140 = vst [vmem:[#allocation65_spill] sm:$0xff] %v10612_v54  ;;  %v2354_v50 = vsel %vm500_vm5, %v15141_v58, %v2339_v19 }
 0x335   :  { %2841 = vrot.lane.b32.xlu1 %v2290_v27, %s7696_s22  ;;  %v2150_v27 = vrot.slane %v10526_v20, 7 }
 0x337   :  { %v10620_v25 = vpop.permute.xlu1 %2677  ;;  %v2159_v53 = vsel %vm305_vm1, %v2149_v47, %v2150_v27 }
 0x339   :  { %2965 = vrot.lane.b32.xlu1 %v2356_v0, %s7697_s17 }
 0x33b   :  { %v10628_v0 = vpop.permute.xlu1 %2681 }
 0x33c   :  { %15142 = vst [vmem:[#allocation66_spill] sm:$0xff] %v10628_v0 }
 0x33d   :  { %2969 = vrot.lane.b32.xlu1 %v2354_v50, %s7697_s17 }
 0x33f   :  { %v10633_v19 = vpop.permute.xlu1 %2805 }
 0x341   :  { %2461 = vrot.lane.b32.xlu1 %v2161_v46, %s7693_s3 }
 0x343   :  { %v10639_v17 = vpop.permute.xlu1 %2809 }
 0x344   :  { %15143 = vst [vmem:[#allocation67_spill] sm:$0xff] %v10639_v17 }
 0x345   :  { %2465 = vrot.lane.b32.xlu1 %v2159_v53, %s7693_s3 }
 0x347   :  { %v10642_v47 = vpop.permute.xlu1 %2933 }
 0x348   :  { %15144 = vst [vmem:[#allocation68_spill] sm:$0xff] %v10642_v47 }
 0x349   :  { %2589 = vrot.lane.b32.xlu1 %v10528_v49, %s7694_s20 }
 0x34b   :  { %v10644_v58 = vpop.permute.xlu1 %2937 }
 0x34c   :  { %15145 = vst [vmem:[#allocation69_spill] sm:$0xff] %v10644_v58 }
 0x34d   :  { %2593 = vrot.lane.b32.xlu1 %v10526_v20, %s7694_s20 }
 0x34f   :  { %v10660_v17 = vpop.permute.xlu1 %2429 }
 0x350   :  { %15147 = vst [vmem:[#allocation71_spill] sm:$0xff] %v10660_v17 }
 0x351   :  { %2717 = vrot.lane.b32.xlu1 %v2224_v5, %s7695_s2  ;;  %v7549_v5 = vld [vmem:[%s14915_s8] sm:$0xff]  }
 0x352   :  { %7361 = vmatprep.subr.bf16.mxu1 %v7549_v5 }
 0x353   :  { %7362 = vmatpush3.bf16.msra.mxu1 %v7549_v5  ;;  %v15149_v5 = vrot.slane %v10528_v49, 2  ;;  %v10692_v47 = vpop.permute.xlu1 %2433 }
 0x35c   :  { %v7359_v36 = vpop.f32.mrb[28].mxu0 }
 0x35d   :  { %v2012_v50 = vpop.f32.mrb[29].mxu0  ;;  %v2021_v9 = vadd.f32 %v10286_v33, %v7359_v36 }
 0x35e   :  { %v2013_v46 = vadd.f32 %v10286_v33, %v2012_v50  ;;  %v7360_v53 = vpop.f32.mrb[30].mxu0 }
 0x35f   :  { %v2024_v18 = vadd.f32 %v10286_v33, %v7360_v53  ;;  %v2015_v13 = vpop.f32.mrb[31].mxu0  ;;  %v10663_v36 = vmax.f32 %v2021_v9, 0.0 }
 0x360   :  { %v10649_v59 = vmax.f32 %v2013_v46, 0.0  ;;  %v2016_v63 = vadd.f32 %v10286_v33, %v2015_v13  ;;  %v7550_v46 = vld [vmem:[%s14915_s8 + $0x8] sm:$0xff]  }
 0x361   :  { %v10652_v55 = vmax.f32 %v2024_v18, 0.0  ;;  %v15148_v18 = vrot.slane %v9693_v6, 7  ;;  %7363 = vmatprep.subr.bf16.mxu1 %v7550_v46  ;;  %v2153_v0 = vrot.slane %v10663_v36, 7 }
 0x362   :  { %15146 = vst [vmem:[#allocation70_spill] sm:$0xff] %v10649_v59  ;;  %v10657_v58 = vmax.f32 %v2016_v63, 0.0  ;;  %v2215_v50 = vrot.slane %v10649_v59, 1  ;;  %v2151_v9 = vrot.slane %v10649_v59, 7  ;;  %7364 = vmatpush3.bf16.msra.mxu1 %v7550_v46 }
 0x363   :  { %v14989_v53 = vrot.slane %v10652_v55, 7  ;;  %v14992_v17 = vrot.slane %v10652_v55, 1 }
 0x364   :  { %v2222_v33 = vsel %vm370_vm2, %v2214_v37, %v2215_v50  ;;  %v2152_v37 = vrot.slane %v10657_v58, 7  ;;  %v10706_v46 = vsel %vm305_vm1, %v2150_v27, %v2151_v9  ;;  %v15151_v54 = vrot.slane %v10657_v58, 1 }
 0x365   :  { %2721 = vrot.lane.b32.xlu1 %v2222_v33, %s7695_s2  ;;  %v2186_v13 = vsel %vm305_vm1, %v14989_v53, %v15148_v18  ;;  %v2288_v33 = vsel %vm435_vm4, %v15149_v5, %v2277_v21  ;;  %v2343_v21 = vrot.slane %v10649_v59, 3  ;;  %v2217_v5 = vrot.slane %v10663_v36, 1  ;;  %v7551_v18 = vld [vmem:[%s14915_s8 + $0x10] sm:$0xff]  }
 0x366   :  { %2411 = vrot.lane.b32.xlu0 %v2186_v13, %s7693_s3  ;;  %v2279_v13 = vrot.slane %v10649_v59, 2  ;;  %v10716_v53 = vsel %vm370_vm2, %v2215_v50, %v15151_v54  ;;  %7365 = vmatprep.subr.bf16.mxu1 %v7551_v18  ;;  %v15154_v27 = vrot.slane %v10657_v58, 2  ;;  %v15156_v59 = vrot.slane %v10652_v55, 2 }
 0x367   :  { %15152 = vst [vmem:[#allocation73_spill] sm:$0xff] %v10716_v53  ;;  %v15158_v50 = vrot.slane %v10526_v20, 2  ;;  %7366 = vmatpush3.bf16.msra.mxu1 %v7551_v18  ;;  %v15161_v53 = vrot.slane %v10663_v36, 3  ;;  %v7552_v18 = vld [vmem:[%s14915_s8 + $0x18] sm:$0xff]  }
 0x368   :  { %v10728_v63 = vsel %vm435_vm4, %v2279_v13, %v15154_v27  ;;  %7367 = vmatprep.subr.bf16.mxu1 %v7552_v18 }
 0x369   :  { %2845 = vrot.lane.b32.xlu1 %v2288_v33, %s7696_s22  ;;  %v10710_v33 = vsel %vm305_vm1, %v2152_v37, %v2153_v0  ;;  %15155 = vst [vmem:[#allocation75_spill] sm:$0xff] %v10728_v63  ;;  %v15160_v63 = vrot.slane %v10652_v55, 3 }
 0x36a   :  { %2415 = vrot.lane.b32.xlu0 %v9540_v11, %s7693_s3  ;;  %15150 = vst [vmem:[#allocation72_spill] sm:$0xff] %v10710_v33  ;;  %v10722_v11 = vsel %vm370_vm2, %v2217_v5, %v14992_v17  ;;  %v15157_v33 = vrot.slane %v10663_v36, 2  ;;  %v2286_v17 = vsel %vm435_vm4, %v15158_v50, %v2279_v13  ;;  %v10762_v13 = vpop.permute.xlu1 %2557  ;;  %v15164_v50 = vrot.slane %v10526_v20, 3 }
 0x36b   :  { %15153 = vst [vmem:[#allocation74_spill] sm:$0xff] %v10722_v11  ;;  %v15159_v11 = vrot.slane %v10657_v58, 3  ;;  %7368 = vmatpush3.bf16.msra.mxu1 %v7552_v18  ;;  %v15165_v18 = vrot.slane %v9486_v45, 1 }
 0x36c   :  { %v10736_v54 = vsel %vm435_vm4, %v15157_v33, %v15156_v59  ;;  %v10754_v59 = vsel %vm500_vm5, %v15161_v53, %v15160_v63  ;;  %v15162_v33 = vrot.slane %v10531_v35, 3  ;;  %v2187_v63 = vrot.slane %v9693_v6, 1 }
 0x36d   :  { %v10746_v27 = vsel %vm500_vm5, %v2343_v21, %v15159_v11  ;;  %2849 = vrot.lane.b32.xlu1 %v2286_v17, %s7696_s22  ;;  %v15163_v11 = vrot.slane %v10528_v49, 3  ;;  %v7553_v17 = vld [vmem:[%s14915_s8 + $0x20] sm:$0xff]   ;;  %v2350_v49 = vsel %vm500_vm5, %v15164_v50, %v2343_v21  ;;  %v2157_v21 = vsel %vm305_vm1, %v2151_v9, %v2152_v37 }
 0x36e   :  { %2539 = vrot.lane.b32.xlu0 %v9693_v6, %s7694_s20  ;;  %7369 = vmatprep.subr.bf16.mxu1 %v7553_v17  ;;  %v2251_v50 = vrot.slane %v9693_v6, 2  ;;  %v15167_v9 = vrot.slane %v9486_v45, 2 }
 0x36f   :  { %v2352_v53 = vsel %vm500_vm5, %v15163_v11, %v15162_v33  ;;  %7370 = vmatpush3.bf16.msra.mxu1 %v7553_v17  ;;  %v10781_v33 = vpop.permute.xlu1 %2561  ;;  %v2249_v11 = vsel %vm370_vm2, %v2187_v63, %v15165_v18  ;;  %v15166_v18 = vrot.slane %v10652_v55, 7 }
 0x371   :  { %2973 = vrot.lane.b32.xlu1 %v2352_v53, %s7697_s17  ;;  %v7554_v53 = vld [vmem:[%s14915_s8 + $0x28] sm:$0xff]  }
 0x372   :  { %2543 = vrot.lane.b32.xlu0 %v9495_v8, %s7694_s20  ;;  %7371 = vmatprep.subr.bf16.mxu1 %v7554_v53 }
 0x373   :  { %7372 = vmatpush3.bf16.msra.mxu1 %v7554_v53  ;;  %v10800_v17 = vpop.permute.xlu1 %2685  ;;  %v7556_v53 = vld [vmem:[%s14915_s8 + $0x38] ss:$0 sps:$4 sm:$0xff]  }
 0x375   :  { %2977 = vrot.lane.b32.xlu1 %v2350_v49, %s7697_s17  ;;  %v7555_v49 = vld [vmem:[%s14915_s8 + $0x30] sm:$0xff]  }
 0x376   :  { %2667 = vrot.lane.b32.xlu0 %v2249_v11, %s7695_s2  ;;  %v2155_v11 = vsel %vm305_vm1, %v2153_v0, %v15166_v18  ;;  %7373 = vmatprep.subr.bf16.mxu1 %v7555_v49  ;;  %v3381_v0 = vsel %vm1862_vm6, %v7556_v53, 0  ;;  %v15168_v18 = vrot.slane %v9486_v45, 3 }
 0x377   :  { %7374 = vmatpush3.bf16.msra.mxu1 %v7555_v49  ;;  %v10813_v37 = vpop.permute.xlu1 %2689 }
 0x378   :  { %7524 = vmatprep.subr.msk.bf16.mxu1 %vm1862_vm6, %v7556_v53  ;;  %v15170_v53 = vrot.slane %v10652_v55, 1 }
 0x379   :  { %2469 = vrot.lane.b32.xlu1 %v2157_v21, %s7693_s3  ;;  %v2315_v21 = vrot.slane %v9693_v6, 3 }
 0x37a   :  { %2671 = vrot.lane.b32.xlu0 %v9548_v51, %s7695_s2  ;;  %v2313_v51 = vsel %vm435_vm4, %v2251_v50, %v15167_v9 }
 0x37b   :  { %7376 = vmatpush3.bf16.msra.mxu1 %v3381_v0  ;;  %v10825_v49 = vpop.permute.xlu1 %2813  ;;  %v2250_v0 = vsel %vm370_vm2, %v15170_v53, %v2187_v63  ;;  %v15173_v63 = vrot.slane %v10652_v55, 2  ;;  %v15175_v53 = vrot.slane %v10657_v58, 3 }
 0x37d   :  { %2473 = vrot.lane.b32.xlu1 %v2155_v11, %s7693_s3  ;;  %v2377_v11 = vsel %vm500_vm5, %v2315_v21, %v15168_v18  ;;  %v15171_v18 = vrot.slane %v10663_v36, 2 }
 0x37e   :  { %2795 = vrot.lane.b32.xlu0 %v2313_v51, %s7696_s22 }
 0x37f   :  { %v10841_v51 = vpop.permute.xlu1 %2817 }
 0x381   :  { %2597 = vrot.lane.b32.xlu1 %v10657_v58, %s7694_s20 }
 0x382   :  { %2799 = vrot.lane.b32.xlu0 %v9562_v26, %s7696_s22  ;;  %v15169_v26 = vrot.slane %v10657_v58, 1 }
 0x384   :  { %v2220_v9 = vsel %vm370_vm2, %v15169_v26, %v2217_v5  ;;  %v15172_v5 = vrot.slane %v10657_v58, 2  ;;  %v2314_v26 = vsel %vm435_vm4, %v15173_v63, %v2251_v50  ;;  %v15181_v63 = vld [vmem:[#allocation12_spill] sm:$0xff] }
 0x385   :  { %2601 = vrot.lane.b32.xlu1 %v10652_v55, %s7694_s20 }
 0x386   :  { %2923 = vrot.lane.b32.xlu0 %v2377_v11, %s7697_s17  ;;  %v2284_v11 = vsel %vm435_vm4, %v15172_v5, %v15171_v18  ;;  %v2090_v5 = vrot.slane %v10652_v55, 6 }
 0x389   :  { %2725 = vrot.lane.b32.xlu1 %v2220_v9, %s7695_s2  ;;  %v15174_v9 = vrot.slane %v10663_v36, 3 }
 0x38a   :  { %2927 = vrot.lane.b32.xlu0 %v9572_v28, %s7697_s17  ;;  %v10856_v28 = vpop.permute.xlu1 %2941 }
 0x38d   :  { %2729 = vrot.lane.b32.xlu1 %v2250_v0, %s7695_s2  ;;  %v2348_v0 = vsel %vm500_vm5, %v15175_v53, %v15174_v9 }
 0x38e   :  { %2419 = vrot.lane.b32.xlu0 %v9819_v3, %s7693_s3  ;;  %v10868_v3 = vpop.permute.xlu1 %2945 }
 0x391   :  { %2853 = vrot.lane.b32.xlu1 %v2284_v11, %s7696_s22 }
 0x392   :  { %2423 = vrot.lane.b32.xlu0 %v9831_v44, %s7693_s3  ;;  %v15176_v44 = vrot.slane %v10652_v55, 3  ;;  %v10883_v18 = vpop.permute.xlu1 %2437 }
 0x394   :  { %v2378_v50 = vsel %vm500_vm5, %v15176_v44, %v2315_v21  ;;  %v2060_v21 = vrot.slane %v9486_v45, 6  ;;  %vm3052_vm5 = vcmask 326656  }
 0x395   :  { %2857 = vrot.lane.b32.xlu1 %v2314_v26, %s7696_s22  ;;  %v2062_v26 = vrot.slane %v15181_v63, 6  ;;  %v15197_v63 = vld [vmem:[#allocation34_spill] sm:$0xff] }
 0x396   :  { %2547 = vrot.lane.b32.xlu0 %v9772_v60, %s7694_s20 }
 0x399   :  { %2981 = vrot.lane.b32.xlu1 %v2348_v0, %s7697_s17 }
 0x39a   :  { %2551 = vrot.lane.b32.xlu0 %v9784_v22, %s7694_s20 }
 0x39d   :  { %2985 = vrot.lane.b32.xlu1 %v2378_v50, %s7697_s17  ;;  %v3185_v50 = vld [vmem:[#allocation4 + $0x8] sm:$0xff] }
 0x39e   :  { %2675 = vrot.lane.b32.xlu0 %v9837_v62, %s7695_s2  ;;  %v15177_v62 = vld [vmem:[#allocation17_spill] sm:$0xff] }
 0x3a2   :  { %2679 = vrot.lane.b32.xlu0 %v9848_v32, %s7695_s2  ;;  %v15178_v32 = vld [vmem:[#allocation18_spill] sm:$0xff] }
 0x3a6   :  { %2803 = vrot.lane.b32.xlu0 %v9854_v12, %s7696_s22  ;;  %v15179_v12 = vld [vmem:[#allocation19_spill] sm:$0xff] }
 0x3aa   :  { %2807 = vrot.lane.b32.xlu0 %v9862_v4, %s7696_s22 }
 0x3ae   :  { %2931 = vrot.lane.b32.xlu0 %v9868_v24, %s7697_s17  ;;  %v15180_v24 = vld [vmem:[#allocation20_spill] sm:$0xff] }
 0x3b2   :  { %2935 = vrot.lane.b32.xlu0 %v9876_v48, %s7697_s17 }
 0x3b6   :  { %2427 = vrot.lane.b32.xlu0 %v10043_v61, %s7693_s3 }
 0x3ba   :  { %2431 = vrot.lane.b32.xlu0 %v10047_v30, %s7693_s3 }
 0x3be   :  { %2555 = vrot.lane.b32.xlu0 %v9983_v10, %s7694_s20 }
 0x3c2   :  { %2559 = vrot.lane.b32.xlu0 %v10005_v43, %s7694_s20 }
 0x3c6   :  { %2683 = vrot.lane.b32.xlu0 %v10054_v15, %s7695_s2 }
 0x3ca   :  { %2687 = vrot.lane.b32.xlu0 %v10061_v16, %s7695_s2 }
 0x3ce   :  { %2811 = vrot.lane.b32.xlu0 %v15177_v62, %s7696_s22 }
 0x3d2   :  { %2815 = vrot.lane.b32.xlu0 %v15178_v32, %s7696_s22  ;;  %v3184_v32 = vld [vmem:[#allocation4] sm:$0xff] }
 0x3d6   :  { %2939 = vrot.lane.b32.xlu0 %v15179_v12, %s7697_s17 }
 0x3d8   :  { %v2412_v4 = vpop.permute.xlu0 %2411 }
 0x3da   :  { %2943 = vrot.lane.b32.xlu0 %v15180_v24, %s7697_s17 }
 0x3dc   :  { %v2416_v48 = vpop.permute.xlu0 %2415 }
 0x3de   :  { %2435 = vrot.lane.b32.xlu0 %v10213_v7, %s7693_s3  ;;  %v2059_v7 = vrot.slane %v9693_v6, 6 }
 0x3e0   :  { %v2540_v61 = vpop.permute.xlu0 %2539  ;;  %v2121_v11 = vsel %vm240_vm0, %v2059_v7, %v2060_v21  ;;  %v2122_v9 = vsel %vm240_vm0, %v2090_v5, %v2059_v7 }
 0x3e1   :  { %v3021_v45 = vsel %vm3019_vm3, %v2121_v11, %v10392_v57 }
 0x3e2   :  { %2439 = vrot.lane.b32.xlu0 %v10217_v29, %s7693_s3  ;;  %v3054_v6 = vsel %vm3052_vm5, %v3021_v45, %v10419_v40 }
 0x3e3   :  { %v3087_v0 = vsel %vm3085_vm7, %v3054_v6, %v10487_v2  ;;  %v15183_v6 = vld [vmem:[#allocation23_spill] sm:$0xff] }
 0x3e4   :  { %v2544_v30 = vpop.permute.xlu0 %2543  ;;  %v3120_v40 = vsel %vm3118_vm8, %v3087_v0, %v10503_v23 }
 0x3e5   :  { %v3153_v2 = vsel %vm3151_vm9, %v3120_v40, %v10514_v34 }
 0x3e6   :  { %2563 = vrot.lane.b32.xlu0 %v10165_v31, %s7694_s20  ;;  %v3217_v11 = vmul.f32 %v3185_v50, %v3153_v2 }
 0x3e8   :  { %v2668_v15 = vpop.permute.xlu0 %2667 }
 0x3ea   :  { %2567 = vrot.lane.b32.xlu0 %v10176_v52, %s7694_s20 }
 0x3ec   :  { %v2672_v16 = vpop.permute.xlu0 %2671 }
 0x3ee   :  { %2691 = vrot.lane.b32.xlu0 %v10222_v56, %s7695_s2  ;;  %v2061_v56 = vrot.slane %v9495_v8, 6 }
 0x3f0   :  { %v2796_v29 = vpop.permute.xlu0 %2795  ;;  %v2119_v8 = vsel %vm240_vm0, %v2061_v56, %v2062_v26  ;;  %v2120_v23 = vsel %vm240_vm0, %v2060_v21, %v2061_v56  ;;  %v3187_v21 = vld [vmem:[#allocation4 + $0x18] sm:$0xff] }
 0x3f1   :  { %v3023_v44 = vsel %vm3019_vm3, %v2119_v8, %v10400_v42 }
 0x3f2   :  { %2695 = vrot.lane.b32.xlu0 %v10226_v14, %s7695_s2  ;;  %v3020_v14 = vsel %vm3019_vm3, %v2122_v9, %v2412_v4  ;;  %v3056_v12 = vsel %vm3052_vm5, %v3023_v44, %v10477_v39  ;;  %v10964_v4 = vpop.permute.xlu1 %2441  ;;  %v3186_v9 = vld [vmem:[#allocation4 + $0x10] sm:$0xff]  ;;  %v15185_v44 = vld [vmem:[#allocation24_spill] sm:$0xff] }
 0x3f3   :  { %v3053_v57 = vsel %vm3052_vm5, %v3020_v14, %v2540_v61  ;;  %v3089_v42 = vsel %vm3085_vm7, %v3056_v12, %v10497_v38  ;;  %v3022_v61 = vsel %vm3019_vm3, %v2120_v23, %v2416_v48 }
 0x3f4   :  { %v2800_v53 = vpop.permute.xlu0 %2799  ;;  %v3086_v62 = vsel %vm3085_vm7, %v3053_v57, %v2668_v15  ;;  %v15182_v15 = vld [vmem:[#allocation50_spill] sm:$0xff]  ;;  %v3055_v39 = vsel %vm3052_vm5, %v3022_v61, %v2544_v30 }
 0x3f5   :  { %v3122_v7 = vsel %vm3118_vm8, %v3089_v42, %v15182_v15  ;;  %v3088_v38 = vsel %vm3085_vm7, %v3055_v39, %v2672_v16  ;;  %v15186_v16 = vld [vmem:[#allocation25_spill] sm:$0xff]  ;;  %v15189_v61 = vld [vmem:[#allocation26_spill] sm:$0xff] }
 0x3f6   :  { %2819 = vrot.lane.b32.xlu0 %v10234_v41, %s7696_s22  ;;  %v3119_v41 = vsel %vm3118_vm8, %v3086_v62, %v2796_v29  ;;  %v15184_v29 = vld [vmem:[#allocation51_spill] sm:$0xff]  ;;  %v3121_v48 = vsel %vm3118_vm8, %v3088_v38, %v2800_v53  ;;  %v10983_v30 = vpop.permute.xlu1 %2565  ;;  %v15190_v15 = vld [vmem:[#allocation29_spill] sm:$0xff]  ;;  %v15193_v38 = vld [vmem:[#allocation14_spill] sm:$0xff] }
 0x3f7   :  { %v3155_v56 = vsel %vm3151_vm9, %v3122_v7, %v15184_v29  ;;  %v15191_v39 = vld [vmem:[#allocation13_spill] sm:$0xff] }
 0x3f8   :  { %v2924_v24 = vpop.permute.xlu0 %2923  ;;  %v3219_v40 = vmul.f32 %v3187_v21, %v3155_v56  ;;  %v2063_v21 = vrot.slane %v9772_v60, 6 }
 0x3f9   :  { %v3152_v34 = vsel %vm3151_vm9, %v3119_v41, %v2924_v24  ;;  %v15188_v41 = vld [vmem:[#allocation31_spill] sm:$0xff] }
 0x3fa   :  { %v3216_v45 = vmul.f32 %v3184_v32, %v3152_v34  ;;  %2823 = vrot.lane.b32.xlu0 %v15183_v6, %s7696_s22  ;;  %v10991_v53 = vpop.permute.xlu1 %2569  ;;  %v15187_v32 = vld [vmem:[#allocation30_spill] sm:$0xff]  ;;  %v15192_v6 = vld [vmem:[#allocation32_spill] sm:$0xff]  ;;  %v2118_v60 = vsel %vm240_vm0, %v2062_v26, %v2063_v21  ;;  %v15198_v26 = vld [vmem:[#allocation55_spill] sm:$0xff] }
 0x3fc   :  { %v2928_v0 = vpop.permute.xlu0 %2927  ;;  %v3248_v14 = vpack.c.bf16 %v3217_v11, %v3216_v45  ;;  %v2064_v45 = vrot.slane %v15191_v39, 6 }
 0x3fd   :  { %v3154_v8 = vsel %vm3151_vm9, %v3121_v48, %v2928_v0  ;;  %v15194_v0 = vld [vmem:[#allocation33_spill] sm:$0xff] }
 0x3fe   :  { %v3218_v57 = vmul.f32 %v3186_v9, %v3154_v8  ;;  %2947 = vrot.lane.b32.xlu0 %v15185_v44, %s7697_s17  ;;  %7377 = vmatprep.mubr.msk.bf16.mxu1 %vm3331_vm10, %v3248_v14  ;;  %v10995_v23 = vpop.permute.xlu1 %2693  ;;  %v2117_v56 = vsel %vm240_vm0, %v2063_v21, %v2064_v45  ;;  %v2066_v9 = vrot.slane %v15193_v38, 6  ;;  %v15195_v14 = vld [vmem:[#allocation52_spill] sm:$0xff]  ;;  %v3189_v21 = vld [vmem:[#allocation4 + $0x28] sm:$0xff]  ;;  %v15216_v38 = vld [vmem:[#allocation46_spill] sm:$0xff] }
 0x3ff   :  { %v3025_v8 = vsel %vm3019_vm3, %v2117_v56, %v15195_v14  ;;  %v15200_v14 = vld [vmem:[#allocation65_spill] sm:$0xff] }
 0x400   :  { %v3249_v50 = vpack.c.bf16 %v3219_v40, %v3218_v57  ;;  %v2420_v2 = vpop.permute.xlu0 %2419  ;;  %v2065_v40 = vrot.slane %v9784_v22, 6  ;;  %v15196_v57 = vld [vmem:[#allocation63_spill] sm:$0xff] }
 0x401   :  { %v3058_v44 = vsel %vm3052_vm5, %v3025_v8, %v15196_v57 }
 0x402   :  { %2951 = vrot.lane.b32.xlu0 %v15186_v16, %s7697_s17  ;;  %7378 = vmatmul.mubr.msk.bf16.vlgmr.msra.gmra.mrb[0].mxu1 %vm3331_vm10, %v3249_v50  ;;  %v10999_v42 = vpop.permute.xlu1 %2697  ;;  %v3091_v16 = vsel %vm3085_vm7, %v3058_v44, %v10620_v25  ;;  %v15199_v25 = vld [vmem:[#allocation68_spill] sm:$0xff] }
 0x403   :  { %v3124_v22 = vsel %vm3118_vm8, %v3091_v16, %v10633_v19  ;;  %v2116_v19 = vsel %vm240_vm0, %v2064_v45, %v2065_v40  ;;  %v3191_v45 = vld [vmem:[#allocation4 + $0x38] sm:$0xff] }
 0x404   :  { %v2424_v62 = vpop.permute.xlu0 %2423 }
 0x406   :  { %2443 = vrot.lane.b32.xlu0 %v15187_v32, %s7693_s3  ;;  %v11005_v7 = vpop.permute.xlu1 %2821  ;;  %v3024_v32 = vsel %vm3019_vm3, %v2118_v60, %v2420_v2  ;;  %v3157_v2 = vsel %vm3151_vm9, %v3124_v22, %v15199_v25  ;;  %v15201_v60 = vld [vmem:[#allocation66_spill] sm:$0xff] }
 0x408   :  { %v2548_v12 = vpop.permute.xlu0 %2547 }
 0x409   :  { %v3057_v39 = vsel %vm3052_vm5, %v3024_v32, %v2548_v12  ;;  %v3026_v32 = vsel %vm3019_vm3, %v2116_v19, %v2424_v62 }
 0x40a   :  { %2447 = vrot.lane.b32.xlu0 %v15188_v41, %s7693_s3  ;;  %v11014_v48 = vpop.permute.xlu1 %2825  ;;  %v2115_v41 = vsel %vm240_vm0, %v2065_v40, %v2066_v9 }
 0x40c   :  { %v2552_v24 = vpop.permute.xlu0 %2551 }
 0x40e   :  { %2571 = vrot.lane.b32.xlu0 %v15189_v61, %s7694_s20  ;;  %v11046_v57 = vpop.permute.xlu1 %2949 }
 0x410   :  { %v2676_v34 = vpop.permute.xlu0 %2675 }
 0x411   :  { %v3090_v56 = vsel %vm3085_vm7, %v3057_v39, %v2676_v34  ;;  %v15202_v34 = vld [vmem:[#allocation67_spill] sm:$0xff]  ;;  %v3221_v39 = vmul.f32 %v3189_v21, %v3157_v2 }
 0x412   :  { %2575 = vrot.lane.b32.xlu0 %v15190_v15, %s7694_s20  ;;  %v11065_v2 = vpop.permute.xlu1 %2953 }
 0x414   :  { %v2680_v11 = vpop.permute.xlu0 %2679 }
 0x416   :  { %2699 = vrot.lane.b32.xlu0 %v15192_v6, %s7695_s2  ;;  %v3027_v6 = vsel %vm3019_vm3, %v2115_v41, %v15198_v26 }
 0x417   :  { %v3060_v8 = vsel %vm3052_vm5, %v3027_v6, %v15200_v14  ;;  %v15203_v6 = vld [vmem:[#allocation35_spill] sm:$0xff] }
 0x418   :  { %v2804_v29 = vpop.permute.xlu0 %2803  ;;  %v3093_v16 = vsel %vm3085_vm7, %v3060_v8, %v15201_v60 }
 0x419   :  { %v3123_v12 = vsel %vm3118_vm8, %v3090_v56, %v2804_v29  ;;  %v3126_v22 = vsel %vm3118_vm8, %v3093_v16, %v15202_v34  ;;  %v15204_v29 = vld [vmem:[#allocation69_spill] sm:$0xff]  ;;  %v3190_v56 = vld [vmem:[#allocation4 + $0x30] sm:$0xff]  ;;  %v15208_v34 = vld [vmem:[#allocation43_spill] sm:$0xff] }
 0x41a   :  { %2703 = vrot.lane.b32.xlu0 %v15194_v0, %s7695_s2  ;;  %v3188_v0 = vld [vmem:[#allocation4 + $0x20] sm:$0xff]  ;;  %v3159_v40 = vsel %vm3151_vm9, %v3126_v22, %v15204_v29  ;;  %v15207_v16 = vld [vmem:[#allocation42_spill] sm:$0xff]  ;;  %v15211_v29 = vld [vmem:[#allocation15_spill] sm:$0xff] }
 0x41b   :  { %v3223_v21 = vmul.f32 %v3191_v45, %v3159_v40  ;;  %v2068_v40 = vrot.slane %v15211_v29, 6 }
 0x41c   :  { %v2808_v50 = vpop.permute.xlu0 %2807 }
 0x41e   :  { %2827 = vrot.lane.b32.xlu0 %v15197_v63, %s7696_s22  ;;  %v3059_v63 = vsel %vm3052_vm5, %v3026_v32, %v2552_v24 }
 0x41f   :  { %v3092_v25 = vsel %vm3085_vm7, %v3059_v63, %v2680_v11  ;;  %v15206_v11 = vld [vmem:[#allocation37_spill] sm:$0xff] }
 0x420   :  { %v2932_v44 = vpop.permute.xlu0 %2931  ;;  %v3125_v62 = vsel %vm3118_vm8, %v3092_v25, %v2808_v50  ;;  %v11073_v50 = vpop.permute.xlu1 %2445 }
 0x421   :  { %v3156_v41 = vsel %vm3151_vm9, %v3123_v12, %v2932_v44 }
 0x422   :  { %v3220_v26 = vmul.f32 %v3188_v0, %v3156_v41  ;;  %2831 = vrot.lane.b32.xlu0 %v15203_v6, %s7696_s22  ;;  %v15205_v0 = vld [vmem:[#allocation36_spill] sm:$0xff]  ;;  %v15210_v6 = vld [vmem:[#allocation41_spill] sm:$0xff] }
 0x424   :  { %v3250_v14 = vpack.c.bf16 %v3221_v39, %v3220_v26  ;;  %v2936_v8 = vpop.permute.xlu0 %2935  ;;  %v11077_v41 = vpop.permute.xlu1 %2449  ;;  %v15209_v39 = vld [vmem:[#allocation38_spill] sm:$0xff] }
 0x425   :  { %v3158_v19 = vsel %vm3151_vm9, %v3125_v62, %v2936_v8  ;;  %v2067_v62 = vrot.slane %v9983_v10, 6 }
 0x426   :  { %v3222_v24 = vmul.f32 %v3190_v56, %v3158_v19  ;;  %2955 = vrot.lane.b32.xlu0 %v15205_v0, %s7697_s17  ;;  %7381 = vmatprep.mubr.msk.bf16.mxu1 %vm3331_vm10, %v3250_v14  ;;  %v15212_v56 = vld [vmem:[#allocation44_spill] sm:$0xff]  ;;  %v15215_v0 = vld [vmem:[#allocation71_spill] sm:$0xff] }
 0x427   :  { %v2113_v8 = vsel %vm240_vm0, %v2067_v62, %v2068_v40  ;;  %v15213_v19 = vld [vmem:[#allocation16_spill] sm:$0xff]  ;;  %v2114_v10 = vsel %vm240_vm0, %v2066_v9, %v2067_v62  ;;  %v3193_v62 = vld [vmem:[#allocation4 + $0x48] sm:$0xff] }
 0x428   :  { %v3251_v12 = vpack.c.bf16 %v3223_v21, %v3222_v24  ;;  %v2428_v44 = vpop.permute.xlu0 %2427  ;;  %v11083_v63 = vpop.permute.xlu1 %2573  ;;  %v2070_v21 = vrot.slane %v15213_v19, 6  ;;  %v15214_v24 = vld [vmem:[#allocation45_spill] sm:$0xff]  ;;  %v15227_v19 = vld [vmem:[#allocation60_spill] sm:$0xff] }
 0x42a   :  { %2959 = vrot.lane.b32.xlu0 %v15206_v11, %s7697_s17  ;;  %7382 = vmatmul.mubr.msk.bf16.gmra.mrb[4].mxu1 %vm3331_vm10, %v3251_v12  ;;  %v3029_v12 = vsel %vm3019_vm3, %v2113_v8, %v15215_v0  ;;  %v2069_v11 = vrot.slane %v10005_v43, 6  ;;  %v3192_v0 = vld [vmem:[#allocation4 + $0x40] sm:$0xff] }
 0x42c   :  { %v2432_v60 = vpop.permute.xlu0 %2431  ;;  %v11088_v25 = vpop.permute.xlu1 %2577  ;;  %v2111_v43 = vsel %vm240_vm0, %v2069_v11, %v2070_v21 }
 0x42d   :  { %v3031_v9 = vsel %vm3019_vm3, %v2111_v43, %v10692_v47 }
 0x42e   :  { %2451 = vrot.lane.b32.xlu0 %v15207_v16, %s7693_s3  ;;  %v3062_v16 = vsel %vm3052_vm5, %v3029_v12, %v10762_v13  ;;  %v3064_v12 = vsel %vm3052_vm5, %v3031_v9, %v10781_v33 }
 0x42f   :  { %v3097_v47 = vsel %vm3085_vm7, %v3064_v12, %v10813_v37  ;;  %v15220_v12 = vld [vmem:[#allocation56_spill] sm:$0xff] }
 0x430   :  { %v2556_v32 = vpop.permute.xlu0 %2555 }
 0x432   :  { %2455 = vrot.lane.b32.xlu0 %v15208_v34, %s7693_s3  ;;  %v11103_v34 = vpop.permute.xlu1 %2701 }
 0x434   :  { %v2560_v22 = vpop.permute.xlu0 %2559 }
 0x436   :  { %2579 = vrot.lane.b32.xlu0 %v15209_v39, %s7694_s20 }
 0x438   :  { %v2684_v26 = vpop.permute.xlu0 %2683 }
 0x43a   :  { %2583 = vrot.lane.b32.xlu0 %v15210_v6, %s7694_s20 }
 0x43c   :  { %v2688_v45 = vpop.permute.xlu0 %2687 }
 0x43e   :  { %2707 = vrot.lane.b32.xlu0 %v15212_v56, %s7695_s2  ;;  %v3095_v56 = vsel %vm3085_vm7, %v3062_v16, %v10800_v17  ;;  %v11128_v16 = vpop.permute.xlu1 %2705 }
 0x43f   :  { %v3128_v13 = vsel %vm3118_vm8, %v3095_v56, %v10825_v49  ;;  %v2112_v49 = vsel %vm240_vm0, %v2068_v40, %v2069_v11  ;;  %v3195_v40 = vld [vmem:[#allocation4 + $0x58] sm:$0xff]  ;;  %v3194_v11 = vld [vmem:[#allocation4 + $0x50] sm:$0xff] }
 0x440   :  { %v2812_v14 = vpop.permute.xlu0 %2811  ;;  %v3161_v17 = vsel %vm3151_vm9, %v3128_v13, %v10856_v28  ;;  %v3030_v56 = vsel %vm3019_vm3, %v2112_v49, %v2432_v60  ;;  %v15217_v13 = vld [vmem:[#allocation47_spill] sm:$0xff] }
 0x441   :  { %v3063_v33 = vsel %vm3052_vm5, %v3030_v56, %v2560_v22  ;;  %v15222_v56 = vld [vmem:[#allocation53_spill] sm:$0xff] }
 0x442   :  { %2711 = vrot.lane.b32.xlu0 %v15214_v24, %s7695_s2  ;;  %v3028_v24 = vsel %vm3019_vm3, %v2114_v10, %v2428_v44  ;;  %v3096_v37 = vsel %vm3085_vm7, %v3063_v33, %v2688_v45  ;;  %v15219_v45 = vld [vmem:[#allocation49_spill] sm:$0xff] }
 0x443   :  { %v3061_v8 = vsel %vm3052_vm5, %v3028_v24, %v2556_v32  ;;  %v3225_v24 = vmul.f32 %v3193_v62, %v3161_v17  ;;  %v11147_v62 = vpop.permute.xlu1 %2829  ;;  %v15218_v17 = vld [vmem:[#allocation48_spill] sm:$0xff]  ;;  %v15223_v33 = vld [vmem:[#allocation21_spill] sm:$0xff] }
 0x444   :  { %v2816_v29 = vpop.permute.xlu0 %2815  ;;  %v3094_v44 = vsel %vm3085_vm7, %v3061_v8, %v2684_v26  ;;  %v3130_v26 = vsel %vm3118_vm8, %v3097_v47, %v10841_v51 }
 0x445   :  { %v3127_v32 = vsel %vm3118_vm8, %v3094_v44, %v2812_v14  ;;  %v3163_v14 = vsel %vm3151_vm9, %v3130_v26, %v10868_v3  ;;  %v3129_v60 = vsel %vm3118_vm8, %v3096_v37, %v2816_v29 }
 0x446   :  { %2835 = vrot.lane.b32.xlu0 %v15216_v38, %s7696_s22  ;;  %v3227_v9 = vmul.f32 %v3195_v40, %v3163_v14  ;;  %v15224_v40 = vld [vmem:[#allocation58_spill] sm:$0xff]  ;;  %v2071_v14 = vrot.slane %v10165_v31, 6 }
 0x447   :  { %v11155_v29 = vpop.permute.xlu1 %2833 }
 0x448   :  { %v2940_v10 = vpop.permute.xlu0 %2939  ;;  %v2110_v31 = vsel %vm240_vm0, %v2070_v21, %v2071_v14 }
 0x449   :  { %v3160_v28 = vsel %vm3151_vm9, %v3127_v32, %v2940_v10  ;;  %v15221_v10 = vld [vmem:[#allocation57_spill] sm:$0xff] }
 0x44a   :  { %v3224_v43 = vmul.f32 %v3192_v0, %v3160_v28  ;;  %2839 = vrot.lane.b32.xlu0 %v15217_v13, %s7696_s22 }
 0x44b   :  { %v11159_v32 = vpop.permute.xlu1 %2957 }
 0x44c   :  { %v3252_v8 = vpack.c.bf16 %v3225_v24, %v3224_v43  ;;  %v2944_v38 = vpop.permute.xlu0 %2943  ;;  %v2072_v43 = vrot.slane %v15223_v33, 6  ;;  %v3196_v33 = vld [vmem:[#allocation4 + $0x60] sm:$0xff] }
 0x44d   :  { %v3162_v51 = vsel %vm3151_vm9, %v3129_v60, %v2944_v38  ;;  %v15225_v60 = vld [vmem:[#allocation22_spill] sm:$0xff]  ;;  %v15226_v38 = vld [vmem:[#allocation59_spill] sm:$0xff] }
 0x44e   :  { %v3226_v22 = vmul.f32 %v3194_v11, %v3162_v51  ;;  %2963 = vrot.lane.b32.xlu0 %v15218_v17, %s7697_s17  ;;  %7385 = vmatprep.mubr.msk.bf16.mxu1 %vm3331_vm10, %v3252_v8  ;;  %v2109_v11 = vsel %vm240_vm0, %v2071_v14, %v2072_v43  ;;  %v2074_v8 = vrot.slane %v15225_v60, 6  ;;  %v15237_v60 = vld [vmem:[#allocation75_spill] sm:$0xff] }
 0x44f   :  { %v11165_v28 = vpop.permute.xlu1 %2961  ;;  %v3033_v51 = vsel %vm3019_vm3, %v2109_v11, %v10883_v18 }
 0x450   :  { %v3253_v44 = vpack.c.bf16 %v3227_v9, %v3226_v22  ;;  %v2436_v3 = vpop.permute.xlu0 %2435  ;;  %v2073_v9 = vrot.slane %v10176_v52, 6  ;;  %v3066_v22 = vsel %vm3052_vm5, %v3033_v51, %v10983_v30 }
 0x452   :  { %2967 = vrot.lane.b32.xlu0 %v15219_v45, %s7697_s17  ;;  %7386 = vmatmul.mubr.msk.bf16.gmra.mrb[8].mxu1 %vm3331_vm10, %v3253_v44  ;;  %v3099_v45 = vsel %vm3085_vm7, %v3066_v22, %v10995_v23  ;;  %v2107_v52 = vsel %vm240_vm0, %v2073_v9, %v2074_v8 }
 0x453   :  { %v11170_v13 = vpop.permute.xlu1 %2453  ;;  %v3132_v18 = vsel %vm3118_vm8, %v3099_v45, %v11005_v7  ;;  %v3035_v21 = vsel %vm3019_vm3, %v2107_v52, %v10964_v4  ;;  %v2108_v7 = vsel %vm240_vm0, %v2072_v43, %v2073_v9  ;;  %v15228_v43 = vld [vmem:[#allocation61_spill] sm:$0xff]  ;;  %v3198_v9 = vld [vmem:[#allocation4 + $0x70] sm:$0xff] }
 0x454   :  { %v2440_v0 = vpop.permute.xlu0 %2439  ;;  %v3165_v23 = vsel %vm3151_vm9, %v3132_v18, %v11046_v57 }
 0x455   :  { %v3034_v4 = vsel %vm3019_vm3, %v2108_v7, %v2440_v0 }
 0x456   :  { %2459 = vrot.lane.b32.xlu0 %v15220_v12, %s7693_s3  ;;  %v3032_v12 = vsel %vm3019_vm3, %v2110_v31, %v2436_v3 }
 0x457   :  { %v11185_v17 = vpop.permute.xlu1 %2457 }
 0x458   :  { %v2564_v49 = vpop.permute.xlu0 %2563 }
 0x459   :  { %v3065_v30 = vsel %vm3052_vm5, %v3032_v12, %v2564_v49 }
 0x45a   :  { %2463 = vrot.lane.b32.xlu0 %v15221_v10, %s7693_s3  ;;  %v3197_v10 = vld [vmem:[#allocation4 + $0x68] sm:$0xff] }
 0x45b   :  { %v11219_v51 = vpop.permute.xlu1 %2581 }
 0x45c   :  { %v2568_v47 = vpop.permute.xlu0 %2567 }
 0x45e   :  { %2587 = vrot.lane.b32.xlu0 %v15222_v56, %s7694_s20 }
 0x460   :  { %v2692_v26 = vpop.permute.xlu0 %2691 }
 0x461   :  { %v3098_v3 = vsel %vm3085_vm7, %v3065_v30, %v2692_v26  ;;  %v3229_v26 = vmul.f32 %v3197_v10, %v3165_v23  ;;  %v11232_v30 = vpop.permute.xlu1 %2585 }
 0x462   :  { %2591 = vrot.lane.b32.xlu0 %v10531_v35, %s7694_s20 }
 0x464   :  { %v2696_v24 = vpop.permute.xlu0 %2695 }
 0x466   :  { %2715 = vrot.lane.b32.xlu0 %v15224_v40, %s7695_s2  ;;  %v3068_v40 = vsel %vm3052_vm5, %v3035_v21, %v10991_v53  ;;  %v3067_v53 = vsel %vm3052_vm5, %v3034_v4, %v2568_v47  ;;  %v15229_v47 = vld [vmem:[#allocation62_spill] sm:$0xff]  ;;  %v11237_v21 = vpop.permute.xlu1 %2709 }
 0x467   :  { %v3101_v11 = vsel %vm3085_vm7, %v3068_v40, %v10999_v42  ;;  %v3100_v0 = vsel %vm3085_vm7, %v3067_v53, %v2696_v24  ;;  %v15230_v24 = vld [vmem:[#allocation64_spill] sm:$0xff]  ;;  %v15232_v40 = vld [vmem:[#allocation70_spill] sm:$0xff] }
 0x468   :  { %v2820_v37 = vpop.permute.xlu0 %2819  ;;  %v3134_v57 = vsel %vm3118_vm8, %v3101_v11, %v11014_v48  ;;  %v15233_v11 = vld [vmem:[#allocation28_spill] sm:$0xff] }
 0x469   :  { %v3131_v49 = vsel %vm3118_vm8, %v3098_v3, %v2820_v37  ;;  %v3199_v37 = vld [vmem:[#allocation4 + $0x78] sm:$0xff]  ;;  %v3167_v42 = vsel %vm3151_vm9, %v3134_v57, %v11065_v2  ;;  %v15231_v3 = vld [vmem:[#allocation72_spill] sm:$0xff]  ;;  %v2076_v4 = vrot.slane %v15233_v11, 6  ;;  %v2075_v57 = vrot.slane %v15189_v61, 6 }
 0x46a   :  { %2719 = vrot.lane.b32.xlu0 %v15226_v38, %s7695_s2  ;;  %v3231_v52 = vmul.f32 %v3199_v37, %v3167_v42  ;;  %v11241_v23 = vpop.permute.xlu1 %2713  ;;  %v15236_v37 = vld [vmem:[#allocation74_spill] sm:$0xff] }
 0x46b   :  { %v2105_v53 = vsel %vm240_vm0, %v2075_v57, %v2076_v4  ;;  %v2106_v61 = vsel %vm240_vm0, %v2074_v8, %v2075_v57  ;;  %v3202_v57 = vld [vmem:[#allocation4 + $0x90] sm:$0xff] }
 0x46c   :  { %v2824_v44 = vpop.permute.xlu0 %2823  ;;  %v3037_v42 = vsel %vm3019_vm3, %v2105_v53, %v11073_v50 }
 0x46d   :  { %v3133_v31 = vsel %vm3118_vm8, %v3100_v0, %v2824_v44  ;;  %v2077_v0 = vrot.slane %v15190_v15, 6 }
 0x46e   :  { %2843 = vrot.lane.b32.xlu0 %v15227_v19, %s7696_s22  ;;  %v11247_v7 = vpop.permute.xlu1 %2837 }
 0x470   :  { %v2948_v14 = vpop.permute.xlu0 %2947 }
 0x471   :  { %v3164_v38 = vsel %vm3151_vm9, %v3131_v49, %v2948_v14 }
 0x472   :  { %v3228_v22 = vmul.f32 %v3196_v33, %v3164_v38  ;;  %2847 = vrot.lane.b32.xlu0 %v15228_v43, %s7696_s22  ;;  %v15234_v38 = vld [vmem:[#allocation73_spill] sm:$0xff] }
 0x474   :  { %v3254_v45 = vpack.c.bf16 %v3229_v26, %v3228_v22  ;;  %v2952_v48 = vpop.permute.xlu0 %2951  ;;  %v15235_v22 = vld [vmem:[#allocation27_spill] sm:$0xff] }
 0x475   :  { %v3166_v12 = vsel %vm3151_vm9, %v3133_v31, %v2952_v48  ;;  %v2078_v43 = vrot.slane %v15235_v22, 6 }
 0x476   :  { %v3230_v18 = vmul.f32 %v3198_v9, %v3166_v12  ;;  %2971 = vrot.lane.b32.xlu0 %v15229_v47, %s7697_s17  ;;  %7389 = vmatprep.mubr.msk.bf16.mxu1 %vm3331_vm10, %v3254_v45  ;;  %v3070_v9 = vsel %vm3052_vm5, %v3037_v42, %v11083_v63  ;;  %v3200_v47 = vld [vmem:[#allocation4 + $0x80] sm:$0xff] }
 0x477   :  { %v3103_v48 = vsel %vm3085_vm7, %v3070_v9, %v11103_v34  ;;  %v2103_v15 = vsel %vm240_vm0, %v2077_v0, %v2078_v43 }
 0x478   :  { %v3255_v19 = vpack.c.bf16 %v3231_v52, %v3230_v18  ;;  %v2444_v2 = vpop.permute.xlu0 %2443  ;;  %v3136_v50 = vsel %vm3118_vm8, %v3103_v48, %v11147_v62  ;;  %v3039_v8 = vsel %vm3019_vm3, %v2103_v15, %v11077_v41  ;;  %v3201_v52 = vld [vmem:[#allocation4 + $0x88] sm:$0xff]  ;;  %v2104_v62 = vsel %vm240_vm0, %v2076_v4, %v2077_v0  ;;  %v3203_v4 = vld [vmem:[#allocation4 + $0x98] sm:$0xff] }
 0x479   :  { %v3036_v12 = vsel %vm3019_vm3, %v2106_v61, %v2444_v2  ;;  %v3169_v34 = vsel %vm3151_vm9, %v3136_v50, %v11159_v32  ;;  %v15238_v50 = vld [vmem:[#allocation40_spill] sm:$0xff] }
 0x47a   :  { %2975 = vrot.lane.b32.xlu0 %v15230_v24, %s7697_s17  ;;  %7390 = vmatmul.mubr.msk.bf16.gmra.mrb[12].mxu1 %vm3331_vm10, %v3255_v19  ;;  %v3072_v19 = vsel %vm3052_vm5, %v3039_v8, %v11088_v25 }
 0x47c   :  { %v2448_v44 = vpop.permute.xlu0 %2447 }
 0x47d   :  { %v3038_v41 = vsel %vm3019_vm3, %v2104_v62, %v2448_v44 }
 0x47e   :  { %2467 = vrot.lane.b32.xlu0 %v10706_v46, %s7693_s3  ;;  %v11252_v46 = vpop.permute.xlu1 %2841 }
 0x480   :  { %v2572_v10 = vpop.permute.xlu0 %2571 }
 0x481   :  { %v3069_v63 = vsel %vm3052_vm5, %v3036_v12, %v2572_v10  ;;  %v3105_v10 = vsel %vm3085_vm7, %v3072_v19, %v11128_v16  ;;  %v2081_v19 = vrot.slane %v15210_v6, 6 }
 0x482   :  { %2471 = vrot.lane.b32.xlu0 %v15231_v3, %s7693_s3  ;;  %v11267_v31 = vpop.permute.xlu1 %2965  ;;  %v3138_v32 = vsel %vm3118_vm8, %v3105_v10, %v11155_v29 }
 0x483   :  { %v3171_v16 = vsel %vm3151_vm9, %v3138_v32, %v11165_v28  ;;  %v3204_v32 = vld [vmem:[#allocation4 + $0xa0] sm:$0xff] }
 0x484   :  { %v2576_v33 = vpop.permute.xlu0 %2575  ;;  %v3235_v42 = vmul.f32 %v3203_v4, %v3171_v16 }
 0x485   :  { %v3071_v25 = vsel %vm3052_vm5, %v3038_v41, %v2576_v33 }
 0x486   :  { %2595 = vrot.lane.b32.xlu0 %v15232_v40, %s7694_s20  ;;  %v11301_v11 = vpop.permute.xlu1 %2969 }
 0x488   :  { %v2700_v49 = vpop.permute.xlu0 %2699 }
 0x489   :  { %v3102_v18 = vsel %vm3085_vm7, %v3069_v63, %v2700_v49  ;;  %v3233_v49 = vmul.f32 %v3201_v52, %v3169_v34  ;;  %v2080_v63 = vrot.slane %v15238_v50, 6  ;;  %v15239_v34 = vld [vmem:[#allocation39_spill] sm:$0xff] }
 0x48a   :  { %2599 = vrot.lane.b32.xlu0 %v10663_v36, %s7694_s20 }
 0x48c   :  { %v2704_v14 = vpop.permute.xlu0 %2703 }
 0x48d   :  { %v3104_v44 = vsel %vm3085_vm7, %v3071_v25, %v2704_v14  ;;  %v2100_v25 = vsel %vm240_vm0, %v2080_v63, %v2081_v19 }
 0x48e   :  { %2723 = vrot.lane.b32.xlu0 %v15234_v38, %s7695_s2 }
 0x490   :  { %v2828_v26 = vpop.permute.xlu0 %2827 }
 0x491   :  { %v3135_v2 = vsel %vm3118_vm8, %v3102_v18, %v2828_v26  ;;  %v2082_v18 = vrot.slane %v15239_v34, 6 }
 0x492   :  { %2727 = vrot.lane.b32.xlu0 %v15236_v37, %s7695_s2 }
 0x493   :  { %v2099_v6 = vsel %vm240_vm0, %v2081_v19, %v2082_v18 }
 0x494   :  { %v2832_v45 = vpop.permute.xlu0 %2831  ;;  %v3043_v22 = vsel %vm3019_vm3, %v2099_v6, %v11185_v17 }
 0x495   :  { %v3137_v26 = vsel %vm3118_vm8, %v3104_v44, %v2832_v45 }
 0x496   :  { %2851 = vrot.lane.b32.xlu0 %v15237_v60, %s7696_s22  ;;  %v2079_v60 = vrot.slane %v15209_v39, 6 }
 0x498   :  { %v2956_v24 = vpop.permute.xlu0 %2955  ;;  %v2101_v52 = vsel %vm240_vm0, %v2079_v60, %v2080_v63  ;;  %v2102_v39 = vsel %vm240_vm0, %v2078_v43, %v2079_v60  ;;  %v3205_v43 = vld [vmem:[#allocation4 + $0xa8] sm:$0xff]  ;;  %v11392_v63 = vld [vmem:[%s14916_s9] ss:$0 sm:$0xff] }
 0x499   :  { %v3168_v3 = vsel %vm3151_vm9, %v3135_v2, %v2956_v24 }
 0x49a   :  { %v3232_v38 = vmul.f32 %v3200_v47, %v3168_v3  ;;  %2855 = vrot.lane.b32.xlu0 %v10736_v54, %s7696_s22  ;;  %v11314_v54 = vpop.permute.xlu1 %2461  ;;  %v3041_v47 = vsel %vm3019_vm3, %v2101_v52, %v11170_v13 }
 0x49b   :  { %v3074_v62 = vsel %vm3052_vm5, %v3041_v47, %v11219_v51 }
 0x49c   :  { %v3256_v53 = vpack.c.bf16 %v3233_v49, %v3232_v38  ;;  %v2960_v29 = vpop.permute.xlu0 %2959  ;;  %v3107_v10 = vsel %vm3085_vm7, %v3074_v62, %v11237_v21  ;;  %v3076_v49 = vsel %vm3052_vm5, %v3043_v22, %v11232_v30  ;;  %v15240_v22 = vld [vmem:[#allocation54_spill] sm:$0xff] }
 0x49d   :  { %v3170_v37 = vsel %vm3151_vm9, %v3137_v26, %v2960_v29  ;;  %v3140_v13 = vsel %vm3118_vm8, %v3107_v10, %v11247_v7  ;;  %v3109_v4 = vsel %vm3085_vm7, %v3076_v49, %v11241_v23  ;;  %v3206_v23 = vld [vmem:[#allocation4 + $0xb0] sm:$0xff] }
 0x49e   :  { %v3234_v0 = vmul.f32 %v3202_v57, %v3170_v37  ;;  %2979 = vrot.lane.b32.xlu0 %v10746_v27, %s7697_s17  ;;  %7393 = vmatprep.mubr.msk.bf16.mxu1 %vm3331_vm10, %v3256_v53  ;;  %v11319_v9 = vpop.permute.xlu1 %2465  ;;  %v3173_v3 = vsel %vm3151_vm9, %v3140_v13, %v11267_v31  ;;  %v3142_v31 = vsel %vm3118_vm8, %v3109_v4, %v11252_v46  ;;  %v3207_v53 = vld [vmem:[#allocation4 + $0xb8] sm:$0xff] }
 0x49f   :  { %v3237_v44 = vmul.f32 %v3205_v43, %v3173_v3  ;;  %v3175_v29 = vsel %vm3151_vm9, %v3142_v31, %v11301_v11  ;;  %v2084_v43 = vrot.slane %v15240_v22, 6  ;;  %v2085_v22 = vrot.slane %v10531_v35, 6 }
 0x4a0   :  { %v3257_v33 = vpack.c.bf16 %v3235_v42, %v3234_v0  ;;  %v2452_v28 = vpop.permute.xlu0 %2451  ;;  %v3239_v46 = vmul.f32 %v3207_v53, %v3175_v29 }
 0x4a1   :  { %v3040_v41 = vsel %vm3019_vm3, %v2102_v39, %v2452_v28 }
 0x4a2   :  { %2983 = vrot.lane.b32.xlu0 %v10754_v59, %s7697_s17  ;;  %7394 = vmatmul.mubr.msk.bf16.gmra.mrb[16].mxu1 %vm3331_vm10, %v3257_v33  ;;  %v11321_v45 = vpop.permute.xlu1 %2589 }
 0x4a4   :  { %v2456_v14 = vpop.permute.xlu0 %2455 }
 0x4a5   :  { %v3042_v17 = vsel %vm3019_vm3, %v2100_v25, %v2456_v14 }
 0x4a6   :  { %v11323_v27 = vpop.permute.xlu1 %2593 }
 0x4a8   :  { %v2580_v61 = vpop.permute.xlu0 %2579 }
 0x4a9   :  { %v3073_v51 = vsel %vm3052_vm5, %v3040_v41, %v2580_v61 }
 0x4aa   :  { %v11327_v8 = vpop.permute.xlu1 %2717 }
 0x4ac   :  { %v2584_v48 = vpop.permute.xlu0 %2583 }
 0x4ad   :  { %v3075_v30 = vsel %vm3052_vm5, %v3042_v17, %v2584_v48 }
 0x4ae   :  { %v11337_v2 = vpop.permute.xlu1 %2721 }
 0x4b0   :  { %v2708_v12 = vpop.permute.xlu0 %2707 }
 0x4b1   :  { %v3106_v21 = vsel %vm3085_vm7, %v3073_v51, %v2708_v12 }
 0x4b2   :  { %v11369_v57 = vpop.permute.xlu1 %2845 }
 0x4b4   :  { %v2712_v15 = vpop.permute.xlu0 %2711 }
 0x4b5   :  { %v3108_v37 = vsel %vm3085_vm7, %v3075_v30, %v2712_v15 }
 0x4b6   :  { %v11378_v61 = vpop.permute.xlu1 %2849 }
 0x4b8   :  { %v2836_v59 = vpop.permute.xlu0 %2835 }
 0x4b9   :  { %v3139_v7 = vsel %vm3118_vm8, %v3106_v21, %v2836_v59 }
 0x4ba   :  { %v11385_v15 = vpop.permute.xlu1 %2973 }
 0x4bc   :  { %v2840_v24 = vpop.permute.xlu0 %2839 }
 0x4bd   :  { %v3141_v42 = vsel %vm3118_vm8, %v3108_v37, %v2840_v24 }
 0x4be   :  { %v11394_v60 = vpop.permute.xlu1 %2977 }
 0x4c0   :  { %v2964_v38 = vpop.permute.xlu0 %2963 }
 0x4c1   :  { %v3172_v16 = vsel %vm3151_vm9, %v3139_v7, %v2964_v38 }
 0x4c2   :  { %v3236_v26 = vmul.f32 %v3204_v32, %v3172_v16  ;;  %v11407_v3 = vpop.permute.xlu1 %2469 }
 0x4c4   :  { %v3258_v0 = vpack.c.bf16 %v3237_v44, %v3236_v26  ;;  %v2968_v33 = vpop.permute.xlu0 %2967 }
 0x4c5   :  { %v3174_v28 = vsel %vm3151_vm9, %v3141_v42, %v2968_v33 }
 0x4c6   :  { %v3238_v14 = vmul.f32 %v3206_v23, %v3174_v28  ;;  %7397 = vmatprep.mubr.msk.bf16.mxu1 %vm3331_vm10, %v3258_v0 }
 0x4c8   :  { %v3259_v48 = vpack.c.bf16 %v3239_v46, %v3238_v14  ;;  %v11380_v12 = vpop.permute.xlu0 %2459  ;;  %v2083_v46 = vrot.slane %v15222_v56, 6  ;;  %v11454_v14 = vpop.permute.xlu1 %2473 }
 0x4ca   :  { %7398 = vmatmul.mubr.msk.bf16.gmra.mrb[20].mxu1 %vm3331_vm10, %v3259_v48 }
 0x4cc   :  { %v11383_v11 = vpop.permute.xlu0 %2463 }
 0x4d0   :  { %v11387_v50 = vpop.permute.xlu0 %2587 }
 0x4d4   :  { %v11396_v59 = vpop.permute.xlu0 %2591 }
 0x4d5   :  { %v7379_v52 = vpop.f32.mrb[0].mxu1 }
 0x4d6   :  { %v3426_v47 = vadd.f32 %v7379_v52, %v11392_v63  ;;  %v3417_v19 = vpop.f32.mrb[1].mxu1 }
 0x4d7   :  { %v3418_v62 = vadd.f32 %v11392_v63, %v3417_v19  ;;  %v7380_v39 = vpop.f32.mrb[2].mxu1 }
 0x4d8   :  { %v11400_v24 = vmax.f32 %v3426_v47, 0.0  ;;  %v3429_v10 = vadd.f32 %v7380_v39, %v11392_v63  ;;  %v2716_v41 = vpop.permute.xlu0 %2715  ;;  %v3420_v6 = vpop.f32.mrb[3].mxu1  ;;  %v2086_v39 = vrot.slane %v10526_v20, 6 }
 0x4d9   :  { %v11403_v13 = vmax.f32 %v3418_v62, 0.0  ;;  %v3421_v51 = vadd.f32 %v11392_v63, %v3420_v6  ;;  %v2097_v62 = vsel %vm240_vm0, %v2083_v46, %v2084_v43 }
 0x4da   :  { %v11409_v21 = vmax.f32 %v3429_v10, 0.0  ;;  %v3642_v49 = vrot.slane %v11400_v24, 7  ;;  %v3706_v25 = vrot.slane %v11400_v24, 1  ;;  %v3770_v7 = vrot.slane %v11400_v24, 2 }
 0x4db   :  { %v11411_v32 = vmax.f32 %v3421_v51, 0.0  ;;  %v14998_v4 = vrot.slane %v11403_v13, 7  ;;  %v3578_v53 = vrot.slane %v11400_v24, 6  ;;  %v14997_v19 = vrot.slane %v11403_v13, 6 }
 0x4dc   :  { %v11416_v38 = vpop.permute.xlu0 %2719  ;;  %v3643_v17 = vrot.slane %v11409_v21, 7  ;;  %v3707_v16 = vrot.slane %v11409_v21, 1  ;;  %v3771_v31 = vrot.slane %v11409_v21, 2  ;;  %v3579_v56 = vrot.slane %v11409_v21, 6 }
 0x4dd   :  { %v3641_v44 = vrot.slane %v11411_v32, 7  ;;  %v3705_v30 = vrot.slane %v11411_v32, 1  ;;  %v3769_v26 = vrot.slane %v11411_v32, 2  ;;  %v3577_v42 = vrot.slane %v11411_v32, 6 }
 0x4de   :  { %v3700_v29 = vsel %vm305_vm1, %v3642_v49, %v3643_v17  ;;  %v11434_v37 = vsel %vm370_vm2, %v3706_v25, %v3707_v16  ;;  %v11440_v23 = vsel %vm435_vm4, %v3770_v7, %v3771_v31  ;;  %v3045_v6 = vsel %vm3019_vm3, %v2097_v62, %v11314_v54  ;;  %v3211_v62 = vld [vmem:[#allocation4 + $0xd8] sm:$0xff] }
 0x4df   :  { %v3701_v0 = vsel %vm305_vm1, %v3641_v44, %v3642_v49  ;;  %v3702_v33 = vsel %vm305_vm1, %v14998_v4, %v3641_v44  ;;  %v11451_v28 = vsel %vm370_vm2, %v3705_v30, %v3706_v25  ;;  %v11462_v52 = vsel %vm435_vm4, %v3769_v26, %v3770_v7 }
 0x4e0   :  { %v2844_v48 = vpop.permute.xlu0 %2843  ;;  %3868 = vrot.lane.b32.xlu0 %v3701_v0, %s7693_s3  ;;  %3866 = vrot.lane.b32.xlu1 %v3702_v33, %s7693_s3  ;;  %v11466_v47 = vsel %vm240_vm0, %v3577_v42, %v3578_v53  ;;  %v11477_v10 = vsel %vm240_vm0, %v14997_v19, %v3577_v42  ;;  %v11485_v51 = vsel %vm240_vm0, %v3578_v53, %v3579_v56  ;;  %v3208_v42 = vld [vmem:[#allocation4 + $0xc0] sm:$0xff] }
 0x4e1   :  { %v3078_v49 = vsel %vm3052_vm5, %v3045_v6, %v11321_v45  ;;  %v2098_v25 = vsel %vm240_vm0, %v2082_v18, %v2083_v46  ;;  %v2095_v45 = vsel %vm240_vm0, %v2085_v22, %v2086_v39  ;;  %v11507_v18 = vpop.permute.xlu1 %2597 }
 0x4e2   :  { %v3111_v54 = vsel %vm3085_vm7, %v3078_v49, %v11327_v8  ;;  %v3044_v35 = vsel %vm3019_vm3, %v2098_v25, %v11380_v12  ;;  %v3047_v53 = vsel %vm3019_vm3, %v2095_v45, %v11319_v9  ;;  %v3209_v8 = vld [vmem:[#allocation4 + $0xc8] sm:$0xff] }
 0x4e3   :  { %v3144_v34 = vsel %vm3118_vm8, %v3111_v54, %v11369_v57  ;;  %v3077_v44 = vsel %vm3052_vm5, %v3044_v35, %v11387_v50  ;;  %v3080_v0 = vsel %vm3052_vm5, %v3047_v53, %v11323_v27  ;;  %v2096_v57 = vsel %vm240_vm0, %v2084_v43, %v2085_v22 }
 0x4e4   :  { %v2848_v7 = vpop.permute.xlu0 %2847  ;;  %3992 = vrot.lane.b32.xlu0 %v11403_v13, %s7694_s20  ;;  %3870 = vrot.lane.b32.xlu1 %v3700_v29, %s7693_s3  ;;  %v3177_v12 = vsel %vm3151_vm9, %v3144_v34, %v11385_v15  ;;  %v3110_v29 = vsel %vm3085_vm7, %v3077_v44, %v2716_v41  ;;  %v3113_v9 = vsel %vm3085_vm7, %v3080_v0, %v11337_v2  ;;  %v14996_v50 = vrot.slane %v11403_v13, 1 }
 0x4e5   :  { %v3143_v33 = vsel %vm3118_vm8, %v3110_v29, %v2844_v48  ;;  %v3046_v15 = vsel %vm3019_vm3, %v2096_v57, %v11383_v11  ;;  %v3146_v41 = vsel %vm3118_vm8, %v3113_v9, %v11378_v61  ;;  %v3241_v43 = vmul.f32 %v3209_v8, %v3177_v12  ;;  %v3210_v11 = vld [vmem:[#allocation4 + $0xd0] sm:$0xff]  ;;  %v11543_v49 = vpop.permute.xlu1 %2601 }
 0x4e6   :  { %v3179_v6 = vsel %vm3151_vm9, %v3146_v41, %v11394_v60  ;;  %v3766_v22 = vsel %vm370_vm2, %v14996_v50, %v3705_v30  ;;  %v14995_v30 = vrot.slane %v11403_v13, 2 }
 0x4e8   :  { %v2972_v46 = vpop.permute.xlu0 %2971  ;;  %3996 = vrot.lane.b32.xlu0 %v11400_v24, %s7694_s20  ;;  %3994 = vrot.lane.b32.xlu1 %v11411_v32, %s7694_s20  ;;  %v3079_v24 = vsel %vm3052_vm5, %v3046_v15, %v11396_v59  ;;  %v3830_v34 = vsel %vm435_vm4, %v14995_v30, %v3769_v26 }
 0x4e9   :  { %v3176_v27 = vsel %vm3151_vm9, %v3143_v33, %v2972_v46  ;;  %v3112_v2 = vsel %vm3085_vm7, %v3079_v24, %v11416_v38  ;;  %v3243_v38 = vmul.f32 %v3211_v62, %v3179_v6 }
 0x4ea   :  { %v3240_v48 = vmul.f32 %v3208_v42, %v3176_v27  ;;  %v3145_v61 = vsel %vm3118_vm8, %v3112_v2, %v2848_v7  ;;  %v11558_v7 = vpop.permute.xlu1 %2725  ;;  %v2088_v27 = vrot.slane %v10657_v58, 6  ;;  %v3215_v58 = vld [vmem:[#allocation4 + $0xf8] sm:$0xff] }
 0x4ec   :  { %v3260_v25 = vpack.c.bf16 %v3241_v43, %v3240_v48  ;;  %v2976_v59 = vpop.permute.xlu0 %2975  ;;  %4120 = vrot.lane.b32.xlu0 %v3766_v22, %s7695_s2  ;;  %3998 = vrot.lane.b32.xlu1 %v11409_v21, %s7694_s20 }
 0x4ed   :  { %v3178_v60 = vsel %vm3151_vm9, %v3145_v61, %v2976_v59 }
 0x4ee   :  { %v3242_v54 = vmul.f32 %v3210_v11, %v3178_v60  ;;  %7401 = vmatprep.mubr.msk.bf16.mxu1 %vm3331_vm10, %v3260_v25 }
 0x4f0   :  { %v3261_v35 = vpack.c.bf16 %v3243_v38, %v3242_v54  ;;  %v11551_v45 = vpop.permute.xlu0 %2467  ;;  %4124 = vrot.lane.b32.xlu0 %v11434_v37, %s7695_s2  ;;  %4122 = vrot.lane.b32.xlu1 %v11451_v28, %s7695_s2  ;;  %v11570_v37 = vpop.permute.xlu1 %2729 }
 0x4f2   :  { %7402 = vmatmul.mubr.msk.bf16.gmra.mrb[24].mxu1 %vm3331_vm10, %v3261_v35 }
 0x4f4   :  { %v11567_v44 = vpop.permute.xlu0 %2471  ;;  %4248 = vrot.lane.b32.xlu0 %v3830_v34, %s7696_s22  ;;  %v11578_v32 = vpop.permute.xlu1 %2853 }
 0x4f8   :  { %v11572_v28 = vpop.permute.xlu0 %2595  ;;  %4252 = vrot.lane.b32.xlu0 %v11440_v23, %s7696_s22  ;;  %v2087_v23 = vrot.slane %v15232_v40, 6  ;;  %v2858_v11 = vpop.permute.xlu1 %2857 }
 0x4fa   :  { %v2093_v21 = vsel %vm240_vm0, %v2087_v23, %v2088_v27 }
 0x4fc   :  { %v11576_v53 = vpop.permute.xlu0 %2599 }
 0x4fd   :  { %v7383_v8 = vpop.f32.mrb[4].mxu1 }
 0x4fe   :  { %v3442_v12 = vadd.f32 %v7383_v8, %v11392_v63  ;;  %v3433_v29 = vpop.f32.mrb[5].mxu1 }
 0x4ff   :  { %v3434_v26 = vadd.f32 %v11392_v63, %v3433_v29  ;;  %v7384_v42 = vpop.f32.mrb[6].mxu1 }
 0x500   :  { %v11582_v0 = vmax.f32 %v3442_v12, 0.0  ;;  %v3445_v57 = vadd.f32 %v7384_v42, %v11392_v63  ;;  %v11585_v33 = vpop.permute.xlu0 %2723  ;;  %v3436_v46 = vpop.f32.mrb[7].mxu1 }
 0x501   :  { %v3548_v9 = vmax.f32 %v3434_v26, 0.0  ;;  %v3437_v15 = vadd.f32 %v11392_v63, %v3436_v46 }
 0x502   :  { %v11590_v41 = vmax.f32 %v3445_v57, 0.0  ;;  %v3646_v43 = vrot.slane %v11582_v0, 7  ;;  %v3710_v24 = vrot.slane %v11582_v0, 1  ;;  %v3774_v25 = vrot.slane %v11582_v0, 2 }
 0x503   :  { %v11594_v48 = vmax.f32 %v3437_v15, 0.0  ;;  %v3644_v62 = vrot.slane %v3548_v9, 7  ;;  %v3708_v6 = vrot.slane %v3548_v9, 1  ;;  %v3772_v2 = vrot.slane %v3548_v9, 2 }
 0x504   :  { %15241 = vst [vmem:[#allocation17_spill] sm:$0xff] %v11590_v41  ;;  %v11596_v22 = vpop.permute.xlu0 %2727  ;;  %v3647_v40 = vrot.slane %v11590_v41, 7  ;;  %v3711_v61 = vrot.slane %v11590_v41, 1  ;;  %v3580_v59 = vrot.slane %v3548_v9, 6  ;;  %v3775_v35 = vrot.slane %v11590_v41, 2 }
 0x505   :  { %v3699_v60 = vsel %vm305_vm1, %v3643_v17, %v3644_v62  ;;  %v3763_v38 = vsel %vm370_vm2, %v3707_v16, %v3708_v6  ;;  %v3645_v54 = vrot.slane %v11594_v48, 7  ;;  %v3827_v34 = vsel %vm435_vm4, %v3771_v31, %v3772_v2 }
 0x506   :  { %3872 = vrot.lane.b32.xlu0 %v3699_v60, %s7693_s3  ;;  %4126 = vrot.lane.b32.xlu1 %v3763_v38, %s7695_s2  ;;  %v3709_v17 = vrot.slane %v11594_v48, 1  ;;  %v11622_v16 = vsel %vm305_vm1, %v3646_v43, %v3647_v40  ;;  %v3773_v8 = vrot.slane %v11594_v48, 2  ;;  %v11633_v31 = vsel %vm240_vm0, %v3579_v56, %v3580_v59  ;;  %v2982_v60 = vpop.permute.xlu1 %2981 }
 0x507   :  { %v3697_v12 = vsel %vm305_vm1, %v3645_v54, %v3646_v43  ;;  %v3698_v29 = vsel %vm305_vm1, %v3644_v62, %v3645_v54  ;;  %15242 = vst [vmem:[#allocation18_spill] sm:$0xff] %v11633_v31  ;;  %v3581_v26 = vrot.slane %v11594_v48, 6  ;;  %v3582_v43 = vrot.slane %v11582_v0, 6 }
 0x508   :  { %v2852_v42 = vpop.permute.xlu0 %2851  ;;  %v3762_v57 = vsel %vm370_vm2, %v3708_v6, %v3709_v17  ;;  %v3761_v46 = vsel %vm370_vm2, %v3709_v17, %v3710_v24  ;;  %v11642_v15 = vsel %vm435_vm4, %v3773_v8, %v3774_v25  ;;  %v14994_v62 = vrot.slane %v11590_v41, 6 }
 0x509   :  { %v11651_v56 = vsel %vm240_vm0, %v3580_v59, %v3581_v26  ;;  %v11658_v6 = vsel %vm370_vm2, %v3710_v24, %v3711_v61  ;;  %v11665_v38 = vsel %vm240_vm0, %v3581_v26, %v3582_v43  ;;  %v11669_v59 = vsel %vm435_vm4, %v3772_v2, %v3773_v8 }
 0x50a   :  { %15243 = vst [vmem:[#allocation19_spill] sm:$0xff] %v11651_v56  ;;  %3876 = vrot.lane.b32.xlu0 %v3697_v12, %s7693_s3  ;;  %4250 = vrot.lane.b32.xlu1 %v11462_v52, %s7696_s22  ;;  %15244 = vst [vmem:[#allocation20_spill] sm:$0xff] %v11665_v38  ;;  %v11675_v24 = vsel %vm435_vm4, %v3774_v25, %v3775_v35  ;;  %v3049_v54 = vsel %vm3019_vm3, %v2093_v21, %v11407_v3  ;;  %v2089_v17 = vrot.slane %v10663_v36, 6 }
 0x50b   :  { %v11684_v52 = vsel %vm240_vm0, %v3582_v43, %v14994_v62  ;;  %v3082_v2 = vsel %vm3052_vm5, %v3049_v54, %v11507_v18  ;;  %v2094_v25 = vsel %vm240_vm0, %v2086_v39, %v2087_v23  ;;  %v2986_v23 = vpop.permute.xlu1 %2985 }
 0x50c   :  { %15245 = vst [vmem:[#allocation12_spill] sm:$0xff] %v11684_v52  ;;  %v2856_v8 = vpop.permute.xlu0 %2855  ;;  %v2091_v36 = vsel %vm240_vm0, %v2089_v17, %v2090_v5  ;;  %v3115_v3 = vsel %vm3085_vm7, %v3082_v2, %v11558_v7  ;;  %v3048_v12 = vsel %vm3019_vm3, %v2094_v25, %v11551_v45  ;;  %v3213_v5 = vld [vmem:[#allocation4 + $0xe8] sm:$0xff] }
 0x50d   :  { %v3051_v18 = vsel %vm3019_vm3, %v2091_v36, %v11454_v14  ;;  %v3148_v20 = vsel %vm3118_vm8, %v3115_v3, %v11578_v32  ;;  %v3081_v39 = vsel %vm3052_vm5, %v3048_v12, %v11572_v28  ;;  %v3212_v14 = vld [vmem:[#allocation4 + $0xe0] sm:$0xff]  ;;  %v2092_v28 = vsel %vm240_vm0, %v2088_v27, %v2089_v17 }
 0x50e   :  { %4000 = vrot.lane.b32.xlu0 %v3548_v9, %s7694_s20  ;;  %4254 = vrot.lane.b32.xlu1 %v3827_v34, %s7696_s22  ;;  %v3084_v55 = vsel %vm3052_vm5, %v3051_v18, %v11543_v49  ;;  %v3181_v7 = vsel %vm3151_vm9, %v3148_v20, %v2982_v60  ;;  %v3114_v45 = vsel %vm3085_vm7, %v3081_v39, %v11585_v33 }
 0x50f   :  { %v3117_v32 = vsel %vm3085_vm7, %v3084_v55, %v11570_v37  ;;  %v3147_v9 = vsel %vm3118_vm8, %v3114_v45, %v2852_v42  ;;  %v3050_v26 = vsel %vm3019_vm3, %v2092_v28, %v11567_v44  ;;  %v3245_v43 = vmul.f32 %v3213_v5, %v3181_v7  ;;  %v3214_v42 = vld [vmem:[#allocation4 + $0xf0] sm:$0xff] }
 0x510   :  { %v2980_v34 = vpop.permute.xlu0 %2979  ;;  %v3150_v49 = vsel %vm3118_vm8, %v3117_v32, %v2858_v11  ;;  %v3083_v37 = vsel %vm3052_vm5, %v3050_v26, %v11576_v53 }
 0x511   :  { %v3180_v33 = vsel %vm3151_vm9, %v3147_v9, %v2980_v34  ;;  %v3183_v27 = vsel %vm3151_vm9, %v3150_v49, %v2986_v23  ;;  %v3116_v11 = vsel %vm3085_vm7, %v3083_v37, %v11596_v22 }
 0x512   :  { %v3244_v21 = vmul.f32 %v3212_v14, %v3180_v33  ;;  %4004 = vrot.lane.b32.xlu0 %v11582_v0, %s7694_s20  ;;  %3874 = vrot.lane.b32.xlu1 %v3698_v29, %s7693_s3  ;;  %v3149_v44 = vsel %vm3118_vm8, %v3116_v11, %v2856_v8  ;;  %v3247_v53 = vmul.f32 %v3215_v58, %v3183_v27 }
 0x514   :  { %v3262_v60 = vpack.c.bf16 %v3245_v43, %v3244_v21  ;;  %v2984_v54 = vpop.permute.xlu0 %2983 }
 0x515   :  { %v3182_v17 = vsel %vm3151_vm9, %v3149_v44, %v2984_v54 }
 0x516   :  { %v3246_v2 = vmul.f32 %v3214_v42, %v3182_v17  ;;  %7405 = vmatprep.mubr.msk.bf16.mxu1 %vm3331_vm10, %v3262_v60  ;;  %4128 = vrot.lane.b32.xlu0 %v3762_v57, %s7695_s2 }
 0x517   :  { %3878 = vrot.lane.b32.xlu1 %v11622_v16, %s7693_s3 }
 0x518   :  { %v3263_v0 = vpack.c.bf16 %v3247_v53, %v3246_v2 }
 0x51a   :  { %7406 = vmatmul.mubr.msk.bf16.gmra.mrb[28].mxu1 %vm3331_vm10, %v3263_v0 }
 0x51b   :  { %4002 = vrot.lane.b32.xlu1 %v11594_v48, %s7694_s20 }
 0x51f   :  { %4006 = vrot.lane.b32.xlu1 %v11590_v41, %s7694_s20 }
 0x523   :  { %4130 = vrot.lane.b32.xlu1 %v3761_v46, %s7695_s2 }
 0x525   :  { %v7387_v22 = vpop.f32.mrb[8].mxu1 }
 0x526   :  { %v3458_v29 = vadd.f32 %v7387_v22, %v11392_v63  ;;  %v3449_v25 = vpop.f32.mrb[9].mxu1 }
 0x527   :  { %v3450_v57 = vadd.f32 %v11392_v63, %v3449_v25  ;;  %v7388_v8 = vpop.f32.mrb[10].mxu1 }
 0x528   :  { %v3461_v16 = vadd.f32 %v7388_v8, %v11392_v63  ;;  %v3452_v36 = vpop.f32.mrb[11].mxu1  ;;  %v11750_v48 = vmax.f32 %v3458_v29, 0.0 }
 0x529   :  { %v11747_v3 = vmax.f32 %v3450_v57, 0.0  ;;  %v3453_v12 = vadd.f32 %v11392_v63, %v3452_v36 }
 0x52a   :  { %v11752_v18 = vmax.f32 %v3461_v16, 0.0  ;;  %v3650_v32 = vrot.slane %v11750_v48, 7  ;;  %v3714_v9 = vrot.slane %v11750_v48, 1  ;;  %v3778_v34 = vrot.slane %v11750_v48, 2 }
 0x52b   :  { %v11754_v20 = vmax.f32 %v3453_v12, 0.0  ;;  %v3712_v46 = vrot.slane %v11747_v3, 1  ;;  %v3648_v39 = vrot.slane %v11747_v3, 7  ;;  %v3776_v28 = vrot.slane %v11747_v3, 2 }
 0x52c   :  { %15246 = vst [vmem:[#allocation50_spill] sm:$0xff] %v11752_v18  ;;  %v3715_v55 = vrot.slane %v11752_v18, 1  ;;  %v3779_v14 = vrot.slane %v11752_v18, 2  ;;  %v3651_v58 = vrot.slane %v11752_v18, 7 }
 0x52d   :  { %15247 = vst [vmem:[#allocation23_spill] sm:$0xff] %v11754_v20  ;;  %v3759_v5 = vsel %vm370_vm2, %v3711_v61, %v3712_v46  ;;  %v3649_v7 = vrot.slane %v11754_v20, 7  ;;  %v3713_v45 = vrot.slane %v11754_v20, 1  ;;  %v3777_v23 = vrot.slane %v11754_v20, 2 }
 0x52e   :  { %4134 = vrot.lane.b32.xlu1 %v3759_v5, %s7695_s2  ;;  %v11776_v61 = vsel %vm305_vm1, %v3647_v40, %v3648_v39  ;;  %v11788_v33 = vsel %vm370_vm2, %v3714_v9, %v3715_v55  ;;  %v11796_v40 = vsel %vm435_vm4, %v3778_v34, %v3779_v14  ;;  %v3823_v37 = vsel %vm435_vm4, %v3775_v35, %v3776_v28 }
 0x52f   :  { %v11780_v49 = vsel %vm305_vm1, %v3649_v7, %v3650_v32  ;;  %v11784_v26 = vsel %vm370_vm2, %v3712_v46, %v3713_v45  ;;  %v11792_v43 = vsel %vm435_vm4, %v3776_v28, %v3777_v23  ;;  %v3694_v21 = vsel %vm305_vm1, %v3648_v39, %v3649_v7 }
 0x530   :  { %v3692_v27 = vsel %vm305_vm1, %v3650_v32, %v3651_v58  ;;  %v3757_v35 = vsel %vm370_vm2, %v3713_v45, %v3714_v9  ;;  %v3821_v32 = vsel %vm435_vm4, %v3777_v23, %v3778_v34 }
 0x532   :  { %4258 = vrot.lane.b32.xlu1 %v11642_v15, %s7696_s22 }
 0x536   :  { %4262 = vrot.lane.b32.xlu1 %v3823_v37, %s7696_s22 }
 0x53a   :  { %3882 = vrot.lane.b32.xlu1 %v3694_v21, %s7693_s3 }
 0x53e   :  { %3886 = vrot.lane.b32.xlu1 %v3692_v27, %s7693_s3 }
 0x542   :  { %4010 = vrot.lane.b32.xlu1 %v11754_v20, %s7694_s20 }
 0x546   :  { %4014 = vrot.lane.b32.xlu1 %v11752_v18, %s7694_s20 }
 0x54a   :  { %4138 = vrot.lane.b32.xlu1 %v3757_v35, %s7695_s2 }
 0x54d   :  { %v7391_v15 = vpop.f32.mrb[12].mxu1 }
 0x54e   :  { %v3465_v11 = vpop.f32.mrb[13].mxu1  ;;  %v3474_v42 = vadd.f32 %v7391_v15, %v11392_v63 }
 0x54f   :  { %v3466_v44 = vadd.f32 %v11392_v63, %v3465_v11  ;;  %v7392_v60 = vpop.f32.mrb[14].mxu1 }
 0x550   :  { %v3477_v54 = vadd.f32 %v7392_v60, %v11392_v63  ;;  %v3468_v17 = vpop.f32.mrb[15].mxu1  ;;  %v11827_v22 = vmax.f32 %v3474_v42, 0.0 }
 0x551   :  { %v11822_v53 = vmax.f32 %v3466_v44, 0.0  ;;  %v3469_v2 = vadd.f32 %v11392_v63, %v3468_v17 }
 0x552   :  { %v11825_v0 = vmax.f32 %v3477_v54, 0.0  ;;  %v3654_v7 = vrot.slane %v11827_v22, 7  ;;  %v3718_v45 = vrot.slane %v11827_v22, 1  ;;  %v3869_v9 = vpop.permute.xlu0 %3868 }
 0x553   :  { %v11829_v29 = vmax.f32 %v3469_v2, 0.0  ;;  %v3716_v25 = vrot.slane %v11822_v53, 1  ;;  %v3652_v57 = vrot.slane %v11822_v53, 7  ;;  %v3780_v5 = vrot.slane %v11822_v53, 2 }
 0x554   :  { %15248 = vst [vmem:[#allocation51_spill] sm:$0xff] %v11825_v0  ;;  %v3719_v8 = vrot.slane %v11825_v0, 1  ;;  %v14999_v39 = vrot.slane %v11825_v0, 2  ;;  %v3655_v42 = vrot.slane %v11825_v0, 7 }
 0x555   :  { %15249 = vst [vmem:[#allocation24_spill] sm:$0xff] %v11829_v29  ;;  %v3755_v16 = vsel %vm370_vm2, %v3715_v55, %v3716_v25  ;;  %v3653_v36 = vrot.slane %v11829_v29, 7  ;;  %v3717_v12 = vrot.slane %v11829_v29, 1  ;;  %v15000_v46 = vrot.slane %v11829_v29, 2 }
 0x556   :  { %4142 = vrot.lane.b32.xlu1 %v3755_v16, %s7695_s2  ;;  %v15001_v55 = vrot.slane %v11827_v22, 2  ;;  %v11849_v28 = vsel %vm305_vm1, %v3651_v58, %v3652_v57  ;;  %v11861_v27 = vsel %vm370_vm2, %v3718_v45, %v3719_v8  ;;  %v11878_v58 = vpop.permute.xlu1 %3866  ;;  %v3819_v35 = vsel %vm435_vm4, %v3779_v14, %v3780_v5  ;;  %v11883_v15 = vpop.permute.xlu0 %3992 }
 0x557   :  { %v11853_v37 = vsel %vm305_vm1, %v3653_v36, %v3654_v7  ;;  %v11857_v21 = vsel %vm370_vm2, %v3716_v25, %v3717_v12  ;;  %v11867_v23 = vsel %vm435_vm4, %v3780_v5, %v15000_v46  ;;  %v3690_v11 = vsel %vm305_vm1, %v3652_v57, %v3653_v36 }
 0x558   :  { %v11876_v34 = vsel %vm435_vm4, %v15001_v55, %v14999_v39  ;;  %v3688_v54 = vsel %vm305_vm1, %v3654_v7, %v3655_v42  ;;  %v3753_v57 = vsel %vm370_vm2, %v3717_v12, %v3718_v45  ;;  %v4474_v55 = vld [vmem:[#allocation6 + $0x10] sm:$0xff] }
 0x55a   :  { %4266 = vrot.lane.b32.xlu1 %v3821_v32, %s7696_s22  ;;  %v3871_v44 = vpop.permute.xlu1 %3870  ;;  %v3997_v60 = vpop.permute.xlu0 %3996 }
 0x55e   :  { %4270 = vrot.lane.b32.xlu1 %v3819_v35, %s7696_s22  ;;  %v11892_v17 = vpop.permute.xlu1 %3994  ;;  %v11896_v14 = vpop.permute.xlu0 %4120 }
 0x562   :  { %3890 = vrot.lane.b32.xlu1 %v3690_v11, %s7693_s3  ;;  %v3999_v2 = vpop.permute.xlu1 %3998  ;;  %v4125_v25 = vpop.permute.xlu0 %4124 }
 0x566   :  { %3894 = vrot.lane.b32.xlu1 %v3688_v54, %s7693_s3  ;;  %v11903_v16 = vpop.permute.xlu1 %4122  ;;  %v11905_v7 = vpop.permute.xlu0 %4248 }
 0x567   :  { %15250 = vst [vmem:[#allocation25_spill] sm:$0xff] %v11905_v7 }
 0x56a   :  { %4018 = vrot.lane.b32.xlu1 %v11829_v29, %s7694_s20 }
 0x56e   :  { %4022 = vrot.lane.b32.xlu1 %v11825_v0, %s7694_s20 }
 0x572   :  { %4146 = vrot.lane.b32.xlu1 %v3753_v57, %s7695_s2 }
 0x575   :  { %v7395_v36 = vpop.f32.mrb[16].mxu1 }
 0x576   :  { %v3481_v5 = vpop.f32.mrb[17].mxu1  ;;  %v3490_v32 = vadd.f32 %v7395_v36, %v11392_v63  ;;  %v4346_v36 = vsel %vm3019_vm3, %v11466_v47, %v3869_v9 }
 0x577   :  { %v3482_v35 = vadd.f32 %v11392_v63, %v3481_v5  ;;  %v7396_v11 = vpop.f32.mrb[18].mxu1  ;;  %v4347_v5 = vsel %vm3019_vm3, %v11485_v51, %v3871_v44 }
 0x578   :  { %v3493_v54 = vadd.f32 %v7396_v11, %v11392_v63  ;;  %v3484_v62 = vpop.f32.mrb[19].mxu1  ;;  %v4127_v45 = vpop.permute.xlu1 %4126  ;;  %v11915_v50 = vmax.f32 %v3490_v32, 0.0  ;;  %v4379_v39 = vsel %vm3052_vm5, %v4347_v5, %v3999_v2  ;;  %v4475_v2 = vld [vmem:[#allocation6 + $0x18] sm:$0xff]  ;;  %v15254_v5 = vrot.slane %v11829_v29, 2 }
 0x579   :  { %v11910_v30 = vmax.f32 %v3482_v35, 0.0  ;;  %v3485_v12 = vadd.f32 %v11392_v63, %v3484_v62  ;;  %v4253_v11 = vpop.permute.xlu0 %4252 }
 0x57a   :  { %v11913_v57 = vmax.f32 %v3493_v54, 0.0  ;;  %v3658_v44 = vrot.slane %v11915_v50, 7  ;;  %v3786_v46 = vrot.slane %v11915_v50, 2 }
 0x57b   :  { %v11917_v19 = vmax.f32 %v3485_v12, 0.0  ;;  %v3720_v4 = vrot.slane %v11910_v30, 1  ;;  %v3656_v54 = vrot.slane %v11910_v30, 7  ;;  %v4378_v12 = vsel %vm3052_vm5, %v4346_v36, %v3997_v60 }
 0x57c   :  { %15251 = vst [vmem:[#allocation30_spill] sm:$0xff] %v11913_v57  ;;  %v11924_v35 = vpop.permute.xlu1 %4250  ;;  %v3723_v51 = vrot.slane %v11913_v57, 1  ;;  %v4410_v9 = vsel %vm3085_vm7, %v4378_v12, %v4125_v25  ;;  %v4411_v60 = vsel %vm3085_vm7, %v4379_v39, %v4127_v45  ;;  %v15253_v36 = vrot.slane %v11827_v22, 2 }
 0x57d   :  { %15252 = vst [vmem:[#allocation31_spill] sm:$0xff] %v11917_v19  ;;  %v3751_v62 = vsel %vm370_vm2, %v3719_v8, %v3720_v4  ;;  %v3657_v32 = vrot.slane %v11917_v19, 7  ;;  %v3721_v47 = vrot.slane %v11917_v19, 1  ;;  %v3785_v8 = vrot.slane %v11917_v19, 2 }
 0x57e   :  { %4150 = vrot.lane.b32.xlu1 %v3751_v62, %s7695_s2  ;;  %v4442_v41 = vsel %vm3118_vm8, %v4410_v9, %v4253_v11  ;;  %v3817_v62 = vsel %vm435_vm4, %v15254_v5, %v15253_v36  ;;  %v3722_v25 = vrot.slane %v11915_v50, 1  ;;  %v3784_v18 = vrot.slane %v11910_v30, 2 }
 0x57f   :  { %v11952_v11 = vsel %vm305_vm1, %v3655_v42, %v3656_v54  ;;  %v11956_v39 = vsel %vm305_vm1, %v3657_v32, %v3658_v44  ;;  %v11962_v9 = vsel %vm370_vm2, %v3720_v4, %v3721_v47  ;;  %v11968_v5 = vmul.f32 %v4474_v55, %v4442_v41 }
 0x580   :  { %v4255_v12 = vpop.permute.xlu1 %4254  ;;  %v11966_v36 = vsel %vm370_vm2, %v3722_v25, %v3723_v51  ;;  %v11974_v29 = vsel %vm435_vm4, %v3784_v18, %v3785_v8  ;;  %v3686_v55 = vsel %vm305_vm1, %v3656_v54, %v3657_v32 }
 0x581   :  { %v4443_v45 = vsel %vm3118_vm8, %v4411_v60, %v4255_v12  ;;  %15255 = vst [vmem:[#allocation26_spill] sm:$0xff] %v11968_v5  ;;  %v15257_v60 = vrot.slane %v11913_v57, 2  ;;  %v15258_v12 = vrot.slane %v11825_v0, 2 }
 0x582   :  { %4274 = vrot.lane.b32.xlu1 %v3817_v62, %s7696_s22  ;;  %v11970_v42 = vmul.f32 %v4475_v2, %v4443_v45  ;;  %v3659_v2 = vrot.slane %v11913_v57, 7 }
 0x583   :  { %v11980_v62 = vsel %vm435_vm4, %v3786_v46, %v15257_v60  ;;  %v3815_v41 = vsel %vm435_vm4, %v15258_v12, %v3784_v18  ;;  %v3749_v18 = vsel %vm370_vm2, %v3721_v47, %v3722_v25 }
 0x584   :  { %15256 = vst [vmem:[#allocation29_spill] sm:$0xff] %v11970_v42  ;;  %v3684_v45 = vsel %vm305_vm1, %v3658_v44, %v3659_v2  ;;  %v3813_v42 = vsel %vm435_vm4, %v3785_v8, %v3786_v46  ;;  %v15267_v46 = vrot.slane %v11913_v57, 2 }
 0x586   :  { %4278 = vrot.lane.b32.xlu1 %v3815_v41, %s7696_s22 }
 0x58a   :  { %3898 = vrot.lane.b32.xlu1 %v3686_v55, %s7693_s3 }
 0x58e   :  { %3902 = vrot.lane.b32.xlu1 %v3684_v45, %s7693_s3 }
 0x592   :  { %4026 = vrot.lane.b32.xlu1 %v11917_v19, %s7694_s20 }
 0x596   :  { %4030 = vrot.lane.b32.xlu1 %v11913_v57, %s7694_s20 }
 0x59a   :  { %4154 = vrot.lane.b32.xlu1 %v3749_v18, %s7695_s2 }
 0x59d   :  { %v7399_v54 = vpop.f32.mrb[20].mxu1 }
 0x59e   :  { %v3506_v32 = vadd.f32 %v7399_v54, %v11392_v63  ;;  %v3497_v60 = vpop.f32.mrb[21].mxu1 }
 0x59f   :  { %v3498_v12 = vadd.f32 %v11392_v63, %v3497_v60  ;;  %v7400_v44 = vpop.f32.mrb[22].mxu1 }
 0x5a0   :  { %v3509_v41 = vadd.f32 %v7400_v44, %v11392_v63  ;;  %v3500_v55 = vpop.f32.mrb[23].mxu1  ;;  %v12006_v45 = vmax.f32 %v3506_v32, 0.0 }
 0x5a1   :  { %v12008_v4 = vmax.f32 %v3498_v12, 0.0  ;;  %v3501_v19 = vadd.f32 %v11392_v63, %v3500_v55 }
 0x5a2   :  { %15259 = vst [vmem:[#allocation13_spill] sm:$0xff] %v12006_v45  ;;  %v12011_v0 = vmax.f32 %v3509_v41, 0.0  ;;  %v3662_v32 = vrot.slane %v12006_v45, 7  ;;  %v3726_v55 = vrot.slane %v12006_v45, 1 }
 0x5a3   :  { %15260 = vst [vmem:[#allocation32_spill] sm:$0xff] %v12008_v4  ;;  %v12013_v47 = vmax.f32 %v3501_v19, 0.0  ;;  %v3724_v25 = vrot.slane %v12008_v4, 1  ;;  %v3660_v18 = vrot.slane %v12008_v4, 7  ;;  %v3788_v20 = vrot.slane %v12008_v4, 2 }
 0x5a4   :  { %15261 = vst [vmem:[#allocation14_spill] sm:$0xff] %v12011_v0  ;;  %v3727_v44 = vrot.slane %v12011_v0, 1  ;;  %v3791_v41 = vrot.slane %v12011_v0, 2  ;;  %v15286_v4 = vrot.slane %v11403_v13, 6 }
 0x5a5   :  { %15262 = vst [vmem:[#allocation33_spill] sm:$0xff] %v12013_v47  ;;  %v3747_v54 = vsel %vm370_vm2, %v3723_v51, %v3724_v25  ;;  %v3661_v60 = vrot.slane %v12013_v47, 7  ;;  %v3725_v12 = vrot.slane %v12013_v47, 1  ;;  %v3789_v19 = vrot.slane %v12013_v47, 2 }
 0x5a6   :  { %4158 = vrot.lane.b32.xlu1 %v3747_v54, %s7695_s2  ;;  %v3790_v51 = vrot.slane %v12006_v45, 2  ;;  %v12031_v5 = vsel %vm305_vm1, %v3659_v2, %v3660_v18  ;;  %v12046_v45 = vsel %vm370_vm2, %v3726_v55, %v3727_v44  ;;  %v3811_v8 = vsel %vm435_vm4, %v15267_v46, %v3788_v20 }
 0x5a7   :  { %v12035_v54 = vsel %vm305_vm1, %v3661_v60, %v3662_v32  ;;  %v12041_v38 = vsel %vm370_vm2, %v3724_v25, %v3725_v12  ;;  %15264 = vst [vmem:[#allocation63_spill] sm:$0xff] %v12046_v45  ;;  %v12050_v2 = vsel %vm435_vm4, %v3788_v20, %v3789_v19  ;;  %v3663_v25 = vrot.slane %v12011_v0, 7 }
 0x5a8   :  { %15263 = vst [vmem:[#allocation52_spill] sm:$0xff] %v12041_v38  ;;  %15265 = vst [vmem:[#allocation34_spill] sm:$0xff] %v12050_v2  ;;  %v12054_v52 = vsel %vm435_vm4, %v3790_v51, %v3791_v41  ;;  %v3745_v20 = vsel %vm370_vm2, %v3725_v12, %v3726_v55 }
 0x5a9   :  { %15266 = vst [vmem:[#allocation55_spill] sm:$0xff] %v12054_v52  ;;  %v3680_v2 = vsel %vm305_vm1, %v3662_v32, %v3663_v25 }
 0x5aa   :  { %4282 = vrot.lane.b32.xlu1 %v3813_v42, %s7696_s22  ;;  %v3682_v42 = vsel %vm305_vm1, %v3660_v18, %v3661_v60 }
 0x5ae   :  { %4286 = vrot.lane.b32.xlu1 %v3811_v8, %s7696_s22 }
 0x5b2   :  { %3906 = vrot.lane.b32.xlu1 %v3682_v42, %s7693_s3 }
 0x5b6   :  { %3910 = vrot.lane.b32.xlu1 %v3680_v2, %s7693_s3 }
 0x5ba   :  { %4034 = vrot.lane.b32.xlu1 %v12013_v47, %s7694_s20 }
 0x5be   :  { %4038 = vrot.lane.b32.xlu1 %v12011_v0, %s7694_s20 }
 0x5c2   :  { %4162 = vrot.lane.b32.xlu1 %v3745_v20, %s7695_s2 }
 0x5c5   :  { %v7403_v18 = vpop.f32.mrb[24].mxu1 }
 0x5c6   :  { %v3522_v60 = vadd.f32 %v7403_v18, %v11392_v63  ;;  %v3513_v46 = vpop.f32.mrb[25].mxu1 }
 0x5c7   :  { %v3514_v8 = vadd.f32 %v11392_v63, %v3513_v46  ;;  %v7404_v32 = vpop.f32.mrb[26].mxu1 }
 0x5c8   :  { %v3525_v2 = vadd.f32 %v7404_v32, %v11392_v63  ;;  %v3516_v42 = vpop.f32.mrb[27].mxu1  ;;  %v12078_v57 = vmax.f32 %v3522_v60, 0.0  ;;  %v3809_v32 = vsel %vm435_vm4, %v3789_v19, %v3790_v51 }
 0x5c9   :  { %v12080_v47 = vmax.f32 %v3514_v8, 0.0  ;;  %v3517_v0 = vadd.f32 %v11392_v63, %v3516_v42 }
 0x5ca   :  { %15268 = vst [vmem:[#allocation68_spill] sm:$0xff] %v12078_v57  ;;  %v12083_v52 = vmax.f32 %v3525_v2, 0.0  ;;  %v3666_v60 = vrot.slane %v12078_v57, 7  ;;  %v3730_v42 = vrot.slane %v12078_v57, 1  ;;  %v15279_v51 = vrot.slane %v12078_v57, 2 }
 0x5cb   :  { %15269 = vst [vmem:[#allocation65_spill] sm:$0xff] %v12080_v47  ;;  %v12085_v12 = vmax.f32 %v3517_v0, 0.0  ;;  %v3728_v55 = vrot.slane %v12080_v47, 1  ;;  %v3664_v20 = vrot.slane %v12080_v47, 7  ;;  %v3792_v45 = vrot.slane %v12080_v47, 2 }
 0x5cc   :  { %v15274_v0 = vrot.slane %v12083_v52, 1  ;;  %v15278_v19 = vrot.slane %v12083_v52, 2 }
 0x5cd   :  { %15270 = vst [vmem:[#allocation66_spill] sm:$0xff] %v12085_v12  ;;  %v3743_v18 = vsel %vm370_vm2, %v3727_v44, %v3728_v55  ;;  %v3665_v46 = vrot.slane %v12085_v12, 7  ;;  %v3729_v8 = vrot.slane %v12085_v12, 1  ;;  %v12103_v38 = vsel %vm305_vm1, %v3663_v25, %v3664_v20 }
 0x5ce   :  { %4166 = vrot.lane.b32.xlu1 %v3743_v18, %s7695_s2  ;;  %15271 = vst [vmem:[#allocation67_spill] sm:$0xff] %v12103_v38  ;;  %v12120_v44 = vsel %vm370_vm2, %v3730_v42, %v15274_v0  ;;  %v15276_v25 = vrot.slane %v12085_v12, 2  ;;  %v7557_v0 = vld [vmem:[%s14917_s10] sm:$0xff]  }
 0x5cf   :  { %v12107_v18 = vsel %vm305_vm1, %v3665_v46, %v3666_v60  ;;  %v12113_v2 = vsel %vm370_vm2, %v3728_v55, %v3729_v8  ;;  %15275 = vst [vmem:[#allocation36_spill] sm:$0xff] %v12120_v44  ;;  %v12134_v55 = vsel %vm435_vm4, %v15279_v51, %v15278_v19  ;;  %7409 = vmatprep.subr.bf16.mxu0 %v7557_v0  ;;  %v7558_v19 = vld [vmem:[%s14917_s10 + $0x8] sm:$0xff]   ;;  %v12182_v44 = vpop.permute.xlu1 %3874 }
 0x5d0   :  { %15272 = vst [vmem:[#allocation35_spill] sm:$0xff] %v12107_v18  ;;  %15273 = vst [vmem:[#allocation69_spill] sm:$0xff] %v12113_v2  ;;  %v12126_v47 = vsel %vm435_vm4, %v3792_v45, %v15276_v25  ;;  %7410 = vmatpush3.bf16.msra.mxu0 %v7557_v0  ;;  %v3678_v25 = vsel %vm305_vm1, %v3664_v20, %v3665_v46  ;;  %v7560_v20 = vld [vmem:[%s14917_s10 + $0x18] sm:$0xff]   ;;  %v7561_v46 = vld [vmem:[%s14917_s10 + $0x20] sm:$0xff]  }
 0x5d1   :  { %15277 = vst [vmem:[#allocation37_spill] sm:$0xff] %v12126_v47  ;;  %15280 = vst [vmem:[#allocation42_spill] sm:$0xff] %v12134_v55  ;;  %v3667_v47 = vrot.slane %v12083_v52, 7  ;;  %7411 = vmatprep.subr.bf16.mxu0 %v7558_v19 }
 0x5d2   :  { %4290 = vrot.lane.b32.xlu1 %v3809_v32, %s7696_s22  ;;  %v3807_v32 = vsel %vm435_vm4, %v3791_v41, %v3792_v45  ;;  %v7559_v41 = vld [vmem:[%s14917_s10 + $0x10] sm:$0xff]  }
 0x5d3   :  { %v3676_v45 = vsel %vm305_vm1, %v3666_v60, %v3667_v47  ;;  %v3741_v60 = vsel %vm370_vm2, %v3729_v8, %v3730_v42  ;;  %v12222_v7 = vpop.permute.xlu1 %3878 }
 0x5d4   :  { %7412 = vmatpush3.bf16.msra.mxu0 %v7558_v19 }
 0x5d5   :  { %7413 = vmatprep.subr.bf16.mxu0 %v7559_v41 }
 0x5d6   :  { %4294 = vrot.lane.b32.xlu1 %v3807_v32, %s7696_s22  ;;  %v7562_v32 = vld [vmem:[%s14917_s10 + $0x28] sm:$0xff]  }
 0x5d8   :  { %7414 = vmatpush3.bf16.msra.mxu0 %v7559_v41 }
 0x5d9   :  { %7415 = vmatprep.subr.bf16.mxu0 %v7560_v20 }
 0x5da   :  { %3914 = vrot.lane.b32.xlu1 %v3678_v25, %s7693_s3  ;;  %v7563_v25 = vld [vmem:[%s14917_s10 + $0x30] ss:$0 sps:$4 sm:$0x33]  }
 0x5dc   :  { %7416 = vmatpush3.bf16.msra.mxu0 %v7560_v20 }
 0x5dd   :  { %7417 = vmatprep.subr.bf16.mxu0 %v7561_v46 }
 0x5de   :  { %3918 = vrot.lane.b32.xlu1 %v3676_v45, %s7693_s3 }
 0x5e0   :  { %7418 = vmatpush3.bf16.msra.mxu0 %v7561_v46 }
 0x5e1   :  { %7419 = vmatprep.subr.bf16.mxu0 %v7562_v32 }
 0x5e2   :  { %4042 = vrot.lane.b32.xlu1 %v12085_v12, %s7694_s20 }
 0x5e4   :  { %7420 = vmatpush3.bf16.msra.mxu0 %v7562_v32  ;;  %v15284_v32 = vrot.slane %v12078_v57, 2 }
 0x5e5   :  { %7525 = vmatprep.subr.msk.bf16.mxu0 %vm4659_vm11, %v7563_v25 }
 0x5e6   :  { %4046 = vrot.lane.b32.xlu1 %v12083_v52, %s7694_s20 }
 0x5ea   :  { %4170 = vrot.lane.b32.xlu1 %v3741_v60, %s7695_s2  ;;  %v4661_v60 = vsel %vm4659_vm11, %v7563_v25, 0 }
 0x5eb   :  { %7422 = vmatpush3.bf16.msra.mxu0 %v4661_v60 }
 0x5ed   :  { %v7407_v51 = vpop.f32.mrb[28].mxu1 }
 0x5ee   :  { %v3529_v0 = vpop.f32.mrb[29].mxu1  ;;  %v3538_v41 = vadd.f32 %v7407_v51, %v11392_v63 }
 0x5ef   :  { %v3530_v19 = vadd.f32 %v11392_v63, %v3529_v0  ;;  %v7408_v45 = vpop.f32.mrb[30].mxu1 }
 0x5f0   :  { %v3541_v8 = vadd.f32 %v7408_v45, %v11392_v63  ;;  %v3532_v42 = vpop.f32.mrb[31].mxu1  ;;  %v12187_v18 = vmax.f32 %v3538_v41, 0.0  ;;  %v15283_v45 = vrot.slane %v11403_v13, 7 }
 0x5f1   :  { %v12177_v20 = vmax.f32 %v3530_v19, 0.0  ;;  %v3533_v46 = vadd.f32 %v11392_v63, %v3532_v42  ;;  %v15282_v19 = vrot.slane %v12083_v52, 1 }
 0x5f2   :  { %v12180_v55 = vmax.f32 %v3541_v8, 0.0  ;;  %15281 = vst [vmem:[#allocation43_spill] sm:$0xff] %v12187_v18  ;;  %v3734_v57 = vrot.slane %v12187_v18, 1 }
 0x5f3   :  { %v12184_v2 = vmax.f32 %v3533_v46, 0.0  ;;  %v3732_v0 = vrot.slane %v12177_v20, 1  ;;  %v3668_v25 = vrot.slane %v12177_v20, 7  ;;  %v3796_v56 = vrot.slane %v12177_v20, 2 }
 0x5f4   :  { %v3671_v51 = vrot.slane %v12180_v55, 7  ;;  %v3735_v46 = vrot.slane %v12180_v55, 1  ;;  %v15287_v31 = vrot.slane %v12180_v55, 6 }
 0x5f5   :  { %v3739_v63 = vsel %vm370_vm2, %v15282_v19, %v3732_v0  ;;  %v3669_v8 = vrot.slane %v12184_v2, 7  ;;  %v3733_v42 = vrot.slane %v12184_v2, 1  ;;  %v3797_v60 = vrot.slane %v12184_v2, 2 }
 0x5f6   :  { %4174 = vrot.lane.b32.xlu1 %v3739_v63, %s7695_s2  ;;  %v3703_v41 = vsel %vm305_vm1, %v3671_v51, %v15283_v45  ;;  %v3799_v19 = vrot.slane %v12180_v55, 2  ;;  %v15285_v63 = vrot.slane %v12085_v12, 2  ;;  %v3670_v45 = vrot.slane %v12187_v18, 7 }
 0x5f7   :  { %3864 = vrot.lane.b32.xlu0 %v3703_v41, %s7693_s3  ;;  %v12220_v41 = vsel %vm240_vm0, %v15287_v31, %v15286_v4  ;;  %v3798_v12 = vrot.slane %v12187_v18, 2  ;;  %v12238_v31 = vsel %vm370_vm2, %v3732_v0, %v3733_v42  ;;  %v12244_v4 = vsel %vm370_vm2, %v3734_v57, %v3735_v46 }
 0x5f8   :  { %v3805_v38 = vsel %vm435_vm4, %v15285_v63, %v15284_v32  ;;  %v12229_v32 = vsel %vm305_vm1, %v3667_v47, %v3668_v25  ;;  %v12234_v63 = vsel %vm305_vm1, %v3669_v8, %v3670_v45  ;;  %15288 = vst [vmem:[#allocation38_spill] sm:$0xff] %v12244_v4  ;;  %v12248_v47 = vsel %vm435_vm4, %v3796_v56, %v3797_v60 }
 0x5f9   :  { %v15290_v18 = vrot.slane %v12083_v52, 2  ;;  %v3674_v4 = vsel %vm305_vm1, %v3668_v25, %v3669_v8  ;;  %v15292_v8 = vrot.slane %v11403_v13, 2 }
 0x5fa   :  { %4298 = vrot.lane.b32.xlu1 %v3805_v38, %s7696_s22  ;;  %v12252_v38 = vsel %vm435_vm4, %v3798_v12, %v3799_v19 }
 0x5fb   :  { %4132 = vrot.lane.b32.xlu0 %v11658_v6, %s7695_s2  ;;  %15289 = vst [vmem:[#allocation41_spill] sm:$0xff] %v12252_v38  ;;  %v3803_v0 = vsel %vm435_vm4, %v15290_v18, %v3796_v56  ;;  %v12259_v6 = vpop.permute.xlu1 %4002  ;;  %v3672_v56 = vsel %vm305_vm1, %v3670_v45, %v3671_v51  ;;  %v3737_v18 = vsel %vm370_vm2, %v3733_v42, %v3734_v57 }
 0x5fc   :  { %v3801_v57 = vsel %vm435_vm4, %v3797_v60, %v3798_v12  ;;  %v3831_v42 = vsel %vm435_vm4, %v3799_v19, %v15292_v8  ;;  %v15295_v8 = vld [vmem:[#allocation18_spill] sm:$0xff] }
 0x5fe   :  { %4302 = vrot.lane.b32.xlu1 %v3803_v0, %s7696_s22  ;;  %v4473_v0 = vld [vmem:[#allocation6 + $0x8] sm:$0xff] }
 0x5ff   :  { %4256 = vrot.lane.b32.xlu0 %v11669_v59, %s7696_s22  ;;  %v12268_v38 = vpop.permute.xlu1 %4006 }
 0x602   :  { %3922 = vrot.lane.b32.xlu1 %v3674_v4, %s7693_s3 }
 0x603   :  { %4260 = vrot.lane.b32.xlu0 %v11675_v24, %s7696_s22  ;;  %v12277_v59 = vpop.permute.xlu1 %4130 }
 0x606   :  { %3926 = vrot.lane.b32.xlu1 %v3672_v56, %s7693_s3 }
 0x607   :  { %3880 = vrot.lane.b32.xlu0 %v11776_v61, %s7693_s3  ;;  %v12283_v24 = vpop.permute.xlu1 %4134 }
 0x60a   :  { %4050 = vrot.lane.b32.xlu1 %v12184_v2, %s7694_s20 }
 0x60b   :  { %3884 = vrot.lane.b32.xlu0 %v11780_v49, %s7693_s3  ;;  %v12292_v61 = vpop.permute.xlu1 %4258  ;;  %v15291_v49 = vrot.slane %v11403_v13, 1 }
 0x60d   :  { %v3767_v51 = vsel %vm370_vm2, %v3735_v46, %v15291_v49 }
 0x60e   :  { %4054 = vrot.lane.b32.xlu1 %v12180_v55, %s7694_s20 }
 0x60f   :  { %4008 = vrot.lane.b32.xlu0 %v11747_v3, %s7694_s20  ;;  %v12304_v25 = vpop.permute.xlu1 %4262 }
 0x612   :  { %4178 = vrot.lane.b32.xlu1 %v3737_v18, %s7695_s2 }
 0x613   :  { %4012 = vrot.lane.b32.xlu0 %v11750_v48, %s7694_s20 }
 0x616   :  { %4182 = vrot.lane.b32.xlu1 %v3767_v51, %s7695_s2 }
 0x617   :  { %4136 = vrot.lane.b32.xlu0 %v11784_v26, %s7695_s2  ;;  %v12315_v26 = vpop.permute.xlu1 %3882 }
 0x61a   :  { %4306 = vrot.lane.b32.xlu1 %v3801_v57, %s7696_s22 }
 0x61b   :  { %4140 = vrot.lane.b32.xlu0 %v11788_v33, %s7695_s2  ;;  %v12319_v12 = vpop.permute.xlu1 %3886 }
 0x61e   :  { %4310 = vrot.lane.b32.xlu1 %v3831_v42, %s7696_s22 }
 0x61f   :  { %4264 = vrot.lane.b32.xlu0 %v11792_v43, %s7696_s22  ;;  %v12325_v13 = vpop.permute.xlu1 %4010 }
 0x623   :  { %4268 = vrot.lane.b32.xlu0 %v11796_v40, %s7696_s22  ;;  %v12329_v33 = vpop.permute.xlu1 %4014 }
 0x627   :  { %3888 = vrot.lane.b32.xlu0 %v11849_v28, %s7693_s3  ;;  %v12335_v43 = vpop.permute.xlu1 %4138 }
 0x62b   :  { %3892 = vrot.lane.b32.xlu0 %v11853_v37, %s7693_s3  ;;  %v12339_v40 = vpop.permute.xlu1 %4142 }
 0x62f   :  { %4016 = vrot.lane.b32.xlu0 %v11822_v53, %s7694_s20  ;;  %v12343_v28 = vpop.permute.xlu1 %4266 }
 0x633   :  { %4020 = vrot.lane.b32.xlu0 %v11827_v22, %s7694_s20  ;;  %v12349_v37 = vpop.permute.xlu1 %4270 }
 0x637   :  { %4144 = vrot.lane.b32.xlu0 %v11857_v21, %s7695_s2  ;;  %v3873_v21 = vpop.permute.xlu0 %3872 }
 0x63b   :  { %4148 = vrot.lane.b32.xlu0 %v11861_v27, %s7695_s2  ;;  %v12353_v27 = vpop.permute.xlu1 %3890 }
 0x63f   :  { %4272 = vrot.lane.b32.xlu0 %v11867_v23, %s7696_s22  ;;  %v3877_v23 = vpop.permute.xlu0 %3876  ;;  %v12359_v46 = vpop.permute.xlu1 %3894 }
 0x643   :  { %4276 = vrot.lane.b32.xlu0 %v11876_v34, %s7696_s22  ;;  %v4001_v34 = vpop.permute.xlu0 %4000 }
 0x647   :  { %3896 = vrot.lane.b32.xlu0 %v11952_v11, %s7693_s3  ;;  %v12363_v11 = vpop.permute.xlu1 %4018 }
 0x64b   :  { %3900 = vrot.lane.b32.xlu0 %v11956_v39, %s7693_s3  ;;  %v4005_v39 = vpop.permute.xlu0 %4004  ;;  %v12369_v60 = vpop.permute.xlu1 %4022 }
 0x64f   :  { %4024 = vrot.lane.b32.xlu0 %v11910_v30, %s7694_s20  ;;  %v4129_v19 = vpop.permute.xlu0 %4128  ;;  %v12373_v45 = vpop.permute.xlu1 %4146 }
 0x653   :  { %4028 = vrot.lane.b32.xlu0 %v11915_v50, %s7694_s20  ;;  %v12388_v18 = vpop.permute.xlu1 %4150 }
 0x657   :  { %4152 = vrot.lane.b32.xlu0 %v11962_v9, %s7695_s2  ;;  %v4345_v9 = vsel %vm3019_vm3, %v11477_v10, %v11878_v58  ;;  %v4472_v10 = vld [vmem:[#allocation6] sm:$0xff] }
 0x65b   :  { %4156 = vrot.lane.b32.xlu0 %v11966_v36, %s7695_s2  ;;  %v4377_v36 = vsel %vm3052_vm5, %v4345_v9, %v11892_v17  ;;  %v15293_v17 = vld [vmem:[#allocation19_spill] sm:$0xff]  ;;  %v4477_v9 = vld [vmem:[#allocation6 + $0x28] sm:$0xff] }
 0x65f   :  { %4280 = vrot.lane.b32.xlu0 %v11974_v29, %s7696_s22  ;;  %v4409_v29 = vsel %vm3085_vm7, %v4377_v36, %v11903_v16  ;;  %v4349_v16 = vsel %vm3019_vm3, %v15293_v17, %v12182_v44  ;;  %v15300_v17 = vld [vmem:[#allocation29_spill] sm:$0xff] }
 0x660   :  { %v4441_v56 = vsel %vm3118_vm8, %v4409_v29, %v11924_v35  ;;  %v4381_v57 = vsel %vm3052_vm5, %v4349_v16, %v12259_v6  ;;  %v15301_v16 = vld [vmem:[#allocation26_spill] sm:$0xff] }
 0x661   :  { %v4505_v51 = vmul.f32 %v4473_v0, %v4441_v56  ;;  %v4413_v42 = vsel %vm3085_vm7, %v4381_v57, %v12277_v59  ;;  %v12416_v0 = vpop.permute.xlu1 %4274  ;;  %v15298_v56 = vld [vmem:[#allocation20_spill] sm:$0xff] }
 0x662   :  { %v4445_v36 = vsel %vm3118_vm8, %v4413_v42, %v12292_v61 }
 0x663   :  { %4284 = vrot.lane.b32.xlu0 %v11980_v62, %s7696_s22 }
 0x665   :  { %v12437_v42 = vpop.permute.xlu1 %4278 }
 0x667   :  { %3904 = vrot.lane.b32.xlu0 %v12031_v5, %s7693_s3 }
 0x669   :  { %v3865_v4 = vpop.permute.xlu0 %3864 }
 0x66a   :  { %v4344_v62 = vsel %vm3019_vm3, %v12220_v41, %v3865_v4  ;;  %v15294_v41 = vld [vmem:[#allocation25_spill] sm:$0xff]  ;;  %v4476_v4 = vld [vmem:[#allocation6 + $0x20] sm:$0xff] }
 0x66b   :  { %v4376_v5 = vsel %vm3052_vm5, %v4344_v62, %v11883_v15  ;;  %3908 = vrot.lane.b32.xlu0 %v12035_v54, %s7693_s3  ;;  %v4348_v54 = vsel %vm3019_vm3, %v15295_v8, %v3873_v21  ;;  %v15297_v62 = vld [vmem:[#allocation12_spill] sm:$0xff] }
 0x66c   :  { %v4408_v58 = vsel %vm3085_vm7, %v4376_v5, %v11896_v14  ;;  %v15296_v14 = vld [vmem:[#allocation32_spill] sm:$0xff]  ;;  %v4380_v44 = vsel %vm3052_vm5, %v4348_v54, %v4001_v34  ;;  %v4351_v21 = vsel %vm3019_vm3, %v15297_v62, %v12222_v7  ;;  %v4350_v5 = vsel %vm3019_vm3, %v15298_v56, %v3877_v23  ;;  %v15299_v7 = vld [vmem:[#allocation13_spill] sm:$0xff]  ;;  %v15307_v56 = vld [vmem:[#allocation67_spill] sm:$0xff] }
 0x66d   :  { %v4440_v49 = vsel %vm3118_vm8, %v4408_v58, %v15294_v41  ;;  %v4133_v35 = vpop.permute.xlu0 %4132  ;;  %v4412_v6 = vsel %vm3085_vm7, %v4380_v44, %v4129_v19  ;;  %v4383_v34 = vsel %vm3052_vm5, %v4351_v21, %v12268_v38  ;;  %v4509_v19 = vmul.f32 %v4477_v9, %v4445_v36  ;;  %v4479_v38 = vld [vmem:[#allocation6 + $0x38] sm:$0xff]  ;;  %v15303_v9 = vld [vmem:[#allocation52_spill] sm:$0xff] }
 0x66e   :  { %v4504_v15 = vmul.f32 %v4472_v10, %v4440_v49  ;;  %v4415_v61 = vsel %vm3085_vm7, %v4383_v34, %v12283_v24  ;;  %v15302_v41 = vpack.c.bf16 %v15300_v17, %v15301_v16  ;;  %v4382_v23 = vsel %vm3052_vm5, %v4350_v5, %v4005_v39  ;;  %v15306_v21 = vld [vmem:[#allocation55_spill] sm:$0xff]  ;;  %v15310_v16 = vld [vmem:[#allocation50_spill] sm:$0xff] }
 0x66f   :  { %4032 = vrot.lane.b32.xlu0 %v15296_v14, %s7694_s20  ;;  %v4447_v49 = vsel %vm3118_vm8, %v4415_v61, %v12304_v25  ;;  %v4414_v57 = vsel %vm3085_vm7, %v4382_v23, %v4133_v35  ;;  %v15304_v25 = vld [vmem:[#allocation63_spill] sm:$0xff]  ;;  %v12445_v35 = vpop.permute.xlu1 %3898 }
 0x670   :  { %v4536_v29 = vpack.c.bf16 %v4505_v51, %v4504_v15  ;;  %v4478_v51 = vld [vmem:[#allocation6 + $0x30] sm:$0xff]  ;;  %v4511_v54 = vmul.f32 %v4479_v38, %v4447_v49  ;;  %v15308_v5 = vld [vmem:[#allocation23_spill] sm:$0xff]  ;;  %v3586_v49 = vrot.slane %v11750_v48, 6 }
 0x671   :  { %v4257_v59 = vpop.permute.xlu0 %4256  ;;  %v3585_v34 = vrot.slane %v15308_v5, 6 }
 0x672   :  { %v4444_v10 = vsel %vm3118_vm8, %v4412_v6, %v4257_v59  ;;  %7423 = vmatprep.mubr.msk.bf16.mxu0 %vm3151_vm9, %v4536_v29  ;;  %v15305_v29 = vld [vmem:[#allocation34_spill] sm:$0xff] }
 0x673   :  { %v4508_v58 = vmul.f32 %v4476_v4, %v4444_v10  ;;  %4036 = vrot.lane.b32.xlu0 %v15299_v7, %s7694_s20  ;;  %7424 = vmatmul.mubr.msk.bf16.vlgmr.msra.gmra.mrb[32].mxu0 %vm3151_vm9, %v15302_v41  ;;  %v12449_v62 = vpop.permute.xlu1 %3902  ;;  %v3587_v41 = vrot.slane %v15310_v16, 6 }
 0x675   :  { %v4538_v24 = vpack.c.bf16 %v4509_v19, %v4508_v58  ;;  %v4261_v15 = vpop.permute.xlu0 %4260  ;;  %v3584_v19 = vrot.slane %v11747_v3, 6  ;;  %v15309_v58 = vld [vmem:[#allocation35_spill] sm:$0xff]  ;;  %v3628_v48 = vsel %vm240_vm0, %v3586_v49, %v3587_v41 }
 0x676   :  { %v4446_v8 = vsel %vm3118_vm8, %v4414_v57, %v4261_v15  ;;  %v15311_v57 = vld [vmem:[#allocation17_spill] sm:$0xff] }
 0x677   :  { %v4510_v44 = vmul.f32 %v4478_v51, %v4446_v8  ;;  %4160 = vrot.lane.b32.xlu0 %v15303_v9, %s7695_s2  ;;  %7427 = vmatprep.mubr.msk.bf16.mxu0 %vm3151_vm9, %v4538_v24  ;;  %v12456_v10 = vpop.permute.xlu1 %4026  ;;  %v3630_v17 = vsel %vm240_vm0, %v3584_v19, %v3585_v34  ;;  %v15312_v24 = vrot.slane %v15311_v57, 6 }
 0x678   :  { %v4353_v23 = vsel %vm3019_vm3, %v3630_v17, %v12315_v26  ;;  %v15313_v26 = vld [vmem:[#allocation65_spill] sm:$0xff]  ;;  %v4482_v17 = vld [vmem:[#allocation6 + $0x50] sm:$0xff] }
 0x679   :  { %v4539_v39 = vpack.c.bf16 %v4511_v54, %v4510_v44  ;;  %v3881_v36 = vpop.permute.xlu0 %3880  ;;  %v4385_v51 = vsel %vm3052_vm5, %v4353_v23, %v12325_v13  ;;  %v3631_v3 = vsel %vm240_vm0, %v15312_v24, %v3584_v19  ;;  %v4481_v13 = vld [vmem:[#allocation6 + $0x48] sm:$0xff] }
 0x67a   :  { %v4417_v15 = vsel %vm3085_vm7, %v4385_v51, %v12335_v43  ;;  %v4352_v54 = vsel %vm3019_vm3, %v3631_v3, %v3881_v36  ;;  %v4355_v43 = vsel %vm3019_vm3, %v3628_v48, %v12319_v12  ;;  %v15314_v12 = vld [vmem:[#allocation68_spill] sm:$0xff]  ;;  %v15315_v24 = vld [vmem:[#allocation69_spill] sm:$0xff] }
 0x67b   :  { %4164 = vrot.lane.b32.xlu0 %v15304_v25, %s7695_s2  ;;  %7428 = vmatmul.mubr.msk.bf16.gmra.mrb[36].mxu0 %vm3151_vm9, %v4539_v39  ;;  %v12475_v8 = vpop.permute.xlu1 %4030  ;;  %v4449_v44 = vsel %vm3118_vm8, %v4417_v15, %v12343_v28  ;;  %v4480_v39 = vld [vmem:[#allocation6 + $0x40] sm:$0xff]  ;;  %v15317_v48 = vld [vmem:[#allocation37_spill] sm:$0xff] }
 0x67c   :  { %v4513_v5 = vmul.f32 %v4481_v13, %v4449_v44  ;;  %v15316_v15 = vld [vmem:[#allocation36_spill] sm:$0xff]  ;;  %v15318_v44 = vld [vmem:[#allocation42_spill] sm:$0xff] }
 0x67d   :  { %v3885_v4 = vpop.permute.xlu0 %3884 }
 0x67f   :  { %4288 = vrot.lane.b32.xlu0 %v15305_v29, %s7696_s22  ;;  %v4387_v29 = vsel %vm3052_vm5, %v4355_v43, %v12329_v33  ;;  %v15319_v43 = vld [vmem:[#allocation24_spill] sm:$0xff] }
 0x680   :  { %v4419_v28 = vsel %vm3085_vm7, %v4387_v29, %v12339_v40  ;;  %v3588_v29 = vrot.slane %v11822_v53, 6 }
 0x681   :  { %v4009_v6 = vpop.permute.xlu0 %4008 }
 0x682   :  { %v4384_v9 = vsel %vm3052_vm5, %v4352_v54, %v4009_v6  ;;  %v3627_v53 = vsel %vm240_vm0, %v3587_v41, %v3588_v29 }
 0x683   :  { %4292 = vrot.lane.b32.xlu0 %v15306_v21, %s7696_s22  ;;  %v3629_v21 = vsel %vm240_vm0, %v3585_v34, %v3586_v49  ;;  %v12503_v34 = vpop.permute.xlu1 %4154 }
 0x684   :  { %v4354_v6 = vsel %vm3019_vm3, %v3629_v21, %v3885_v4 }
 0x685   :  { %v4013_v59 = vpop.permute.xlu0 %4012 }
 0x686   :  { %v4386_v33 = vsel %vm3052_vm5, %v4354_v6, %v4013_v59 }
 0x687   :  { %3912 = vrot.lane.b32.xlu0 %v15307_v56, %s7693_s3  ;;  %v12510_v3 = vpop.permute.xlu1 %4158 }
 0x689   :  { %v4137_v61 = vpop.permute.xlu0 %4136 }
 0x68a   :  { %v4416_v36 = vsel %vm3085_vm7, %v4384_v9, %v4137_v61  ;;  %v4483_v61 = vld [vmem:[#allocation6 + $0x58] sm:$0xff] }
 0x68b   :  { %3916 = vrot.lane.b32.xlu0 %v15309_v58, %s7693_s3  ;;  %v4451_v58 = vsel %vm3118_vm8, %v4419_v28, %v12349_v37  ;;  %v12515_v54 = vpop.permute.xlu1 %4282  ;;  %v15320_v28 = vld [vmem:[#allocation51_spill] sm:$0xff] }
 0x68c   :  { %v4515_v4 = vmul.f32 %v4483_v61, %v4451_v58 }
 0x68d   :  { %v4141_v38 = vpop.permute.xlu0 %4140 }
 0x68e   :  { %v4418_v23 = vsel %vm3085_vm7, %v4386_v33, %v4141_v38  ;;  %v4484_v33 = vld [vmem:[#allocation6 + $0x60] sm:$0xff] }
 0x68f   :  { %4040 = vrot.lane.b32.xlu0 %v15313_v26, %s7694_s20  ;;  %v12521_v9 = vpop.permute.xlu1 %4286 }
 0x691   :  { %v4265_v25 = vpop.permute.xlu0 %4264 }
 0x692   :  { %v4448_v56 = vsel %vm3118_vm8, %v4416_v36, %v4265_v25  ;;  %v3589_v36 = vrot.slane %v15319_v43, 6 }
 0x693   :  { %v4512_v19 = vmul.f32 %v4480_v39, %v4448_v56  ;;  %4044 = vrot.lane.b32.xlu0 %v15314_v12, %s7694_s20  ;;  %v12527_v21 = vpop.permute.xlu1 %3906 }
 0x694   :  { %v3626_v56 = vsel %vm240_vm0, %v3588_v29, %v3589_v36 }
 0x695   :  { %v4540_v49 = vpack.c.bf16 %v4513_v5, %v4512_v19  ;;  %v4269_v40 = vpop.permute.xlu0 %4268  ;;  %v3591_v5 = vrot.slane %v15320_v28, 6  ;;  %v4357_v6 = vsel %vm3019_vm3, %v3626_v56, %v12353_v27 }
 0x696   :  { %v4450_v51 = vsel %vm3118_vm8, %v4418_v23, %v4269_v40  ;;  %v4389_v61 = vsel %vm3052_vm5, %v4357_v6, %v12363_v11 }
 0x697   :  { %v4514_v57 = vmul.f32 %v4482_v17, %v4450_v51  ;;  %4168 = vrot.lane.b32.xlu0 %v15315_v24, %s7695_s2  ;;  %7431 = vmatprep.mubr.msk.bf16.mxu0 %vm3151_vm9, %v4540_v49  ;;  %v12555_v17 = vpop.permute.xlu1 %3910  ;;  %v15321_v24 = vld [vmem:[#allocation43_spill] sm:$0xff] }
 0x699   :  { %v4541_v37 = vpack.c.bf16 %v4515_v4, %v4514_v57  ;;  %v3889_v59 = vpop.permute.xlu0 %3888 }
 0x69a   :  { %v4356_v58 = vsel %vm3019_vm3, %v3627_v53, %v3889_v59 }
 0x69b   :  { %4172 = vrot.lane.b32.xlu0 %v15316_v15, %s7695_s2  ;;  %7432 = vmatmul.mubr.msk.bf16.gmra.mrb[40].mxu0 %vm3151_vm9, %v4541_v37  ;;  %v4487_v37 = vld [vmem:[#allocation6 + $0x78] sm:$0xff]  ;;  %v4486_v15 = vld [vmem:[#allocation6 + $0x70] sm:$0xff] }
 0x69d   :  { %v3893_v38 = vpop.permute.xlu0 %3892 }
 0x69f   :  { %4296 = vrot.lane.b32.xlu0 %v15317_v48, %s7696_s22 }
 0x6a1   :  { %v4017_v13 = vpop.permute.xlu0 %4016 }
 0x6a2   :  { %v4388_v16 = vsel %vm3052_vm5, %v4356_v58, %v4017_v13  ;;  %v3592_v58 = vrot.slane %v11910_v30, 6 }
 0x6a3   :  { %4300 = vrot.lane.b32.xlu0 %v15318_v44, %s7696_s22 }
 0x6a5   :  { %v4021_v39 = vpop.permute.xlu0 %4020 }
 0x6a7   :  { %3920 = vrot.lane.b32.xlu0 %v12229_v32, %s7693_s3  ;;  %v3590_v32 = vrot.slane %v11827_v22, 6  ;;  %v4485_v22 = vld [vmem:[#allocation6 + $0x68] sm:$0xff] }
 0x6a9   :  { %v4145_v25 = vpop.permute.xlu0 %4144  ;;  %v3624_v27 = vsel %vm240_vm0, %v3590_v32, %v3591_v5  ;;  %v3625_v40 = vsel %vm240_vm0, %v3589_v36, %v3590_v32  ;;  %v12573_v36 = vpop.permute.xlu1 %4034 }
 0x6aa   :  { %v4359_v41 = vsel %vm3019_vm3, %v3624_v27, %v12359_v46  ;;  %v4358_v57 = vsel %vm3019_vm3, %v3625_v40, %v3893_v38 }
 0x6ab   :  { %3924 = vrot.lane.b32.xlu0 %v12234_v63, %s7693_s3  ;;  %v4421_v63 = vsel %vm3085_vm7, %v4389_v61, %v12373_v45  ;;  %v4420_v45 = vsel %vm3085_vm7, %v4388_v16, %v4145_v25  ;;  %v4391_v49 = vsel %vm3052_vm5, %v4359_v41, %v12369_v60  ;;  %v4390_v60 = vsel %vm3052_vm5, %v4358_v57, %v4021_v39  ;;  %v15322_v39 = vld [vmem:[#allocation38_spill] sm:$0xff]  ;;  %v15324_v61 = vld [vmem:[#allocation31_spill] sm:$0xff] }
 0x6ac   :  { %v4453_v11 = vsel %vm3118_vm8, %v4421_v63, %v12416_v0  ;;  %v4423_v0 = vsel %vm3085_vm7, %v4391_v49, %v12388_v18  ;;  %v3593_v53 = vrot.slane %v15324_v61, 6  ;;  %v3594_v41 = vrot.slane %v11915_v50, 6 }
 0x6ad   :  { %v4149_v19 = vpop.permute.xlu0 %4148  ;;  %v4517_v4 = vmul.f32 %v4485_v22, %v4453_v11  ;;  %v4455_v59 = vsel %vm3118_vm8, %v4423_v0, %v12437_v42  ;;  %v12581_v29 = vpop.permute.xlu1 %4038  ;;  %v15325_v22 = vld [vmem:[#allocation30_spill] sm:$0xff]  ;;  %v4488_v0 = vld [vmem:[#allocation6 + $0x80] sm:$0xff] }
 0x6ae   :  { %v4422_v48 = vsel %vm3085_vm7, %v4390_v60, %v4149_v19  ;;  %v4519_v43 = vmul.f32 %v4487_v37, %v4455_v59  ;;  %v3622_v27 = vsel %vm240_vm0, %v3592_v58, %v3593_v53  ;;  %v3595_v11 = vrot.slane %v15325_v22, 6 }
 0x6af   :  { %4048 = vrot.lane.b32.xlu0 %v12177_v20, %s7694_s20  ;;  %v3621_v57 = vsel %vm240_vm0, %v3593_v53, %v3594_v41  ;;  %v15326_v53 = vld [vmem:[#allocation33_spill] sm:$0xff] }
 0x6b0   :  { %v3620_v40 = vsel %vm240_vm0, %v3594_v41, %v3595_v11 }
 0x6b1   :  { %v4273_v23 = vpop.permute.xlu0 %4272  ;;  %v12585_v6 = vpop.permute.xlu1 %4162 }
 0x6b2   :  { %v4452_v51 = vsel %vm3118_vm8, %v4420_v45, %v4273_v23  ;;  %v3623_v23 = vsel %vm240_vm0, %v3591_v5, %v3592_v58 }
 0x6b3   :  { %v4516_v46 = vmul.f32 %v4484_v33, %v4452_v51  ;;  %4052 = vrot.lane.b32.xlu0 %v15321_v24, %s7694_s20  ;;  %v4489_v51 = vld [vmem:[#allocation6 + $0x88] sm:$0xff] }
 0x6b5   :  { %v4542_v13 = vpack.c.bf16 %v4517_v4, %v4516_v46  ;;  %v4277_v44 = vpop.permute.xlu0 %4276  ;;  %v12589_v32 = vpop.permute.xlu1 %4166 }
 0x6b6   :  { %v4454_v18 = vsel %vm3118_vm8, %v4422_v48, %v4277_v44 }
 0x6b7   :  { %v4518_v38 = vmul.f32 %v4486_v15, %v4454_v18  ;;  %4176 = vrot.lane.b32.xlu0 %v12238_v31, %s7695_s2  ;;  %7435 = vmatprep.mubr.msk.bf16.mxu0 %vm3151_vm9, %v4542_v13  ;;  %v15323_v31 = vld [vmem:[#allocation41_spill] sm:$0xff] }
 0x6b9   :  { %v4543_v25 = vpack.c.bf16 %v4519_v43, %v4518_v38  ;;  %v3897_v42 = vpop.permute.xlu0 %3896  ;;  %v4291_v16 = vpop.permute.xlu1 %4290 }
 0x6ba   :  { %v4360_v49 = vsel %vm3019_vm3, %v3623_v23, %v3897_v42 }
 0x6bb   :  { %4180 = vrot.lane.b32.xlu0 %v15322_v39, %s7695_s2  ;;  %7436 = vmatmul.mubr.msk.bf16.gmra.mrb[44].mxu0 %vm3151_vm9, %v4543_v25 }
 0x6bd   :  { %v3901_v56 = vpop.permute.xlu0 %3900  ;;  %v4295_v59 = vpop.permute.xlu1 %4294 }
 0x6be   :  { %v4362_v60 = vsel %vm3019_vm3, %v3621_v57, %v3901_v56 }
 0x6bf   :  { %4304 = vrot.lane.b32.xlu0 %v12248_v47, %s7696_s22  ;;  %v4361_v47 = vsel %vm3019_vm3, %v3622_v27, %v12445_v35  ;;  %v3596_v27 = vrot.slane %v15296_v14, 6 }
 0x6c0   :  { %v4393_v45 = vsel %vm3052_vm5, %v4361_v47, %v12456_v10  ;;  %v4363_v10 = vsel %vm3019_vm3, %v3620_v40, %v12449_v62  ;;  %v4491_v62 = vld [vmem:[#allocation6 + $0x98] sm:$0xff] }
 0x6c1   :  { %v4025_v28 = vpop.permute.xlu0 %4024  ;;  %v4425_v30 = vsel %vm3085_vm7, %v4393_v45, %v12503_v34  ;;  %v4395_v34 = vsel %vm3052_vm5, %v4363_v10, %v12475_v8  ;;  %v4490_v8 = vld [vmem:[#allocation6 + $0x90] sm:$0xff]  ;;  %v12628_v42 = vpop.permute.xlu1 %3914  ;;  %v3619_v40 = vsel %vm240_vm0, %v3595_v11, %v3596_v27 }
 0x6c2   :  { %v4457_v35 = vsel %vm3118_vm8, %v4425_v30, %v12515_v54  ;;  %v4392_v50 = vsel %vm3052_vm5, %v4360_v49, %v4025_v28  ;;  %v4427_v54 = vsel %vm3085_vm7, %v4395_v34, %v12510_v3  ;;  %v3598_v30 = vrot.slane %v15299_v7, 6  ;;  %v4492_v7 = vld [vmem:[#allocation6 + $0xa0] sm:$0xff] }
 0x6c3   :  { %4308 = vrot.lane.b32.xlu0 %v15323_v31, %s7696_s22  ;;  %v4521_v37 = vmul.f32 %v4489_v51, %v4457_v35  ;;  %v4459_v48 = vsel %vm3118_vm8, %v4427_v54, %v12521_v9 }
 0x6c4   :  { %v4523_v25 = vmul.f32 %v4491_v62, %v4459_v48 }
 0x6c5   :  { %v4029_v19 = vpop.permute.xlu0 %4028  ;;  %v12631_v28 = vpop.permute.xlu1 %3918 }
 0x6c6   :  { %v4394_v13 = vsel %vm3052_vm5, %v4362_v60, %v4029_v19 }
 0x6c9   :  { %v4153_v63 = vpop.permute.xlu0 %4152  ;;  %v4043_v19 = vpop.permute.xlu1 %4042 }
 0x6ca   :  { %v4424_v5 = vsel %vm3085_vm7, %v4392_v50, %v4153_v63  ;;  %v3597_v63 = vrot.slane %v15326_v53, 6  ;;  %v4493_v50 = vld [vmem:[#allocation6 + $0xa8] sm:$0xff]  ;;  %v3600_v53 = vrot.slane %v15313_v26, 6 }
 0x6cc   :  { %v3618_v47 = vsel %vm240_vm0, %v3596_v27, %v3597_v63 }
 0x6cd   :  { %v4157_v33 = vpop.permute.xlu0 %4156  ;;  %v12635_v22 = vpop.permute.xlu1 %4046  ;;  %v4365_v45 = vsel %vm3019_vm3, %v3618_v47, %v12527_v21 }
 0x6ce   :  { %v4426_v44 = vsel %vm3085_vm7, %v4394_v13, %v4157_v33  ;;  %v15327_v33 = vld [vmem:[#allocation14_spill] sm:$0xff]  ;;  %v4397_v49 = vsel %vm3052_vm5, %v4365_v45, %v12573_v36  ;;  %v3602_v45 = vrot.slane %v15314_v12, 6 }
 0x6cf   :  { %v3599_v41 = vrot.slane %v15327_v33, 6  ;;  %v4429_v14 = vsel %vm3085_vm7, %v4397_v49, %v12585_v6 }
 0x6d0   :  { %v4461_v21 = vsel %vm3118_vm8, %v4429_v14, %v4291_v16 }
 0x6d1   :  { %v4281_v4 = vpop.permute.xlu0 %4280  ;;  %v3616_v35 = vsel %vm240_vm0, %v3598_v30, %v3599_v41  ;;  %v4171_v10 = vpop.permute.xlu1 %4170  ;;  %v4525_v57 = vmul.f32 %v4493_v50, %v4461_v21 }
 0x6d2   :  { %v4456_v46 = vsel %vm3118_vm8, %v4424_v5, %v4281_v4  ;;  %v4367_v36 = vsel %vm3019_vm3, %v3616_v35, %v12555_v17  ;;  %v3617_v4 = vsel %vm240_vm0, %v3597_v63, %v3598_v30  ;;  %v4495_v17 = vld [vmem:[#allocation6 + $0xb8] sm:$0xff]  ;;  %v3615_v30 = vsel %vm240_vm0, %v3599_v41, %v3600_v53 }
 0x6d3   :  { %v4520_v15 = vmul.f32 %v4488_v0, %v4456_v46  ;;  %v4399_v6 = vsel %vm3052_vm5, %v4367_v36, %v12581_v29 }
 0x6d4   :  { %v4431_v16 = vsel %vm3085_vm7, %v4399_v6, %v12589_v32 }
 0x6d5   :  { %v4544_v18 = vpack.c.bf16 %v4521_v37, %v4520_v15  ;;  %v4285_v43 = vpop.permute.xlu0 %4284  ;;  %v4463_v37 = vsel %vm3118_vm8, %v4431_v16, %v4295_v59  ;;  %v4494_v15 = vld [vmem:[#allocation6 + $0xb0] sm:$0xff]  ;;  %v4175_v62 = vpop.permute.xlu1 %4174 }
 0x6d6   :  { %v4458_v38 = vsel %vm3118_vm8, %v4426_v44, %v4285_v43  ;;  %v4527_v44 = vmul.f32 %v4495_v17, %v4463_v37 }
 0x6d7   :  { %v4522_v3 = vmul.f32 %v4490_v8, %v4458_v38  ;;  %7439 = vmatprep.mubr.msk.bf16.mxu0 %vm3151_vm9, %v4544_v18 }
 0x6d9   :  { %v4545_v39 = vpack.c.bf16 %v4523_v25, %v4522_v3  ;;  %v3905_v56 = vpop.permute.xlu0 %3904  ;;  %v4299_v38 = vpop.permute.xlu1 %4298 }
 0x6da   :  { %v4364_v51 = vsel %vm3019_vm3, %v3619_v40, %v3905_v56 }
 0x6db   :  { %7440 = vmatmul.mubr.msk.bf16.gmra.mrb[48].mxu0 %vm3151_vm9, %v4545_v39 }
 0x6dd   :  { %v3909_v9 = vpop.permute.xlu0 %3908  ;;  %v4303_v25 = vpop.permute.xlu1 %4302 }
 0x6de   :  { %v4366_v46 = vsel %vm3019_vm3, %v3617_v4, %v3909_v9  ;;  %v15328_v9 = vld [vmem:[#allocation66_spill] sm:$0xff] }
 0x6df   :  { %v4498_v4 = vld [vmem:[#allocation6 + $0xd0] sm:$0xff] }
 0x6e1   :  { %v4033_v31 = vpop.permute.xlu0 %4032  ;;  %v3923_v56 = vpop.permute.xlu1 %3922 }
 0x6e2   :  { %v4396_v0 = vsel %vm3052_vm5, %v4364_v51, %v4033_v31  ;;  %v3601_v31 = vrot.slane %v15328_v9, 6  ;;  %v4496_v51 = vld [vmem:[#allocation6 + $0xc0] sm:$0xff] }
 0x6e4   :  { %v3614_v63 = vsel %vm240_vm0, %v3600_v53, %v3601_v31  ;;  %v3613_v50 = vsel %vm240_vm0, %v3601_v31, %v3602_v45 }
 0x6e5   :  { %v4037_v61 = vpop.permute.xlu0 %4036  ;;  %v4369_v27 = vsel %vm3019_vm3, %v3614_v63, %v12628_v42  ;;  %v3927_v47 = vpop.permute.xlu1 %3926 }
 0x6e6   :  { %v4398_v60 = vsel %vm3052_vm5, %v4366_v46, %v4037_v61 }
 0x6e9   :  { %v4161_v58 = vpop.permute.xlu0 %4160  ;;  %v4051_v36 = vpop.permute.xlu1 %4050 }
 0x6ea   :  { %v4428_v11 = vsel %vm3085_vm7, %v4396_v0, %v4161_v58  ;;  %v3603_v58 = vrot.slane %v12083_v52, 6  ;;  %v4497_v52 = vld [vmem:[#allocation6 + $0xc8] sm:$0xff] }
 0x6ec   :  { %v3612_v40 = vsel %vm240_vm0, %v3602_v45, %v3603_v58 }
 0x6ed   :  { %v4165_v23 = vpop.permute.xlu0 %4164  ;;  %v4371_v12 = vsel %vm3019_vm3, %v3612_v40, %v12631_v28  ;;  %v4055_v17 = vpop.permute.xlu1 %4054 }
 0x6ee   :  { %v4430_v29 = vsel %vm3085_vm7, %v4398_v60, %v4165_v23  ;;  %v4401_v23 = vsel %vm3052_vm5, %v4369_v27, %v4043_v19  ;;  %v4403_v41 = vsel %vm3052_vm5, %v4371_v12, %v12635_v22 }
 0x6ef   :  { %v4433_v49 = vsel %vm3085_vm7, %v4401_v23, %v4171_v10  ;;  %v4435_v0 = vsel %vm3085_vm7, %v4403_v41, %v4175_v62 }
 0x6f0   :  { %v4465_v14 = vsel %vm3118_vm8, %v4433_v49, %v4299_v38  ;;  %v4467_v28 = vsel %vm3118_vm8, %v4435_v0, %v4303_v25  ;;  %v3606_v25 = vrot.slane %v15321_v24, 6  ;;  %v4500_v24 = vld [vmem:[#allocation6 + $0xe0] sm:$0xff] }
 0x6f1   :  { %v4289_v5 = vpop.permute.xlu0 %4288  ;;  %v4179_v62 = vpop.permute.xlu1 %4178  ;;  %v12738_v0 = vld [vmem:[%s14918_s11] ss:$0 sm:$0xff]  ;;  %s7699_s11 = smov 90  }
 0x6f2   :  { %v4460_v34 = vsel %vm3118_vm8, %v4428_v11, %v4289_v5  ;;  %v4499_v5 = vld [vmem:[#allocation6 + $0xd8] sm:$0xff] }
 0x6f3   :  { %v4524_v54 = vmul.f32 %v4492_v7, %v4460_v34  ;;  %v4529_v7 = vmul.f32 %v4497_v52, %v4465_v14  ;;  %v4531_v46 = vmul.f32 %v4499_v5, %v4467_v28  ;;  %v4503_v52 = vld [vmem:[#allocation6 + $0xf8] sm:$0xff] }
 0x6f5   :  { %v4546_v48 = vpack.c.bf16 %v4525_v57, %v4524_v54  ;;  %v4293_v13 = vpop.permute.xlu0 %4292 }
 0x6f6   :  { %v4462_v8 = vsel %vm3118_vm8, %v4430_v29, %v4293_v13 }
 0x6f7   :  { %v4526_v18 = vmul.f32 %v4494_v15, %v4462_v8  ;;  %7443 = vmatprep.mubr.msk.bf16.mxu0 %vm3151_vm9, %v4546_v48  ;;  %v4183_v48 = vpop.permute.xlu1 %4182  ;;  %v3605_v8 = vrot.slane %v12184_v2, 6 }
 0x6f9   :  { %v4547_v32 = vpack.c.bf16 %v4527_v44, %v4526_v18  ;;  %v3913_v43 = vpop.permute.xlu0 %3912  ;;  %v3604_v18 = vrot.slane %v12177_v20, 6  ;;  %v15329_v20 = vrot.slane %v12180_v55, 6  ;;  %v3609_v55 = vsel %vm240_vm0, %v3605_v8, %v3606_v25 }
 0x6fa   :  { %v4368_v26 = vsel %vm3019_vm3, %v3615_v30, %v3913_v43 }
 0x6fb   :  { %7444 = vmatmul.mubr.msk.bf16.gmra.mrb[52].mxu0 %vm3151_vm9, %v4547_v32  ;;  %v4307_v32 = vpop.permute.xlu1 %4306  ;;  %v3610_v43 = vsel %vm240_vm0, %v3604_v18, %v3605_v8  ;;  %v3608_v31 = vsel %vm240_vm0, %v3606_v25, %v15329_v20 }
 0x6fc   :  { %v4373_v38 = vsel %vm3019_vm3, %v3610_v43, %v3923_v56  ;;  %v4375_v63 = vsel %vm3019_vm3, %v3608_v31, %v3927_v47 }
 0x6fd   :  { %v3917_v59 = vpop.permute.xlu0 %3916  ;;  %v4407_v45 = vsel %vm3052_vm5, %v4375_v63, %v4055_v17 }
 0x6fe   :  { %v4370_v10 = vsel %vm3019_vm3, %v3613_v50, %v3917_v59  ;;  %v4439_v30 = vsel %vm3085_vm7, %v4407_v45, %v4183_v48 }
 0x6ff   :  { %v4311_v27 = vpop.permute.xlu1 %4310 }
 0x700   :  { %v4471_v47 = vsel %vm3118_vm8, %v4439_v30, %v4311_v27 }
 0x701   :  { %v4041_v3 = vpop.permute.xlu0 %4040  ;;  %v4535_v41 = vmul.f32 %v4503_v52, %v4471_v47 }
 0x702   :  { %v4400_v42 = vsel %vm3052_vm5, %v4368_v26, %v4041_v3  ;;  %v4405_v3 = vsel %vm3052_vm5, %v4373_v38, %v4051_v36 }
 0x703   :  { %v4437_v9 = vsel %vm3085_vm7, %v4405_v3, %v4179_v62 }
 0x704   :  { %v4469_v56 = vsel %vm3118_vm8, %v4437_v9, %v4307_v32 }
 0x705   :  { %v4045_v39 = vpop.permute.xlu0 %4044 }
 0x706   :  { %v4402_v6 = vsel %vm3052_vm5, %v4370_v10, %v4045_v39  ;;  %v3611_v39 = vsel %vm240_vm0, %v3603_v58, %v3604_v18  ;;  %vm5432_vm0 = vcmask 244736  }
 0x709   :  { %v4169_v61 = vpop.permute.xlu0 %4168 }
 0x70a   :  { %v4432_v19 = vsel %vm3085_vm7, %v4400_v42, %v4169_v61  ;;  %v4501_v61 = vld [vmem:[#allocation6 + $0xe8] sm:$0xff]  ;;  %v4502_v42 = vld [vmem:[#allocation6 + $0xf0] sm:$0xff] }
 0x70b   :  { %v4533_v49 = vmul.f32 %v4501_v61, %v4469_v56 }
 0x70d   :  { %v4173_v33 = vpop.permute.xlu0 %4172 }
 0x70e   :  { %v4434_v22 = vsel %vm3085_vm7, %v4402_v6, %v4173_v33 }
 0x711   :  { %v4297_v35 = vpop.permute.xlu0 %4296 }
 0x712   :  { %v4464_v21 = vsel %vm3118_vm8, %v4432_v19, %v4297_v35 }
 0x713   :  { %v4528_v11 = vmul.f32 %v4496_v51, %v4464_v21 }
 0x715   :  { %v4548_v34 = vpack.c.bf16 %v4529_v7, %v4528_v11  ;;  %v4301_v16 = vpop.permute.xlu0 %4300 }
 0x716   :  { %v4466_v57 = vsel %vm3118_vm8, %v4434_v22, %v4301_v16 }
 0x717   :  { %v4530_v54 = vmul.f32 %v4498_v4, %v4466_v57  ;;  %7447 = vmatprep.mubr.msk.bf16.mxu0 %vm3151_vm9, %v4548_v34 }
 0x719   :  { %v4549_v37 = vpack.c.bf16 %v4531_v46, %v4530_v54  ;;  %v3921_v60 = vpop.permute.xlu0 %3920 }
 0x71a   :  { %v4372_v2 = vsel %vm3019_vm3, %v3611_v39, %v3921_v60 }
 0x71b   :  { %7448 = vmatmul.mubr.msk.bf16.gmra.mrb[56].mxu0 %vm3151_vm9, %v4549_v37 }
 0x71d   :  { %v3925_v15 = vpop.permute.xlu0 %3924 }
 0x71e   :  { %v4374_v26 = vsel %vm3019_vm3, %v3609_v55, %v3925_v15 }
 0x721   :  { %v4049_v29 = vpop.permute.xlu0 %4048 }
 0x722   :  { %v4404_v53 = vsel %vm3052_vm5, %v4372_v2, %v4049_v29 }
 0x725   :  { %v4053_v13 = vpop.permute.xlu0 %4052 }
 0x726   :  { %v4406_v14 = vsel %vm3052_vm5, %v4374_v26, %v4053_v13 }
 0x729   :  { %v4177_v44 = vpop.permute.xlu0 %4176 }
 0x72a   :  { %v4436_v58 = vsel %vm3085_vm7, %v4404_v53, %v4177_v44 }
 0x72d   :  { %v4181_v59 = vpop.permute.xlu0 %4180 }
 0x72e   :  { %v4438_v51 = vsel %vm3085_vm7, %v4406_v14, %v4181_v59 }
 0x731   :  { %v4305_v33 = vpop.permute.xlu0 %4304 }
 0x732   :  { %v4468_v23 = vsel %vm3118_vm8, %v4436_v58, %v4305_v33 }
 0x733   :  { %v4532_v40 = vmul.f32 %v4500_v24, %v4468_v23 }
 0x735   :  { %v4550_v12 = vpack.c.bf16 %v4533_v49, %v4532_v40  ;;  %v4309_v19 = vpop.permute.xlu0 %4308 }
 0x736   :  { %v4470_v35 = vsel %vm3118_vm8, %v4438_v51, %v4309_v19 }
 0x737   :  { %v4534_v50 = vmul.f32 %v4502_v42, %v4470_v35  ;;  %7451 = vmatprep.mubr.msk.bf16.mxu0 %vm3151_vm9, %v4550_v12 }
 0x739   :  { %v4551_v21 = vpack.c.bf16 %v4535_v41, %v4534_v50 }
 0x73b   :  { %7452 = vmatmul.mubr.msk.bf16.gmra.mrb[60].mxu0 %vm3151_vm9, %v4551_v21 }
 0x746   :  { %v7425_v7 = vpop.f32.mrb[32].mxu0 }
 0x747   :  { %v4706_v36 = vadd.f32 %v7425_v7, %v12738_v0  ;;  %v4697_v10 = vpop.f32.mrb[33].mxu0 }
 0x748   :  { %v4698_v11 = vadd.f32 %v12738_v0, %v4697_v10  ;;  %v7426_v5 = vpop.f32.mrb[34].mxu0 }
 0x749   :  { %v4826_v28 = vmax.f32 %v4706_v36, 0.0  ;;  %v4709_v6 = vadd.f32 %v7426_v5, %v12738_v0  ;;  %v4700_v4 = vpop.f32.mrb[35].mxu0 }
 0x74a   :  { %v4701_v22 = vadd.f32 %v12738_v0, %v4700_v4  ;;  %v12747_v16 = vmax.f32 %v4698_v11, 0.0  ;;  %v7564_v4 = vld [vmem:[%s14919_s12] sm:$0xff]  }
 0x74b   :  { %v12744_v34 = vmax.f32 %v4709_v6, 0.0  ;;  %5084 = vrot.lane.b32.xlu0 %v4826_v28, %s7698_s28  ;;  %v4922_v46 = vrot.slane %v4826_v28, 1  ;;  %v4986_v54 = vrot.slane %v4826_v28, 2  ;;  %v4858_v60 = vrot.slane %v4826_v28, 7  ;;  %7455 = vmatprep.subr.bf16.mxu1 %v7564_v4 }
 0x74c   :  { %v12749_v57 = vmax.f32 %v4701_v22, 0.0  ;;  %v15027_v39 = vrot.slane %v12747_v16, 7  ;;  %v15026_v63 = vrot.slane %v12747_v16, 1  ;;  %v15025_v28 = vrot.slane %v12747_v16, 2  ;;  %7456 = vmatpush3.bf16.msra.mxu1 %v7564_v4  ;;  %v7565_v22 = vld [vmem:[%s14919_s12 + $0x8] sm:$0xff]  }
 0x74d   :  { %5086 = vrot.lane.b32.xlu1 %v12744_v34, %s7698_s28  ;;  %v4923_v17 = vrot.slane %v12744_v34, 1  ;;  %v4987_v37 = vrot.slane %v12744_v34, 2  ;;  %v4859_v15 = vrot.slane %v12744_v34, 7  ;;  %7457 = vmatprep.subr.bf16.mxu1 %v7565_v22 }
 0x74e   :  { %v7429_v62 = vpop.f32.mrb[36].mxu0  ;;  %v4921_v29 = vrot.slane %v12749_v57, 1  ;;  %v4985_v48 = vrot.slane %v12749_v57, 2  ;;  %v4857_v13 = vrot.slane %v12749_v57, 7 }
 0x74f   :  { %v4722_v8 = vadd.f32 %v7429_v62, %v12738_v0  ;;  %v4713_v44 = vpop.f32.mrb[37].mxu0  ;;  %5080 = vrot.lane.b32.xlu0 %v12747_v16, %s7698_s28  ;;  %v4980_v18 = vsel %vm370_vm2, %v4922_v46, %v4923_v17  ;;  %v5044_v32 = vsel %vm435_vm4, %v4986_v54, %v4987_v37  ;;  %v12768_v43 = vsel %vm305_vm1, %v4858_v60, %v4859_v15 }
 0x750   :  { %v4714_v38 = vadd.f32 %v12738_v0, %v4713_v44  ;;  %v7430_v59 = vpop.f32.mrb[38].mxu0  ;;  %v4981_v25 = vsel %vm370_vm2, %v4921_v29, %v4922_v46  ;;  %v5045_v3 = vsel %vm435_vm4, %v4985_v48, %v4986_v54  ;;  %v12781_v31 = vsel %vm305_vm1, %v4857_v13, %v4858_v60  ;;  %7458 = vmatpush3.bf16.msra.mxu1 %v7565_v22  ;;  %v7570_v22 = vld [vmem:[%s14919_s12 + $0x30] sm:$0xff]  }
 0x751   :  { %v4830_v9 = vmax.f32 %v4722_v8, 0.0  ;;  %v4725_v2 = vadd.f32 %v7430_v59, %v12738_v0  ;;  %v4716_v20 = vpop.f32.mrb[39].mxu0  ;;  %5082 = vrot.lane.b32.xlu1 %v12749_v57, %s7698_s28  ;;  %v12788_v53 = vsel %vm305_vm1, %v15027_v39, %v4857_v13  ;;  %v4982_v5 = vsel %vm370_vm2, %v15026_v63, %v4921_v29 }
 0x752   :  { %v4828_v61 = vmax.f32 %v4714_v38, 0.0  ;;  %v4717_v56 = vadd.f32 %v12738_v0, %v4716_v20  ;;  %v5046_v6 = vsel %vm435_vm4, %v15025_v28, %v4985_v48  ;;  %v7566_v48 = vld [vmem:[%s14919_s12 + $0x10] sm:$0xff]  }
 0x753   :  { %v12790_v24 = vmax.f32 %v4725_v2, 0.0  ;;  %5212 = vrot.lane.b32.xlu0 %v4980_v18, %s7695_s2  ;;  %v4926_v27 = vrot.slane %v4830_v9, 1  ;;  %v4990_v58 = vrot.slane %v4830_v9, 2  ;;  %v4862_v23 = vrot.slane %v4830_v9, 7  ;;  %7459 = vmatprep.subr.bf16.mxu1 %v7566_v48 }
 0x754   :  { %v4829_v33 = vmax.f32 %v4717_v56, 0.0  ;;  %v4924_v45 = vrot.slane %v4828_v61, 1  ;;  %v4988_v55 = vrot.slane %v4828_v61, 2  ;;  %v4860_v40 = vrot.slane %v4828_v61, 7  ;;  %7460 = vmatpush3.bf16.msra.mxu1 %v7566_v48 }
 0x755   :  { %5210 = vrot.lane.b32.xlu1 %v4981_v25, %s7695_s2  ;;  %v4927_v30 = vrot.slane %v12790_v24, 1  ;;  %v4991_v49 = vrot.slane %v12790_v24, 2  ;;  %v4863_v26 = vrot.slane %v12790_v24, 7 }
 0x756   :  { %v4979_v52 = vsel %vm370_vm2, %v4923_v17, %v4924_v45  ;;  %v5043_v47 = vsel %vm435_vm4, %v4987_v37, %v4988_v55  ;;  %v4925_v14 = vrot.slane %v4829_v33, 1  ;;  %v4989_v42 = vrot.slane %v4829_v33, 2 }
 0x757   :  { %5340 = vrot.lane.b32.xlu0 %v5044_v32, %s7699_s11  ;;  %v4976_v51 = vsel %vm370_vm2, %v4926_v27, %v4927_v30  ;;  %v5040_v12 = vsel %vm435_vm4, %v4990_v58, %v4991_v49  ;;  %v12815_v19 = vsel %vm305_vm1, %v4862_v23, %v4863_v26  ;;  %v4861_v35 = vrot.slane %v4829_v33, 7 }
 0x758   :  { %v4977_v41 = vsel %vm370_vm2, %v4925_v14, %v4926_v27  ;;  %v5041_v50 = vsel %vm435_vm4, %v4989_v42, %v4990_v58  ;;  %v4978_v21 = vsel %vm370_vm2, %v4924_v45, %v4925_v14  ;;  %v5042_v7 = vsel %vm435_vm4, %v4988_v55, %v4989_v42 }
 0x759   :  { %5338 = vrot.lane.b32.xlu1 %v5045_v3, %s7699_s11  ;;  %v12828_v36 = vsel %vm305_vm1, %v4860_v40, %v4861_v35  ;;  %v12832_v10 = vsel %vm305_vm1, %v4861_v35, %v4862_v23  ;;  %v12836_v11 = vsel %vm305_vm1, %v4859_v15, %v4860_v40  ;;  %v7567_v23 = vld [vmem:[%s14919_s12 + $0x18] sm:$0xff]  }
 0x75a   :  { %7461 = vmatprep.subr.bf16.mxu1 %v7567_v23 }
 0x75b   :  { %5208 = vrot.lane.b32.xlu0 %v4982_v5, %s7695_s2  ;;  %7462 = vmatpush3.bf16.msra.mxu1 %v7567_v23 }
 0x75d   :  { %5094 = vrot.lane.b32.xlu1 %v12790_v24, %s7698_s28  ;;  %v7569_v24 = vld [vmem:[%s14919_s12 + $0x28] sm:$0xff]  }
 0x75f   :  { %5336 = vrot.lane.b32.xlu0 %v5046_v6, %s7699_s11 }
 0x761   :  { %5090 = vrot.lane.b32.xlu1 %v4829_v33, %s7698_s28 }
 0x763   :  { %5092 = vrot.lane.b32.xlu0 %v4830_v9, %s7698_s28 }
 0x765   :  { %5214 = vrot.lane.b32.xlu1 %v4979_v52, %s7695_s2 }
 0x767   :  { %5088 = vrot.lane.b32.xlu0 %v4828_v61, %s7698_s28 }
 0x769   :  { %5342 = vrot.lane.b32.xlu1 %v5043_v47, %s7699_s11 }
 0x76b   :  { %5220 = vrot.lane.b32.xlu0 %v4976_v51, %s7695_s2  ;;  %v7568_v51 = vld [vmem:[%s14919_s12 + $0x20] sm:$0xff]  }
 0x76c   :  { %7463 = vmatprep.subr.bf16.mxu1 %v7568_v51 }
 0x76d   :  { %5218 = vrot.lane.b32.xlu1 %v4977_v41, %s7695_s2  ;;  %7464 = vmatpush3.bf16.msra.mxu1 %v7568_v51 }
 0x76e   :  { %v7433_v34 = vpop.f32.mrb[40].mxu0  ;;  %7465 = vmatprep.subr.bf16.mxu1 %v7569_v24 }
 0x76f   :  { %v4738_v57 = vadd.f32 %v7433_v34, %v12738_v0  ;;  %v4729_v46 = vpop.f32.mrb[41].mxu0  ;;  %5348 = vrot.lane.b32.xlu0 %v5040_v12, %s7699_s11 }
 0x770   :  { %v4730_v54 = vadd.f32 %v12738_v0, %v4729_v46  ;;  %v7434_v17 = vpop.f32.mrb[42].mxu0 }
 0x771   :  { %v4834_v37 = vmax.f32 %v4738_v57, 0.0  ;;  %v4741_v60 = vadd.f32 %v7434_v17, %v12738_v0  ;;  %v4732_v15 = vpop.f32.mrb[43].mxu0  ;;  %5346 = vrot.lane.b32.xlu1 %v5041_v50, %s7699_s11  ;;  %7466 = vmatpush3.bf16.msra.mxu1 %v7569_v24 }
 0x772   :  { %v4832_v62 = vmax.f32 %v4730_v54, 0.0  ;;  %v4733_v29 = vadd.f32 %v12738_v0, %v4732_v15  ;;  %7467 = vmatprep.subr.bf16.mxu1 %v7570_v22 }
 0x773   :  { %v12873_v13 = vmax.f32 %v4741_v60, 0.0  ;;  %5216 = vrot.lane.b32.xlu0 %v4978_v21, %s7695_s2  ;;  %v4930_v8 = vrot.slane %v4834_v37, 1  ;;  %v4994_v44 = vrot.slane %v4834_v37, 2  ;;  %v4866_v59 = vrot.slane %v4834_v37, 7 }
 0x774   :  { %v4833_v18 = vmax.f32 %v4733_v29, 0.0  ;;  %v4928_v32 = vrot.slane %v4832_v62, 1  ;;  %v4992_v38 = vrot.slane %v4832_v62, 2  ;;  %v4864_v2 = vrot.slane %v4832_v62, 7 }
 0x775   :  { %5102 = vrot.lane.b32.xlu1 %v12873_v13, %s7698_s28  ;;  %v4931_v25 = vrot.slane %v12873_v13, 1  ;;  %v4995_v3 = vrot.slane %v12873_v13, 2  ;;  %v4867_v9 = vrot.slane %v12873_v13, 7  ;;  %7468 = vmatpush3.bf16.msra.mxu1 %v7570_v22 }
 0x776   :  { %v4975_v20 = vsel %vm370_vm2, %v4927_v30, %v4928_v32  ;;  %v5039_v61 = vsel %vm435_vm4, %v4991_v49, %v4992_v38  ;;  %v4929_v56 = vrot.slane %v4833_v18, 1  ;;  %v4993_v27 = vrot.slane %v4833_v18, 2 }
 0x777   :  { %5344 = vrot.lane.b32.xlu0 %v5042_v7, %s7699_s11  ;;  %v4972_v58 = vsel %vm370_vm2, %v4930_v8, %v4931_v25  ;;  %v5036_v33 = vsel %vm435_vm4, %v4994_v44, %v4995_v3  ;;  %v12902_v45 = vsel %vm305_vm1, %v4866_v59, %v4867_v9  ;;  %v4865_v55 = vrot.slane %v4833_v18, 7 }
 0x778   :  { %v4973_v30 = vsel %vm370_vm2, %v4929_v56, %v4930_v8  ;;  %v5037_v49 = vsel %vm435_vm4, %v4993_v27, %v4994_v44  ;;  %v4974_v40 = vsel %vm370_vm2, %v4928_v32, %v4929_v56  ;;  %v5038_v52 = vsel %vm435_vm4, %v4992_v38, %v4993_v27 }
 0x779   :  { %5098 = vrot.lane.b32.xlu1 %v4833_v18, %s7698_s28  ;;  %v12918_v47 = vsel %vm305_vm1, %v4864_v2, %v4865_v55  ;;  %v12922_v14 = vsel %vm305_vm1, %v4865_v55, %v4866_v59  ;;  %v12928_v42 = vsel %vm305_vm1, %v4863_v26, %v4864_v2 }
 0x77b   :  { %5100 = vrot.lane.b32.xlu0 %v4834_v37, %s7698_s28 }
 0x77d   :  { %5222 = vrot.lane.b32.xlu1 %v4975_v20, %s7695_s2 }
 0x77f   :  { %5096 = vrot.lane.b32.xlu0 %v4832_v62, %s7698_s28 }
 0x781   :  { %5350 = vrot.lane.b32.xlu1 %v5039_v61, %s7699_s11 }
 0x783   :  { %5228 = vrot.lane.b32.xlu0 %v4972_v58, %s7695_s2 }
 0x785   :  { %5226 = vrot.lane.b32.xlu1 %v4973_v30, %s7695_s2 }
 0x787   :  { %5356 = vrot.lane.b32.xlu0 %v5036_v33, %s7699_s11 }
 0x789   :  { %5354 = vrot.lane.b32.xlu1 %v5037_v49, %s7699_s11 }
 0x78b   :  { %5224 = vrot.lane.b32.xlu0 %v4974_v40, %s7695_s2 }
 0x78e   :  { %v7437_v26 = vpop.f32.mrb[44].mxu0 }
 0x78f   :  { %v4754_v12 = vadd.f32 %v7437_v26, %v12738_v0  ;;  %v4745_v35 = vpop.f32.mrb[45].mxu0  ;;  %5352 = vrot.lane.b32.xlu0 %v5038_v52, %s7699_s11 }
 0x790   :  { %v4746_v41 = vadd.f32 %v12738_v0, %v4745_v35  ;;  %v7438_v50 = vpop.f32.mrb[46].mxu0 }
 0x791   :  { %v4838_v21 = vmax.f32 %v4754_v12, 0.0  ;;  %v4757_v7 = vadd.f32 %v7438_v50, %v12738_v0  ;;  %v4748_v5 = vpop.f32.mrb[47].mxu0 }
 0x792   :  { %v4836_v6 = vmax.f32 %v4746_v41, 0.0  ;;  %v4749_v4 = vadd.f32 %v12738_v0, %v4748_v5 }
 0x793   :  { %v12953_v34 = vmax.f32 %v4757_v7, 0.0  ;;  %5108 = vrot.lane.b32.xlu0 %v4838_v21, %s7698_s28  ;;  %v4934_v57 = vrot.slane %v4838_v21, 1  ;;  %v4998_v46 = vrot.slane %v4838_v21, 2  ;;  %v4870_v60 = vrot.slane %v4838_v21, 7 }
 0x794   :  { %v4837_v54 = vmax.f32 %v4749_v4, 0.0  ;;  %v4932_v17 = vrot.slane %v4836_v6, 1  ;;  %v4996_v37 = vrot.slane %v4836_v6, 2  ;;  %v4868_v48 = vrot.slane %v4836_v6, 7 }
 0x795   :  { %5110 = vrot.lane.b32.xlu1 %v12953_v34, %s7698_s28  ;;  %v4935_v15 = vrot.slane %v12953_v34, 1  ;;  %v4999_v62 = vrot.slane %v12953_v34, 2  ;;  %v4871_v29 = vrot.slane %v12953_v34, 7 }
 0x796   :  { %v4971_v8 = vsel %vm370_vm2, %v4931_v25, %v4932_v17  ;;  %v5035_v44 = vsel %vm435_vm4, %v4995_v3, %v4996_v37  ;;  %v4933_v18 = vrot.slane %v4837_v54, 1  ;;  %v4997_v32 = vrot.slane %v4837_v54, 2  ;;  %v7571_v3 = vld [vmem:[%s14919_s12 + $0x38] ss:$0 sps:$4 sm:$0xff]  }
 0x797   :  { %5104 = vrot.lane.b32.xlu0 %v4836_v6, %s7698_s28  ;;  %v4968_v38 = vsel %vm370_vm2, %v4934_v57, %v4935_v15  ;;  %v5032_v59 = vsel %vm435_vm4, %v4998_v46, %v4999_v62  ;;  %v4869_v2 = vrot.slane %v4837_v54, 7  ;;  %v12978_v25 = vsel %vm305_vm1, %v4870_v60, %v4871_v29  ;;  %7526 = vmatprep.subr.msk.bf16.mxu1 %vm1862_vm6, %v7571_v3 }
 0x798   :  { %v4970_v20 = vsel %vm370_vm2, %v4932_v17, %v4933_v18  ;;  %v4969_v61 = vsel %vm370_vm2, %v4933_v18, %v4934_v57  ;;  %v5034_v56 = vsel %vm435_vm4, %v4996_v37, %v4997_v32  ;;  %v5033_v27 = vsel %vm435_vm4, %v4997_v32, %v4998_v46 }
 0x799   :  { %5106 = vrot.lane.b32.xlu1 %v4837_v54, %s7698_s28  ;;  %v12994_v58 = vsel %vm305_vm1, %v4869_v2, %v4870_v60  ;;  %v13000_v33 = vsel %vm305_vm1, %v4867_v9, %v4868_v48  ;;  %v13004_v55 = vsel %vm305_vm1, %v4868_v48, %v4869_v2  ;;  %v5726_v23 = vsel %vm1862_vm6, %v7571_v3, 0 }
 0x79a   :  { %7470 = vmatpush3.bf16.msra.mxu1 %v5726_v23  ;;  %vm5497_vm6 = vcmask 736256  }
 0x79b   :  { %5236 = vrot.lane.b32.xlu0 %v4968_v38, %s7695_s2 }
 0x79d   :  { %5230 = vrot.lane.b32.xlu1 %v4971_v8, %s7695_s2 }
 0x79f   :  { %5364 = vrot.lane.b32.xlu0 %v5032_v59, %s7699_s11 }
 0x7a1   :  { %5358 = vrot.lane.b32.xlu1 %v5035_v44, %s7699_s11 }
 0x7a3   :  { %5232 = vrot.lane.b32.xlu0 %v4970_v20, %s7695_s2 }
 0x7a5   :  { %5234 = vrot.lane.b32.xlu1 %v4969_v61, %s7695_s2 }
 0x7a7   :  { %5360 = vrot.lane.b32.xlu0 %v5034_v56, %s7699_s11 }
 0x7a9   :  { %5362 = vrot.lane.b32.xlu1 %v5033_v27, %s7699_s11 }
 0x7ae   :  { %v7441_v13 = vpop.f32.mrb[48].mxu0 }
 0x7af   :  { %v4770_v9 = vadd.f32 %v7441_v13, %v12738_v0  ;;  %v4761_v30 = vpop.f32.mrb[49].mxu0 }
 0x7b0   :  { %v4762_v49 = vadd.f32 %v12738_v0, %v4761_v30  ;;  %v7442_v40 = vpop.f32.mrb[50].mxu0 }
 0x7b1   :  { %v4842_v52 = vmax.f32 %v4770_v9, 0.0  ;;  %v4773_v51 = vadd.f32 %v7442_v40, %v12738_v0  ;;  %v4764_v24 = vpop.f32.mrb[51].mxu0 }
 0x7b2   :  { %v4840_v26 = vmax.f32 %v4762_v49, 0.0  ;;  %v4765_v12 = vadd.f32 %v12738_v0, %v4764_v24 }
 0x7b3   :  { %v13020_v35 = vmax.f32 %v4773_v51, 0.0  ;;  %5116 = vrot.lane.b32.xlu0 %v4842_v52, %s7698_s28  ;;  %v4938_v41 = vrot.slane %v4842_v52, 1  ;;  %v5002_v50 = vrot.slane %v4842_v52, 2  ;;  %v4874_v6 = vrot.slane %v4842_v52, 7 }
 0x7b4   :  { %v4841_v21 = vmax.f32 %v4765_v12, 0.0  ;;  %v4936_v7 = vrot.slane %v4840_v26, 1  ;;  %v5000_v5 = vrot.slane %v4840_v26, 2  ;;  %v4872_v46 = vrot.slane %v4840_v26, 7 }
 0x7b5   :  { %5118 = vrot.lane.b32.xlu1 %v13020_v35, %s7698_s28  ;;  %v4939_v4 = vrot.slane %v13020_v35, 1  ;;  %v5003_v22 = vrot.slane %v13020_v35, 2  ;;  %v4875_v57 = vrot.slane %v13020_v35, 7 }
 0x7b6   :  { %v4967_v54 = vsel %vm370_vm2, %v4935_v15, %v4936_v7  ;;  %v5031_v17 = vsel %vm435_vm4, %v4999_v62, %v5000_v5  ;;  %v4937_v37 = vrot.slane %v4841_v21, 1  ;;  %v5001_v60 = vrot.slane %v4841_v21, 2 }
 0x7b7   :  { %5112 = vrot.lane.b32.xlu0 %v4840_v26, %s7698_s28  ;;  %v4964_v48 = vsel %vm370_vm2, %v4938_v41, %v4939_v4  ;;  %v5028_v8 = vsel %vm435_vm4, %v5002_v50, %v5003_v22  ;;  %v4873_v44 = vrot.slane %v4841_v21, 7  ;;  %v13045_v15 = vsel %vm305_vm1, %v4874_v6, %v4875_v57 }
 0x7b8   :  { %v4966_v62 = vsel %vm370_vm2, %v4936_v7, %v4937_v37  ;;  %v4965_v18 = vsel %vm370_vm2, %v4937_v37, %v4938_v41  ;;  %v5030_v32 = vsel %vm435_vm4, %v5000_v5, %v5001_v60  ;;  %v5029_v38 = vsel %vm435_vm4, %v5001_v60, %v5002_v50 }
 0x7b9   :  { %5114 = vrot.lane.b32.xlu1 %v4841_v21, %s7698_s28  ;;  %v13058_v59 = vsel %vm305_vm1, %v4873_v44, %v4874_v6  ;;  %v13064_v2 = vsel %vm305_vm1, %v4871_v29, %v4872_v46  ;;  %v13068_v3 = vsel %vm305_vm1, %v4872_v46, %v4873_v44 }
 0x7bb   :  { %5244 = vrot.lane.b32.xlu0 %v4964_v48, %s7695_s2 }
 0x7bd   :  { %v5085_v20 = vpop.permute.xlu0 %5084  ;;  %5238 = vrot.lane.b32.xlu1 %v4967_v54, %s7695_s2 }
 0x7be   :  { %v5435_v5 = vsel %vm5432_vm0, %v12781_v31, %v5085_v20 }
 0x7bf   :  { %v13072_v61 = vpop.permute.xlu1 %5086  ;;  %5372 = vrot.lane.b32.xlu0 %v5028_v8, %s7699_s11 }
 0x7c1   :  { %5366 = vrot.lane.b32.xlu1 %v5031_v17, %s7699_s11  ;;  %v13076_v34 = vpop.permute.xlu0 %5080 }
 0x7c3   :  { %v13078_v56 = vpop.permute.xlu1 %5082  ;;  %5240 = vrot.lane.b32.xlu0 %v4966_v62, %s7695_s2 }
 0x7c5   :  { %5242 = vrot.lane.b32.xlu1 %v4965_v18, %s7695_s2  ;;  %v5213_v29 = vpop.permute.xlu0 %5212 }
 0x7c7   :  { %v13082_v27 = vpop.permute.xlu1 %5210  ;;  %5368 = vrot.lane.b32.xlu0 %v5030_v32, %s7699_s11 }
 0x7c9   :  { %5370 = vrot.lane.b32.xlu1 %v5029_v38, %s7699_s11  ;;  %v5341_v23 = vpop.permute.xlu0 %5340 }
 0x7cb   :  { %v13086_v13 = vpop.permute.xlu1 %5338 }
 0x7cd   :  { %v13088_v9 = vpop.permute.xlu0 %5208 }
 0x7ce   :  { %v7445_v30 = vpop.f32.mrb[52].mxu0 }
 0x7cf   :  { %v4786_v49 = vadd.f32 %v7445_v30, %v12738_v0  ;;  %v4777_v40 = vpop.f32.mrb[53].mxu0  ;;  %v13091_v52 = vpop.permute.xlu1 %5094 }
 0x7d0   :  { %v4778_v51 = vadd.f32 %v12738_v0, %v4777_v40  ;;  %v7446_v24 = vpop.f32.mrb[54].mxu0 }
 0x7d1   :  { %v4846_v26 = vmax.f32 %v4786_v49, 0.0  ;;  %v4789_v12 = vadd.f32 %v7446_v24, %v12738_v0  ;;  %v4780_v41 = vpop.f32.mrb[55].mxu0  ;;  %v13095_v50 = vpop.permute.xlu0 %5336 }
 0x7d2   :  { %v4844_v21 = vmax.f32 %v4778_v51, 0.0  ;;  %v4781_v7 = vadd.f32 %v12738_v0, %v4780_v41 }
 0x7d3   :  { %v13100_v6 = vmax.f32 %v4789_v12, 0.0  ;;  %v5091_v46 = vpop.permute.xlu1 %5090  ;;  %5124 = vrot.lane.b32.xlu0 %v4846_v26, %s7698_s28  ;;  %v4942_v54 = vrot.slane %v4846_v26, 1  ;;  %v5006_v60 = vrot.slane %v4846_v26, 2  ;;  %v4878_v30 = vrot.slane %v4846_v26, 7 }
 0x7d4   :  { %v4845_v17 = vmax.f32 %v4781_v7, 0.0  ;;  %v4940_v37 = vrot.slane %v4844_v21, 1  ;;  %v5004_v48 = vrot.slane %v4844_v21, 2  ;;  %v4876_v18 = vrot.slane %v4844_v21, 7 }
 0x7d5   :  { %5126 = vrot.lane.b32.xlu1 %v13100_v6, %s7698_s28  ;;  %v13105_v8 = vpop.permute.xlu0 %5092  ;;  %v4943_v44 = vrot.slane %v13100_v6, 1  ;;  %v5007_v31 = vrot.slane %v13100_v6, 2  ;;  %v4879_v62 = vrot.slane %v13100_v6, 7  ;;  %v5467_v12 = vsel %vm3085_vm7, %v5435_v5, %v5213_v29 }
 0x7d6   :  { %v4963_v32 = vsel %vm370_vm2, %v4939_v4, %v4940_v37  ;;  %v5027_v38 = vsel %vm435_vm4, %v5003_v22, %v5004_v48  ;;  %v4941_v20 = vrot.slane %v4845_v17, 1  ;;  %v5005_v51 = vrot.slane %v4845_v17, 2 }
 0x7d7   :  { %v5215_v49 = vpop.permute.xlu1 %5214  ;;  %5120 = vrot.lane.b32.xlu0 %v4844_v21, %s7698_s28  ;;  %v4960_v40 = vsel %vm370_vm2, %v4942_v54, %v4943_v44  ;;  %v5024_v4 = vsel %vm435_vm4, %v5006_v60, %v5007_v31  ;;  %v4877_v24 = vrot.slane %v4845_v17, 7  ;;  %v13136_v41 = vsel %vm305_vm1, %v4878_v30, %v4879_v62 }
 0x7d8   :  { %v4962_v22 = vsel %vm370_vm2, %v4940_v37, %v4941_v20  ;;  %v4961_v26 = vsel %vm370_vm2, %v4941_v20, %v4942_v54  ;;  %v5026_v7 = vsel %vm435_vm4, %v5004_v48, %v5005_v51  ;;  %v5025_v29 = vsel %vm435_vm4, %v5005_v51, %v5006_v60  ;;  %v5532_v37 = vld [vmem:[#allocation7 + $0x10] sm:$0xff]  ;;  %v5533_v20 = vld [vmem:[#allocation7 + $0x18] sm:$0xff] }
 0x7d9   :  { %5122 = vrot.lane.b32.xlu1 %v4845_v17, %s7698_s28  ;;  %v5089_v21 = vpop.permute.xlu0 %5088  ;;  %v13145_v5 = vsel %vm305_vm1, %v4877_v24, %v4878_v30  ;;  %v13151_v54 = vsel %vm305_vm1, %v4875_v57, %v4876_v18  ;;  %v5436_v17 = vsel %vm5432_vm0, %v12768_v43, %v13072_v61  ;;  %v5500_v48 = vsel %vm5497_vm6, %v5467_v12, %v5341_v23 }
 0x7da   :  { %v13159_v60 = vsel %vm305_vm1, %v4876_v18, %v4877_v24  ;;  %v5468_v30 = vsel %vm3085_vm7, %v5436_v17, %v5215_v49  ;;  %v13164_v57 = vmul.f32 %v5532_v37, %v5500_v48  ;;  %v5438_v24 = vsel %vm5432_vm0, %v12828_v36, %v5091_v46  ;;  %v5534_v37 = vld [vmem:[#allocation7 + $0x20] sm:$0xff] }
 0x7db   :  { %v5343_v51 = vpop.permute.xlu1 %5342  ;;  %5252 = vrot.lane.b32.xlu0 %v4960_v40, %s7695_s2 }
 0x7dc   :  { %v5501_v35 = vsel %vm5497_vm6, %v5468_v30, %v5343_v51  ;;  %v5536_v51 = vld [vmem:[#allocation7 + $0x30] sm:$0xff] }
 0x7dd   :  { %v13166_v28 = vmul.f32 %v5533_v20, %v5501_v35  ;;  %5246 = vrot.lane.b32.xlu1 %v4963_v32, %s7695_s2  ;;  %v5221_v43 = vpop.permute.xlu0 %5220 }
 0x7df   :  { %v5219_v23 = vpop.permute.xlu1 %5218  ;;  %5380 = vrot.lane.b32.xlu0 %v5024_v4, %s7699_s11  ;;  %v5437_v4 = vsel %vm5432_vm0, %v12836_v11, %v5089_v21  ;;  %v5439_v11 = vsel %vm5432_vm0, %v12832_v10, %v13105_v8 }
 0x7e0   :  { %v5470_v32 = vsel %vm3085_vm7, %v5438_v24, %v5219_v23 }
 0x7e1   :  { %5374 = vrot.lane.b32.xlu1 %v5027_v38, %s7699_s11  ;;  %v5349_v18 = vpop.permute.xlu0 %5348  ;;  %v5535_v38 = vld [vmem:[#allocation7 + $0x28] sm:$0xff] }
 0x7e3   :  { %v5347_v49 = vpop.permute.xlu1 %5346  ;;  %5248 = vrot.lane.b32.xlu0 %v4962_v22, %s7695_s2 }
 0x7e4   :  { %v5503_v17 = vsel %vm5497_vm6, %v5470_v32, %v5347_v49 }
 0x7e5   :  { %5250 = vrot.lane.b32.xlu1 %v4961_v26, %s7695_s2  ;;  %v5217_v40 = vpop.permute.xlu0 %5216  ;;  %v13187_v46 = vmul.f32 %v5535_v38, %v5503_v17 }
 0x7e6   :  { %v5469_v22 = vsel %vm3085_vm7, %v5437_v4, %v5217_v40 }
 0x7e7   :  { %v13178_v12 = vpop.permute.xlu1 %5102  ;;  %5376 = vrot.lane.b32.xlu0 %v5026_v7, %s7699_s11 }
 0x7e9   :  { %5378 = vrot.lane.b32.xlu1 %v5025_v29, %s7699_s11  ;;  %v5345_v26 = vpop.permute.xlu0 %5344  ;;  %v5471_v29 = vsel %vm3085_vm7, %v5439_v11, %v5221_v43  ;;  %v5440_v43 = vsel %vm5432_vm0, %v12815_v19, %v13091_v52 }
 0x7ea   :  { %v5502_v36 = vsel %vm5497_vm6, %v5469_v22, %v5345_v26  ;;  %v5504_v35 = vsel %vm5497_vm6, %v5471_v29, %v5349_v18  ;;  %v5537_v22 = vld [vmem:[#allocation7 + $0x38] sm:$0xff] }
 0x7eb   :  { %v13189_v48 = vmul.f32 %v5534_v37, %v5502_v36  ;;  %v13191_v20 = vpop.permute.xlu1 %5098  ;;  %v13208_v17 = vmul.f32 %v5536_v51, %v5504_v35 }
 0x7ed   :  { %v13198_v7 = vpop.permute.xlu0 %5100 }
 0x7ee   :  { %v7449_v30 = vpop.f32.mrb[56].mxu0 }
 0x7ef   :  { %v4802_v23 = vadd.f32 %v7449_v30, %v12738_v0  ;;  %v4793_v49 = vpop.f32.mrb[57].mxu0  ;;  %v5223_v40 = vpop.permute.xlu1 %5222 }
 0x7f0   :  { %v4794_v24 = vadd.f32 %v12738_v0, %v4793_v49  ;;  %v7450_v32 = vpop.f32.mrb[58].mxu0  ;;  %v5472_v26 = vsel %vm3085_vm7, %v5440_v43, %v5223_v40 }
 0x7f1   :  { %v4850_v4 = vmax.f32 %v4802_v23, 0.0  ;;  %v4805_v10 = vadd.f32 %v7450_v32, %v12738_v0  ;;  %v4796_v8 = vpop.f32.mrb[59].mxu0  ;;  %v5097_v38 = vpop.permute.xlu0 %5096 }
 0x7f2   :  { %v4848_v37 = vmax.f32 %v4794_v24, 0.0  ;;  %v4797_v18 = vadd.f32 %v12738_v0, %v4796_v8  ;;  %v5441_v6 = vsel %vm5432_vm0, %v12928_v42, %v5097_v38  ;;  %v5530_v42 = vld [vmem:[#allocation7] sm:$0xff] }
 0x7f3   :  { %v13212_v36 = vmax.f32 %v4805_v10, 0.0  ;;  %v5351_v11 = vpop.permute.xlu1 %5350  ;;  %5132 = vrot.lane.b32.xlu0 %v4850_v4, %s7698_s28  ;;  %v4946_v29 = vrot.slane %v4850_v4, 1  ;;  %v5010_v30 = vrot.slane %v4850_v4, 2 }
 0x7f4   :  { %v4849_v23 = vmax.f32 %v4797_v18, 0.0  ;;  %v5505_v49 = vsel %vm5497_vm6, %v5472_v26, %v5351_v11  ;;  %v4944_v32 = vrot.slane %v4848_v37, 1  ;;  %v5008_v19 = vrot.slane %v4848_v37, 2 }
 0x7f5   :  { %v13216_v52 = vmul.f32 %v5537_v22, %v5505_v49  ;;  %5134 = vrot.lane.b32.xlu1 %v13212_v36, %s7698_s28  ;;  %v5229_v51 = vpop.permute.xlu0 %5228  ;;  %v4947_v35 = vrot.slane %v13212_v36, 1  ;;  %v5011_v40 = vrot.slane %v13212_v36, 2  ;;  %v15028_v24 = vrot.slane %v13212_v36, 7 }
 0x7f6   :  { %v4959_v10 = vsel %vm370_vm2, %v4943_v44, %v4944_v32  ;;  %v5023_v8 = vsel %vm435_vm4, %v5007_v31, %v5008_v19  ;;  %v4945_v43 = vrot.slane %v4849_v23, 1  ;;  %v4882_v18 = vrot.slane %v4850_v4, 7 }
 0x7f7   :  { %v5227_v26 = vpop.permute.xlu1 %5226  ;;  %5128 = vrot.lane.b32.xlu0 %v4848_v37, %s7698_s28  ;;  %v4956_v11 = vsel %vm370_vm2, %v4946_v29, %v4947_v35  ;;  %v5020_v44 = vsel %vm435_vm4, %v5010_v30, %v5011_v40  ;;  %v5009_v49 = vrot.slane %v4849_v23, 2  ;;  %v4881_v22 = vrot.slane %v4849_v23, 7 }
 0x7f8   :  { %v4958_v31 = vsel %vm370_vm2, %v4944_v32, %v4945_v43  ;;  %v4957_v4 = vsel %vm370_vm2, %v4945_v43, %v4946_v29  ;;  %v13255_v39 = vsel %vm305_vm1, %v4882_v18, %v15028_v24  ;;  %v4880_v32 = vrot.slane %v4848_v37, 7 }
 0x7f9   :  { %5130 = vrot.lane.b32.xlu1 %v4849_v23, %s7698_s28  ;;  %v5357_v63 = vpop.permute.xlu0 %5356  ;;  %v5022_v21 = vsel %vm435_vm4, %v5008_v19, %v5009_v49  ;;  %v5021_v61 = vsel %vm435_vm4, %v5009_v49, %v5010_v30  ;;  %15330 = vst [vmem:[#allocation15_spill] sm:$0xff] %v13255_v39  ;;  %v13259_v29 = vsel %vm305_vm1, %v4881_v22, %v4882_v18 }
 0x7fa   :  { %15331 = vst [vmem:[#allocation44_spill] sm:$0xff] %v13259_v29  ;;  %v13266_v23 = vsel %vm305_vm1, %v4879_v62, %v4880_v32  ;;  %v13270_v30 = vsel %vm305_vm1, %v4880_v32, %v4881_v22  ;;  %v5442_v43 = vsel %vm5432_vm0, %v12918_v47, %v13191_v20  ;;  %v5539_v62 = vld [vmem:[#allocation7 + $0x48] sm:$0xff]  ;;  %v5538_v22 = vld [vmem:[#allocation7 + $0x40] sm:$0xff] }
 0x7fb   :  { %5260 = vrot.lane.b32.xlu0 %v4956_v11, %s7695_s2  ;;  %v5355_v19 = vpop.permute.xlu1 %5354  ;;  %v5474_v18 = vsel %vm3085_vm7, %v5442_v43, %v5227_v26  ;;  %v5540_v43 = vld [vmem:[#allocation7 + $0x50] sm:$0xff] }
 0x7fc   :  { %v5507_v11 = vsel %vm5497_vm6, %v5474_v18, %v5355_v19 }
 0x7fd   :  { %5254 = vrot.lane.b32.xlu1 %v4959_v10, %s7695_s2  ;;  %v5225_v37 = vpop.permute.xlu0 %5224  ;;  %v13284_v24 = vmul.f32 %v5539_v62, %v5507_v11 }
 0x7fe   :  { %v5473_v49 = vsel %vm3085_vm7, %v5441_v6, %v5225_v37  ;;  %v5434_v37 = vsel %vm5432_vm0, %v12788_v53, %v13078_v56 }
 0x7ff   :  { %5388 = vrot.lane.b32.xlu0 %v5020_v44, %s7699_s11  ;;  %v5443_v44 = vsel %vm5432_vm0, %v12922_v14, %v13198_v7  ;;  %v5466_v62 = vsel %vm3085_vm7, %v5434_v37, %v13082_v27 }
 0x800   :  { %v5475_v19 = vsel %vm3085_vm7, %v5443_v44, %v5229_v51  ;;  %v5499_v51 = vsel %vm5497_vm6, %v5466_v62, %v13086_v13 }
 0x801   :  { %5382 = vrot.lane.b32.xlu1 %v5023_v8, %s7699_s11  ;;  %v5353_v10 = vpop.permute.xlu0 %5352 }
 0x802   :  { %v5506_v32 = vsel %vm5497_vm6, %v5473_v49, %v5353_v10 }
 0x803   :  { %v13286_v47 = vmul.f32 %v5538_v22, %v5506_v32  ;;  %5256 = vrot.lane.b32.xlu0 %v4958_v31, %s7695_s2  ;;  %v5541_v32 = vld [vmem:[#allocation7 + $0x58] sm:$0xff] }
 0x805   :  { %5258 = vrot.lane.b32.xlu1 %v4957_v4, %s7695_s2  ;;  %v13292_v20 = vpop.permute.xlu0 %5108 }
 0x807   :  { %v13294_v38 = vpop.permute.xlu1 %5110  ;;  %5384 = vrot.lane.b32.xlu0 %v5022_v21, %s7699_s11  ;;  %v5508_v21 = vsel %vm5497_vm6, %v5475_v19, %v5357_v63  ;;  %v5444_v63 = vsel %vm5432_vm0, %v12902_v45, %v13178_v12 }
 0x808   :  { %v13324_v49 = vmul.f32 %v5540_v43, %v5508_v21  ;;  %v5531_v21 = vld [vmem:[#allocation7 + $0x8] sm:$0xff] }
 0x809   :  { %5386 = vrot.lane.b32.xlu1 %v5021_v61, %s7699_s11  ;;  %v5105_v8 = vpop.permute.xlu0 %5104 }
 0x80a   :  { %v5445_v13 = vsel %vm5432_vm0, %v13000_v33, %v5105_v8 }
 0x80b   :  { %v13298_v26 = vpop.permute.xlu1 %5106 }
 0x80d   :  { %v13303_v31 = vpop.permute.xlu0 %5236 }
 0x80e   :  { %v7453_v4 = vpop.f32.mrb[60].mxu0 }
 0x80f   :  { %v4818_v61 = vadd.f32 %v7453_v4, %v12738_v0  ;;  %v4809_v18 = vpop.f32.mrb[61].mxu0  ;;  %v5231_v6 = vpop.permute.xlu1 %5230 }
 0x810   :  { %v4810_v14 = vadd.f32 %v12738_v0, %v4809_v18  ;;  %v7454_v7 = vpop.f32.mrb[62].mxu0  ;;  %v5476_v44 = vsel %vm3085_vm7, %v5444_v63, %v5231_v6 }
 0x811   :  { %v13316_v11 = vmax.f32 %v4818_v61, 0.0  ;;  %v4821_v53 = vadd.f32 %v7454_v7, %v12738_v0  ;;  %v4812_v56 = vpop.f32.mrb[63].mxu0  ;;  %v13319_v22 = vpop.permute.xlu0 %5364 }
 0x812   :  { %v13326_v27 = vmax.f32 %v4810_v14, 0.0  ;;  %v4813_v10 = vadd.f32 %v12738_v0, %v4812_v56  ;;  %v15332_v56 = vrot.slane %v12747_v16, 7 }
 0x813   :  { %v13332_v19 = vmax.f32 %v4821_v53, 0.0  ;;  %v5359_v4 = vpop.permute.xlu1 %5358  ;;  %5140 = vrot.lane.b32.xlu0 %v13316_v11, %s7698_s28  ;;  %v4950_v45 = vrot.slane %v13316_v11, 1  ;;  %v5014_v53 = vrot.slane %v13316_v11, 2 }
 0x814   :  { %v4853_v12 = vmax.f32 %v4813_v10, 0.0  ;;  %v5509_v37 = vsel %vm5497_vm6, %v5476_v44, %v5359_v4  ;;  %v4948_v43 = vrot.slane %v13326_v27, 1  ;;  %v5012_v0 = vrot.slane %v13326_v27, 2 }
 0x815   :  { %v4887_v33 = vrot.slane %v13332_v19, 7  ;;  %v13341_v8 = vmul.f32 %v5541_v32, %v5509_v37  ;;  %5142 = vrot.lane.b32.xlu1 %v13332_v19, %s7698_s28  ;;  %v5233_v61 = vpop.permute.xlu0 %5232  ;;  %v4951_v18 = vrot.slane %v13332_v19, 1  ;;  %v5563_v4 = vmul.f32 %v5531_v21, %v5499_v51 }
 0x816   :  { %v4955_v62 = vsel %vm370_vm2, %v4947_v35, %v4948_v43  ;;  %v4949_v14 = vrot.slane %v4853_v12, 1  ;;  %v5019_v7 = vsel %vm435_vm4, %v5011_v40, %v5012_v0  ;;  %v5013_v44 = vrot.slane %v4853_v12, 2 }
 0x817   :  { %v4919_v63 = vsel %vm305_vm1, %v4887_v33, %v15332_v56  ;;  %v5599_v10 = vpack.c.bf16 %v13341_v8, %v13324_v49  ;;  %v5235_v32 = vpop.permute.xlu1 %5234  ;;  %5136 = vrot.lane.b32.xlu0 %v13326_v27, %s7698_s28  ;;  %v4952_v35 = vsel %vm370_vm2, %v4950_v45, %v4951_v18  ;;  %v5477_v40 = vsel %vm3085_vm7, %v5445_v13, %v5233_v61  ;;  %v5542_v49 = vld [vmem:[#allocation7 + $0x60] sm:$0xff]  ;;  %v5543_v61 = vld [vmem:[#allocation7 + $0x68] sm:$0xff] }
 0x818   :  { %v4954_v37 = vsel %vm370_vm2, %v4948_v43, %v4949_v14  ;;  %v5433_v56 = vsel %vm5432_vm0, %v4919_v63, %v13076_v34  ;;  %v5018_v39 = vsel %vm435_vm4, %v5012_v0, %v5013_v44  ;;  %v15333_v51 = vrot.slane %v13332_v19, 2 }
 0x819   :  { %5138 = vrot.lane.b32.xlu1 %v4853_v12, %s7698_s28  ;;  %v5361_v8 = vpop.permute.xlu0 %5360  ;;  %v5465_v6 = vsel %vm3085_vm7, %v5433_v56, %v13088_v9  ;;  %v4953_v43 = vsel %vm370_vm2, %v4949_v14, %v4950_v45  ;;  %v5446_v34 = vsel %vm5432_vm0, %v13004_v55, %v13298_v26  ;;  %v5017_v0 = vsel %vm435_vm4, %v5013_v44, %v5014_v53 }
 0x81a   :  { %v5016_v13 = vsel %vm435_vm4, %v5014_v53, %v15333_v51  ;;  %v5510_v21 = vsel %vm5497_vm6, %v5477_v40, %v5361_v8  ;;  %v5498_v9 = vsel %vm5497_vm6, %v5465_v6, %v13095_v50  ;;  %v5478_v63 = vsel %vm3085_vm7, %v5446_v34, %v5235_v32 }
 0x81b   :  { %v5363_v56 = vpop.permute.xlu1 %5362  ;;  %5268 = vrot.lane.b32.xlu0 %v4952_v35, %s7695_s2  ;;  %v5562_v51 = vmul.f32 %v5530_v42, %v5498_v9  ;;  %v4885_v45 = vrot.slane %v4853_v12, 7  ;;  %v4886_v14 = vrot.slane %v13316_v11, 7  ;;  %v5574_v29 = vmul.f32 %v5542_v49, %v5510_v21  ;;  %v5546_v21 = vld [vmem:[#allocation7 + $0x80] sm:$0xff]  ;;  %v5547_v9 = vld [vmem:[#allocation7 + $0x88] sm:$0xff] }
 0x81c   :  { %v5511_v55 = vsel %vm5497_vm6, %v5478_v63, %v5363_v56  ;;  %v4884_v26 = vrot.slane %v13326_v27, 7  ;;  %v15334_v42 = vrot.slane %v13212_v36, 7  ;;  %v15336_v36 = vpack.c.bf16 %v13187_v46, %v13189_v48 }
 0x81d   :  { %v5575_v40 = vmul.f32 %v5543_v61, %v5511_v55  ;;  %5262 = vrot.lane.b32.xlu1 %v4955_v62, %s7695_s2  ;;  %v5594_v50 = vpack.c.bf16 %v5563_v4, %v5562_v51  ;;  %v13398_v6 = vsel %vm305_vm1, %v4885_v45, %v4886_v14  ;;  %v13402_v53 = vsel %vm305_vm1, %v4886_v14, %v4887_v33 }
 0x81e   :  { %v13408_v11 = vsel %vm305_vm1, %v15334_v42, %v4884_v26  ;;  %v13412_v27 = vsel %vm305_vm1, %v4884_v26, %v4885_v45  ;;  %v15335_v62 = vpack.c.bf16 %v13166_v28, %v13164_v57  ;;  %v15338_v57 = vpack.c.bf16 %v13216_v52, %v13208_v17 }
 0x81f   :  { %v5600_v12 = vpack.c.bf16 %v5575_v40, %v5574_v29  ;;  %5264 = vrot.lane.b32.xlu0 %v4954_v37, %s7695_s2  ;;  %7471 = vmatprep.mubr.msk.bf16.mxu1 %vm3331_vm10, %v5594_v50  ;;  %v15337_v29 = vrot.slane %v12747_v16, 1  ;;  %v5447_v35 = vsel %vm5432_vm0, %v12994_v58, %v13292_v20  ;;  %v15340_v17 = vrot.slane %v12747_v16, 2  ;;  %v5544_v20 = vld [vmem:[#allocation7 + $0x70] sm:$0xff] }
 0x820   :  { %7472 = vmatmul.mubr.msk.bf16.vlgmr.msra.gmra.mrb[32].mxu1 %vm3331_vm10, %v15335_v62  ;;  %v15341_v52 = vrot.slane %v13332_v19, 2  ;;  %v5448_v58 = vsel %vm5432_vm0, %v12978_v25, %v13294_v38  ;;  %v5545_v19 = vld [vmem:[#allocation7 + $0x78] sm:$0xff] }
 0x821   :  { %5390 = vrot.lane.b32.xlu1 %v5019_v7, %s7699_s11  ;;  %7475 = vmatprep.mubr.msk.bf16.mxu1 %vm3331_vm10, %v15336_v36  ;;  %v4983_v33 = vsel %vm370_vm2, %v4951_v18, %v15337_v29  ;;  %v5548_v29 = vld [vmem:[#allocation7 + $0x90] sm:$0xff] }
 0x823   :  { %5392 = vrot.lane.b32.xlu0 %v5018_v39, %s7699_s11  ;;  %v15339_v39 = vpack.c.bf16 %v13284_v24, %v13286_v47  ;;  %v5047_v24 = vsel %vm435_vm4, %v15341_v52, %v15340_v17  ;;  %v5479_v47 = vsel %vm3085_vm7, %v5447_v35, %v13303_v31 }
 0x824   :  { %v5512_v16 = vsel %vm5497_vm6, %v5479_v47, %v13319_v22 }
 0x825   :  { %5270 = vrot.lane.b32.xlu1 %v4983_v33, %s7695_s2  ;;  %v5117_v32 = vpop.permute.xlu0 %5116  ;;  %v5576_v31 = vmul.f32 %v5544_v20, %v5512_v16 }
 0x826   :  { %v5451_v42 = vsel %vm5432_vm0, %v13058_v59, %v5117_v32 }
 0x827   :  { %v5119_v28 = vpop.permute.xlu1 %5118  ;;  %5396 = vrot.lane.b32.xlu0 %v5016_v13, %s7699_s11 }
 0x828   :  { %7476 = vmatmul.mubr.msk.bf16.gmra.mrb[36].mxu1 %vm3331_vm10, %v15338_v57  ;;  %v5452_v36 = vsel %vm5432_vm0, %v13045_v15, %v5119_v28  ;;  %v5549_v57 = vld [vmem:[#allocation7 + $0x98] sm:$0xff] }
 0x829   :  { %5266 = vrot.lane.b32.xlu1 %v4953_v43, %s7695_s2  ;;  %v5113_v46 = vpop.permute.xlu0 %5112  ;;  %7479 = vmatprep.mubr.msk.bf16.mxu1 %vm3331_vm10, %v15339_v39 }
 0x82a   :  { %v5449_v34 = vsel %vm5432_vm0, %v13064_v2, %v5113_v46 }
 0x82b   :  { %v5115_v48 = vpop.permute.xlu1 %5114 }
 0x82c   :  { %v5450_v22 = vsel %vm5432_vm0, %v13068_v3, %v5115_v48 }
 0x82d   :  { %5394 = vrot.lane.b32.xlu1 %v5017_v0, %s7699_s11  ;;  %v5245_v18 = vpop.permute.xlu0 %5244 }
 0x82f   :  { %v5239_v7 = vpop.permute.xlu1 %5238 }
 0x830   :  { %7480 = vmatmul.mubr.msk.bf16.gmra.mrb[40].mxu1 %vm3331_vm10, %v5599_v10  ;;  %v5480_v10 = vsel %vm3085_vm7, %v5448_v58, %v5239_v7 }
 0x831   :  { %5398 = vrot.lane.b32.xlu1 %v5047_v24, %s7699_s11  ;;  %v5373_v44 = vpop.permute.xlu0 %5372  ;;  %7483 = vmatprep.mubr.msk.bf16.mxu1 %vm3331_vm10, %v5600_v12  ;;  %v5483_v12 = vsel %vm3085_vm7, %v5451_v42, %v5245_v18  ;;  %v5550_v24 = vld [vmem:[#allocation7 + $0xa0] sm:$0xff] }
 0x832   :  { %v5516_v33 = vsel %vm5497_vm6, %v5483_v12, %v5373_v44  ;;  %v5551_v44 = vld [vmem:[#allocation7 + $0xa8] sm:$0xff] }
 0x833   :  { %v5367_v4 = vpop.permute.xlu1 %5366  ;;  %v5580_v7 = vmul.f32 %v5548_v29, %v5516_v33 }
 0x834   :  { %v5513_v37 = vsel %vm5497_vm6, %v5480_v10, %v5367_v4 }
 0x835   :  { %v5577_v49 = vmul.f32 %v5545_v19, %v5513_v37  ;;  %v5241_v8 = vpop.permute.xlu0 %5240 }
 0x836   :  { %v5481_v25 = vsel %vm3085_vm7, %v5449_v34, %v5241_v8 }
 0x837   :  { %v5601_v13 = vpack.c.bf16 %v5577_v49, %v5576_v31  ;;  %v5243_v43 = vpop.permute.xlu1 %5242 }
 0x838   :  { %v5482_v0 = vsel %vm3085_vm7, %v5450_v22, %v5243_v43 }
 0x839   :  { %v5369_v38 = vpop.permute.xlu0 %5368  ;;  %7484 = vmatmul.mubr.msk.bf16.gmra.mrb[44].mxu1 %vm3331_vm10, %v5601_v13 }
 0x83a   :  { %v5514_v61 = vsel %vm5497_vm6, %v5481_v25, %v5369_v38  ;;  %v5552_v38 = vld [vmem:[#allocation7 + $0xb0] sm:$0xff] }
 0x83b   :  { %v5371_v63 = vpop.permute.xlu1 %5370  ;;  %v5578_v51 = vmul.f32 %v5546_v21, %v5514_v61  ;;  %v5553_v21 = vld [vmem:[#allocation7 + $0xb8] sm:$0xff] }
 0x83c   :  { %v5515_v56 = vsel %vm5497_vm6, %v5482_v0, %v5371_v63 }
 0x83d   :  { %v5579_v45 = vmul.f32 %v5547_v9, %v5515_v56 }
 0x83f   :  { %v5602_v2 = vpack.c.bf16 %v5579_v45, %v5578_v51 }
 0x841   :  { %7487 = vmatprep.mubr.msk.bf16.mxu1 %vm3331_vm10, %v5602_v2 }
 0x845   :  { %v5125_v14 = vpop.permute.xlu0 %5124 }
 0x846   :  { %v5455_v13 = vsel %vm5432_vm0, %v13145_v5, %v5125_v14 }
 0x847   :  { %v5127_v55 = vpop.permute.xlu1 %5126 }
 0x848   :  { %v5456_v25 = vsel %vm5432_vm0, %v13136_v41, %v5127_v55 }
 0x849   :  { %v5121_v26 = vpop.permute.xlu0 %5120 }
 0x84a   :  { %v5453_v32 = vsel %vm5432_vm0, %v13151_v54, %v5121_v26  ;;  %v5554_v26 = vld [vmem:[#allocation7 + $0xc0] sm:$0xff] }
 0x84b   :  { %v5123_v40 = vpop.permute.xlu1 %5122 }
 0x84c   :  { %v5454_v28 = vsel %vm5432_vm0, %v13159_v60, %v5123_v40 }
 0x84d   :  { %v5253_v50 = vpop.permute.xlu0 %5252 }
 0x84e   :  { %v5487_v43 = vsel %vm3085_vm7, %v5455_v13, %v5253_v50  ;;  %v5555_v50 = vld [vmem:[#allocation7 + $0xc8] sm:$0xff] }
 0x84f   :  { %v5247_v3 = vpop.permute.xlu1 %5246 }
 0x850   :  { %v5484_v46 = vsel %vm3085_vm7, %v5452_v36, %v5247_v3 }
 0x851   :  { %v5381_v62 = vpop.permute.xlu0 %5380 }
 0x852   :  { %v5520_v22 = vsel %vm5497_vm6, %v5487_v43, %v5381_v62 }
 0x853   :  { %v5375_v39 = vpop.permute.xlu1 %5374  ;;  %v5584_v63 = vmul.f32 %v5552_v38, %v5520_v22 }
 0x854   :  { %v5517_v48 = vsel %vm5497_vm6, %v5484_v46, %v5375_v39 }
 0x855   :  { %v5581_v35 = vmul.f32 %v5549_v57, %v5517_v48  ;;  %v5249_v17 = vpop.permute.xlu0 %5248  ;;  %v15342_v48 = vld [vmem:[#allocation44_spill] sm:$0xff] }
 0x856   :  { %v5485_v18 = vsel %vm3085_vm7, %v5453_v32, %v5249_v17  ;;  %v15343_v17 = vld [vmem:[#allocation15_spill] sm:$0xff] }
 0x857   :  { %v5603_v52 = vpack.c.bf16 %v5581_v35, %v5580_v7  ;;  %v5251_v59 = vpop.permute.xlu1 %5250 }
 0x858   :  { %v5486_v58 = vsel %vm3085_vm7, %v5454_v28, %v5251_v59  ;;  %v5556_v59 = vld [vmem:[#allocation7 + $0xd0] sm:$0xff] }
 0x859   :  { %v5377_v15 = vpop.permute.xlu0 %5376  ;;  %7488 = vmatmul.mubr.msk.bf16.gmra.mrb[48].mxu1 %vm3331_vm10, %v5603_v52 }
 0x85a   :  { %v5518_v47 = vsel %vm5497_vm6, %v5485_v18, %v5377_v15  ;;  %v5557_v18 = vld [vmem:[#allocation7 + $0xd8] sm:$0xff] }
 0x85b   :  { %v5379_v20 = vpop.permute.xlu1 %5378  ;;  %v5582_v19 = vmul.f32 %v5550_v24, %v5518_v47 }
 0x85c   :  { %v5519_v16 = vsel %vm5497_vm6, %v5486_v58, %v5379_v20 }
 0x85d   :  { %v5583_v10 = vmul.f32 %v5551_v44, %v5519_v16 }
 0x85f   :  { %v5604_v54 = vpack.c.bf16 %v5583_v10, %v5582_v19 }
 0x861   :  { %7491 = vmatprep.mubr.msk.bf16.mxu1 %vm3331_vm10, %v5604_v54 }
 0x865   :  { %v5133_v4 = vpop.permute.xlu0 %5132 }
 0x866   :  { %v5459_v7 = vsel %vm5432_vm0, %v15342_v48, %v5133_v4 }
 0x867   :  { %v5135_v37 = vpop.permute.xlu1 %5134 }
 0x868   :  { %v5460_v52 = vsel %vm5432_vm0, %v15343_v17, %v5135_v37 }
 0x869   :  { %v5129_v31 = vpop.permute.xlu0 %5128 }
 0x86a   :  { %v5457_v2 = vsel %vm5432_vm0, %v13266_v23, %v5129_v31  ;;  %v5558_v31 = vld [vmem:[#allocation7 + $0xe0] sm:$0xff] }
 0x86b   :  { %v5131_v49 = vpop.permute.xlu1 %5130 }
 0x86c   :  { %v5458_v55 = vsel %vm5432_vm0, %v13270_v30, %v5131_v49 }
 0x86d   :  { %v5261_v8 = vpop.permute.xlu0 %5260 }
 0x86e   :  { %v5491_v35 = vsel %vm3085_vm7, %v5459_v7, %v5261_v8  ;;  %v5559_v8 = vld [vmem:[#allocation7 + $0xe8] sm:$0xff] }
 0x86f   :  { %v5255_v60 = vpop.permute.xlu1 %5254 }
 0x870   :  { %v5488_v61 = vsel %vm3085_vm7, %v5456_v25, %v5255_v60 }
 0x871   :  { %v5389_v34 = vpop.permute.xlu0 %5388 }
 0x872   :  { %v5524_v32 = vsel %vm5497_vm6, %v5491_v35, %v5389_v34 }
 0x873   :  { %v5383_v9 = vpop.permute.xlu1 %5382  ;;  %v5588_v44 = vmul.f32 %v5556_v59, %v5524_v32 }
 0x874   :  { %v5521_v0 = vsel %vm5497_vm6, %v5488_v61, %v5383_v9  ;;  %v5561_v9 = vld [vmem:[#allocation7 + $0xf8] sm:$0xff] }
 0x875   :  { %v5585_v56 = vmul.f32 %v5553_v21, %v5521_v0  ;;  %v5257_v51 = vpop.permute.xlu0 %5256  ;;  %v5560_v21 = vld [vmem:[#allocation7 + $0xf0] sm:$0xff] }
 0x876   :  { %v5489_v14 = vsel %vm3085_vm7, %v5457_v2, %v5257_v51  ;;  %v7700_v2 = vmov 0  }
 0x877   :  { %v5605_v45 = vpack.c.bf16 %v5585_v56, %v5584_v63  ;;  %v5259_v5 = vpop.permute.xlu1 %5258  ;;  %6889 = vmatprep.subr.bf16.mxu0 %v7700_v2  ;;  %7503 = vmatprep.subr.bf16.mxu1 %v7700_v2 }
 0x878   :  { %v5490_v3 = vsel %vm3085_vm7, %v5458_v55, %v5259_v5  ;;  %v7574_v55 = vld [vmem:[%s14921_s14 + $0x10] sm:$0xff]  }
 0x879   :  { %v5385_v41 = vpop.permute.xlu0 %5384  ;;  %7492 = vmatmul.mubr.msk.bf16.gmra.mrb[52].mxu1 %vm3331_vm10, %v5605_v45 }
 0x87a   :  { %v5522_v40 = vsel %vm5497_vm6, %v5489_v14, %v5385_v41  ;;  %v7573_v14 = vld [vmem:[%s14921_s14 + $0x8] sm:$0xff]   ;;  %v13551_v41 = vld [vmem:[%s14920_s13] ss:$0 sm:$0xff] }
 0x87b   :  { %v5387_v42 = vpop.permute.xlu1 %5386  ;;  %v5586_v62 = vmul.f32 %v5554_v26, %v5522_v40  ;;  %v7575_v40 = vld [vmem:[%s14921_s14 + $0x18] sm:$0xff]  }
 0x87c   :  { %v5523_v12 = vsel %vm5497_vm6, %v5490_v3, %v5387_v42 }
 0x87d   :  { %v5587_v36 = vmul.f32 %v5555_v50, %v5523_v12 }
 0x87f   :  { %v5606_v23 = vpack.c.bf16 %v5587_v36, %v5586_v62 }
 0x881   :  { %7495 = vmatprep.mubr.msk.bf16.mxu1 %vm3331_vm10, %v5606_v23 }
 0x885   :  { %v5141_v29 = vpop.permute.xlu0 %5140 }
 0x886   :  { %v5463_v34 = vsel %vm5432_vm0, %v13398_v6, %v5141_v29 }
 0x887   :  { %v5143_v33 = vpop.permute.xlu1 %5142 }
 0x889   :  { %v5137_v57 = vpop.permute.xlu0 %5136 }
 0x88a   :  { %v5461_v54 = vsel %vm5432_vm0, %v13408_v11, %v5137_v57 }
 0x88b   :  { %v5139_v46 = vpop.permute.xlu1 %5138 }
 0x88c   :  { %v5462_v37 = vsel %vm5432_vm0, %v13412_v27, %v5139_v46  ;;  %v5464_v27 = vsel %vm5432_vm0, %v13402_v53, %v5143_v33  ;;  %v7572_v53 = vld [vmem:[%s14921_s14] sm:$0xff]  }
 0x88d   :  { %v5269_v39 = vpop.permute.xlu0 %5268  ;;  %6890 = vmatpush1.bf16.msra.mxu0 %v7572_v53  ;;  %7513 = vmatpush1.bf16.msra.mxu1 %v7572_v53  ;;  %v7576_v33 = vld [vmem:[%s14921_s14 + $0x20] sm:$0xff]  }
 0x88e   :  { %v5495_v11 = vsel %vm3085_vm7, %v5463_v34, %v5269_v39  ;;  %6891 = vmatprep.subr.bf16.mxu0 %v7700_v2  ;;  %7504 = vmatprep.subr.bf16.mxu1 %v7700_v2 }
 0x88f   :  { %v5263_v30 = vpop.permute.xlu1 %5262 }
 0x890   :  { %v5492_v15 = vsel %vm3085_vm7, %v5460_v52, %v5263_v30 }
 0x891   :  { %v5265_v28 = vpop.permute.xlu0 %5264  ;;  %6892 = vmatpush1.bf16.msra.mxu0 %v7573_v14  ;;  %7514 = vmatpush1.bf16.msra.mxu1 %v7573_v14 }
 0x892   :  { %v5493_v4 = vsel %vm3085_vm7, %v5461_v54, %v5265_v28  ;;  %6893 = vmatprep.subr.bf16.mxu0 %v7700_v2  ;;  %7505 = vmatprep.subr.bf16.mxu1 %v7700_v2  ;;  %v7577_v28 = vld [vmem:[%s14921_s14 + $0x28] sm:$0xff]  }
 0x893   :  { %v5391_v24 = vpop.permute.xlu1 %5390 }
 0x894   :  { %v5525_v47 = vsel %vm5497_vm6, %v5492_v15, %v5391_v24 }
 0x895   :  { %v5589_v58 = vmul.f32 %v5557_v18, %v5525_v47  ;;  %v5393_v19 = vpop.permute.xlu0 %5392  ;;  %6894 = vmatpush1.bf16.msra.mxu0 %v7574_v55  ;;  %7515 = vmatpush1.bf16.msra.mxu1 %v7574_v55 }
 0x896   :  { %v5526_v49 = vsel %vm5497_vm6, %v5493_v4, %v5393_v19  ;;  %6895 = vmatprep.subr.bf16.mxu0 %v7700_v2  ;;  %7506 = vmatprep.subr.bf16.mxu1 %v7700_v2 }
 0x897   :  { %v5607_v20 = vpack.c.bf16 %v5589_v58, %v5588_v44  ;;  %v5271_v16 = vpop.permute.xlu1 %5270  ;;  %v5590_v38 = vmul.f32 %v5558_v31, %v5526_v49 }
 0x898   :  { %v5496_v0 = vsel %vm3085_vm7, %v5464_v27, %v5271_v16 }
 0x899   :  { %7496 = vmatmul.mubr.msk.bf16.gmra.mrb[56].mxu1 %vm3331_vm10, %v5607_v20  ;;  %v5397_v60 = vpop.permute.xlu0 %5396  ;;  %6896 = vmatpush1.bf16.msra.mxu0 %v7575_v40 }
 0x89a   :  { %v5528_v61 = vsel %vm5497_vm6, %v5495_v11, %v5397_v60  ;;  %7516 = vmatpush1.bf16.msra.mxu1 %v7575_v40  ;;  %6897 = vmatprep.subr.bf16.mxu0 %v7700_v2 }
 0x89b   :  { %v5267_v10 = vpop.permute.xlu1 %5266  ;;  %v5592_v6 = vmul.f32 %v5560_v21, %v5528_v61  ;;  %7507 = vmatprep.subr.bf16.mxu1 %v7700_v2 }
 0x89c   :  { %v5494_v13 = vsel %vm3085_vm7, %v5462_v37, %v5267_v10 }
 0x89d   :  { %6898 = vmatpush1.bf16.msra.mxu0 %v7576_v33 }
 0x89e   :  { %7517 = vmatpush1.bf16.msra.mxu1 %v7576_v33  ;;  %6899 = vmatprep.subr.bf16.mxu0 %v7700_v2 }
 0x89f   :  { %v5395_v43 = vpop.permute.xlu1 %5394  ;;  %7508 = vmatprep.subr.bf16.mxu1 %v7700_v2 }
 0x8a0   :  { %v5527_v25 = vsel %vm5497_vm6, %v5494_v13, %v5395_v43 }
 0x8a1   :  { %v5591_v22 = vmul.f32 %v5559_v8, %v5527_v25  ;;  %6900 = vmatpush1.bf16.msra.mxu0 %v7577_v28 }
 0x8a2   :  { %7518 = vmatpush1.bf16.msra.mxu1 %v7577_v28  ;;  %6901 = vmatprep.subr.bf16.mxu0 %v7700_v2 }
 0x8a3   :  { %v5608_v63 = vpack.c.bf16 %v5591_v22, %v5590_v38  ;;  %v5399_v56 = vpop.permute.xlu1 %5398  ;;  %7509 = vmatprep.subr.bf16.mxu1 %v7700_v2 }
 0x8a4   :  { %v5529_v51 = vsel %vm5497_vm6, %v5496_v0, %v5399_v56 }
 0x8a5   :  { %v5593_v45 = vmul.f32 %v5561_v9, %v5529_v51  ;;  %7499 = vmatprep.mubr.msk.bf16.mxu1 %vm3331_vm10, %v5608_v63 }
 0x8a7   :  { %v5609_v5 = vpack.c.bf16 %v5593_v45, %v5592_v6 }
 0x8a9   :  { %7500 = vmatmul.mubr.msk.bf16.gmra.mrb[60].mxu1 %vm3331_vm10, %v5609_v5 }
 0x8f3   :  { %v7473_v26 = vpop.f32.mrb[32].mxu1 }
 0x8f4   :  { %v5771_v50 = vadd.f32 %v7473_v26, %v13551_v41  ;;  %v5762_v3 = vpop.f32.mrb[33].mxu1  ;;  %v7578_v26 = vld [vmem:[%s14921_s14 + $0x30] sm:$0xff]  }
 0x8f5   :  { %v5763_v42 = vadd.f32 %v13551_v41, %v5762_v3  ;;  %v7474_v12 = vpop.f32.mrb[34].mxu1  ;;  %6902 = vmatpush1.bf16.msra.mxu0 %v7578_v26  ;;  %7519 = vmatpush1.bf16.msra.mxu1 %v7578_v26 }
 0x8f6   :  { %v5891_v62 = vmax.f32 %v5771_v50, 0.0  ;;  %v5774_v36 = vadd.f32 %v7474_v12, %v13551_v41  ;;  %v5765_v23 = vpop.f32.mrb[35].mxu1  ;;  %6903 = vmatprep.subr.bf16.mxu0 %v7700_v2  ;;  %7510 = vmatprep.subr.bf16.mxu1 %v7700_v2 }
 0x8f7   :  { %v5766_v29 = vadd.f32 %v13551_v41, %v5765_v23  ;;  %v13572_v46 = vmax.f32 %v5763_v42, 0.0 }
 0x8f8   :  { %v13568_v57 = vmax.f32 %v5774_v36, 0.0  ;;  %6149 = vrot.lane.b32.xlu0 %v5891_v62, %s7694_s20  ;;  %v5987_v30 = vrot.slane %v5891_v62, 1  ;;  %v6051_v48 = vrot.slane %v5891_v62, 2  ;;  %v5923_v17 = vrot.slane %v5891_v62, 7 }
 0x8f9   :  { %v13574_v39 = vmax.f32 %v5766_v29, 0.0  ;;  %v15031_v4 = vrot.slane %v13572_v46, 7  ;;  %v15030_v8 = vrot.slane %v13572_v46, 1  ;;  %v15029_v34 = vrot.slane %v13572_v46, 2 }
 0x8fa   :  { %6151 = vrot.lane.b32.xlu1 %v13568_v57, %s7694_s20  ;;  %v5988_v7 = vrot.slane %v13568_v57, 1  ;;  %v6052_v35 = vrot.slane %v13568_v57, 2  ;;  %v5924_v52 = vrot.slane %v13568_v57, 7 }
 0x8fb   :  { %v7477_v59 = vpop.f32.mrb[36].mxu1  ;;  %v5986_v32 = vrot.slane %v13574_v39, 1  ;;  %v6050_v18 = vrot.slane %v13574_v39, 2  ;;  %v5922_v15 = vrot.slane %v13574_v39, 7 }
 0x8fc   :  { %v5787_v24 = vadd.f32 %v7477_v59, %v13551_v41  ;;  %v5778_v47 = vpop.f32.mrb[37].mxu1  ;;  %6145 = vrot.lane.b32.xlu0 %v13572_v46, %s7694_s20  ;;  %v6045_v44 = vsel %vm370_vm2, %v5987_v30, %v5988_v7  ;;  %v6109_v58 = vsel %vm435_vm4, %v6051_v48, %v6052_v35  ;;  %v13599_v20 = vsel %vm305_vm1, %v5923_v17, %v5924_v52 }
 0x8fd   :  { %v5779_v16 = vadd.f32 %v13551_v41, %v5778_v47  ;;  %v7478_v19 = vpop.f32.mrb[38].mxu1  ;;  %v6046_v10 = vsel %vm370_vm2, %v5986_v32, %v5987_v30  ;;  %v6110_v54 = vsel %vm435_vm4, %v6050_v18, %v6051_v48  ;;  %v13618_v60 = vsel %vm305_vm1, %v5922_v15, %v5923_v17 }
 0x8fe   :  { %v13610_v37 = vmax.f32 %v5787_v24, 0.0  ;;  %v5790_v31 = vadd.f32 %v7478_v19, %v13551_v41  ;;  %v5781_v49 = vpop.f32.mrb[39].mxu1  ;;  %6147 = vrot.lane.b32.xlu1 %v13574_v39, %s7694_s20  ;;  %v13629_v25 = vsel %vm305_vm1, %v15031_v4, %v5922_v15  ;;  %v6047_v38 = vsel %vm370_vm2, %v15030_v8, %v5986_v32 }
 0x8ff   :  { %v13621_v13 = vmax.f32 %v5779_v16, 0.0  ;;  %v5782_v43 = vadd.f32 %v13551_v41, %v5781_v49  ;;  %v6111_v15 = vsel %vm435_vm4, %v15029_v34, %v6050_v18 }
 0x900   :  { %v13631_v11 = vmax.f32 %v5790_v31, 0.0  ;;  %6277 = vrot.lane.b32.xlu0 %v6045_v44, %s7696_s22  ;;  %v5991_v22 = vrot.slane %v13610_v37, 1  ;;  %v6055_v27 = vrot.slane %v13610_v37, 2  ;;  %v5927_v0 = vrot.slane %v13610_v37, 7 }
 0x901   :  { %v13641_v21 = vmax.f32 %v5782_v43, 0.0  ;;  %v5989_v61 = vrot.slane %v13621_v13, 1  ;;  %v6053_v9 = vrot.slane %v13621_v13, 2  ;;  %v5925_v6 = vrot.slane %v13621_v13, 7 }
 0x902   :  { %6275 = vrot.lane.b32.xlu1 %v6046_v10, %s7696_s22  ;;  %v5992_v63 = vrot.slane %v13631_v11, 1  ;;  %v6056_v56 = vrot.slane %v13631_v11, 2  ;;  %v5928_v51 = vrot.slane %v13631_v11, 7  ;;  %v7579_v10 = vld [vmem:[%s14921_s14 + $0x38] sm:$0xff]  }
 0x903   :  { %v7481_v45 = vpop.f32.mrb[40].mxu1  ;;  %v13654_v5 = vsel %vm370_vm2, %v5988_v7, %v5989_v61  ;;  %v13658_v53 = vsel %vm435_vm4, %v6052_v35, %v6053_v9  ;;  %v5990_v14 = vrot.slane %v13641_v21, 1  ;;  %v6054_v55 = vrot.slane %v13641_v21, 2  ;;  %6904 = vmatpush1.bf16.msra.mxu0 %v7579_v10  ;;  %7520 = vmatpush1.bf16.msra.mxu1 %v7579_v10 }
 0x904   :  { %v5803_v40 = vadd.f32 %v7481_v45, %v13551_v41  ;;  %v5794_v50 = vpop.f32.mrb[41].mxu1  ;;  %6405 = vrot.lane.b32.xlu0 %v6109_v58, %s7701_s6  ;;  %v13669_v3 = vsel %vm370_vm2, %v5991_v22, %v5992_v63  ;;  %v13673_v42 = vsel %vm435_vm4, %v6055_v27, %v6056_v56  ;;  %v13679_v12 = vsel %vm305_vm1, %v5927_v0, %v5928_v51 }
 0x905   :  { %v5795_v62 = vadd.f32 %v13551_v41, %v5794_v50  ;;  %v7482_v36 = vpop.f32.mrb[42].mxu1  ;;  %v13684_v23 = vsel %vm370_vm2, %v5990_v14, %v5991_v22  ;;  %v13688_v29 = vsel %vm435_vm4, %v6054_v55, %v6055_v27  ;;  %v13692_v33 = vsel %vm370_vm2, %v5989_v61, %v5990_v14  ;;  %6905 = vmatprep.subr.bf16.mxu0 %v7700_v2 }
 0x906   :  { %v13694_v30 = vmax.f32 %v5803_v40, 0.0  ;;  %v5806_v48 = vadd.f32 %v7482_v36, %v13551_v41  ;;  %v5797_v7 = vpop.f32.mrb[43].mxu1  ;;  %6403 = vrot.lane.b32.xlu1 %v6110_v54, %s7701_s6  ;;  %v13700_v35 = vsel %vm435_vm4, %v6053_v9, %v6054_v55  ;;  %v5926_v17 = vrot.slane %v13641_v21, 7  ;;  %7511 = vmatprep.subr.bf16.mxu1 %v7700_v2 }
 0x907   :  { %v13704_v59 = vmax.f32 %v5795_v62, 0.0  ;;  %v5798_v32 = vadd.f32 %v13551_v41, %v5797_v7  ;;  %v13717_v28 = vsel %vm305_vm1, %v5924_v52, %v5925_v6 }
 0x908   :  { %v13719_v24 = vmax.f32 %v5806_v48, 0.0  ;;  %6273 = vrot.lane.b32.xlu0 %v6047_v38, %s7696_s22  ;;  %v5995_v47 = vrot.slane %v13694_v30, 1  ;;  %v6059_v39 = vrot.slane %v13694_v30, 2  ;;  %v13726_v44 = vsel %vm305_vm1, %v5925_v6, %v5926_v17 }
 0x909   :  { %v13729_v57 = vmax.f32 %v5798_v32, 0.0  ;;  %v5993_v52 = vrot.slane %v13704_v59, 1  ;;  %v6057_v18 = vrot.slane %v13704_v59, 2  ;;  %v13735_v58 = vsel %vm305_vm1, %v5926_v17, %v5927_v0  ;;  %v7580_v0 = vld [vmem:[%s14921_s14 + $0x40] sm:$0xff]  }
 0x90a   :  { %6159 = vrot.lane.b32.xlu1 %v13631_v11, %s7694_s20  ;;  %v5996_v16 = vrot.slane %v13719_v24, 1  ;;  %v6060_v19 = vrot.slane %v13719_v24, 2  ;;  %v5931_v54 = vrot.slane %v13694_v30, 7  ;;  %v5932_v31 = vrot.slane %v13719_v24, 7  ;;  %6906 = vmatpush1.bf16.msra.mxu0 %v7580_v0 }
 0x90b   :  { %v13748_v49 = vsel %vm370_vm2, %v5992_v63, %v5993_v52  ;;  %v13752_v43 = vsel %vm435_vm4, %v6056_v56, %v6057_v18  ;;  %v5994_v38 = vrot.slane %v13729_v57, 1  ;;  %v6058_v22 = vrot.slane %v13729_v57, 2  ;;  %6907 = vmatprep.subr.bf16.mxu0 %v7700_v2  ;;  %7521 = vmatpush1.bf16.msra.mxu1 %v7580_v0 }
 0x90c   :  { %v7485_v27 = vpop.f32.mrb[44].mxu1  ;;  %6401 = vrot.lane.b32.xlu0 %v6111_v15, %s7701_s6  ;;  %v13759_v61 = vsel %vm370_vm2, %v5995_v47, %v5996_v16  ;;  %v13763_v9 = vsel %vm435_vm4, %v6059_v39, %v6060_v19  ;;  %v13772_v63 = vsel %vm305_vm1, %v5931_v54, %v5932_v31  ;;  %v5929_v62 = vrot.slane %v13704_v59, 7  ;;  %v7581_v15 = vld [vmem:[%s14921_s14 + $0x48] sm:$0xff]   ;;  %7512 = vmatprep.subr.bf16.mxu1 %v7700_v2 }
 0x90d   :  { %v5819_v56 = vadd.f32 %v7485_v27, %v13551_v41  ;;  %v5810_v6 = vpop.f32.mrb[45].mxu1  ;;  %v13777_v45 = vsel %vm370_vm2, %v5994_v38, %v5995_v47  ;;  %v13781_v14 = vsel %vm435_vm4, %v6058_v22, %v6059_v39  ;;  %v13785_v55 = vsel %vm370_vm2, %v5993_v52, %v5994_v38 }
 0x90e   :  { %v5811_v26 = vadd.f32 %v13551_v41, %v5810_v6  ;;  %v7486_v40 = vpop.f32.mrb[46].mxu1  ;;  %6155 = vrot.lane.b32.xlu1 %v13641_v21, %s7694_s20  ;;  %v13793_v50 = vsel %vm435_vm4, %v6057_v18, %v6058_v22  ;;  %v5930_v36 = vrot.slane %v13729_v57, 7  ;;  %6908 = vmatpush1.bf16.msra.mxu0 %v7581_v15 }
 0x90f   :  { %v13797_v48 = vmax.f32 %v5819_v56, 0.0  ;;  %v5822_v7 = vadd.f32 %v7486_v40, %v13551_v41  ;;  %v5813_v17 = vpop.f32.mrb[47].mxu1  ;;  %7522 = vmatpush1.bf16.msra.mxu1 %v7581_v15 }
 0x910   :  { %v13801_v32 = vmax.f32 %v5811_v26, 0.0  ;;  %v5814_v21 = vadd.f32 %v13551_v41, %v5813_v17  ;;  %6157 = vrot.lane.b32.xlu0 %v13610_v37, %s7694_s20  ;;  %v13811_v47 = vsel %vm305_vm1, %v5929_v62, %v5930_v36  ;;  %v13815_v39 = vsel %vm305_vm1, %v5930_v36, %v5931_v54 }
 0x911   :  { %v13817_v52 = vmax.f32 %v5822_v7, 0.0  ;;  %v5999_v18 = vrot.slane %v13797_v48, 1  ;;  %v6063_v10 = vrot.slane %v13797_v48, 2  ;;  %v13826_v37 = vsel %vm305_vm1, %v5928_v51, %v5929_v62 }
 0x912   :  { %v13828_v38 = vmax.f32 %v5814_v21, 0.0  ;;  %6279 = vrot.lane.b32.xlu1 %v13654_v5, %s7696_s22  ;;  %v5997_v54 = vrot.slane %v13801_v32, 1  ;;  %v6061_v22 = vrot.slane %v13801_v32, 2  ;;  %v5935_v27 = vrot.slane %v13797_v48, 7 }
 0x913   :  { %v6000_v56 = vrot.slane %v13817_v52, 1  ;;  %v6064_v11 = vrot.slane %v13817_v52, 2  ;;  %v5936_v6 = vrot.slane %v13817_v52, 7  ;;  %v5933_v51 = vrot.slane %v13801_v32, 7 }
 0x914   :  { %6153 = vrot.lane.b32.xlu0 %v13621_v13, %s7694_s20  ;;  %v13844_v5 = vsel %vm370_vm2, %v5996_v16, %v5997_v54  ;;  %v13848_v0 = vsel %vm435_vm4, %v6060_v19, %v6061_v22  ;;  %v5998_v26 = vrot.slane %v13828_v38, 1  ;;  %v6062_v40 = vrot.slane %v13828_v38, 2 }
 0x915   :  { %v13854_v62 = vsel %vm370_vm2, %v5999_v18, %v6000_v56  ;;  %v13858_v2 = vsel %vm435_vm4, %v6063_v10, %v6064_v11  ;;  %v13864_v13 = vsel %vm305_vm1, %v5935_v27, %v5936_v6  ;;  %v5934_v16 = vrot.slane %v13828_v38, 7 }
 0x916   :  { %15344 = vst [vmem:[#allocation16_spill] sm:$0xff] %v13864_v13  ;;  %6407 = vrot.lane.b32.xlu1 %v13658_v53, %s7701_s6  ;;  %v13871_v19 = vsel %vm370_vm2, %v5998_v26, %v5999_v18  ;;  %v13875_v36 = vsel %vm435_vm4, %v6062_v40, %v6063_v10  ;;  %v13879_v7 = vsel %vm370_vm2, %v5997_v54, %v5998_v26 }
 0x917   :  { %v13883_v17 = vsel %vm435_vm4, %v6061_v22, %v6062_v40  ;;  %v13887_v21 = vsel %vm305_vm1, %v5933_v51, %v5934_v16  ;;  %v13891_v53 = vsel %vm305_vm1, %v5934_v16, %v5935_v27  ;;  %v13897_v18 = vsel %vm305_vm1, %v5932_v31, %v5933_v51 }
 0x918   :  { %15345 = vst [vmem:[#allocation45_spill] sm:$0xff] %v13891_v53  ;;  %6285 = vrot.lane.b32.xlu0 %v13669_v3, %s7696_s22 }
 0x91a   :  { %6283 = vrot.lane.b32.xlu1 %v13684_v23, %s7696_s22 }
 0x91c   :  { %6413 = vrot.lane.b32.xlu0 %v13673_v42, %s7701_s6 }
 0x91e   :  { %6411 = vrot.lane.b32.xlu1 %v13688_v29, %s7701_s6 }
 0x920   :  { %6281 = vrot.lane.b32.xlu0 %v13692_v33, %s7696_s22 }
 0x922   :  { %6167 = vrot.lane.b32.xlu1 %v13719_v24, %s7694_s20 }
 0x924   :  { %6409 = vrot.lane.b32.xlu0 %v13700_v35, %s7701_s6 }
 0x926   :  { %6163 = vrot.lane.b32.xlu1 %v13729_v57, %s7694_s20 }
 0x928   :  { %6165 = vrot.lane.b32.xlu0 %v13694_v30, %s7694_s20 }
 0x92a   :  { %6287 = vrot.lane.b32.xlu1 %v13748_v49, %s7696_s22 }
 0x92c   :  { %v7489_v3 = vpop.f32.mrb[48].mxu1  ;;  %6161 = vrot.lane.b32.xlu0 %v13704_v59, %s7694_s20 }
 0x92d   :  { %v5835_v42 = vadd.f32 %v7489_v3, %v13551_v41  ;;  %v5826_v23 = vpop.f32.mrb[49].mxu1 }
 0x92e   :  { %v5827_v29 = vadd.f32 %v13551_v41, %v5826_v23  ;;  %v7490_v33 = vpop.f32.mrb[50].mxu1  ;;  %6415 = vrot.lane.b32.xlu1 %v13752_v43, %s7701_s6 }
 0x92f   :  { %v13925_v35 = vmax.f32 %v5835_v42, 0.0  ;;  %v5838_v30 = vadd.f32 %v7490_v33, %v13551_v41  ;;  %v5829_v24 = vpop.f32.mrb[51].mxu1 }
 0x930   :  { %v13928_v57 = vmax.f32 %v5827_v29, 0.0  ;;  %v5830_v31 = vadd.f32 %v13551_v41, %v5829_v24  ;;  %6293 = vrot.lane.b32.xlu0 %v13759_v61, %s7696_s22 }
 0x931   :  { %v13933_v59 = vmax.f32 %v5838_v30, 0.0  ;;  %v6003_v49 = vrot.slane %v13925_v35, 1  ;;  %v6067_v15 = vrot.slane %v13925_v35, 2  ;;  %v5939_v22 = vrot.slane %v13925_v35, 7 }
 0x932   :  { %v13937_v10 = vmax.f32 %v5830_v31, 0.0  ;;  %6291 = vrot.lane.b32.xlu1 %v13777_v45, %s7696_s22  ;;  %v6001_v43 = vrot.slane %v13928_v57, 1  ;;  %v6065_v54 = vrot.slane %v13928_v57, 2  ;;  %v5937_v26 = vrot.slane %v13928_v57, 7 }
 0x933   :  { %v6004_v27 = vrot.slane %v13933_v59, 1  ;;  %v6068_v61 = vrot.slane %v13933_v59, 2  ;;  %v5940_v51 = vrot.slane %v13933_v59, 7 }
 0x934   :  { %6421 = vrot.lane.b32.xlu0 %v13763_v9, %s7701_s6  ;;  %v13952_v45 = vsel %vm370_vm2, %v6000_v56, %v6001_v43  ;;  %v13956_v40 = vsel %vm435_vm4, %v6064_v11, %v6065_v54  ;;  %v6002_v16 = vrot.slane %v13937_v10, 1  ;;  %v6066_v3 = vrot.slane %v13937_v10, 2 }
 0x935   :  { %v13962_v42 = vsel %vm370_vm2, %v6003_v49, %v6004_v27  ;;  %v13966_v23 = vsel %vm435_vm4, %v6067_v15, %v6068_v61  ;;  %v13972_v9 = vsel %vm305_vm1, %v5939_v22, %v5940_v51  ;;  %v5938_v56 = vrot.slane %v13937_v10, 7 }
 0x936   :  { %6419 = vrot.lane.b32.xlu1 %v13781_v14, %s7701_s6  ;;  %v13979_v11 = vsel %vm370_vm2, %v6002_v16, %v6003_v49  ;;  %v13983_v29 = vsel %vm370_vm2, %v6001_v43, %v6002_v16  ;;  %v13987_v33 = vsel %vm435_vm4, %v6066_v3, %v6067_v15  ;;  %v13991_v30 = vsel %vm435_vm4, %v6065_v54, %v6066_v3 }
 0x937   :  { %v13995_v24 = vsel %vm305_vm1, %v5937_v26, %v5938_v56  ;;  %v13999_v14 = vsel %vm305_vm1, %v5938_v56, %v5939_v22  ;;  %v14005_v31 = vsel %vm305_vm1, %v5936_v6, %v5937_v26 }
 0x938   :  { %15346 = vst [vmem:[#allocation71_spill] sm:$0xff] %v13995_v24  ;;  %15347 = vst [vmem:[#allocation46_spill] sm:$0xff] %v14005_v31  ;;  %6289 = vrot.lane.b32.xlu0 %v13785_v55, %s7696_s22 }
 0x93a   :  { %6175 = vrot.lane.b32.xlu1 %v13817_v52, %s7694_s20 }
 0x93c   :  { %6417 = vrot.lane.b32.xlu0 %v13793_v50, %s7701_s6 }
 0x93e   :  { %6171 = vrot.lane.b32.xlu1 %v13828_v38, %s7694_s20 }
 0x940   :  { %6173 = vrot.lane.b32.xlu0 %v13797_v48, %s7694_s20 }
 0x942   :  { %6295 = vrot.lane.b32.xlu1 %v13844_v5, %s7696_s22 }
 0x944   :  { %6169 = vrot.lane.b32.xlu0 %v13801_v32, %s7694_s20 }
 0x946   :  { %6423 = vrot.lane.b32.xlu1 %v13848_v0, %s7701_s6 }
 0x948   :  { %6301 = vrot.lane.b32.xlu0 %v13854_v62, %s7696_s22 }
 0x94a   :  { %6299 = vrot.lane.b32.xlu1 %v13871_v19, %s7696_s22 }
 0x94c   :  { %v7493_v55 = vpop.f32.mrb[52].mxu1  ;;  %6429 = vrot.lane.b32.xlu0 %v13858_v2, %s7701_s6 }
 0x94d   :  { %v5851_v50 = vadd.f32 %v7493_v55, %v13551_v41  ;;  %v5842_v48 = vpop.f32.mrb[53].mxu1 }
 0x94e   :  { %v5843_v52 = vadd.f32 %v13551_v41, %v5842_v48  ;;  %v7494_v38 = vpop.f32.mrb[54].mxu1  ;;  %6427 = vrot.lane.b32.xlu1 %v13875_v36, %s7701_s6 }
 0x94f   :  { %v5911_v32 = vmax.f32 %v5851_v50, 0.0  ;;  %v5854_v6 = vadd.f32 %v7494_v38, %v13551_v41  ;;  %v5845_v5 = vpop.f32.mrb[55].mxu1 }
 0x950   :  { %v5909_v0 = vmax.f32 %v5843_v52, 0.0  ;;  %v5846_v62 = vadd.f32 %v13551_v41, %v5845_v5  ;;  %6297 = vrot.lane.b32.xlu0 %v13879_v7, %s7696_s22 }
 0x951   :  { %v14037_v2 = vmax.f32 %v5854_v6, 0.0  ;;  %v6007_v19 = vrot.slane %v5911_v32, 1  ;;  %v6071_v49 = vrot.slane %v5911_v32, 2  ;;  %v5943_v54 = vrot.slane %v5911_v32, 7 }
 0x952   :  { %v5910_v15 = vmax.f32 %v5846_v62, 0.0  ;;  %6183 = vrot.lane.b32.xlu1 %v13933_v59, %s7694_s20  ;;  %v6005_v43 = vrot.slane %v5909_v0, 1  ;;  %v6069_v36 = vrot.slane %v5909_v0, 2  ;;  %v5941_v3 = vrot.slane %v5909_v0, 7 }
 0x953   :  { %v6008_v22 = vrot.slane %v14037_v2, 1  ;;  %v6072_v26 = vrot.slane %v14037_v2, 2  ;;  %v5944_v16 = vrot.slane %v14037_v2, 7 }
 0x954   :  { %6425 = vrot.lane.b32.xlu0 %v13883_v17, %s7701_s6  ;;  %v6028_v7 = vsel %vm370_vm2, %v6004_v27, %v6005_v43  ;;  %v6006_v56 = vrot.slane %v5910_v15, 1  ;;  %v6070_v55 = vrot.slane %v5910_v15, 2  ;;  %v14050_v50 = vsel %vm435_vm4, %v6068_v61, %v6069_v36 }
 0x955   :  { %v6025_v48 = vsel %vm370_vm2, %v6007_v19, %v6008_v22  ;;  %v14060_v52 = vsel %vm435_vm4, %v6071_v49, %v6072_v26  ;;  %v14066_v17 = vsel %vm305_vm1, %v5943_v54, %v5944_v16  ;;  %v5942_v27 = vrot.slane %v5910_v15, 7 }
 0x956   :  { %15348 = vst [vmem:[#allocation47_spill] sm:$0xff] %v14066_v17  ;;  %6179 = vrot.lane.b32.xlu1 %v13937_v10, %s7694_s20  ;;  %v6026_v61 = vsel %vm370_vm2, %v6006_v56, %v6007_v19  ;;  %v14074_v38 = vsel %vm435_vm4, %v6070_v55, %v6071_v49  ;;  %v14078_v6 = vsel %vm370_vm2, %v6005_v43, %v6006_v56 }
 0x957   :  { %v14082_v5 = vsel %vm435_vm4, %v6069_v36, %v6070_v55  ;;  %v14086_v62 = vsel %vm305_vm1, %v5942_v27, %v5943_v54  ;;  %v14090_v10 = vsel %vm305_vm1, %v5941_v3, %v5942_v27  ;;  %v14096_v19 = vsel %vm305_vm1, %v5940_v51, %v5941_v3 }
 0x958   :  { %15349 = vst [vmem:[#allocation48_spill] sm:$0xff] %v14086_v62  ;;  %15350 = vst [vmem:[#allocation49_spill] sm:$0xff] %v14090_v10  ;;  %6181 = vrot.lane.b32.xlu0 %v13925_v35, %s7694_s20 }
 0x959   :  { %15351 = vst [vmem:[#allocation56_spill] sm:$0xff] %v14096_v19 }
 0x95a   :  { %6303 = vrot.lane.b32.xlu1 %v13952_v45, %s7696_s22 }
 0x95c   :  { %6177 = vrot.lane.b32.xlu0 %v13928_v57, %s7694_s20 }
 0x95e   :  { %6431 = vrot.lane.b32.xlu1 %v13956_v40, %s7701_s6 }
 0x960   :  { %6309 = vrot.lane.b32.xlu0 %v13962_v42, %s7696_s22 }
 0x962   :  { %6307 = vrot.lane.b32.xlu1 %v13979_v11, %s7696_s22 }
 0x964   :  { %6305 = vrot.lane.b32.xlu0 %v13983_v29, %s7696_s22 }
 0x966   :  { %6435 = vrot.lane.b32.xlu1 %v13987_v33, %s7701_s6 }
 0x968   :  { %6433 = vrot.lane.b32.xlu0 %v13991_v30, %s7701_s6 }
 0x96a   :  { %v6150_v35 = vpop.permute.xlu0 %6149  ;;  %6191 = vrot.lane.b32.xlu1 %v14037_v2, %s7694_s20 }
 0x96c   :  { %v6152_v57 = vpop.permute.xlu1 %6151  ;;  %v7497_v59 = vpop.f32.mrb[56].mxu1  ;;  %6189 = vrot.lane.b32.xlu0 %v5911_v32, %s7694_s20 }
 0x96d   :  { %v5867_v51 = vadd.f32 %v7497_v59, %v13551_v41  ;;  %v5858_v45 = vpop.f32.mrb[57].mxu1 }
 0x96e   :  { %v5859_v40 = vadd.f32 %v13551_v41, %v5858_v45  ;;  %v7498_v42 = vpop.f32.mrb[58].mxu1  ;;  %6187 = vrot.lane.b32.xlu1 %v5910_v15, %s7694_s20  ;;  %v14122_v11 = vpop.permute.xlu0 %6145 }
 0x96f   :  { %v14124_v29 = vmax.f32 %v5867_v51, 0.0  ;;  %v5870_v33 = vadd.f32 %v7498_v42, %v13551_v41  ;;  %v5861_v30 = vpop.f32.mrb[59].mxu1 }
 0x970   :  { %v14127_v49 = vmax.f32 %v5859_v40, 0.0  ;;  %v5862_v43 = vadd.f32 %v13551_v41, %v5861_v30  ;;  %v6148_v32 = vpop.permute.xlu1 %6147  ;;  %6185 = vrot.lane.b32.xlu0 %v5909_v0, %s7694_s20 }
 0x971   :  { %v14131_v36 = vmax.f32 %v5870_v33, 0.0  ;;  %v6011_v54 = vrot.slane %v14124_v29, 1  ;;  %v6075_v27 = vrot.slane %v14124_v29, 2  ;;  %v5947_v0 = vrot.slane %v14124_v29, 7 }
 0x972   :  { %v14134_v3 = vmax.f32 %v5862_v43, 0.0  ;;  %6311 = vrot.lane.b32.xlu1 %v6028_v7, %s7696_s22  ;;  %v6278_v15 = vpop.permute.xlu0 %6277  ;;  %v6009_v56 = vrot.slane %v14127_v49, 1  ;;  %v6073_v55 = vrot.slane %v14127_v49, 2 }
 0x973   :  { %v15034_v59 = vrot.slane %v14131_v36, 1  ;;  %v15032_v51 = vrot.slane %v14131_v36, 2  ;;  %v15033_v45 = vrot.slane %v14131_v36, 7 }
 0x974   :  { %v6276_v40 = vpop.permute.xlu1 %6275  ;;  %6317 = vrot.lane.b32.xlu0 %v6025_v48, %s7696_s22  ;;  %v14149_v7 = vsel %vm370_vm2, %v6008_v22, %v6009_v56  ;;  %v14155_v42 = vsel %vm435_vm4, %v6072_v26, %v6073_v55  ;;  %v6010_v33 = vrot.slane %v14134_v3, 1  ;;  %v6074_v30 = vrot.slane %v14134_v3, 2 }
 0x975   :  { %v14163_v48 = vsel %vm370_vm2, %v6011_v54, %v15034_v59  ;;  %v14169_v22 = vsel %vm435_vm4, %v6075_v27, %v15032_v51  ;;  %v14175_v26 = vsel %vm305_vm1, %v5947_v0, %v15033_v45  ;;  %v5945_v45 = vrot.slane %v14127_v49, 7 }
 0x976   :  { %15352 = vst [vmem:[#allocation57_spill] sm:$0xff] %v14175_v26  ;;  %6315 = vrot.lane.b32.xlu1 %v6026_v61, %s7696_s22  ;;  %v6406_v43 = vpop.permute.xlu0 %6405  ;;  %v14180_v34 = vsel %vm370_vm2, %v6010_v33, %v6011_v54  ;;  %v14184_v8 = vsel %vm435_vm4, %v6074_v30, %v6075_v27  ;;  %v14188_v4 = vsel %vm370_vm2, %v6009_v56, %v6010_v33  ;;  %v5946_v61 = vrot.slane %v14134_v3, 7 }
 0x977   :  { %v14192_v51 = vsel %vm435_vm4, %v6073_v55, %v6074_v30  ;;  %v14214_v27 = vsel %vm305_vm1, %v5944_v16, %v5945_v45  ;;  %v6499_v16 = vsel %vm3052_vm5, %v13618_v60, %v6150_v35  ;;  %v6498_v60 = vsel %vm3052_vm5, %v13629_v25, %v6148_v32  ;;  %v6598_v25 = vld [vmem:[%s14912_s5 + $0x28] sm:$0xff] }
 0x978   :  { %v6404_v59 = vpop.permute.xlu1 %6403  ;;  %6445 = vrot.lane.b32.xlu0 %v14060_v52, %s7701_s6  ;;  %v14200_v54 = vsel %vm305_vm1, %v5945_v45, %v5946_v61  ;;  %v14204_v56 = vsel %vm305_vm1, %v5946_v61, %v5947_v0  ;;  %15355 = vst [vmem:[#allocation58_spill] sm:$0xff] %v14214_v27  ;;  %v6596_v52 = vld [vmem:[%s14912_s5 + $0x18] sm:$0xff]  ;;  %v6500_v45 = vsel %vm3052_vm5, %v13599_v20, %v6152_v57 }
 0x979   :  { %15353 = vst [vmem:[#allocation53_spill] sm:$0xff] %v14200_v54  ;;  %15354 = vst [vmem:[#allocation21_spill] sm:$0xff] %v14204_v56  ;;  %v6660_v56 = vmul.f32 %v6596_v52, %v6404_v59  ;;  %v6531_v20 = vsel %vm3118_vm8, %v6499_v16, %v6278_v15  ;;  %v6530_v52 = vsel %vm3118_vm8, %v6498_v60, %v6276_v40  ;;  %v15357_v60 = vrot.slane %v14131_v36, 2 }
 0x97a   :  { %6443 = vrot.lane.b32.xlu1 %v14074_v38, %s7701_s6  ;;  %v14208_v55 = vpop.permute.xlu0 %6273  ;;  %v6594_v38 = vld [vmem:[%s14912_s5 + $0x8] sm:$0xff]  ;;  %v6562_v32 = vsel %vm3331_vm10, %v6530_v52, %v6404_v59  ;;  %v15358_v59 = vrot.slane %v13572_v46, 7 }
 0x97c   :  { %v7501_v33 = vpop.f32.mrb[60].mxu1  ;;  %v14219_v30 = vpop.permute.xlu1 %6159  ;;  %6313 = vrot.lane.b32.xlu0 %v14078_v6, %s7696_s22 }
 0x97d   :  { %v5883_v2 = vadd.f32 %v7501_v33, %v13551_v41  ;;  %v5874_v0 = vpop.f32.mrb[61].mxu1 }
 0x97e   :  { %v5875_v61 = vadd.f32 %v13551_v41, %v5874_v0  ;;  %v7502_v26 = vpop.f32.mrb[62].mxu1  ;;  %6199 = vrot.lane.b32.xlu1 %v14131_v36, %s7694_s20  ;;  %v6402_v6 = vpop.permute.xlu0 %6401 }
 0x97f   :  { %v14234_v27 = vmax.f32 %v5883_v2, 0.0  ;;  %v5886_v33 = vadd.f32 %v7502_v26, %v13551_v41  ;;  %v6658_v54 = vmul.f32 %v6594_v38, %v6402_v6  ;;  %v5877_v17 = vpop.f32.mrb[63].mxu1  ;;  %v6563_v26 = vsel %vm3331_vm10, %v6531_v20, %v6406_v43 }
 0x980   :  { %v14240_v35 = vmax.f32 %v5875_v61, 0.0  ;;  %v5878_v57 = vadd.f32 %v13551_v41, %v5877_v17  ;;  %v14243_v0 = vpop.permute.xlu1 %6155  ;;  %6441 = vrot.lane.b32.xlu0 %v14082_v5, %s7701_s6  ;;  %v15356_v61 = vrot.slane %v14131_v36, 1 }
 0x981   :  { %v14249_v38 = vmax.f32 %v5886_v33, 0.0  ;;  %v6722_v2 = vpack.c.bf16 %v6660_v56, %v6658_v54  ;;  %v6015_v54 = vrot.slane %v14234_v27, 1  ;;  %v6079_v62 = vrot.slane %v14234_v27, 2 }
 0x982   :  { %v14255_v15 = vmax.f32 %v5878_v57, 0.0  ;;  %6195 = vrot.lane.b32.xlu1 %v14134_v3, %s7694_s20  ;;  %v14259_v41 = vpop.permute.xlu0 %6157  ;;  %v6013_v17 = vrot.slane %v14240_v35, 1  ;;  %v6077_v5 = vrot.slane %v14240_v35, 2  ;;  %v6595_v3 = vld [vmem:[%s14912_s5 + $0x10] sm:$0xff] }
 0x983   :  { %v5952_v40 = vrot.slane %v14249_v38, 7  ;;  %7223 = vmatprep.mubr.msk.bf16.mxu0 %vm6840_vm12, %v6722_v2  ;;  %v15035_v56 = vrot.slane %v14249_v38, 1  ;;  %v6662_v2 = vmul.f32 %v6598_v25, %v6406_v43 }
 0x984   :  { %v6280_v16 = vpop.permute.xlu1 %6279  ;;  %6197 = vrot.lane.b32.xlu0 %v14124_v29, %s7694_s20  ;;  %v14277_v33 = vsel %vm370_vm2, %v15356_v61, %v6013_v17  ;;  %v14283_v20 = vsel %vm435_vm4, %v15357_v60, %v6077_v5  ;;  %v6014_v57 = vrot.slane %v14255_v15, 1  ;;  %v6078_v52 = vrot.slane %v14255_v15, 2  ;;  %v6593_v60 = vld [vmem:[%s14912_s5] sm:$0xff] }
 0x985   :  { %v5984_v29 = vsel %vm305_vm1, %v5952_v40, %v15358_v59  ;;  %v14295_v61 = vsel %vm370_vm2, %v6015_v54, %v15035_v56  ;;  %v6600_v59 = vld [vmem:[%s14912_s5 + $0x38] sm:$0xff]  ;;  %v5950_v53 = vrot.slane %v14255_v15, 7 }
 0x986   :  { %v6497_v43 = vsel %vm3052_vm5, %v5984_v29, %v14122_v11  ;;  %6319 = vrot.lane.b32.xlu1 %v14149_v7, %s7696_s22  ;;  %v6154_v25 = vpop.permute.xlu0 %6153  ;;  %v14310_v56 = vsel %vm370_vm2, %v6013_v17, %v6014_v57  ;;  %v14314_v19 = vsel %vm370_vm2, %v6014_v57, %v6015_v54  ;;  %v14318_v10 = vsel %vm435_vm4, %v6077_v5, %v6078_v52  ;;  %v6597_v11 = vld [vmem:[%s14912_s5 + $0x20] sm:$0xff]  ;;  %v6599_v17 = vld [vmem:[%s14912_s5 + $0x30] sm:$0xff] }
 0x987   :  { %v6659_v7 = vmul.f32 %v6595_v3, %v6562_v32  ;;  %v6529_v29 = vsel %vm3118_vm8, %v6497_v43, %v14208_v55  ;;  %v14330_v54 = vsel %vm435_vm4, %v6078_v52, %v6079_v62  ;;  %v15359_v57 = vrot.slane %v14249_v38, 2 }
 0x988   :  { %v6561_v31 = vsel %vm3331_vm10, %v6529_v29, %v6402_v6  ;;  %v6532_v32 = vsel %vm3118_vm8, %v6500_v45, %v6280_v16  ;;  %v6408_v3 = vpop.permute.xlu1 %6407  ;;  %6193 = vrot.lane.b32.xlu0 %v14127_v49, %s7694_s20  ;;  %v5951_v55 = vrot.slane %v14234_v27, 7  ;;  %v5949_v43 = vrot.slane %v14240_v35, 7 }
 0x989   :  { %v14336_v5 = vsel %vm435_vm4, %v6079_v62, %v15359_v57  ;;  %v6657_v52 = vmul.f32 %v6593_v60, %v6561_v31  ;;  %v6564_v24 = vsel %vm3331_vm10, %v6532_v32, %v6408_v3  ;;  %v6664_v13 = vmul.f32 %v6600_v59, %v6408_v3 }
 0x98a   :  { %v6661_v62 = vmul.f32 %v6597_v11, %v6563_v26  ;;  %v6663_v57 = vmul.f32 %v6599_v17, %v6564_v24  ;;  %6447 = vrot.lane.b32.xlu1 %v14155_v42, %s7701_s6  ;;  %v6286_v45 = vpop.permute.xlu0 %6285  ;;  %v14350_v6 = vsel %vm305_vm1, %v5951_v55, %v5952_v40  ;;  %v15360_v49 = vrot.slane %v14131_v36, 7  ;;  %v6601_v11 = vld [vmem:[%s14912_s5 + $0x40] sm:$0xff] }
 0x98b   :  { %v6721_v16 = vpack.c.bf16 %v6659_v7, %v6657_v52  ;;  %v6724_v60 = vpack.c.bf16 %v6664_v13, %v6662_v2  ;;  %v14360_v26 = vsel %vm305_vm1, %v5949_v43, %v5950_v53  ;;  %v14366_v40 = vsel %vm305_vm1, %v5950_v53, %v5951_v55 }
 0x98c   :  { %v14356_v31 = vsel %vm305_vm1, %v15360_v49, %v5949_v43  ;;  %v6284_v24 = vpop.permute.xlu1 %6283  ;;  %6325 = vrot.lane.b32.xlu0 %v14163_v48, %s7696_s22  ;;  %v6723_v42 = vpack.c.bf16 %v6663_v57, %v6661_v62  ;;  %v6502_v53 = vsel %vm3052_vm5, %v13726_v44, %v14243_v0  ;;  %v6603_v44 = vld [vmem:[%s14912_s5 + $0x50] sm:$0xff]  ;;  %v6503_v57 = vsel %vm3052_vm5, %v13735_v58, %v14259_v41  ;;  %v6605_v58 = vld [vmem:[%s14912_s5 + $0x60] sm:$0xff] }
 0x98d   :  { %6922 = vmatmul.mubr.bf16.vlgmr.msra.gmra.mrb[64].mxu0 %v6721_v16  ;;  %v6534_v2 = vsel %vm3118_vm8, %v6502_v53, %v6284_v24  ;;  %v6608_v16 = vld [vmem:[%s14912_s5 + $0x78] sm:$0xff] }
 0x98e   :  { %6323 = vrot.lane.b32.xlu1 %v14180_v34, %s7696_s22  ;;  %v6414_v36 = vpop.permute.xlu0 %6413  ;;  %7224 = vmatprep.mubr.msk.bf16.mxu0 %vm6840_vm12, %v6724_v60  ;;  %v6604_v34 = vld [vmem:[%s14912_s5 + $0x58] sm:$0xff] }
 0x990   :  { %v6412_v13 = vpop.permute.xlu1 %6411  ;;  %6453 = vrot.lane.b32.xlu0 %v14169_v22, %s7701_s6  ;;  %v6501_v22 = vsel %vm3052_vm5, %v13717_v28, %v6154_v25 }
 0x991   :  { %v6566_v0 = vsel %vm3331_vm10, %v6534_v2, %v6412_v13  ;;  %v6668_v29 = vmul.f32 %v6604_v34, %v6412_v13 }
 0x992   :  { %6451 = vrot.lane.b32.xlu1 %v14184_v8, %s7701_s6  ;;  %v6282_v48 = vpop.permute.xlu0 %6281  ;;  %v6602_v8 = vld [vmem:[%s14912_s5 + $0x48] sm:$0xff]  ;;  %v6667_v17 = vmul.f32 %v6603_v44, %v6566_v0 }
 0x994   :  { %v14382_v59 = vpop.permute.xlu1 %6167  ;;  %6321 = vrot.lane.b32.xlu0 %v14188_v4, %s7696_s22  ;;  %v6533_v4 = vsel %vm3118_vm8, %v6501_v22, %v6282_v48 }
 0x995   :  { %6930 = vmatmul.mubr.bf16.gmra.mrb[68].mxu0 %v6723_v42 }
 0x996   :  { %6207 = vrot.lane.b32.xlu1 %v14249_v38, %s7694_s20  ;;  %v6410_v7 = vpop.permute.xlu0 %6409 }
 0x997   :  { %v6565_v28 = vsel %vm3331_vm10, %v6533_v4, %v6410_v7  ;;  %v6666_v25 = vmul.f32 %v6602_v8, %v6410_v7 }
 0x998   :  { %v6665_v32 = vmul.f32 %v6601_v11, %v6565_v28  ;;  %v6164_v3 = vpop.permute.xlu1 %6163  ;;  %6449 = vrot.lane.b32.xlu0 %v14192_v51, %s7701_s6  ;;  %v6535_v51 = vsel %vm3118_vm8, %v6503_v57, %v6286_v45  ;;  %v6607_v45 = vld [vmem:[%s14912_s5 + $0x70] sm:$0xff]  ;;  %v6612_v11 = vld [vmem:[%s14912_s5 + $0x98] sm:$0xff] }
 0x999   :  { %v6726_v55 = vpack.c.bf16 %v6668_v29, %v6666_v25  ;;  %v6567_v41 = vsel %vm3331_vm10, %v6535_v51, %v6414_v36  ;;  %v6506_v44 = vsel %vm3052_vm5, %v13811_v47, %v6164_v3  ;;  %v6611_v47 = vld [vmem:[%s14912_s5 + $0x90] sm:$0xff]  ;;  %v6609_v29 = vld [vmem:[%s14912_s5 + $0x80] sm:$0xff] }
 0x99a   :  { %6203 = vrot.lane.b32.xlu1 %v14255_v15, %s7694_s20  ;;  %v14406_v43 = vpop.permute.xlu0 %6165  ;;  %v6725_v52 = vpack.c.bf16 %v6667_v17, %v6665_v32  ;;  %v6606_v15 = vld [vmem:[%s14912_s5 + $0x68] sm:$0xff] }
 0x99b   :  { %7225 = vmatprep.mubr.msk.bf16.mxu0 %vm6840_vm12, %v6726_v55  ;;  %v6670_v24 = vmul.f32 %v6606_v15, %v6414_v36  ;;  %v15362_v36 = vrot.slane %v14249_v38, 1  ;;  %v6507_v51 = vsel %vm3052_vm5, %v13815_v39, %v14406_v43  ;;  %v15363_v15 = vrot.slane %v13572_v46, 2  ;;  %v6616_v39 = vld [vmem:[%s14912_s5 + $0xb8] sm:$0xff]  ;;  %v6615_v43 = vld [vmem:[%s14912_s5 + $0xb0] sm:$0xff] }
 0x99c   :  { %v6288_v62 = vpop.permute.xlu1 %6287  ;;  %6205 = vrot.lane.b32.xlu0 %v14234_v27, %s7694_s20  ;;  %v6504_v27 = vsel %vm3052_vm5, %v13679_v12, %v14219_v30  ;;  %v6669_v30 = vmul.f32 %v6605_v58, %v6567_v41 }
 0x99d   :  { %6938 = vmatmul.mubr.bf16.gmra.mrb[72].mxu0 %v6725_v52 }
 0x99e   :  { %6327 = vrot.lane.b32.xlu1 %v14277_v33, %s7696_s22  ;;  %v6162_v49 = vpop.permute.xlu0 %6161  ;;  %v6536_v33 = vsel %vm3118_vm8, %v6504_v27, %v6288_v62 }
 0x9a0   :  { %v6416_v60 = vpop.permute.xlu1 %6415  ;;  %6201 = vrot.lane.b32.xlu0 %v14240_v35, %s7694_s20  ;;  %v15361_v35 = vrot.slane %v13572_v46, 1  ;;  %v6508_v46 = vsel %vm3052_vm5, %v13772_v63, %v14382_v59 }
 0x9a1   :  { %v6568_v42 = vsel %vm3331_vm10, %v6536_v33, %v6416_v60  ;;  %v6672_v12 = vmul.f32 %v6608_v16, %v6416_v60  ;;  %v6614_v16 = vld [vmem:[%s14912_s5 + $0xa8] sm:$0xff] }
 0x9a2   :  { %v6671_v13 = vmul.f32 %v6607_v45, %v6568_v42  ;;  %6455 = vrot.lane.b32.xlu1 %v14283_v20, %s7701_s6  ;;  %v6294_v48 = vpop.permute.xlu0 %6293  ;;  %v6048_v8 = vsel %vm370_vm2, %v15362_v36, %v15361_v35  ;;  %v6618_v36 = vld [vmem:[%s14912_s5 + $0xc8] sm:$0xff] }
 0x9a3   :  { %v6728_v53 = vpack.c.bf16 %v6672_v12, %v6670_v24 }
 0x9a4   :  { %v6292_v2 = vpop.permute.xlu1 %6291  ;;  %6333 = vrot.lane.b32.xlu0 %v14295_v61, %s7696_s22  ;;  %v6727_v34 = vpack.c.bf16 %v6671_v13, %v6669_v30 }
 0x9a5   :  { %7226 = vmatprep.mubr.msk.bf16.mxu0 %vm6840_vm12, %v6728_v53  ;;  %v6538_v0 = vsel %vm3118_vm8, %v6506_v44, %v6292_v2 }
 0x9a6   :  { %6335 = vrot.lane.b32.xlu1 %v6048_v8, %s7696_s22  ;;  %v6422_v22 = vpop.permute.xlu0 %6421  ;;  %6946 = vmatmul.mubr.bf16.gmra.mrb[76].mxu0 %v6727_v34  ;;  %v6620_v34 = vld [vmem:[%s14912_s5 + $0xd8] sm:$0xff] }
 0x9a7   :  { %v6678_v41 = vmul.f32 %v6614_v16, %v6422_v22 }
 0x9a8   :  { %v6420_v20 = vpop.permute.xlu1 %6419  ;;  %6329 = vrot.lane.b32.xlu0 %v14310_v56, %s7696_s22  ;;  %v6610_v56 = vld [vmem:[%s14912_s5 + $0x88] sm:$0xff] }
 0x9a9   :  { %v6570_v7 = vsel %vm3331_vm10, %v6538_v0, %v6420_v20  ;;  %v6676_v25 = vmul.f32 %v6612_v11, %v6420_v20 }
 0x9aa   :  { %6331 = vrot.lane.b32.xlu1 %v14314_v19, %s7696_s22  ;;  %v6290_v61 = vpop.permute.xlu0 %6289  ;;  %v6505_v19 = vsel %vm3052_vm5, %v13826_v37, %v6162_v49  ;;  %v6675_v32 = vmul.f32 %v6611_v47, %v6570_v7  ;;  %v6539_v49 = vsel %vm3118_vm8, %v6507_v51, %v6294_v48  ;;  %v6623_v51 = vld [vmem:[%s14912_s5 + $0xf0] sm:$0xff] }
 0x9ab   :  { %v6537_v28 = vsel %vm3118_vm8, %v6505_v19, %v6290_v61  ;;  %v6617_v61 = vld [vmem:[%s14912_s5 + $0xc0] sm:$0xff] }
 0x9ac   :  { %v14459_v4 = vpop.permute.xlu1 %6175  ;;  %6457 = vrot.lane.b32.xlu0 %v14318_v10, %s7701_s6 }
 0x9ae   :  { %6459 = vrot.lane.b32.xlu1 %v14330_v54, %s7701_s6  ;;  %v6418_v10 = vpop.permute.xlu0 %6417 }
 0x9af   :  { %v6569_v17 = vsel %vm3331_vm10, %v6537_v28, %v6418_v10  ;;  %v6674_v37 = vmul.f32 %v6610_v56, %v6418_v10 }
 0x9b0   :  { %v6673_v3 = vmul.f32 %v6609_v29, %v6569_v17  ;;  %v6172_v55 = vpop.permute.xlu1 %6171  ;;  %6437 = vrot.lane.b32.xlu0 %v13966_v23, %s7701_s6  ;;  %v15364_v23 = vrot.slane %v14249_v38, 2  ;;  %v6571_v38 = vsel %vm3331_vm10, %v6539_v49, %v6422_v22  ;;  %v6619_v22 = vld [vmem:[%s14912_s5 + $0xd0] sm:$0xff]  ;;  %v15365_v17 = vld [vmem:[#allocation45_spill] sm:$0xff] }
 0x9b1   :  { %v6730_v52 = vpack.c.bf16 %v6676_v25, %v6674_v37  ;;  %v6677_v60 = vmul.f32 %v6613_v1, %v6571_v38  ;;  %v6510_v53 = vsel %vm3052_vm5, %v13887_v21, %v6172_v55 }
 0x9b2   :  { %6439 = vrot.lane.b32.xlu1 %v14050_v50, %s7701_s6  ;;  %v6174_v62 = vpop.permute.xlu0 %6173  ;;  %v6729_v57 = vpack.c.bf16 %v6675_v32, %v6673_v3  ;;  %v6112_v50 = vsel %vm435_vm4, %v15364_v23, %v15363_v15  ;;  %v6622_v3 = vld [vmem:[%s14912_s5 + $0xe8] sm:$0xff] }
 0x9b3   :  { %7227 = vmatprep.mubr.msk.bf16.mxu0 %vm6840_vm12, %v6730_v52  ;;  %v6511_v37 = vsel %vm3052_vm5, %v15365_v17, %v6174_v62  ;;  %v6624_v52 = vld [vmem:[%s14912_s5 + $0xf8] sm:$0xff]  ;;  %v6634_v17 = vld [vmem:[%s14912_s5 + $0x148] sm:$0xff] }
 0x9b4   :  { %v6296_v54 = vpop.permute.xlu1 %6295  ;;  %6461 = vrot.lane.b32.xlu0 %v14336_v5, %s7701_s6  ;;  %6954 = vmatmul.mubr.bf16.gmra.mrb[80].mxu0 %v6729_v57 }
 0x9b5   :  { %v6540_v27 = vsel %vm3118_vm8, %v6508_v46, %v6296_v54  ;;  %v6621_v54 = vld [vmem:[%s14912_s5 + $0xe0] sm:$0xff] }
 0x9b6   :  { %6463 = vrot.lane.b32.xlu1 %v6112_v50, %s7701_s6  ;;  %v6170_v5 = vpop.permute.xlu0 %6169 }
 0x9b7   :  { %v6509_v8 = vsel %vm3052_vm5, %v13897_v18, %v6170_v5 }
 0x9b8   :  { %v6424_v58 = vpop.permute.xlu1 %6423 }
 0x9b9   :  { %v6572_v45 = vsel %vm3331_vm10, %v6540_v27, %v6424_v58  ;;  %v6680_v33 = vmul.f32 %v6616_v39, %v6424_v58  ;;  %v15367_v58 = vld [vmem:[#allocation71_spill] sm:$0xff] }
 0x9ba   :  { %v6679_v24 = vmul.f32 %v6615_v43, %v6572_v45  ;;  %v6302_v63 = vpop.permute.xlu0 %6301 }
 0x9bb   :  { %v6732_v59 = vpack.c.bf16 %v6680_v33, %v6678_v41  ;;  %v6543_v32 = vsel %vm3118_vm8, %v6511_v37, %v6302_v63  ;;  %v6628_v33 = vld [vmem:[%s14912_s5 + $0x118] sm:$0xff]  ;;  %v15368_v63 = vld [vmem:[#allocation46_spill] sm:$0xff]  ;;  %v15370_v37 = vld [vmem:[#allocation56_spill] sm:$0xff] }
 0x9bc   :  { %v6300_v42 = vpop.permute.xlu1 %6299  ;;  %v6731_v12 = vpack.c.bf16 %v6679_v24, %v6677_v60  ;;  %v6626_v24 = vld [vmem:[%s14912_s5 + $0x108] sm:$0xff] }
 0x9bd   :  { %7228 = vmatprep.mubr.msk.bf16.mxu0 %vm6840_vm12, %v6732_v59  ;;  %v6542_v2 = vsel %vm3118_vm8, %v6510_v53, %v6300_v42  ;;  %v6627_v42 = vld [vmem:[%s14912_s5 + $0x110] sm:$0xff] }
 0x9be   :  { %v6430_v30 = vpop.permute.xlu0 %6429  ;;  %6962 = vmatmul.mubr.bf16.gmra.mrb[84].mxu0 %v6731_v12 }
 0x9bf   :  { %v6575_v62 = vsel %vm3331_vm10, %v6543_v32, %v6430_v30  ;;  %v6686_v50 = vmul.f32 %v6622_v3, %v6430_v30  ;;  %v6625_v30 = vld [vmem:[%s14912_s5 + $0x100] sm:$0xff]  ;;  %v6635_v3 = vld [vmem:[%s14912_s5 + $0x150] sm:$0xff] }
 0x9c0   :  { %v6428_v13 = vpop.permute.xlu1 %6427  ;;  %v6685_v5 = vmul.f32 %v6621_v54, %v6575_v62 }
 0x9c1   :  { %v6574_v21 = vsel %vm3331_vm10, %v6542_v2, %v6428_v13  ;;  %v6684_v11 = vmul.f32 %v6620_v34, %v6428_v13 }
 0x9c2   :  { %v6298_v48 = vpop.permute.xlu0 %6297  ;;  %v6683_v19 = vmul.f32 %v6619_v22, %v6574_v21 }
 0x9c3   :  { %v6541_v44 = vsel %vm3118_vm8, %v6509_v8, %v6298_v48 }
 0x9c4   :  { %v6184_v35 = vpop.permute.xlu1 %6183 }
 0x9c5   :  { %v14533_v20 = vsel %vm3052_vm5, %v13972_v9, %v6184_v35 }
 0x9c6   :  { %v6426_v0 = vpop.permute.xlu0 %6425 }
 0x9c7   :  { %v6573_v18 = vsel %vm3331_vm10, %v6541_v44, %v6426_v0  ;;  %v6682_v56 = vmul.f32 %v6618_v36, %v6426_v0 }
 0x9c8   :  { %v6681_v47 = vmul.f32 %v6617_v61, %v6573_v18  ;;  %v6180_v7 = vpop.permute.xlu1 %6179 }
 0x9c9   :  { %v6734_v29 = vpack.c.bf16 %v6684_v11, %v6682_v56  ;;  %v6514_v41 = vsel %vm3052_vm5, %v15367_v58, %v6180_v7  ;;  %v6640_v58 = vld [vmem:[%s14912_s5 + $0x178] sm:$0xff] }
 0x9ca   :  { %v6182_v28 = vpop.permute.xlu0 %6181  ;;  %v6733_v10 = vpack.c.bf16 %v6683_v19, %v6681_v47 }
 0x9cb   :  { %v6515_v9 = vsel %vm3052_vm5, %v13999_v14, %v6182_v28  ;;  %7229 = vmatprep.mubr.msk.bf16.mxu0 %vm6840_vm12, %v6734_v29  ;;  %v15366_v14 = vld [vmem:[#allocation16_spill] sm:$0xff]  ;;  %v15369_v29 = vld [vmem:[#allocation49_spill] sm:$0xff] }
 0x9cc   :  { %v6304_v25 = vpop.permute.xlu1 %6303  ;;  %6970 = vmatmul.mubr.bf16.gmra.mrb[88].mxu0 %v6733_v10  ;;  %v6512_v57 = vsel %vm3052_vm5, %v15366_v14, %v14459_v4 }
 0x9cd   :  { %v6544_v15 = vsel %vm3118_vm8, %v6512_v57, %v6304_v25 }
 0x9ce   :  { %v6178_v55 = vpop.permute.xlu0 %6177 }
 0x9cf   :  { %v6513_v59 = vsel %vm3052_vm5, %v15368_v63, %v6178_v55 }
 0x9d0   :  { %v6432_v23 = vpop.permute.xlu1 %6431 }
 0x9d1   :  { %v6576_v49 = vsel %vm3331_vm10, %v6544_v15, %v6432_v23  ;;  %v6688_v16 = vmul.f32 %v6624_v52, %v6432_v23  ;;  %v6633_v52 = vld [vmem:[%s14912_s5 + $0x140] sm:$0xff] }
 0x9d2   :  { %v6687_v39 = vmul.f32 %v6623_v51, %v6576_v49  ;;  %v6310_v4 = vpop.permute.xlu0 %6309 }
 0x9d3   :  { %v6736_v46 = vpack.c.bf16 %v6688_v16, %v6686_v50  ;;  %v14565_v1 = vsel %vm3118_vm8, %v6515_v9, %v6310_v4  ;;  %v6636_v9 = vld [vmem:[%s14912_s5 + $0x158] sm:$0xff]  ;;  %v15371_v4 = vld [vmem:[#allocation48_spill] sm:$0xff] }
 0x9d4   :  { %v6308_v38 = vpop.permute.xlu1 %6307  ;;  %v6735_v43 = vpack.c.bf16 %v6687_v39, %v6685_v5 }
 0x9d5   :  { %7230 = vmatprep.mubr.msk.bf16.mxu0 %vm6840_vm12, %v6736_v46  ;;  %v6546_v45 = vsel %vm3118_vm8, %v6514_v41, %v6308_v38  ;;  %v15372_v41 = vld [vmem:[#allocation47_spill] sm:$0xff] }
 0x9d6   :  { %v6306_v27 = vpop.permute.xlu0 %6305  ;;  %6978 = vmatmul.mubr.bf16.gmra.mrb[92].mxu0 %v6735_v43  ;;  %v6638_v43 = vld [vmem:[%s14912_s5 + $0x168] sm:$0xff] }
 0x9d7   :  { %v6545_v13 = vsel %vm3118_vm8, %v6513_v59, %v6306_v27 }
 0x9d8   :  { %v6436_v60 = vpop.permute.xlu1 %6435 }
 0x9d9   :  { %v6578_v12 = vsel %vm3331_vm10, %v6546_v45, %v6436_v60  ;;  %v6692_v53 = vmul.f32 %v6628_v33, %v6436_v60  ;;  %v6637_v33 = vld [vmem:[%s14912_s5 + $0x160] sm:$0xff] }
 0x9da   :  { %v6434_v48 = vpop.permute.xlu0 %6433  ;;  %v6691_v35 = vmul.f32 %v6627_v42, %v6578_v12 }
 0x9db   :  { %v6577_v2 = vsel %vm3331_vm10, %v6545_v13, %v6434_v48  ;;  %v6690_v34 = vmul.f32 %v6626_v24, %v6434_v48  ;;  %v6639_v24 = vld [vmem:[%s14912_s5 + $0x170] sm:$0xff] }
 0x9dc   :  { %v6689_v36 = vmul.f32 %v6625_v30, %v6577_v2  ;;  %v6192_v8 = vpop.permute.xlu1 %6191 }
 0x9dd   :  { %v6738_v22 = vpack.c.bf16 %v6692_v53, %v6690_v34  ;;  %v6520_v45 = vsel %vm3052_vm5, %v15372_v41, %v6192_v8 }
 0x9de   :  { %v6190_v21 = vpop.permute.xlu0 %6189  ;;  %v6737_v61 = vpack.c.bf16 %v6691_v35, %v6689_v36 }
 0x9df   :  { %7231 = vmatprep.mubr.msk.bf16.mxu0 %vm6840_vm12, %v6738_v22  ;;  %v6519_v46 = vsel %vm3052_vm5, %v15371_v4, %v6190_v21  ;;  %v15373_v21 = vld [vmem:[#allocation53_spill] sm:$0xff] }
 0x9e0   :  { %v6188_v44 = vpop.permute.xlu1 %6187  ;;  %6986 = vmatmul.mubr.bf16.gmra.mrb[96].mxu0 %v6737_v61 }
 0x9e1   :  { %v6518_v28 = vsel %vm3052_vm5, %v15369_v29, %v6188_v44 }
 0x9e2   :  { %v6186_v0 = vpop.permute.xlu0 %6185 }
 0x9e3   :  { %v6517_v32 = vsel %vm3052_vm5, %v15370_v37, %v6186_v0  ;;  %v6644_v0 = vld [vmem:[%s14912_s5 + $0x198] sm:$0xff] }
 0x9e4   :  { %v14589_v11 = vpop.permute.xlu1 %6311 }
 0x9e6   :  { %v6318_v18 = vpop.permute.xlu0 %6317 }
 0x9e7   :  { %v6551_v38 = vsel %vm3118_vm8, %v6519_v46, %v6318_v18  ;;  %v6645_v46 = vld [vmem:[%s14912_s5 + $0x1a0] sm:$0xff] }
 0x9e8   :  { %v6316_v56 = vpop.permute.xlu1 %6315 }
 0x9e9   :  { %v6550_v10 = vsel %vm3118_vm8, %v6518_v28, %v6316_v56  ;;  %v6642_v56 = vld [vmem:[%s14912_s5 + $0x188] sm:$0xff]  ;;  %v6641_v28 = vld [vmem:[%s14912_s5 + $0x180] sm:$0xff] }
 0x9ea   :  { %v6446_v19 = vpop.permute.xlu0 %6445 }
 0x9eb   :  { %v6583_v60 = vsel %vm3331_vm10, %v6551_v38, %v6446_v19  ;;  %v6702_v42 = vmul.f32 %v6638_v43, %v6446_v19  ;;  %v15374_v19 = vld [vmem:[#allocation58_spill] sm:$0xff] }
 0x9ec   :  { %v6444_v47 = vpop.permute.xlu1 %6443  ;;  %v6701_v13 = vmul.f32 %v6637_v33, %v6583_v60  ;;  %v6647_v38 = vld [vmem:[%s14912_s5 + $0x1b0] sm:$0xff] }
 0x9ed   :  { %v6582_v55 = vsel %vm3331_vm10, %v6550_v10, %v6444_v47  ;;  %v6700_v54 = vmul.f32 %v6636_v9, %v6444_v47 }
 0x9ee   :  { %v6314_v7 = vpop.permute.xlu0 %6313  ;;  %v6699_v15 = vmul.f32 %v6635_v3, %v6582_v55 }
 0x9ef   :  { %v6549_v14 = vsel %vm3118_vm8, %v6517_v32, %v6314_v7  ;;  %v6643_v7 = vld [vmem:[%s14912_s5 + $0x190] sm:$0xff] }
 0x9f0   :  { %v14597_v25 = vpop.permute.xlu1 %6199 }
 0x9f2   :  { %v6442_v57 = vpop.permute.xlu0 %6441 }
 0x9f3   :  { %v6581_v62 = vsel %vm3331_vm10, %v6549_v14, %v6442_v57  ;;  %v6698_v51 = vmul.f32 %v6634_v17, %v6442_v57 }
 0x9f4   :  { %v6697_v23 = vmul.f32 %v6633_v52, %v6581_v62  ;;  %v6196_v50 = vpop.permute.xlu1 %6195 }
 0x9f5   :  { %v6742_v49 = vpack.c.bf16 %v6700_v54, %v6698_v51  ;;  %v6522_v61 = vsel %vm3052_vm5, %v15373_v21, %v6196_v50  ;;  %v15375_v51 = vld [vmem:[#allocation21_spill] sm:$0xff] }
 0x9f6   :  { %v6741_v16 = vpack.c.bf16 %v6699_v15, %v6697_v23  ;;  %v6198_v5 = vpop.permute.xlu0 %6197  ;;  %v6646_v50 = vld [vmem:[%s14912_s5 + $0x1a8] sm:$0xff] }
 0x9f7   :  { %7233 = vmatprep.mubr.msk.bf16.mxu1 %vm6840_vm12, %v6742_v49  ;;  %v6523_v15 = vsel %vm3052_vm5, %v15375_v51, %v6198_v5  ;;  %v6653_v51 = vld [vmem:[%s14912_s5 + $0x1e0] sm:$0xff] }
 0x9f8   :  { %v6320_v39 = vpop.permute.xlu1 %6319  ;;  %7002 = vmatmul.mubr.bf16.vlgmr.msra.gmra.mrb[64].mxu1 %v6741_v16  ;;  %v6648_v16 = vld [vmem:[%s14912_s5 + $0x1b8] sm:$0xff] }
 0x9f9   :  { %v6552_v63 = vsel %vm3118_vm8, %v6520_v45, %v6320_v39  ;;  %v15376_v39 = vld [vmem:[#allocation57_spill] sm:$0xff] }
 0x9fa   :  { %v6194_v27 = vpop.permute.xlu0 %6193  ;;  %v6524_v4 = vsel %vm3052_vm5, %v15376_v39, %v14597_v25 }
 0x9fb   :  { %v6521_v47 = vsel %vm3052_vm5, %v15374_v19, %v6194_v27 }
 0x9fc   :  { %v6448_v59 = vpop.permute.xlu1 %6447 }
 0x9fd   :  { %v6584_v12 = vsel %vm3331_vm10, %v6552_v63, %v6448_v59  ;;  %v6704_v30 = vmul.f32 %v6640_v58, %v6448_v59 }
 0x9fe   :  { %v6703_v48 = vmul.f32 %v6639_v24, %v6584_v12  ;;  %v6326_v53 = vpop.permute.xlu0 %6325 }
 0x9ff   :  { %v6744_v2 = vpack.c.bf16 %v6704_v30, %v6702_v42  ;;  %v6555_v23 = vsel %vm3118_vm8, %v6523_v15, %v6326_v53 }
 0xa00   :  { %v6324_v34 = vpop.permute.xlu1 %6323  ;;  %v6743_v35 = vpack.c.bf16 %v6703_v48, %v6701_v13  ;;  %v6650_v48 = vld [vmem:[%s14912_s5 + $0x1c8] sm:$0xff] }
 0xa01   :  { %7234 = vmatprep.mubr.msk.bf16.mxu1 %vm6840_vm12, %v6744_v2  ;;  %v6554_v44 = vsel %vm3118_vm8, %v6522_v61, %v6324_v34  ;;  %v6652_v2 = vld [vmem:[%s14912_s5 + $0x1d8] sm:$0xff] }
 0xa02   :  { %7010 = vmatmul.mubr.bf16.gmra.mrb[68].mxu1 %v6743_v35  ;;  %v6454_v36 = vpop.permute.xlu0 %6453  ;;  %v6649_v35 = vld [vmem:[%s14912_s5 + $0x1c0] sm:$0xff] }
 0xa03   :  { %v6587_v5 = vsel %vm3331_vm10, %v6555_v23, %v6454_v36  ;;  %v6710_v58 = vmul.f32 %v6646_v50, %v6454_v36  ;;  %v6651_v36 = vld [vmem:[%s14912_s5 + $0x1d0] sm:$0xff] }
 0xa04   :  { %v6452_v8 = vpop.permute.xlu1 %6451  ;;  %v6709_v33 = vmul.f32 %v6645_v46, %v6587_v5  ;;  %v6655_v23 = vld [vmem:[%s14912_s5 + $0x1f0] sm:$0xff] }
 0xa05   :  { %v6586_v29 = vsel %vm3331_vm10, %v6554_v44, %v6452_v8  ;;  %v6708_v17 = vmul.f32 %v6644_v0, %v6452_v8 }
 0xa06   :  { %v6322_v22 = vpop.permute.xlu0 %6321  ;;  %v6707_v3 = vmul.f32 %v6643_v7, %v6586_v29  ;;  %v6629_v29 = vld [vmem:[%s14912_s5 + $0x120] sm:$0xff] }
 0xa07   :  { %v6553_v10 = vsel %vm3118_vm8, %v6521_v47, %v6322_v22  ;;  %v6632_v47 = vld [vmem:[%s14912_s5 + $0x138] sm:$0xff] }
 0xa08   :  { %v14641_v18 = vpop.permute.xlu1 %6207 }
 0xa0a   :  { %v6450_v9 = vpop.permute.xlu0 %6449 }
 0xa0b   :  { %v6585_v37 = vsel %vm3331_vm10, %v6553_v10, %v6450_v9  ;;  %v6706_v32 = vmul.f32 %v6642_v56, %v6450_v9  ;;  %v6631_v10 = vld [vmem:[%s14912_s5 + $0x130] sm:$0xff]  ;;  %v6548_v9 = vsel %vm3118_vm8, %v14533_v20, %v14589_v11  ;;  %v6654_v20 = vld [vmem:[%s14912_s5 + $0x1e8] sm:$0xff] }
 0xa0c   :  { %v6705_v55 = vmul.f32 %v6641_v28, %v6585_v37  ;;  %v6204_v52 = vpop.permute.xlu1 %6203 }
 0xa0d   :  { %v6746_v14 = vpack.c.bf16 %v6708_v17, %v6706_v32  ;;  %v6526_v34 = vsel %vm3052_vm5, %v14360_v26, %v6204_v52  ;;  %v6630_v26 = vld [vmem:[%s14912_s5 + $0x128] sm:$0xff] }
 0xa0e   :  { %v6206_v57 = vpop.permute.xlu0 %6205  ;;  %v6745_v54 = vpack.c.bf16 %v6707_v3, %v6705_v55 }
 0xa0f   :  { %7235 = vmatprep.mubr.msk.bf16.mxu1 %vm6840_vm12, %v6746_v14  ;;  %v6527_v32 = vsel %vm3052_vm5, %v14366_v40, %v6206_v57  ;;  %v6656_v40 = vld [vmem:[%s14912_s5 + $0x1f8] sm:$0xff]  ;;  %v6528_v57 = vsel %vm3052_vm5, %v14350_v6, %v14641_v18 }
 0xa10   :  { %v6328_v62 = vpop.permute.xlu1 %6327  ;;  %7018 = vmatmul.mubr.bf16.gmra.mrb[72].mxu1 %v6745_v54 }
 0xa11   :  { %v6556_v43 = vsel %vm3118_vm8, %v6524_v4, %v6328_v62 }
 0xa12   :  { %v6202_v49 = vpop.permute.xlu0 %6201 }
 0xa13   :  { %v6525_v30 = vsel %vm3052_vm5, %v14356_v31, %v6202_v49 }
 0xa14   :  { %v6456_v27 = vpop.permute.xlu1 %6455 }
 0xa15   :  { %v6588_v41 = vsel %vm3331_vm10, %v6556_v43, %v6456_v27  ;;  %v6712_v45 = vmul.f32 %v6648_v16, %v6456_v27  ;;  %v14745_v43 = vld [vmem:[%s14922_s15] ss:$0 sm:$0xff] }
 0xa16   :  { %v6711_v60 = vmul.f32 %v6647_v38, %v6588_v41  ;;  %v6334_v25 = vpop.permute.xlu0 %6333 }
 0xa17   :  { %v6748_v24 = vpack.c.bf16 %v6712_v45, %v6710_v58 }
 0xa18   :  { %v6336_v63 = vpop.permute.xlu1 %6335  ;;  %v6747_v59 = vpack.c.bf16 %v6711_v60, %v6709_v33 }
 0xa19   :  { %7236 = vmatprep.mubr.msk.bf16.mxu1 %vm6840_vm12, %v6748_v24  ;;  %v6560_v50 = vsel %vm3118_vm8, %v6528_v57, %v6336_v63 }
 0xa1a   :  { %7026 = vmatmul.mubr.bf16.gmra.mrb[76].mxu1 %v6747_v59  ;;  %v6330_v42 = vpop.permute.xlu0 %6329 }
 0xa1b   :  { %v6557_v13 = vsel %vm3118_vm8, %v6525_v30, %v6330_v42 }
 0xa1c   :  { %v6332_v12 = vpop.permute.xlu1 %6331 }
 0xa1d   :  { %v6558_v8 = vsel %vm3118_vm8, %v6526_v34, %v6332_v12 }
 0xa1e   :  { %v6458_v53 = vpop.permute.xlu0 %6457 }
 0xa1f   :  { %v6589_v31 = vsel %vm3331_vm10, %v6557_v13, %v6458_v53  ;;  %v6714_v21 = vmul.f32 %v6650_v48, %v6458_v53 }
 0xa20   :  { %v6460_v22 = vpop.permute.xlu1 %6459  ;;  %v6713_v0 = vmul.f32 %v6649_v35, %v6589_v31 }
 0xa21   :  { %v6590_v61 = vsel %vm3331_vm10, %v6558_v8, %v6460_v22  ;;  %v6716_v44 = vmul.f32 %v6652_v2, %v6460_v22 }
 0xa22   :  { %v6715_v56 = vmul.f32 %v6651_v36, %v6590_v61  ;;  %v6438_v19 = vpop.permute.xlu0 %6437 }
 0xa23   :  { %v6750_v7 = vpack.c.bf16 %v6716_v44, %v6714_v21  ;;  %v6579_v28 = vsel %vm3331_vm10, %v14565_v1, %v6438_v19  ;;  %v6694_v3 = vmul.f32 %v6630_v26, %v6438_v19  ;;  %v6559_v1 = vsel %vm3118_vm8, %v6527_v32, %v6334_v25 }
 0xa24   :  { %v6440_v17 = vpop.permute.xlu1 %6439  ;;  %v6749_v37 = vpack.c.bf16 %v6715_v56, %v6713_v0  ;;  %v6693_v14 = vmul.f32 %v6629_v29, %v6579_v28 }
 0xa25   :  { %v6580_v55 = vsel %vm3331_vm10, %v6548_v9, %v6440_v17  ;;  %v6696_v52 = vmul.f32 %v6632_v47, %v6440_v17  ;;  %7237 = vmatprep.mubr.msk.bf16.mxu1 %vm6840_vm12, %v6750_v7 }
 0xa26   :  { %v6695_v54 = vmul.f32 %v6631_v10, %v6580_v55  ;;  %7034 = vmatmul.mubr.bf16.gmra.mrb[80].mxu1 %v6749_v37  ;;  %v6462_v11 = vpop.permute.xlu0 %6461 }
 0xa27   :  { %v6740_v62 = vpack.c.bf16 %v6696_v52, %v6694_v3  ;;  %v6591_v15 = vsel %vm3331_vm10, %v6559_v1, %v6462_v11  ;;  %v6718_v39 = vmul.f32 %v6654_v20, %v6462_v11 }
 0xa28   :  { %v6464_v49 = vpop.permute.xlu1 %6463  ;;  %v6739_v16 = vpack.c.bf16 %v6695_v54, %v6693_v14  ;;  %v6717_v6 = vmul.f32 %v6653_v51, %v6591_v15 }
 0xa29   :  { %v6592_v4 = vsel %vm3331_vm10, %v6560_v50, %v6464_v49  ;;  %v6720_v46 = vmul.f32 %v6656_v40, %v6464_v49  ;;  %7232 = vmatprep.mubr.msk.bf16.mxu0 %vm6840_vm12, %v6740_v62 }
 0xa2a   :  { %v6719_v18 = vmul.f32 %v6655_v23, %v6592_v4  ;;  %6994 = vmatmul.mubr.bf16.gmra.mrb[100].mxu0 %v6739_v16 }
 0xa2b   :  { %v6752_v5 = vpack.c.bf16 %v6720_v46, %v6718_v39 }
 0xa2c   :  { %v6751_v38 = vpack.c.bf16 %v6719_v18, %v6717_v6 }
 0xa2d   :  { %7238 = vmatprep.mubr.msk.bf16.mxu1 %vm6840_vm12, %v6752_v5 }
 0xa2e   :  { %7042 = vmatmul.mubr.bf16.gmra.mrb[84].mxu1 %v6751_v38 }
 0xa60   :  { %v6923_v27 = vpop.f32.mrb[64].mxu0 }
 0xa61   :  { %v6924_v58 = vadd.f32 %v14745_v43, %v6923_v27  ;;  %v6925_v41 = vpop.f32.mrb[65].mxu0 }
 0xa62   :  { %v6926_v45 = vpop.f32.mrb[66].mxu0 }
 0xa63   :  { %v7050_v33 = vmax.f32 %v6924_v58, 0.0  ;;  %v6927_v60 = vadd.f32 %v14745_v43, %v6926_v45  ;;  %v6928_v25 = vpop.f32.mrb[67].mxu0 }
 0xa65   :  { %7082 = vst.msk [vmem:[%s14923_s16] sm:$0xff] %vm3052_vm5, %v7050_v33  ;;  %v7051_v24 = vmax.f32 %v6927_v60, 0.0 }
 0xa67   :  { %7083 = vst.msk [vmem:[%s14923_s16 + $0x8] sm:$0xff] %vm3052_vm5, %v7051_v24 }
 0xa68   :  { %v6931_v63 = vpop.f32.mrb[68].mxu0 }
 0xa69   :  { %v6932_v59 = vadd.f32 %v14745_v43, %v6931_v63  ;;  %v6933_v42 = vpop.f32.mrb[69].mxu0 }
 0xa6a   :  { %v6934_v12 = vpop.f32.mrb[70].mxu0 }
 0xa6b   :  { %v7052_v30 = vmax.f32 %v6932_v59, 0.0  ;;  %v6935_v13 = vadd.f32 %v14745_v43, %v6934_v12  ;;  %v6936_v48 = vpop.f32.mrb[71].mxu0 }
 0xa6d   :  { %7084 = vst.msk [vmem:[%s14923_s16 + $0x10] sm:$0xff] %vm3052_vm5, %v7052_v30  ;;  %v7053_v53 = vmax.f32 %v6935_v13, 0.0 }
 0xa6f   :  { %7085 = vst.msk [vmem:[%s14923_s16 + $0x18] sm:$0xff] %vm3052_vm5, %v7053_v53 }
 0xa70   :  { %v6939_v2 = vpop.f32.mrb[72].mxu0 }
 0xa71   :  { %v6940_v34 = vadd.f32 %v14745_v43, %v6939_v2  ;;  %v6941_v35 = vpop.f32.mrb[73].mxu0 }
 0xa72   :  { %v6942_v31 = vpop.f32.mrb[74].mxu0 }
 0xa73   :  { %v7054_v36 = vmax.f32 %v6940_v34, 0.0  ;;  %v6943_v8 = vadd.f32 %v14745_v43, %v6942_v31  ;;  %v6944_v22 = vpop.f32.mrb[75].mxu0 }
 0xa75   :  { %7086 = vst.msk [vmem:[%s14923_s16 + $0x20] sm:$0xff] %vm3052_vm5, %v7054_v36  ;;  %v7055_v21 = vmax.f32 %v6943_v8, 0.0 }
 0xa77   :  { %7087 = vst.msk [vmem:[%s14923_s16 + $0x28] sm:$0xff] %vm3052_vm5, %v7055_v21 }
 0xa79   :  { %v6947_v61 = vpop.f32.mrb[76].mxu0 }
 0xa7a   :  { %v6948_v44 = vadd.f32 %v14745_v43, %v6947_v61  ;;  %v6949_v0 = vpop.f32.mrb[77].mxu0 }
 0xa7b   :  { %v6950_v56 = vpop.f32.mrb[78].mxu0 }
 0xa7c   :  { %v7056_v26 = vmax.f32 %v6948_v44, 0.0  ;;  %v6951_v19 = vadd.f32 %v14745_v43, %v6950_v56  ;;  %v6952_v47 = vpop.f32.mrb[79].mxu0 }
 0xa7e   :  { %7088 = vst.msk [vmem:[%s14923_s16 + $0x30] sm:$0xff] %vm3052_vm5, %v7056_v26  ;;  %v7057_v7 = vmax.f32 %v6951_v19, 0.0 }
 0xa80   :  { %7089 = vst.msk [vmem:[%s14923_s16 + $0x38] sm:$0xff] %vm3052_vm5, %v7057_v7 }
 0xa87   :  { %v6955_v29 = vpop.f32.mrb[80].mxu0 }
 0xa88   :  { %v6956_v28 = vadd.f32 %v14745_v43, %v6955_v29  ;;  %v6957_v10 = vpop.f32.mrb[81].mxu0 }
 0xa89   :  { %v6958_v9 = vpop.f32.mrb[82].mxu0 }
 0xa8a   :  { %v7058_v17 = vmax.f32 %v6956_v28, 0.0  ;;  %v6959_v37 = vadd.f32 %v14745_v43, %v6958_v9  ;;  %v6960_v32 = vpop.f32.mrb[83].mxu0 }
 0xa8c   :  { %7090 = vst.msk [vmem:[%s14923_s16 + $0x40] sm:$0xff] %vm3052_vm5, %v7058_v17  ;;  %v7059_v3 = vmax.f32 %v6959_v37, 0.0 }
 0xa8e   :  { %7091 = vst.msk [vmem:[%s14923_s16 + $0x48] sm:$0xff] %vm3052_vm5, %v7059_v3 }
 0xa91   :  { %v6963_v55 = vpop.f32.mrb[84].mxu0 }
 0xa92   :  { %v6964_v52 = vadd.f32 %v14745_v43, %v6963_v55  ;;  %v6965_v1 = vpop.f32.mrb[85].mxu0 }
 0xa93   :  { %v6966_v14 = vpop.f32.mrb[86].mxu0 }
 0xa94   :  { %v7060_v54 = vmax.f32 %v6964_v52, 0.0  ;;  %v6967_v20 = vadd.f32 %v14745_v43, %v6966_v14  ;;  %v6968_v11 = vpop.f32.mrb[87].mxu0 }
 0xa96   :  { %7092 = vst.msk [vmem:[%s14923_s16 + $0x50] sm:$0xff] %vm3052_vm5, %v7060_v54  ;;  %v7061_v40 = vmax.f32 %v6967_v20, 0.0 }
 0xa98   :  { %7093 = vst.msk [vmem:[%s14923_s16 + $0x58] sm:$0xff] %vm3052_vm5, %v7061_v40 }
 0xa9f   :  { %v6971_v57 = vpop.f32.mrb[88].mxu0 }
 0xaa0   :  { %v6972_v62 = vadd.f32 %v14745_v43, %v6971_v57  ;;  %v6973_v51 = vpop.f32.mrb[89].mxu0 }
 0xaa1   :  { %v6974_v15 = vpop.f32.mrb[90].mxu0 }
 0xaa2   :  { %v7062_v23 = vmax.f32 %v6972_v62, 0.0  ;;  %v6975_v50 = vadd.f32 %v14745_v43, %v6974_v15  ;;  %v6976_v49 = vpop.f32.mrb[91].mxu0 }
 0xaa4   :  { %7094 = vst.msk [vmem:[%s14923_s16 + $0x60] sm:$0xff] %vm3052_vm5, %v7062_v23  ;;  %v7063_v16 = vmax.f32 %v6975_v50, 0.0 }
 0xaa6   :  { %7095 = vst.msk [vmem:[%s14923_s16 + $0x68] sm:$0xff] %vm3052_vm5, %v7063_v16 }
 0xaa9   :  { %v6979_v39 = vpop.f32.mrb[92].mxu0 }
 0xaaa   :  { %v6980_v4 = vadd.f32 %v14745_v43, %v6979_v39  ;;  %v6981_v46 = vpop.f32.mrb[93].mxu0 }
 0xaab   :  { %v6982_v6 = vpop.f32.mrb[94].mxu0 }
 0xaac   :  { %v7064_v18 = vmax.f32 %v6980_v4, 0.0  ;;  %v6983_v5 = vadd.f32 %v14745_v43, %v6982_v6  ;;  %v6984_v38 = vpop.f32.mrb[95].mxu0 }
 0xaae   :  { %7096 = vst.msk [vmem:[%s14923_s16 + $0x70] sm:$0xff] %vm3052_vm5, %v7064_v18  ;;  %v7065_v27 = vmax.f32 %v6983_v5, 0.0 }
 0xab0   :  { %7097 = vst.msk [vmem:[%s14923_s16 + $0x78] sm:$0xff] %vm3052_vm5, %v7065_v27 }
 0xab3   :  { %v6987_v58 = vpop.f32.mrb[96].mxu0 }
 0xab4   :  { %v6988_v41 = vadd.f32 %v14745_v43, %v6987_v58  ;;  %v6989_v45 = vpop.f32.mrb[97].mxu0 }
 0xab5   :  { %v6990_v33 = vpop.f32.mrb[98].mxu0 }
 0xab6   :  { %v7066_v60 = vmax.f32 %v6988_v41, 0.0  ;;  %v6991_v25 = vadd.f32 %v14745_v43, %v6990_v33  ;;  %v6992_v24 = vpop.f32.mrb[99].mxu0 }
 0xab8   :  { %7098 = vst.msk [vmem:[%s14923_s16 + $0x80] sm:$0xff] %vm3052_vm5, %v7066_v60  ;;  %v7067_v63 = vmax.f32 %v6991_v25, 0.0 }
 0xaba   :  { %7099 = vst.msk [vmem:[%s14923_s16 + $0x88] sm:$0xff] %vm3052_vm5, %v7067_v63 }
 0xacb   :  { %v7003_v59 = vpop.f32.mrb[64].mxu1 }
 0xacc   :  { %v7004_v42 = vadd.f32 %v14745_v43, %v7003_v59  ;;  %v7005_v12 = vpop.f32.mrb[65].mxu1 }
 0xacd   :  { %v7006_v30 = vpop.f32.mrb[66].mxu1 }
 0xace   :  { %v7070_v13 = vmax.f32 %v7004_v42, 0.0  ;;  %v7007_v48 = vadd.f32 %v14745_v43, %v7006_v30  ;;  %v7008_v53 = vpop.f32.mrb[67].mxu1 }
 0xad0   :  { %7102 = vst.msk [vmem:[%s14923_s16 + $0xa0] sm:$0xff] %vm3052_vm5, %v7070_v13  ;;  %v7071_v2 = vmax.f32 %v7007_v48, 0.0 }
 0xad2   :  { %7103 = vst.msk [vmem:[%s14923_s16 + $0xa8] sm:$0xff] %vm3052_vm5, %v7071_v2 }
 0xad5   :  { %v7011_v34 = vpop.f32.mrb[68].mxu1 }
 0xad6   :  { %v7012_v35 = vadd.f32 %v14745_v43, %v7011_v34  ;;  %v7013_v31 = vpop.f32.mrb[69].mxu1 }
 0xad7   :  { %v7014_v36 = vpop.f32.mrb[70].mxu1 }
 0xad8   :  { %v7072_v8 = vmax.f32 %v7012_v35, 0.0  ;;  %v7015_v22 = vadd.f32 %v14745_v43, %v7014_v36  ;;  %v7016_v21 = vpop.f32.mrb[71].mxu1 }
 0xada   :  { %7104 = vst.msk [vmem:[%s14923_s16 + $0xb0] sm:$0xff] %vm3052_vm5, %v7072_v8  ;;  %v7073_v61 = vmax.f32 %v7015_v22, 0.0 }
 0xadc   :  { %7105 = vst.msk [vmem:[%s14923_s16 + $0xb8] sm:$0xff] %vm3052_vm5, %v7073_v61 }
 0xae3   :  { %v7019_v44 = vpop.f32.mrb[72].mxu1 }
 0xae4   :  { %v7020_v0 = vadd.f32 %v14745_v43, %v7019_v44  ;;  %v7021_v56 = vpop.f32.mrb[73].mxu1 }
 0xae5   :  { %v7022_v26 = vpop.f32.mrb[74].mxu1 }
 0xae6   :  { %v7074_v19 = vmax.f32 %v7020_v0, 0.0  ;;  %v7023_v47 = vadd.f32 %v14745_v43, %v7022_v26  ;;  %v7024_v7 = vpop.f32.mrb[75].mxu1 }
 0xae8   :  { %7106 = vst.msk [vmem:[%s14923_s16 + $0xc0] sm:$0xff] %vm3052_vm5, %v7074_v19  ;;  %v7075_v29 = vmax.f32 %v7023_v47, 0.0 }
 0xaea   :  { %7107 = vst.msk [vmem:[%s14923_s16 + $0xc8] sm:$0xff] %vm3052_vm5, %v7075_v29 }
 0xaed   :  { %v7027_v28 = vpop.f32.mrb[76].mxu1 }
 0xaee   :  { %v7028_v10 = vadd.f32 %v14745_v43, %v7027_v28  ;;  %v7029_v9 = vpop.f32.mrb[77].mxu1 }
 0xaef   :  { %v7030_v17 = vpop.f32.mrb[78].mxu1 }
 0xaf0   :  { %v7076_v37 = vmax.f32 %v7028_v10, 0.0  ;;  %v7031_v32 = vadd.f32 %v14745_v43, %v7030_v17  ;;  %v7032_v3 = vpop.f32.mrb[79].mxu1 }
 0xaf2   :  { %7108 = vst.msk [vmem:[%s14923_s16 + $0xd0] sm:$0xff] %vm3052_vm5, %v7076_v37  ;;  %v7077_v55 = vmax.f32 %v7031_v32, 0.0 }
 0xaf4   :  { %7109 = vst.msk [vmem:[%s14923_s16 + $0xd8] sm:$0xff] %vm3052_vm5, %v7077_v55 }
 0xaf9   :  { %v7035_v52 = vpop.f32.mrb[80].mxu1 }
 0xafa   :  { %v7036_v1 = vadd.f32 %v14745_v43, %v7035_v52  ;;  %v7037_v14 = vpop.f32.mrb[81].mxu1 }
 0xafb   :  { %v7038_v54 = vpop.f32.mrb[82].mxu1 }
 0xafc   :  { %v7078_v20 = vmax.f32 %v7036_v1, 0.0  ;;  %v7039_v11 = vadd.f32 %v14745_v43, %v7038_v54  ;;  %v7040_v40 = vpop.f32.mrb[83].mxu1 }
 0xafd   :  { %v6995_v57 = vpop.f32.mrb[100].mxu0 }
 0xafe   :  { %7110 = vst.msk [vmem:[%s14923_s16 + $0xe0] sm:$0xff] %vm3052_vm5, %v7078_v20  ;;  %v7079_v62 = vmax.f32 %v7039_v11, 0.0  ;;  %v6996_v51 = vadd.f32 %v14745_v43, %v6995_v57  ;;  %v6997_v15 = vpop.f32.mrb[101].mxu0 }
 0xaff   :  { %v6998_v23 = vpop.f32.mrb[102].mxu0 }
 0xb00   :  { %7111 = vst.msk [vmem:[%s14923_s16 + $0xe8] sm:$0xff] %vm3052_vm5, %v7079_v62  ;;  %v7068_v50 = vmax.f32 %v6996_v51, 0.0  ;;  %v6999_v49 = vadd.f32 %v14745_v43, %v6998_v23  ;;  %v7000_v16 = vpop.f32.mrb[103].mxu0 }
 0xb01   :  { %v7043_v39 = vpop.f32.mrb[84].mxu1 }
 0xb02   :  { %7100 = vst.msk [vmem:[%s14923_s16 + $0x90] sm:$0xff] %vm3052_vm5, %v7068_v50  ;;  %v7069_v4 = vmax.f32 %v6999_v49, 0.0  ;;  %v7044_v46 = vadd.f32 %v14745_v43, %v7043_v39  ;;  %v7045_v6 = vpop.f32.mrb[85].mxu1 }
 0xb03   :  { %v7046_v18 = vpop.f32.mrb[86].mxu1 }
 0xb04   :  { %7101 = vst.msk [vmem:[%s14923_s16 + $0x98] sm:$0xff] %vm3052_vm5, %v7069_v4  ;;  %v7080_v5 = vmax.f32 %v7044_v46, 0.0  ;;  %v7047_v38 = vadd.f32 %v14745_v43, %v7046_v18  ;;  %v7048_v27 = vpop.f32.mrb[87].mxu1 }
 0xb06   :  { %7112 = vst.msk [vmem:[%s14923_s16 + $0xf0] sm:$0xff] %vm3052_vm5, %v7080_v5  ;;  %v7081_v58 = vmax.f32 %v7047_v38, 0.0 }
 0xb08   :  { %7113 = vst.msk [vmem:[%s14923_s16 + $0xf8] sm:$0xff] %vm3052_vm5, %v7081_v58 }
 0xb09   :  { %7118 = vsyncpa [#allocation3], 1 }
 0xb0a   :  { %7119 = vsyncpa [#allocation5], 1 }
 0xb0b   :  { %7120 = vsyncpa [#allocation8], 1 }

</bundles_post_ra>
